<compile_context>
chip_gen: v5e
topology: v5e:2x2
jax: 0.10.0
libtpu: 0.0.40
codegen_flags: <defaults>
</compile_context>

<pallas_src>
import functools

import jax
import jax.numpy as jnp
from jax.experimental import pallas as pl
from jax.experimental.pallas import tpu as pltpu


DTYPE = jnp.bfloat16        # activations / weights feeding the MXU
ACC_DTYPE = jnp.float32     # accumulation + epilogue


def _round_up(x, m):
    return (x + m - 1) // m * m


def _vmem_limit_bytes():
    # ~75% of physical VMEM, capped at 100 MiB (v5e/v6e: 128 MiB, v7x: 64 MiB).
    try:
        cap = int(pltpu.get_tpu_info().vmem_capacity_bytes)
    except Exception:
        cap = 64 * 1024 * 1024
    return max(32 * 1024 * 1024, min(100 * 1024 * 1024, (cap * 3) // 4))


VMEM_LIMIT = _vmem_limit_bytes()


# ----------------------------------------------------------------------------
# Pallas kernels
# ----------------------------------------------------------------------------
def _conv_s1_kernel(x_ref, w_ref, s_ref, *rest, taps, relu, has_res):
    """Fused stride-1 'same' conv on a row+col padded, flattened image.

    x_ref: (1, Hp*Wp + 2*pad, Cin)  bf16 zero-padded flat image
    w_ref: (KH*KW*Cin, Cout)        bf16 BN-scale-folded weights
    s_ref: (1, Cout)                f32 BN shift
    rest : ([res_ref (1, L, Cout)], out_ref (1, L, Cout)) with L = H*Wp
    Every tap is a contiguous shifted slice of the flat image (width padding
    makes horizontal wraps land on zeros / discarded junk columns), so no
    masks are needed.  The tap slices are concatenated in VMEM into a single
    (L, KH*KW*Cin) operand and contracted with one K-deep bf16 MXU dot.
    """
    if has_res:
        r_ref, o_ref = rest
    else:
        (o_ref,) = rest
        r_ref = None
    L = o_ref.shape[1]
    pieces = [x_ref[0, pl.ds(off, L), :] for off in taps]
    xcol = pieces[0] if len(pieces) == 1 else jnp.concatenate(pieces, axis=-1)
    acc = jnp.dot(xcol, w_ref[...], preferred_element_type=ACC_DTYPE)
    y = acc + s_ref[...]
    if has_res:
        y = y + r_ref[0].astype(ACC_DTYPE)
    if relu:
        y = jnp.maximum(y, 0.0)
    o_ref[0] = y.astype(o_ref.dtype)


def _mm_bn_kernel(*refs, relu, has_res):
    """Tiled matmul: (TM, K) @ (K, Cout) + BN shift (+ residual) (+ ReLU)."""
    if has_res:
        a_ref, b_ref, s_ref, r_ref, o_ref = refs
    else:
        a_ref, b_ref, s_ref, o_ref = refs
        r_ref = None
    y = jnp.dot(a_ref[...], b_ref[...], preferred_element_type=ACC_DTYPE) + s_ref[...]
    if has_res:
        y = y + r_ref[...].astype(ACC_DTYPE)
    if relu:
        y = jnp.maximum(y, 0.0)
    o_ref[...] = y.astype(o_ref.dtype)


# ----------------------------------------------------------------------------
# Kernel wrappers
# ----------------------------------------------------------------------------
def matmul_bn_act(a, b, shift, relu, residual2d=None):
    """a: (M, K) bf16, b: (K, Cout) bf16, shift: (1, Cout) f32 -> (M, Cout) bf16."""
    M, K = a.shape
    _, Nc = b.shape
    Kp = _round_up(max(K, 8), 8)
    if Kp != K:                                # e.g. stem K = 27 -> 32
        a = jnp.pad(a, ((0, 0), (0, Kp - K)))
        b = jnp.pad(b, ((0, Kp - K), (0, 0)))
    TM = min(1024, _round_up(M, 8))
    Mp = _round_up(M, TM)
    if Mp != M:
        a = jnp.pad(a, ((0, Mp - M), (0, 0)))
    has_res = residual2d is not None
    args = [a, b, shift]
    in_specs = [
        pl.BlockSpec((TM, Kp), lambda i: (i, 0)),
        pl.BlockSpec((Kp, Nc), lambda i: (0, 0)),
        pl.BlockSpec((1, Nc), lambda i: (0, 0)),
    ]
    if has_res:
        r = residual2d
        if Mp != M:
            r = jnp.pad(r, ((0, Mp - M), (0, 0)))
        args.append(r)
        in_specs.append(pl.BlockSpec((TM, Nc), lambda i: (i, 0)))
    out = pl.pallas_call(
        functools.partial(_mm_bn_kernel, relu=relu, has_res=has_res),
        out_shape=jax.ShapeDtypeStruct((Mp, Nc), DTYPE),
        grid=(Mp // TM,),
        in_specs=in_specs,
        out_specs=pl.BlockSpec((TM, Nc), lambda i: (i, 0)),
        compiler_params=pltpu.CompilerParams(
            dimension_semantics=("parallel",),
            vmem_limit_bytes=VMEM_LIMIT),
    )(*args)
    return out[:M] if Mp != M else out


def _conv_same_s1(x, w2d, shift, kh, kw, pad, relu, residual):
    """Fused stride-1 'same' conv (no HBM im2col, no mask inputs)."""
    N, H, W, Cin = x.shape
    K, Cout = w2d.shape
    Wp = W + 2 * pad
    Hp = H + 2 * pad
    L = H * Wp                         # output positions computed (junk pad cols kept)
    xp = x if pad == 0 else jnp.pad(x, ((0, 0), (pad, pad), (pad, pad), (0, 0)))
    xf = xp.reshape(N, Hp * Wp, Cin)
    extra = 2 * pad                    # tail pad so the last tap slice stays in-bounds
    if extra:
        xf = jnp.pad(xf, ((0, 0), (0, extra), (0, 0)))
    flat_len = xf.shape[1]
    taps = tuple(di * Wp + dj for di in range(kh) for dj in range(kw))
    has_res = residual is not None

    args = [xf, w2d, shift]
    in_specs = [
        pl.BlockSpec((1, flat_len, Cin), lambda n: (n, 0, 0)),
        pl.BlockSpec((K, Cout), lambda n: (0, 0)),
        pl.BlockSpec((1, Cout), lambda n: (0, 0)),
    ]
    if has_res:
        r = residual.astype(DTYPE)
        if pad > 0:
            r = jnp.pad(r, ((0, 0), (0, 0), (0, 2 * pad), (0, 0)))
        args.append(r.reshape(N, L, Cout))
        in_specs.append(pl.BlockSpec((1, L, Cout), lambda n: (n, 0, 0)))

    out = pl.pallas_call(
        functools.partial(_conv_s1_kernel, taps=taps, relu=relu, has_res=has_res),
        out_shape=jax.ShapeDtypeStruct((N, L, Cout), DTYPE),
        grid=(N,),
        in_specs=in_specs,
        out_specs=pl.BlockSpec((1, L, Cout), lambda n: (n, 0, 0)),
        compiler_params=pltpu.CompilerParams(
            dimension_semantics=("parallel",),
            vmem_limit_bytes=VMEM_LIMIT),
    )(*args)
    out = out.reshape(N, H, Wp, Cout)
    if pad > 0:
        out = out[:, :, :W, :]
    return out


def conv_bn_act(x, w, scale, shift, *, stride=1, padding=0, relu=True, residual=None):
    """x: NHWC (bf16), w: HWIO (f32).  conv -> BN affine -> (+residual) -> ReLU."""
    x = x.astype(DTYPE)
    N, H, W, C = x.shape
    KH, KW, Cin, Cout = w.shape
    assert Cin == C
    w2d = (w * scale[0]).reshape(KH * KW * Cin, Cout).astype(DTYPE)  # fold BN scale
    sh = shift.astype(ACC_DTYPE)
    if residual is not None:
        residual = residual.astype(DTYPE)

    same = (stride == 1) and (2 * padding == KH - 1) and (2 * padding == KW - 1)
    if same:
        return _conv_same_s1(x, w2d, sh, KH, KW, padding, relu, residual)

    # Strided conv (stem / transitions / fuse downsampling): bf16 JAX im2col
    # feeding the fused Pallas matmul.
    xp = x if padding == 0 else jnp.pad(
        x, ((0, 0), (padding, padding), (padding, padding), (0, 0)))
    Hp, Wpp = xp.shape[1], xp.shape[2]
    Ho = (Hp - KH) // stride + 1
    Wo = (Wpp - KW) // stride + 1
    cols = [xp[:, di:di + stride * Ho:stride, dj:dj + stride * Wo:stride, :]
            for di in range(KH) for dj in range(KW)]
    patches = jnp.concatenate(cols, axis=-1)                  # (N, Ho, Wo, KH*KW*Cin)
    a = patches.reshape(N * Ho * Wo, KH * KW * Cin)
    r2 = residual.reshape(N * Ho * Wo, Cout) if residual is not None else None
    out = matmul_bn_act(a, w2d, sh, relu, r2)
    return out.reshape(N, Ho, Wo, Cout)


# ----------------------------------------------------------------------------
# Bilinear resize (PyTorch align_corners=False semantics)
# ----------------------------------------------------------------------------
def _up1d(v, s, axis):
    """Integer-factor bilinear upsample along `axis` (gather-free broadcast-lerp)."""
    if s == 1:
        return v
    n = v.shape[axis]

    def take(a, b):
        sl = [slice(None)] * v.ndim
        sl[axis] = slice(a, b)
        return v[tuple(sl)]

    prev = jnp.concatenate([take(0, 1), take(0, n - 1)], axis=axis)
    nxt = jnp.concatenate([take(1, n), take(n - 1, n)], axis=axis)
    outs = []
    for m in range(s):
        off = (2 * m + 1 - s) / (2.0 * s)
        if off < 0:
            y = (1.0 + off) * v + (-off) * prev
        elif off > 0:
            y = (1.0 - off) * v + off * nxt
        else:
            y = v
        outs.append(y)
    st = jnp.stack(outs, axis=axis + 1)
    shp = list(v.shape)
    shp[axis] = n * s
    return st.reshape(shp)


def upsample_bilinear_int(x, s):
    """NHWC integer-scale bilinear upsample, matches F.interpolate(align_corners=False)."""
    if s == 1:
        return x
    v = x.astype(jnp.float32)
    v = _up1d(v, s, 1)
    v = _up1d(v, s, 2)
    return v.astype(x.dtype)


def resize_bilinear(x, out_h, out_w):
    """General bilinear resize fallback (only hit for non-divisible sizes)."""
    N, H, W, C = x.shape

    def coords(out_size, in_size):
        scale = in_size / out_size
        src = (jnp.arange(out_size, dtype=jnp.float32) + 0.5) * scale - 0.5
        src = jnp.maximum(src, 0.0)
        i0 = jnp.minimum(jnp.floor(src).astype(jnp.int32), in_size - 1)
        i1 = jnp.minimum(i0 + 1, in_size - 1)
        frac = src - i0.astype(jnp.float32)
        return i0, i1, frac

    y0, y1, fy = coords(out_h, H)
    x0, x1, fx = coords(out_w, W)
    xf = x.astype(jnp.float32)
    top = (xf[:, y0, :, :] * (1.0 - fy)[None, :, None, None]
           + xf[:, y1, :, :] * fy[None, :, None, None])
    out = (top[:, :, x0, :] * (1.0 - fx)[None, None, :, None]
           + top[:, :, x1, :] * fx[None, None, :, None])
    return out.astype(x.dtype)


# ----------------------------------------------------------------------------
# Deterministic parameter generation (fresh BatchNorm in eval form)
# ----------------------------------------------------------------------------
class ParamGen:
    def __init__(self, seed=0):
        self._key = jax.random.PRNGKey(seed)

    def _next(self):
        self._key, sub = jax.random.split(self._key)
        return sub

    def conv(self, kh, kw, cin, cout):
        std = (2.0 / (kh * kw * cin)) ** 0.5
        return std * jax.random.normal(self._next(), (kh, kw, cin, cout), jnp.float32)

    def bn(self, c, eps=1e-5):
        gamma = jnp.ones((c,), jnp.float32)
        beta = jnp.zeros((c,), jnp.float32)
        mean = jnp.zeros((c,), jnp.float32)
        var = jnp.ones((c,), jnp.float32)
        scale = gamma / jnp.sqrt(var + eps)
        shift = beta - mean * scale
        return scale.reshape(1, c), shift.reshape(1, c)


# ----------------------------------------------------------------------------
# Blocks / branches / HRModule / transitions
# ----------------------------------------------------------------------------
def make_basic_block(pg, inplanes, planes, stride=1):
    p = dict(kind='basic', stride=stride,
             conv1=pg.conv(3, 3, inplanes, planes), bn1=pg.bn(planes),
             conv2=pg.conv(3, 3, planes, planes), bn2=pg.bn(planes))
    if stride != 1 or inplanes != planes:
        p['ds_conv'] = pg.conv(1, 1, inplanes, planes)
        p['ds_bn'] = pg.bn(planes)
    return p, planes


def make_bottleneck(pg, inplanes, planes, stride=1):
    out_ch = planes * 4
    p = dict(kind='bottleneck', stride=stride,
             conv1=pg.conv(1, 1, inplanes, planes), bn1=pg.bn(planes),
             conv2=pg.conv(3, 3, planes, planes), bn2=pg.bn(planes),
             conv3=pg.conv(1, 1, planes, out_ch), bn3=pg.bn(out_ch))
    if stride != 1 or inplanes != out_ch:
        p['ds_conv'] = pg.conv(1, 1, inplanes, out_ch)
        p['ds_bn'] = pg.bn(out_ch)
    return p, out_ch


def run_block(p, x):
    stride = p['stride']
    if 'ds_conv' in p:
        identity = conv_bn_act(x, p['ds_conv'], *p['ds_bn'],
                               stride=stride, padding=0, relu=False)
    else:
        identity = x
    if p['kind'] == 'basic':
        out = conv_bn_act(x, p['conv1'], *p['bn1'], stride=stride, padding=1, relu=True)
        out = conv_bn_act(out, p['conv2'], *p['bn2'], stride=1, padding=1,
                          relu=True, residual=identity)       # add+ReLU fused in epilogue
    else:
        out = conv_bn_act(x, p['conv1'], *p['bn1'], stride=1, padding=0, relu=True)
        out = conv_bn_act(out, p['conv2'], *p['bn2'], stride=stride, padding=1, relu=True)
        out = conv_bn_act(out, p['conv3'], *p['bn3'], stride=1, padding=0,
                          relu=True, residual=identity)
    return out


def make_layer(pg, block_fn, inplanes, planes, num_blocks, stride=1):
    blocks = []
    p, inplanes = block_fn(pg, inplanes, planes, stride)
    blocks.append(p)
    for _ in range(1, num_blocks):
        p, inplanes = block_fn(pg, inplanes, planes, 1)
        blocks.append(p)
    return blocks, inplanes


def run_blocks(blocks, x):
    for p in blocks:
        x = run_block(p, x)
    return x


def make_hr_module(pg, num_branches, block_fn, num_blocks, in_channels, num_channels,
                   multiscale_output):
    branches = []
    for i in range(num_branches):
        layer, out_ch = make_layer(pg, block_fn, in_channels[i], num_channels[i],
                                   num_blocks[i], 1)
        branches.append(layer)
        in_channels[i] = out_ch
    fuse = []
    if num_branches > 1:
        num_out = num_branches if multiscale_output else 1
        for i in range(num_out):
            row = []
            for j in range(num_branches):
                if j > i:
                    row.append(dict(kind='up', scale=2 ** (j - i),
                                    conv=pg.conv(1, 1, in_channels[j], in_channels[i]),
                                    bn=pg.bn(in_channels[i])))
                elif j == i:
                    row.append(None)
                else:
                    downs = []
                    for k in range(i - j):
                        if k == i - j - 1:
                            downs.append(dict(conv=pg.conv(3, 3, in_channels[j], in_channels[i]),
                                              bn=pg.bn(in_channels[i]), relu=False))
                        else:
                            downs.append(dict(conv=pg.conv(3, 3, in_channels[j], in_channels[j]),
                                              bn=pg.bn(in_channels[j]), relu=True))
                    row.append(dict(kind='down', downs=downs))
            fuse.append(row)
    return dict(num_branches=num_branches, branches=branches, fuse=fuse)


def run_hr_module(m, xs):
    nb = m['num_branches']
    xs = [run_blocks(m['branches'][i], xs[i]) for i in range(nb)]
    if nb == 1:
        return [xs[0]]
    outs = []
    for i in range(len(m['fuse'])):
        # identity + upsampled contributions (pure elementwise; XLA fuses these)
        acc = xs[i].astype(jnp.float32)
        for j in range(i + 1, nb):
            f = m['fuse'][i][j]
            t = conv_bn_act(xs[j], f['conv'], *f['bn'], stride=1, padding=0, relu=False)
            t = upsample_bilinear_int(t, f['scale'])
            th, tw = xs[i].shape[1], xs[i].shape[2]
            if (t.shape[1], t.shape[2]) != (th, tw):
                t = resize_bilinear(t, th, tw)   # reference's resize-to-target
            acc = acc + t.astype(jnp.float32)
        acc = acc.astype(DTYPE)
        if i == 0:
            outs.append(jnp.maximum(acc, 0.0).astype(DTYPE))
        else:
            # the downsample-chain contributions are folded into conv epilogues:
            # each chain's last conv takes the running sum as its fused residual,
            # the very last one also applies the fuse ReLU.
            for j in range(i):
                f = m['fuse'][i][j]
                downs = f['downs']
                t = xs[j]
                for k, d in enumerate(downs):
                    last = (k == len(downs) - 1)
                    t = conv_bn_act(t, d['conv'], *d['bn'], stride=2, padding=1,
                                    relu=(d['relu'] if not last else (j == i - 1)),
                                    residual=(acc if last else None))
                acc = t
            outs.append(acc)
    return outs


def make_transition(pg, pre, cur):
    layers = []
    for i in range(len(cur)):
        if i < len(pre):
            if cur[i] != pre[i]:
                layers.append(dict(kind='same', conv=pg.conv(3, 3, pre[i], cur[i]),
                                   bn=pg.bn(cur[i])))
            else:
                layers.append(None)
        else:
            downs = []
            for j in range(i + 1 - len(pre)):
                in_ch = pre[-1]
                out_ch = cur[i] if j == i - len(pre) else in_ch
                downs.append(dict(conv=pg.conv(3, 3, in_ch, out_ch), bn=pg.bn(out_ch)))
            layers.append(dict(kind='down', downs=downs))
    return layers


def apply_transition(t, x):
    if t['kind'] == 'same':
        return conv_bn_act(x, t['conv'], *t['bn'], stride=1, padding=1, relu=True)
    out = x
    for d in t['downs']:
        out = conv_bn_act(out, d['conv'], *d['bn'], stride=2, padding=1, relu=True)
    return out


def make_stage(pg, cfg, in_channels, multiscale_output=True):
    block_fn = make_bottleneck if cfg['block'] == 'BOTTLENECK' else make_basic_block
    modules = []
    for m in range(cfg['num_modules']):
        ms = not (not multiscale_output and m == cfg['num_modules'] - 1)
        modules.append(make_hr_module(pg, cfg['num_branches'], block_fn,
                                      cfg['num_blocks'], in_channels,
                                      cfg['num_channels'], ms))
    return modules, in_channels


def run_stage(modules, xs):
    for m in modules:
        xs = run_hr_module(m, xs)
    return xs


# ----------------------------------------------------------------------------
# Full HRNet
# ----------------------------------------------------------------------------
def build_hrnet(extra, in_channels=3, seed=0):
    pg = ParamGen(seed)
    params = {}
    params['conv1'] = pg.conv(3, 3, in_channels, 64)
    params['bn1'] = pg.bn(64)
    params['conv2'] = pg.conv(3, 3, 64, 64)
    params['bn2'] = pg.bn(64)

    s1 = extra['stage1']
    block_fn1 = make_bottleneck if s1['block'] == 'BOTTLENECK' else make_basic_block
    params['layer1'], stage1_out = make_layer(pg, block_fn1, 64,
                                              s1['num_channels'][0], s1['num_blocks'][0], 1)

    s2 = extra['stage2']
    exp2 = 4 if s2['block'] == 'BOTTLENECK' else 1
    ch2 = [c * exp2 for c in s2['num_channels']]
    params['transition1'] = make_transition(pg, [stage1_out], ch2)
    params['stage2'], pre = make_stage(pg, s2, ch2)

    s3 = extra['stage3']
    exp3 = 4 if s3['block'] == 'BOTTLENECK' else 1
    ch3 = [c * exp3 for c in s3['num_channels']]
    params['transition2'] = make_transition(pg, pre, ch3)
    params['stage3'], pre = make_stage(pg, s3, ch3)

    s4 = extra['stage4']
    exp4 = 4 if s4['block'] == 'BOTTLENECK' else 1
    ch4 = [c * exp4 for c in s4['num_channels']]
    params['transition3'] = make_transition(pg, pre, ch4)
    params['stage4'], pre = make_stage(pg, s4, ch4, multiscale_output=True)
    return params


def hrnet_forward(params, x_nchw):
    x = jnp.transpose(x_nchw, (0, 2, 3, 1)).astype(DTYPE)     # -> NHWC bf16
    # stem (stride-2 convs -> im2col fallback path)
    x = conv_bn_act(x, params['conv1'], *params['bn1'], stride=2, padding=1, relu=True)
    x = conv_bn_act(x, params['conv2'], *params['bn2'], stride=2, padding=1, relu=True)
    x = run_blocks(params['layer1'], x)

    # stage2
    x_list = []
    for t in params['transition1']:
        x_list.append(apply_transition(t, x) if t is not None else x)
    y_list = run_stage(params['stage2'], x_list)

    # stage3
    x_list = []
    for i, t in enumerate(params['transition2']):
        x_list.append(apply_transition(t, y_list[-1]) if t is not None else y_list[i])
    y_list = run_stage(params['stage3'], x_list)

    # stage4
    x_list = []
    for i, t in enumerate(params['transition3']):
        x_list.append(apply_transition(t, y_list[-1]) if t is not None else y_list[i])
    y_list = run_stage(params['stage4'], x_list)

    # back to PyTorch NCHW convention, f32
    return [jnp.transpose(y, (0, 3, 1, 2)).astype(jnp.float32) for y in y_list]


# Small deterministic HRNet config (same structure as the docstring example,
# scaled down so the synthetic run is fast).
EXTRA = dict(
    stage1=dict(num_modules=1, num_branches=1, block='BOTTLENECK',
                num_blocks=(1,), num_channels=(8,)),
    stage2=dict(num_modules=1, num_branches=2, block='BASIC',
                num_blocks=(1, 1), num_channels=(8, 16)),
    stage3=dict(num_modules=1, num_branches=3, block='BASIC',
                num_blocks=(1, 1, 1), num_channels=(8, 16, 32)),
    stage4=dict(num_modules=1, num_branches=4, block='BASIC',
                num_blocks=(1, 1, 1, 1), num_channels=(8, 16, 32, 64)),
)


if __name__ == "__main__":
    key = jax.random.PRNGKey(0)
    x = jax.random.normal(key, (2, 3, 32, 32), jnp.float32)   # NCHW input, like PyTorch

    params = build_hrnet(EXTRA, in_channels=3, seed=0)
    fwd = jax.jit(functools.partial(hrnet_forward, params))
    outs = fwd(x)
    outs = [jax.block_until_ready(o) for o in outs]

    expected = [(2, 8, 8, 8), (2, 16, 4, 4), (2, 32, 2, 2), (2, 64, 1, 1)]
    assert [tuple(o.shape) for o in outs] == expected, [tuple(o.shape) for o in outs]
    assert all(bool(jnp.isfinite(o).all()) for o in outs)
    print("KERNEL_OK")
</pallas_src>

<mosaic_0001>
module attributes {stable_mosaic.version = 11 : i64} {
  func.func @_mm_bn_kernel(%arg0: i32, %arg1: memref<512x32xbf16, #tpu.memory_space<vmem>>, %arg2: memref<32x64xbf16, #tpu.memory_space<vmem>>, %arg3: memref<1x64xf32, #tpu.memory_space<vmem>>, %arg4: memref<512x64xbf16, #tpu.memory_space<vmem>>) attributes {dimension_semantics = [#tpu.dimension_semantics<parallel>], iteration_bounds = array<i64: 1>, scalar_prefetch = 0 : i64, scratch_operands = 0 : i64, tpu.core_type = #tpu.core_type<tc>, window_params = [{transform_indices = @transform_0, window_bounds = array<i64: 512, 32>}, {pipeline_mode = #tpu.pipeline_mode<synchronous>, transform_indices = @transform_1, window_bounds = array<i64: 32, 64>}, {pipeline_mode = #tpu.pipeline_mode<synchronous>, transform_indices = @transform_2, window_bounds = array<i64: 1, 64>}, {transform_indices = @transform_3, window_bounds = array<i64: 512, 64>}]} {
    %c0 = arith.constant 0 : index
    %c0_0 = arith.constant 0 : index
    %0 = vector.load %arg1[%c0, %c0_0] : memref<512x32xbf16, #tpu.memory_space<vmem>>, vector<512x32xbf16>
    %c0_1 = arith.constant 0 : index
    %c0_2 = arith.constant 0 : index
    %1 = vector.load %arg2[%c0_1, %c0_2] : memref<32x64xbf16, #tpu.memory_space<vmem>>, vector<32x64xbf16>
    %cst = arith.constant dense<0.000000e+00> : vector<512x64xf32>
    %2 = tpu.matmul %0, %1, %cst {dimension_numbers = #tpu.dot_dimension_numbers<[1], [0], [0], [1], [0, 0, 1, 1], [], []>} : vector<512x32xbf16>, vector<32x64xbf16>, vector<512x64xf32> -> vector<512x64xf32>
    %c0_3 = arith.constant 0 : index
    %c0_4 = arith.constant 0 : index
    %3 = vector.load %arg3[%c0_3, %c0_4] : memref<1x64xf32, #tpu.memory_space<vmem>>, vector<1x64xf32>
    %4 = vector.broadcast %3 : vector<1x64xf32> to vector<512x64xf32>
    %5 = arith.addf %2, %4 : vector<512x64xf32>
    %cst_5 = arith.constant 0.000000e+00 : f32
    %6 = vector.broadcast %cst_5 : f32 to vector<512x64xf32>
    %7 = arith.maximumf %5, %6 : vector<512x64xf32>
    %8 = arith.truncf %7 : vector<512x64xf32> to vector<512x64xbf16>
    %c0_6 = arith.constant 0 : index
    %c0_7 = arith.constant 0 : index
    %9 = vector.load %arg4[%c0_6, %c0_7] : memref<512x64xbf16, #tpu.memory_space<vmem>>, vector<512x64xbf16>
    tpu.vector_store %arg4[%c0_6, %c0_7], %8 {strides = array<i32>} : memref<512x64xbf16, #tpu.memory_space<vmem>>, vector<512x64xbf16>,
    return
  }
  func.func @transform_0(%arg0: i32) -> (i32, i32) {
    %c0_i32 = arith.constant 0 : i32
    %c0_i32_0 = arith.constant 0 : i32
    return %arg0, %c0_i32 : i32, i32
  }
  func.func @transform_1(%arg0: i32) -> (i32, i32) {
    %c0_i32 = arith.constant 0 : i32
    %c0_i32_0 = arith.constant 0 : i32
    %c0_i32_1 = arith.constant 0 : i32
    return %c0_i32, %c0_i32_0 : i32, i32
  }
  func.func @transform_2(%arg0: i32) -> (i32, i32) {
    %c0_i32 = arith.constant 0 : i32
    %c0_i32_0 = arith.constant 0 : i32
    %c0_i32_1 = arith.constant 0 : i32
    return %c0_i32, %c0_i32_0 : i32, i32
  }
  func.func @transform_3(%arg0: i32) -> (i32, i32) {
    %c0_i32 = arith.constant 0 : i32
    %c0_i32_0 = arith.constant 0 : i32
    return %arg0, %c0_i32 : i32, i32
  }
}

module attributes {stable_mosaic.version = 11 : i64} {
  func.func @_mm_bn_kernel(%arg0: i32, %arg1: memref<128x576xbf16, #tpu.memory_space<vmem>>, %arg2: memref<576x64xbf16, #tpu.memory_space<vmem>>, %arg3: memref<1x64xf32, #tpu.memory_space<vmem>>, %arg4: memref<128x64xbf16, #tpu.memory_space<vmem>>) attributes {dimension_semantics = [#tpu.dimension_semantics<parallel>], iteration_bounds = array<i64: 1>, scalar_prefetch = 0 : i64, scratch_operands = 0 : i64, tpu.core_type = #tpu.core_type<tc>, window_params = [{transform_indices = @transform_0, window_bounds = array<i64: 128, 576>}, {pipeline_mode = #tpu.pipeline_mode<synchronous>, transform_indices = @transform_1, window_bounds = array<i64: 576, 64>}, {pipeline_mode = #tpu.pipeline_mode<synchronous>, transform_indices = @transform_2, window_bounds = array<i64: 1, 64>}, {transform_indices = @transform_3, window_bounds = array<i64: 128, 64>}]} {
    %c0 = arith.constant 0 : index
    %c0_0 = arith.constant 0 : index
    %0 = vector.load %arg1[%c0, %c0_0] : memref<128x576xbf16, #tpu.memory_space<vmem>>, vector<128x576xbf16>
    %c0_1 = arith.constant 0 : index
    %c0_2 = arith.constant 0 : index
    %1 = vector.load %arg2[%c0_1, %c0_2] : memref<576x64xbf16, #tpu.memory_space<vmem>>, vector<576x64xbf16>
    %cst = arith.constant dense<0.000000e+00> : vector<128x64xf32>
    %2 = tpu.matmul %0, %1, %cst {dimension_numbers = #tpu.dot_dimension_numbers<[1], [0], [0], [1], [0, 0, 1, 1], [], []>} : vector<128x576xbf16>, vector<576x64xbf16>, vector<128x64xf32> -> vector<128x64xf32>
    %c0_3 = arith.constant 0 : index
    %c0_4 = arith.constant 0 : index
    %3 = vector.load %arg3[%c0_3, %c0_4] : memref<1x64xf32, #tpu.memory_space<vmem>>, vector<1x64xf32>
    %4 = vector.broadcast %3 : vector<1x64xf32> to vector<128x64xf32>
    %5 = arith.addf %2, %4 : vector<128x64xf32>
    %cst_5 = arith.constant 0.000000e+00 : f32
    %6 = vector.broadcast %cst_5 : f32 to vector<128x64xf32>
    %7 = arith.maximumf %5, %6 : vector<128x64xf32>
    %8 = arith.truncf %7 : vector<128x64xf32> to vector<128x64xbf16>
    %c0_6 = arith.constant 0 : index
    %c0_7 = arith.constant 0 : index
    %9 = vector.load %arg4[%c0_6, %c0_7] : memref<128x64xbf16, #tpu.memory_space<vmem>>, vector<128x64xbf16>
    tpu.vector_store %arg4[%c0_6, %c0_7], %8 {strides = array<i32>} : memref<128x64xbf16, #tpu.memory_space<vmem>>, vector<128x64xbf16>,
    return
  }
  func.func @transform_0(%arg0: i32) -> (i32, i32) {
    %c0_i32 = arith.constant 0 : i32
    %c0_i32_0 = arith.constant 0 : i32
    return %arg0, %c0_i32 : i32, i32
  }
  func.func @transform_1(%arg0: i32) -> (i32, i32) {
    %c0_i32 = arith.constant 0 : i32
    %c0_i32_0 = arith.constant 0 : i32
    %c0_i32_1 = arith.constant 0 : i32
    return %c0_i32, %c0_i32_0 : i32, i32
  }
  func.func @transform_2(%arg0: i32) -> (i32, i32) {
    %c0_i32 = arith.constant 0 : i32
    %c0_i32_0 = arith.constant 0 : i32
    %c0_i32_1 = arith.constant 0 : i32
    return %c0_i32, %c0_i32_0 : i32, i32
  }
  func.func @transform_3(%arg0: i32) -> (i32, i32) {
    %c0_i32 = arith.constant 0 : i32
    %c0_i32_0 = arith.constant 0 : i32
    return %arg0, %c0_i32 : i32, i32
  }
}

module attributes {stable_mosaic.version = 11 : i64} {
  func.func @_conv_s1_kernel(%arg0: i32, %arg1: memref<1x64x64xbf16, #tpu.memory_space<vmem>>, %arg2: memref<64x8xbf16, #tpu.memory_space<vmem>>, %arg3: memref<1x8xf32, #tpu.memory_space<vmem>>, %arg4: memref<1x64x8xbf16, #tpu.memory_space<vmem>>) attributes {dimension_semantics = [#tpu.dimension_semantics<parallel>], iteration_bounds = array<i64: 2>, scalar_prefetch = 0 : i64, scratch_operands = 0 : i64, tpu.core_type = #tpu.core_type<tc>, window_params = [{transform_indices = @transform_0, window_bounds = array<i64: 1, 64, 64>}, {pipeline_mode = #tpu.pipeline_mode<synchronous>, transform_indices = @transform_1, window_bounds = array<i64: 64, 8>}, {pipeline_mode = #tpu.pipeline_mode<synchronous>, transform_indices = @transform_2, window_bounds = array<i64: 1, 8>}, {transform_indices = @transform_3, window_bounds = array<i64: 1, 64, 8>}]} {
    %c0 = arith.constant 0 : index
    %c0_0 = arith.constant 0 : index
    %c0_1 = arith.constant 0 : index
    %0 = vector.load %arg1[%c0, %c0_0, %c0_1] : memref<1x64x64xbf16, #tpu.memory_space<vmem>>, vector<1x64x64xbf16>
    %1 = vector.shape_cast %0 : vector<1x64x64xbf16> to vector<64x64xbf16>
    %c0_2 = arith.constant 0 : index
    %c0_3 = arith.constant 0 : index
    %2 = vector.load %arg2[%c0_2, %c0_3] : memref<64x8xbf16, #tpu.memory_space<vmem>>, vector<64x8xbf16>
    %cst = arith.constant dense<0.000000e+00> : vector<64x8xf32>
    %3 = tpu.matmul %1, %2, %cst {dimension_numbers = #tpu.dot_dimension_numbers<[1], [0], [0], [1], [0, 0, 1, 1], [], []>} : vector<64x64xbf16>, vector<64x8xbf16>, vector<64x8xf32> -> vector<64x8xf32>
    %c0_4 = arith.constant 0 : index
    %c0_5 = arith.constant 0 : index
    %4 = vector.load %arg3[%c0_4, %c0_5] : memref<1x8xf32, #tpu.memory_space<vmem>>, vector<1x8xf32>
    %5 = vector.broadcast %4 : vector<1x8xf32> to vector<64x8xf32>
    %6 = arith.addf %3, %5 : vector<64x8xf32>
    %cst_6 = arith.constant 0.000000e+00 : f32
    %7 = vector.broadcast %cst_6 : f32 to vector<64x8xf32>
    %8 = arith.maximumf %6, %7 : vector<64x8xf32>
    %9 = arith.truncf %8 : vector<64x8xf32> to vector<64x8xbf16>
    %c0_7 = arith.constant 0 : index
    %c0_8 = arith.constant 0 : index
    %c0_9 = arith.constant 0 : index
    %10 = vector.load %arg4[%c0_7, %c0_8, %c0_9] : memref<1x64x8xbf16, #tpu.memory_space<vmem>>, vector<1x64x8xbf16>
    %11 = vector.shape_cast %10 : vector<1x64x8xbf16> to vector<64x8xbf16>
    %12 = vector.shape_cast %9 : vector<64x8xbf16> to vector<1x64x8xbf16>
    tpu.vector_store %arg4[%c0_7, %c0_8, %c0_9], %12 {strides = array<i32>} : memref<1x64x8xbf16, #tpu.memory_space<vmem>>, vector<1x64x8xbf16>,
    return
  }
  func.func @transform_0(%arg0: i32) -> (i32, i32, i32) {
    %c0_i32 = arith.constant 0 : i32
    %c0_i32_0 = arith.constant 0 : i32
    %c0_i32_1 = arith.constant 0 : i32
    return %arg0, %c0_i32, %c0_i32_0 : i32, i32, i32
  }
  func.func @transform_1(%arg0: i32) -> (i32, i32) {
    %c0_i32 = arith.constant 0 : i32
    %c0_i32_0 = arith.constant 0 : i32
    %c0_i32_1 = arith.constant 0 : i32
    return %c0_i32, %c0_i32_0 : i32, i32
  }
  func.func @transform_2(%arg0: i32) -> (i32, i32) {
    %c0_i32 = arith.constant 0 : i32
    %c0_i32_0 = arith.constant 0 : i32
    %c0_i32_1 = arith.constant 0 : i32
    return %c0_i32, %c0_i32_0 : i32, i32
  }
  func.func @transform_3(%arg0: i32) -> (i32, i32, i32) {
    %c0_i32 = arith.constant 0 : i32
    %c0_i32_0 = arith.constant 0 : i32
    %c0_i32_1 = arith.constant 0 : i32
    return %arg0, %c0_i32, %c0_i32_0 : i32, i32, i32
  }
}

module attributes {stable_mosaic.version = 11 : i64} {
  func.func @_conv_s1_kernel(%arg0: i32, %arg1: memref<1x102x8xbf16, #tpu.memory_space<vmem>>, %arg2: memref<72x8xbf16, #tpu.memory_space<vmem>>, %arg3: memref<1x8xf32, #tpu.memory_space<vmem>>, %arg4: memref<1x80x8xbf16, #tpu.memory_space<vmem>>) attributes {dimension_semantics = [#tpu.dimension_semantics<parallel>], iteration_bounds = array<i64: 2>, scalar_prefetch = 0 : i64, scratch_operands = 0 : i64, tpu.core_type = #tpu.core_type<tc>, window_params = [{transform_indices = @transform_0, window_bounds = array<i64: 1, 102, 8>}, {pipeline_mode = #tpu.pipeline_mode<synchronous>, transform_indices = @transform_1, window_bounds = array<i64: 72, 8>}, {pipeline_mode = #tpu.pipeline_mode<synchronous>, transform_indices = @transform_2, window_bounds = array<i64: 1, 8>}, {transform_indices = @transform_3, window_bounds = array<i64: 1, 80, 8>}]} {
    %c0 = arith.constant 0 : index
    %c0_0 = arith.constant 0 : index
    %c0_1 = arith.constant 0 : index
    %0 = vector.load %arg1[%c0, %c0_0, %c0_1] : memref<1x102x8xbf16, #tpu.memory_space<vmem>>, vector<1x80x8xbf16>
    %1 = vector.shape_cast %0 : vector<1x80x8xbf16> to vector<80x8xbf16>
    %c0_2 = arith.constant 0 : index
    %c1 = arith.constant 1 : index
    %c0_3 = arith.constant 0 : index
    %2 = vector.load %arg1[%c0_2, %c1, %c0_3] : memref<1x102x8xbf16, #tpu.memory_space<vmem>>, vector<1x80x8xbf16>
    %3 = vector.shape_cast %2 : vector<1x80x8xbf16> to vector<80x8xbf16>
    %c0_4 = arith.constant 0 : index
    %c2 = arith.constant 2 : index
    %c0_5 = arith.constant 0 : index
    %4 = vector.load %arg1[%c0_4, %c2, %c0_5] : memref<1x102x8xbf16, #tpu.memory_space<vmem>>, vector<1x80x8xbf16>
    %5 = vector.shape_cast %4 : vector<1x80x8xbf16> to vector<80x8xbf16>
    %c0_6 = arith.constant 0 : index
    %c10 = arith.constant 10 : index
    %c0_7 = arith.constant 0 : index
    %6 = vector.load %arg1[%c0_6, %c10, %c0_7] : memref<1x102x8xbf16, #tpu.memory_space<vmem>>, vector<1x80x8xbf16>
    %7 = vector.shape_cast %6 : vector<1x80x8xbf16> to vector<80x8xbf16>
    %c0_8 = arith.constant 0 : index
    %c11 = arith.constant 11 : index
    %c0_9 = arith.constant 0 : index
    %8 = vector.load %arg1[%c0_8, %c11, %c0_9] : memref<1x102x8xbf16, #tpu.memory_space<vmem>>, vector<1x80x8xbf16>
    %9 = vector.shape_cast %8 : vector<1x80x8xbf16> to vector<80x8xbf16>
    %c0_10 = arith.constant 0 : index
    %c12 = arith.constant 12 : index
    %c0_11 = arith.constant 0 : index
    %10 = vector.load %arg1[%c0_10, %c12, %c0_11] : memref<1x102x8xbf16, #tpu.memory_space<vmem>>, vector<1x80x8xbf16>
    %11 = vector.shape_cast %10 : vector<1x80x8xbf16> to vector<80x8xbf16>
    %c0_12 = arith.constant 0 : index
    %c20 = arith.constant 20 : index
    %c0_13 = arith.constant 0 : index
    %12 = vector.load %arg1[%c0_12, %c20, %c0_13] : memref<1x102x8xbf16, #tpu.memory_space<vmem>>, vector<1x80x8xbf16>
    %13 = vector.shape_cast %12 : vector<1x80x8xbf16> to vector<80x8xbf16>
    %c0_14 = arith.constant 0 : index
    %c21 = arith.constant 21 : index
    %c0_15 = arith.constant 0 : index
    %14 = vector.load %arg1[%c0_14, %c21, %c0_15] : memref<1x102x8xbf16, #tpu.memory_space<vmem>>, vector<1x80x8xbf16>
    %15 = vector.shape_cast %14 : vector<1x80x8xbf16> to vector<80x8xbf16>
    %c0_16 = arith.constant 0 : index
    %c22 = arith.constant 22 : index
    %c0_17 = arith.constant 0 : index
    %16 = vector.load %arg1[%c0_16, %c22, %c0_17] : memref<1x102x8xbf16, #tpu.memory_space<vmem>>, vector<1x80x8xbf16>
    %17 = vector.shape_cast %16 : vector<1x80x8xbf16> to vector<80x8xbf16>
    %18 = tpu.concatenate %1, %3, %5, %7, %9, %11, %13, %15, %17 in 1 : vector<80x8xbf16>, vector<80x8xbf16>, vector<80x8xbf16>, vector<80x8xbf16>, vector<80x8xbf16>, vector<80x8xbf16>, vector<80x8xbf16>, vector<80x8xbf16>, vector<80x8xbf16> -> vector<80x72xbf16>
    %c0_18 = arith.constant 0 : index
    %c0_19 = arith.constant 0 : index
    %19 = vector.load %arg2[%c0_18, %c0_19] : memref<72x8xbf16, #tpu.memory_space<vmem>>, vector<72x8xbf16>
    %cst = arith.constant dense<0.000000e+00> : vector<80x8xf32>
    %20 = tpu.matmul %18, %19, %cst {dimension_numbers = #tpu.dot_dimension_numbers<[1], [0], [0], [1], [0, 0, 1, 1], [], []>} : vector<80x72xbf16>, vector<72x8xbf16>, vector<80x8xf32> -> vector<80x8xf32>
    %c0_20 = arith.constant 0 : index
    %c0_21 = arith.constant 0 : index
    %21 = vector.load %arg3[%c0_20, %c0_21] : memref<1x8xf32, #tpu.memory_space<vmem>>, vector<1x8xf32>
    %22 = vector.broadcast %21 : vector<1x8xf32> to vector<80x8xf32>
    %23 = arith.addf %20, %22 : vector<80x8xf32>
    %cst_22 = arith.constant 0.000000e+00 : f32
    %24 = vector.broadcast %cst_22 : f32 to vector<80x8xf32>
    %25 = arith.maximumf %23, %24 : vector<80x8xf32>
    %26 = arith.truncf %25 : vector<80x8xf32> to vector<80x8xbf16>
    %c0_23 = arith.constant 0 : index
    %c0_24 = arith.constant 0 : index
    %c0_25 = arith.constant 0 : index
    %27 = vector.load %arg4[%c0_23, %c0_24, %c0_25] : memref<1x80x8xbf16, #tpu.memory_space<vmem>>, vector<1x80x8xbf16>
    %28 = vector.shape_cast %27 : vector<1x80x8xbf16> to vector<80x8xbf16>
    %29 = vector.shape_cast %26 : vector<80x8xbf16> to vector<1x80x8xbf16>
    tpu.vector_store %arg4[%c0_23, %c0_24, %c0_25], %29 {strides = array<i32>} : memref<1x80x8xbf16, #tpu.memory_space<vmem>>, vector<1x80x8xbf16>,
    return
  }
  func.func @transform_0(%arg0: i32) -> (i32, i32, i32) {
    %c0_i32 = arith.constant 0 : i32
    %c0_i32_0 = arith.constant 0 : i32
    %c0_i32_1 = arith.constant 0 : i32
    return %arg0, %c0_i32, %c0_i32_0 : i32, i32, i32
  }
  func.func @transform_1(%arg0: i32) -> (i32, i32) {
    %c0_i32 = arith.constant 0 : i32
    %c0_i32_0 = arith.constant 0 : i32
    %c0_i32_1 = arith.constant 0 : i32
    return %c0_i32, %c0_i32_0 : i32, i32
  }
  func.func @transform_2(%arg0: i32) -> (i32, i32) {
    %c0_i32 = arith.constant 0 : i32
    %c0_i32_0 = arith.constant 0 : i32
    %c0_i32_1 = arith.constant 0 : i32
    return %c0_i32, %c0_i32_0 : i32, i32
  }
  func.func @transform_3(%arg0: i32) -> (i32, i32, i32) {
    %c0_i32 = arith.constant 0 : i32
    %c0_i32_0 = arith.constant 0 : i32
    %c0_i32_1 = arith.constant 0 : i32
    return %arg0, %c0_i32, %c0_i32_0 : i32, i32, i32
  }
}

module attributes {stable_mosaic.version = 11 : i64} {
  func.func @_conv_s1_kernel(%arg0: i32, %arg1: memref<1x64x64xbf16, #tpu.memory_space<vmem>>, %arg2: memref<64x32xbf16, #tpu.memory_space<vmem>>, %arg3: memref<1x32xf32, #tpu.memory_space<vmem>>, %arg4: memref<1x64x32xbf16, #tpu.memory_space<vmem>>) attributes {dimension_semantics = [#tpu.dimension_semantics<parallel>], iteration_bounds = array<i64: 2>, scalar_prefetch = 0 : i64, scratch_operands = 0 : i64, tpu.core_type = #tpu.core_type<tc>, window_params = [{transform_indices = @transform_0, window_bounds = array<i64: 1, 64, 64>}, {pipeline_mode = #tpu.pipeline_mode<synchronous>, transform_indices = @transform_1, window_bounds = array<i64: 64, 32>}, {pipeline_mode = #tpu.pipeline_mode<synchronous>, transform_indices = @transform_2, window_bounds = array<i64: 1, 32>}, {transform_indices = @transform_3, window_bounds = array<i64: 1, 64, 32>}]} {
    %c0 = arith.constant 0 : index
    %c0_0 = arith.constant 0 : index
    %c0_1 = arith.constant 0 : index
    %0 = vector.load %arg1[%c0, %c0_0, %c0_1] : memref<1x64x64xbf16, #tpu.memory_space<vmem>>, vector<1x64x64xbf16>
    %1 = vector.shape_cast %0 : vector<1x64x64xbf16> to vector<64x64xbf16>
    %c0_2 = arith.constant 0 : index
    %c0_3 = arith.constant 0 : index
    %2 = vector.load %arg2[%c0_2, %c0_3] : memref<64x32xbf16, #tpu.memory_space<vmem>>, vector<64x32xbf16>
    %cst = arith.constant dense<0.000000e+00> : vector<64x32xf32>
    %3 = tpu.matmul %1, %2, %cst {dimension_numbers = #tpu.dot_dimension_numbers<[1], [0], [0], [1], [0, 0, 1, 1], [], []>} : vector<64x64xbf16>, vector<64x32xbf16>, vector<64x32xf32> -> vector<64x32xf32>
    %c0_4 = arith.constant 0 : index
    %c0_5 = arith.constant 0 : index
    %4 = vector.load %arg3[%c0_4, %c0_5] : memref<1x32xf32, #tpu.memory_space<vmem>>, vector<1x32xf32>
    %5 = vector.broadcast %4 : vector<1x32xf32> to vector<64x32xf32>
    %6 = arith.addf %3, %5 : vector<64x32xf32>
    %7 = arith.truncf %6 : vector<64x32xf32> to vector<64x32xbf16>
    %c0_6 = arith.constant 0 : index
    %c0_7 = arith.constant 0 : index
    %c0_8 = arith.constant 0 : index
    %8 = vector.load %arg4[%c0_6, %c0_7, %c0_8] : memref<1x64x32xbf16, #tpu.memory_space<vmem>>, vector<1x64x32xbf16>
    %9 = vector.shape_cast %8 : vector<1x64x32xbf16> to vector<64x32xbf16>
    %10 = vector.shape_cast %7 : vector<64x32xbf16> to vector<1x64x32xbf16>
    tpu.vector_store %arg4[%c0_6, %c0_7, %c0_8], %10 {strides = array<i32>} : memref<1x64x32xbf16, #tpu.memory_space<vmem>>, vector<1x64x32xbf16>,
    return
  }
  func.func @transform_0(%arg0: i32) -> (i32, i32, i32) {
    %c0_i32 = arith.constant 0 : i32
    %c0_i32_0 = arith.constant 0 : i32
    %c0_i32_1 = arith.constant 0 : i32
    return %arg0, %c0_i32, %c0_i32_0 : i32, i32, i32
  }
  func.func @transform_1(%arg0: i32) -> (i32, i32) {
    %c0_i32 = arith.constant 0 : i32
    %c0_i32_0 = arith.constant 0 : i32
    %c0_i32_1 = arith.constant 0 : i32
    return %c0_i32, %c0_i32_0 : i32, i32
  }
  func.func @transform_2(%arg0: i32) -> (i32, i32) {
    %c0_i32 = arith.constant 0 : i32
    %c0_i32_0 = arith.constant 0 : i32
    %c0_i32_1 = arith.constant 0 : i32
    return %c0_i32, %c0_i32_0 : i32, i32
  }
  func.func @transform_3(%arg0: i32) -> (i32, i32, i32) {
    %c0_i32 = arith.constant 0 : i32
    %c0_i32_0 = arith.constant 0 : i32
    %c0_i32_1 = arith.constant 0 : i32
    return %arg0, %c0_i32, %c0_i32_0 : i32, i32, i32
  }
}

module attributes {stable_mosaic.version = 11 : i64} {
  func.func @_conv_s1_kernel(%arg0: i32, %arg1: memref<1x64x8xbf16, #tpu.memory_space<vmem>>, %arg2: memref<8x32xbf16, #tpu.memory_space<vmem>>, %arg3: memref<1x32xf32, #tpu.memory_space<vmem>>, %arg4: memref<1x64x32xbf16, #tpu.memory_space<vmem>>, %arg5: memref<1x64x32xbf16, #tpu.memory_space<vmem>>) attributes {dimension_semantics = [#tpu.dimension_semantics<parallel>], iteration_bounds = array<i64: 2>, scalar_prefetch = 0 : i64, scratch_operands = 0 : i64, tpu.core_type = #tpu.core_type<tc>, window_params = [{transform_indices = @transform_0, window_bounds = array<i64: 1, 64, 8>}, {pipeline_mode = #tpu.pipeline_mode<synchronous>, transform_indices = @transform_1, window_bounds = array<i64: 8, 32>}, {pipeline_mode = #tpu.pipeline_mode<synchronous>, transform_indices = @transform_2, window_bounds = array<i64: 1, 32>}, {transform_indices = @transform_3, window_bounds = array<i64: 1, 64, 32>}, {transform_indices = @transform_4, window_bounds = array<i64: 1, 64, 32>}]} {
    %c0 = arith.constant 0 : index
    %c0_0 = arith.constant 0 : index
    %c0_1 = arith.constant 0 : index
    %0 = vector.load %arg1[%c0, %c0_0, %c0_1] : memref<1x64x8xbf16, #tpu.memory_space<vmem>>, vector<1x64x8xbf16>
    %1 = vector.shape_cast %0 : vector<1x64x8xbf16> to vector<64x8xbf16>
    %c0_2 = arith.constant 0 : index
    %c0_3 = arith.constant 0 : index
    %2 = vector.load %arg2[%c0_2, %c0_3] : memref<8x32xbf16, #tpu.memory_space<vmem>>, vector<8x32xbf16>
    %cst = arith.constant dense<0.000000e+00> : vector<64x32xf32>
    %3 = tpu.matmul %1, %2, %cst {dimension_numbers = #tpu.dot_dimension_numbers<[1], [0], [0], [1], [0, 0, 1, 1], [], []>} : vector<64x8xbf16>, vector<8x32xbf16>, vector<64x32xf32> -> vector<64x32xf32>
    %c0_4 = arith.constant 0 : index
    %c0_5 = arith.constant 0 : index
    %4 = vector.load %arg3[%c0_4, %c0_5] : memref<1x32xf32, #tpu.memory_space<vmem>>, vector<1x32xf32>
    %5 = vector.broadcast %4 : vector<1x32xf32> to vector<64x32xf32>
    %6 = arith.addf %3, %5 : vector<64x32xf32>
    %c0_6 = arith.constant 0 : index
    %c0_7 = arith.constant 0 : index
    %c0_8 = arith.constant 0 : index
    %7 = vector.load %arg4[%c0_6, %c0_7, %c0_8] : memref<1x64x32xbf16, #tpu.memory_space<vmem>>, vector<1x64x32xbf16>
    %8 = vector.shape_cast %7 : vector<1x64x32xbf16> to vector<64x32xbf16>
    %9 = arith.extf %8 : vector<64x32xbf16> to vector<64x32xf32>
    %10 = arith.addf %6, %9 : vector<64x32xf32>
    %cst_9 = arith.constant 0.000000e+00 : f32
    %11 = vector.broadcast %cst_9 : f32 to vector<64x32xf32>
    %12 = arith.maximumf %10, %11 : vector<64x32xf32>
    %13 = arith.truncf %12 : vector<64x32xf32> to vector<64x32xbf16>
    %c0_10 = arith.constant 0 : index
    %c0_11 = arith.constant 0 : index
    %c0_12 = arith.constant 0 : index
    %14 = vector.load %arg5[%c0_10, %c0_11, %c0_12] : memref<1x64x32xbf16, #tpu.memory_space<vmem>>, vector<1x64x32xbf16>
    %15 = vector.shape_cast %14 : vector<1x64x32xbf16> to vector<64x32xbf16>
    %16 = vector.shape_cast %13 : vector<64x32xbf16> to vector<1x64x32xbf16>
    tpu.vector_store %arg5[%c0_10, %c0_11, %c0_12], %16 {strides = array<i32>} : memref<1x64x32xbf16, #tpu.memory_space<vmem>>, vector<1x64x32xbf16>,
    return
  }
  func.func @transform_0(%arg0: i32) -> (i32, i32, i32) {
    %c0_i32 = arith.constant 0 : i32
    %c0_i32_0 = arith.constant 0 : i32
    %c0_i32_1 = arith.constant 0 : i32
    return %arg0, %c0_i32, %c0_i32_0 : i32, i32, i32
  }
  func.func @transform_1(%arg0: i32) -> (i32, i32) {
    %c0_i32 = arith.constant 0 : i32
    %c0_i32_0 = arith.constant 0 : i32
    %c0_i32_1 = arith.constant 0 : i32
    return %c0_i32, %c0_i32_0 : i32, i32
  }
  func.func @transform_2(%arg0: i32) -> (i32, i32) {
    %c0_i32 = arith.constant 0 : i32
    %c0_i32_0 = arith.constant 0 : i32
    %c0_i32_1 = arith.constant 0 : i32
    return %c0_i32, %c0_i32_0 : i32, i32
  }
  func.func @transform_3(%arg0: i32) -> (i32, i32, i32) {
    %c0_i32 = arith.constant 0 : i32
    %c0_i32_0 = arith.constant 0 : i32
    %c0_i32_1 = arith.constant 0 : i32
    return %arg0, %c0_i32, %c0_i32_0 : i32, i32, i32
  }
  func.func @transform_4(%arg0: i32) -> (i32, i32, i32) {
    %c0_i32 = arith.constant 0 : i32
    %c0_i32_0 = arith.constant 0 : i32
    %c0_i32_1 = arith.constant 0 : i32
    return %arg0, %c0_i32, %c0_i32_0 : i32, i32, i32
  }
}

module attributes {stable_mosaic.version = 11 : i64} {
  func.func @_conv_s1_kernel(%arg0: i32, %arg1: memref<1x102x32xbf16, #tpu.memory_space<vmem>>, %arg2: memref<288x8xbf16, #tpu.memory_space<vmem>>, %arg3: memref<1x8xf32, #tpu.memory_space<vmem>>, %arg4: memref<1x80x8xbf16, #tpu.memory_space<vmem>>) attributes {dimension_semantics = [#tpu.dimension_semantics<parallel>], iteration_bounds = array<i64: 2>, scalar_prefetch = 0 : i64, scratch_operands = 0 : i64, tpu.core_type = #tpu.core_type<tc>, window_params = [{transform_indices = @transform_0, window_bounds = array<i64: 1, 102, 32>}, {pipeline_mode = #tpu.pipeline_mode<synchronous>, transform_indices = @transform_1, window_bounds = array<i64: 288, 8>}, {pipeline_mode = #tpu.pipeline_mode<synchronous>, transform_indices = @transform_2, window_bounds = array<i64: 1, 8>}, {transform_indices = @transform_3, window_bounds = array<i64: 1, 80, 8>}]} {
    %c0 = arith.constant 0 : index
    %c0_0 = arith.constant 0 : index
    %c0_1 = arith.constant 0 : index
    %0 = vector.load %arg1[%c0, %c0_0, %c0_1] : memref<1x102x32xbf16, #tpu.memory_space<vmem>>, vector<1x80x32xbf16>
    %1 = vector.shape_cast %0 : vector<1x80x32xbf16> to vector<80x32xbf16>
    %c0_2 = arith.constant 0 : index
    %c1 = arith.constant 1 : index
    %c0_3 = arith.constant 0 : index
    %2 = vector.load %arg1[%c0_2, %c1, %c0_3] : memref<1x102x32xbf16, #tpu.memory_space<vmem>>, vector<1x80x32xbf16>
    %3 = vector.shape_cast %2 : vector<1x80x32xbf16> to vector<80x32xbf16>
    %c0_4 = arith.constant 0 : index
    %c2 = arith.constant 2 : index
    %c0_5 = arith.constant 0 : index
    %4 = vector.load %arg1[%c0_4, %c2, %c0_5] : memref<1x102x32xbf16, #tpu.memory_space<vmem>>, vector<1x80x32xbf16>
    %5 = vector.shape_cast %4 : vector<1x80x32xbf16> to vector<80x32xbf16>
    %c0_6 = arith.constant 0 : index
    %c10 = arith.constant 10 : index
    %c0_7 = arith.constant 0 : index
    %6 = vector.load %arg1[%c0_6, %c10, %c0_7] : memref<1x102x32xbf16, #tpu.memory_space<vmem>>, vector<1x80x32xbf16>
    %7 = vector.shape_cast %6 : vector<1x80x32xbf16> to vector<80x32xbf16>
    %c0_8 = arith.constant 0 : index
    %c11 = arith.constant 11 : index
    %c0_9 = arith.constant 0 : index
    %8 = vector.load %arg1[%c0_8, %c11, %c0_9] : memref<1x102x32xbf16, #tpu.memory_space<vmem>>, vector<1x80x32xbf16>
    %9 = vector.shape_cast %8 : vector<1x80x32xbf16> to vector<80x32xbf16>
    %c0_10 = arith.constant 0 : index
    %c12 = arith.constant 12 : index
    %c0_11 = arith.constant 0 : index
    %10 = vector.load %arg1[%c0_10, %c12, %c0_11] : memref<1x102x32xbf16, #tpu.memory_space<vmem>>, vector<1x80x32xbf16>
    %11 = vector.shape_cast %10 : vector<1x80x32xbf16> to vector<80x32xbf16>
    %c0_12 = arith.constant 0 : index
    %c20 = arith.constant 20 : index
    %c0_13 = arith.constant 0 : index
    %12 = vector.load %arg1[%c0_12, %c20, %c0_13] : memref<1x102x32xbf16, #tpu.memory_space<vmem>>, vector<1x80x32xbf16>
    %13 = vector.shape_cast %12 : vector<1x80x32xbf16> to vector<80x32xbf16>
    %c0_14 = arith.constant 0 : index
    %c21 = arith.constant 21 : index
    %c0_15 = arith.constant 0 : index
    %14 = vector.load %arg1[%c0_14, %c21, %c0_15] : memref<1x102x32xbf16, #tpu.memory_space<vmem>>, vector<1x80x32xbf16>
    %15 = vector.shape_cast %14 : vector<1x80x32xbf16> to vector<80x32xbf16>
    %c0_16 = arith.constant 0 : index
    %c22 = arith.constant 22 : index
    %c0_17 = arith.constant 0 : index
    %16 = vector.load %arg1[%c0_16, %c22, %c0_17] : memref<1x102x32xbf16, #tpu.memory_space<vmem>>, vector<1x80x32xbf16>
    %17 = vector.shape_cast %16 : vector<1x80x32xbf16> to vector<80x32xbf16>
    %18 = tpu.concatenate %1, %3, %5, %7, %9, %11, %13, %15, %17 in 1 : vector<80x32xbf16>, vector<80x32xbf16>, vector<80x32xbf16>, vector<80x32xbf16>, vector<80x32xbf16>, vector<80x32xbf16>, vector<80x32xbf16>, vector<80x32xbf16>, vector<80x32xbf16> -> vector<80x288xbf16>
    %c0_18 = arith.constant 0 : index
    %c0_19 = arith.constant 0 : index
    %19 = vector.load %arg2[%c0_18, %c0_19] : memref<288x8xbf16, #tpu.memory_space<vmem>>, vector<288x8xbf16>
    %cst = arith.constant dense<0.000000e+00> : vector<80x8xf32>
    %20 = tpu.matmul %18, %19, %cst {dimension_numbers = #tpu.dot_dimension_numbers<[1], [0], [0], [1], [0, 0, 1, 1], [], []>} : vector<80x288xbf16>, vector<288x8xbf16>, vector<80x8xf32> -> vector<80x8xf32>
    %c0_20 = arith.constant 0 : index
    %c0_21 = arith.constant 0 : index
    %21 = vector.load %arg3[%c0_20, %c0_21] : memref<1x8xf32, #tpu.memory_space<vmem>>, vector<1x8xf32>
    %22 = vector.broadcast %21 : vector<1x8xf32> to vector<80x8xf32>
    %23 = arith.addf %20, %22 : vector<80x8xf32>
    %cst_22 = arith.constant 0.000000e+00 : f32
    %24 = vector.broadcast %cst_22 : f32 to vector<80x8xf32>
    %25 = arith.maximumf %23, %24 : vector<80x8xf32>
    %26 = arith.truncf %25 : vector<80x8xf32> to vector<80x8xbf16>
    %c0_23 = arith.constant 0 : index
    %c0_24 = arith.constant 0 : index
    %c0_25 = arith.constant 0 : index
    %27 = vector.load %arg4[%c0_23, %c0_24, %c0_25] : memref<1x80x8xbf16, #tpu.memory_space<vmem>>, vector<1x80x8xbf16>
    %28 = vector.shape_cast %27 : vector<1x80x8xbf16> to vector<80x8xbf16>
    %29 = vector.shape_cast %26 : vector<80x8xbf16> to vector<1x80x8xbf16>
    tpu.vector_store %arg4[%c0_23, %c0_24, %c0_25], %29 {strides = array<i32>} : memref<1x80x8xbf16, #tpu.memory_space<vmem>>, vector<1x80x8xbf16>,
    return
  }
  func.func @transform_0(%arg0: i32) -> (i32, i32, i32) {
    %c0_i32 = arith.constant 0 : i32
    %c0_i32_0 = arith.constant 0 : i32
    %c0_i32_1 = arith.constant 0 : i32
    return %arg0, %c0_i32, %c0_i32_0 : i32, i32, i32
  }
  func.func @transform_1(%arg0: i32) -> (i32, i32) {
    %c0_i32 = arith.constant 0 : i32
    %c0_i32_0 = arith.constant 0 : i32
    %c0_i32_1 = arith.constant 0 : i32
    return %c0_i32, %c0_i32_0 : i32, i32
  }
  func.func @transform_2(%arg0: i32) -> (i32, i32) {
    %c0_i32 = arith.constant 0 : i32
    %c0_i32_0 = arith.constant 0 : i32
    %c0_i32_1 = arith.constant 0 : i32
    return %c0_i32, %c0_i32_0 : i32, i32
  }
  func.func @transform_3(%arg0: i32) -> (i32, i32, i32) {
    %c0_i32 = arith.constant 0 : i32
    %c0_i32_0 = arith.constant 0 : i32
    %c0_i32_1 = arith.constant 0 : i32
    return %arg0, %c0_i32, %c0_i32_0 : i32, i32, i32
  }
}

module attributes {stable_mosaic.version = 11 : i64} {
  func.func @_conv_s1_kernel(%arg0: i32, %arg1: memref<1x102x8xbf16, #tpu.memory_space<vmem>>, %arg2: memref<72x8xbf16, #tpu.memory_space<vmem>>, %arg3: memref<1x8xf32, #tpu.memory_space<vmem>>, %arg4: memref<1x80x8xbf16, #tpu.memory_space<vmem>>, %arg5: memref<1x80x8xbf16, #tpu.memory_space<vmem>>) attributes {dimension_semantics = [#tpu.dimension_semantics<parallel>], iteration_bounds = array<i64: 2>, scalar_prefetch = 0 : i64, scratch_operands = 0 : i64, tpu.core_type = #tpu.core_type<tc>, window_params = [{transform_indices = @transform_0, window_bounds = array<i64: 1, 102, 8>}, {pipeline_mode = #tpu.pipeline_mode<synchronous>, transform_indices = @transform_1, window_bounds = array<i64: 72, 8>}, {pipeline_mode = #tpu.pipeline_mode<synchronous>, transform_indices = @transform_2, window_bounds = array<i64: 1, 8>}, {transform_indices = @transform_3, window_bounds = array<i64: 1, 80, 8>}, {transform_indices = @transform_4, window_bounds = array<i64: 1, 80, 8>}]} {
    %c0 = arith.constant 0 : index
    %c0_0 = arith.constant 0 : index
    %c0_1 = arith.constant 0 : index
    %0 = vector.load %arg1[%c0, %c0_0, %c0_1] : memref<1x102x8xbf16, #tpu.memory_space<vmem>>, vector<1x80x8xbf16>
    %1 = vector.shape_cast %0 : vector<1x80x8xbf16> to vector<80x8xbf16>
    %c0_2 = arith.constant 0 : index
    %c1 = arith.constant 1 : index
    %c0_3 = arith.constant 0 : index
    %2 = vector.load %arg1[%c0_2, %c1, %c0_3] : memref<1x102x8xbf16, #tpu.memory_space<vmem>>, vector<1x80x8xbf16>
    %3 = vector.shape_cast %2 : vector<1x80x8xbf16> to vector<80x8xbf16>
    %c0_4 = arith.constant 0 : index
    %c2 = arith.constant 2 : index
    %c0_5 = arith.constant 0 : index
    %4 = vector.load %arg1[%c0_4, %c2, %c0_5] : memref<1x102x8xbf16, #tpu.memory_space<vmem>>, vector<1x80x8xbf16>
    %5 = vector.shape_cast %4 : vector<1x80x8xbf16> to vector<80x8xbf16>
    %c0_6 = arith.constant 0 : index
    %c10 = arith.constant 10 : index
    %c0_7 = arith.constant 0 : index
    %6 = vector.load %arg1[%c0_6, %c10, %c0_7] : memref<1x102x8xbf16, #tpu.memory_space<vmem>>, vector<1x80x8xbf16>
    %7 = vector.shape_cast %6 : vector<1x80x8xbf16> to vector<80x8xbf16>
    %c0_8 = arith.constant 0 : index
    %c11 = arith.constant 11 : index
    %c0_9 = arith.constant 0 : index
    %8 = vector.load %arg1[%c0_8, %c11, %c0_9] : memref<1x102x8xbf16, #tpu.memory_space<vmem>>, vector<1x80x8xbf16>
    %9 = vector.shape_cast %8 : vector<1x80x8xbf16> to vector<80x8xbf16>
    %c0_10 = arith.constant 0 : index
    %c12 = arith.constant 12 : index
    %c0_11 = arith.constant 0 : index
    %10 = vector.load %arg1[%c0_10, %c12, %c0_11] : memref<1x102x8xbf16, #tpu.memory_space<vmem>>, vector<1x80x8xbf16>
    %11 = vector.shape_cast %10 : vector<1x80x8xbf16> to vector<80x8xbf16>
    %c0_12 = arith.constant 0 : index
    %c20 = arith.constant 20 : index
    %c0_13 = arith.constant 0 : index
    %12 = vector.load %arg1[%c0_12, %c20, %c0_13] : memref<1x102x8xbf16, #tpu.memory_space<vmem>>, vector<1x80x8xbf16>
    %13 = vector.shape_cast %12 : vector<1x80x8xbf16> to vector<80x8xbf16>
    %c0_14 = arith.constant 0 : index
    %c21 = arith.constant 21 : index
    %c0_15 = arith.constant 0 : index
    %14 = vector.load %arg1[%c0_14, %c21, %c0_15] : memref<1x102x8xbf16, #tpu.memory_space<vmem>>, vector<1x80x8xbf16>
    %15 = vector.shape_cast %14 : vector<1x80x8xbf16> to vector<80x8xbf16>
    %c0_16 = arith.constant 0 : index
    %c22 = arith.constant 22 : index
    %c0_17 = arith.constant 0 : index
    %16 = vector.load %arg1[%c0_16, %c22, %c0_17] : memref<1x102x8xbf16, #tpu.memory_space<vmem>>, vector<1x80x8xbf16>
    %17 = vector.shape_cast %16 : vector<1x80x8xbf16> to vector<80x8xbf16>
    %18 = tpu.concatenate %1, %3, %5, %7, %9, %11, %13, %15, %17 in 1 : vector<80x8xbf16>, vector<80x8xbf16>, vector<80x8xbf16>, vector<80x8xbf16>, vector<80x8xbf16>, vector<80x8xbf16>, vector<80x8xbf16>, vector<80x8xbf16>, vector<80x8xbf16> -> vector<80x72xbf16>
    %c0_18 = arith.constant 0 : index
    %c0_19 = arith.constant 0 : index
    %19 = vector.load %arg2[%c0_18, %c0_19] : memref<72x8xbf16, #tpu.memory_space<vmem>>, vector<72x8xbf16>
    %cst = arith.constant dense<0.000000e+00> : vector<80x8xf32>
    %20 = tpu.matmul %18, %19, %cst {dimension_numbers = #tpu.dot_dimension_numbers<[1], [0], [0], [1], [0, 0, 1, 1], [], []>} : vector<80x72xbf16>, vector<72x8xbf16>, vector<80x8xf32> -> vector<80x8xf32>
    %c0_20 = arith.constant 0 : index
    %c0_21 = arith.constant 0 : index
    %21 = vector.load %arg3[%c0_20, %c0_21] : memref<1x8xf32, #tpu.memory_space<vmem>>, vector<1x8xf32>
    %22 = vector.broadcast %21 : vector<1x8xf32> to vector<80x8xf32>
    %23 = arith.addf %20, %22 : vector<80x8xf32>
    %c0_22 = arith.constant 0 : index
    %c0_23 = arith.constant 0 : index
    %c0_24 = arith.constant 0 : index
    %24 = vector.load %arg4[%c0_22, %c0_23, %c0_24] : memref<1x80x8xbf16, #tpu.memory_space<vmem>>, vector<1x80x8xbf16>
    %25 = vector.shape_cast %24 : vector<1x80x8xbf16> to vector<80x8xbf16>
    %26 = arith.extf %25 : vector<80x8xbf16> to vector<80x8xf32>
    %27 = arith.addf %23, %26 : vector<80x8xf32>
    %cst_25 = arith.constant 0.000000e+00 : f32
    %28 = vector.broadcast %cst_25 : f32 to vector<80x8xf32>
    %29 = arith.maximumf %27, %28 : vector<80x8xf32>
    %30 = arith.truncf %29 : vector<80x8xf32> to vector<80x8xbf16>
    %c0_26 = arith.constant 0 : index
    %c0_27 = arith.constant 0 : index
    %c0_28 = arith.constant 0 : index
    %31 = vector.load %arg5[%c0_26, %c0_27, %c0_28] : memref<1x80x8xbf16, #tpu.memory_space<vmem>>, vector<1x80x8xbf16>
    %32 = vector.shape_cast %31 : vector<1x80x8xbf16> to vector<80x8xbf16>
    %33 = vector.shape_cast %30 : vector<80x8xbf16> to vector<1x80x8xbf16>
    tpu.vector_store %arg5[%c0_26, %c0_27, %c0_28], %33 {strides = array<i32>} : memref<1x80x8xbf16, #tpu.memory_space<vmem>>, vector<1x80x8xbf16>,
    return
  }
  func.func @transform_0(%arg0: i32) -> (i32, i32, i32) {
    %c0_i32 = arith.constant 0 : i32
    %c0_i32_0 = arith.constant 0 : i32
    %c0_i32_1 = arith.constant 0 : i32
    return %arg0, %c0_i32, %c0_i32_0 : i32, i32, i32
  }
  func.func @transform_1(%arg0: i32) -> (i32, i32) {
    %c0_i32 = arith.constant 0 : i32
    %c0_i32_0 = arith.constant 0 : i32
    %c0_i32_1 = arith.constant 0 : i32
    return %c0_i32, %c0_i32_0 : i32, i32
  }
  func.func @transform_2(%arg0: i32) -> (i32, i32) {
    %c0_i32 = arith.constant 0 : i32
    %c0_i32_0 = arith.constant 0 : i32
    %c0_i32_1 = arith.constant 0 : i32
    return %c0_i32, %c0_i32_0 : i32, i32
  }
  func.func @transform_3(%arg0: i32) -> (i32, i32, i32) {
    %c0_i32 = arith.constant 0 : i32
    %c0_i32_0 = arith.constant 0 : i32
    %c0_i32_1 = arith.constant 0 : i32
    return %arg0, %c0_i32, %c0_i32_0 : i32, i32, i32
  }
  func.func @transform_4(%arg0: i32) -> (i32, i32, i32) {
    %c0_i32 = arith.constant 0 : i32
    %c0_i32_0 = arith.constant 0 : i32
    %c0_i32_1 = arith.constant 0 : i32
    return %arg0, %c0_i32, %c0_i32_0 : i32, i32, i32
  }
}

module attributes {stable_mosaic.version = 11 : i64} {
  func.func @_mm_bn_kernel(%arg0: i32, %arg1: memref<32x288xbf16, #tpu.memory_space<vmem>>, %arg2: memref<288x16xbf16, #tpu.memory_space<vmem>>, %arg3: memref<1x16xf32, #tpu.memory_space<vmem>>, %arg4: memref<32x16xbf16, #tpu.memory_space<vmem>>) attributes {dimension_semantics = [#tpu.dimension_semantics<parallel>], iteration_bounds = array<i64: 1>, scalar_prefetch = 0 : i64, scratch_operands = 0 : i64, tpu.core_type = #tpu.core_type<tc>, window_params = [{transform_indices = @transform_0, window_bounds = array<i64: 32, 288>}, {pipeline_mode = #tpu.pipeline_mode<synchronous>, transform_indices = @transform_1, window_bounds = array<i64: 288, 16>}, {pipeline_mode = #tpu.pipeline_mode<synchronous>, transform_indices = @transform_2, window_bounds = array<i64: 1, 16>}, {transform_indices = @transform_3, window_bounds = array<i64: 32, 16>}]} {
    %c0 = arith.constant 0 : index
    %c0_0 = arith.constant 0 : index
    %0 = vector.load %arg1[%c0, %c0_0] : memref<32x288xbf16, #tpu.memory_space<vmem>>, vector<32x288xbf16>
    %c0_1 = arith.constant 0 : index
    %c0_2 = arith.constant 0 : index
    %1 = vector.load %arg2[%c0_1, %c0_2] : memref<288x16xbf16, #tpu.memory_space<vmem>>, vector<288x16xbf16>
    %cst = arith.constant dense<0.000000e+00> : vector<32x16xf32>
    %2 = tpu.matmul %0, %1, %cst {dimension_numbers = #tpu.dot_dimension_numbers<[1], [0], [0], [1], [0, 0, 1, 1], [], []>} : vector<32x288xbf16>, vector<288x16xbf16>, vector<32x16xf32> -> vector<32x16xf32>
    %c0_3 = arith.constant 0 : index
    %c0_4 = arith.constant 0 : index
    %3 = vector.load %arg3[%c0_3, %c0_4] : memref<1x16xf32, #tpu.memory_space<vmem>>, vector<1x16xf32>
    %4 = vector.broadcast %3 : vector<1x16xf32> to vector<32x16xf32>
    %5 = arith.addf %2, %4 : vector<32x16xf32>
    %cst_5 = arith.constant 0.000000e+00 : f32
    %6 = vector.broadcast %cst_5 : f32 to vector<32x16xf32>
    %7 = arith.maximumf %5, %6 : vector<32x16xf32>
    %8 = arith.truncf %7 : vector<32x16xf32> to vector<32x16xbf16>
    %c0_6 = arith.constant 0 : index
    %c0_7 = arith.constant 0 : index
    %9 = vector.load %arg4[%c0_6, %c0_7] : memref<32x16xbf16, #tpu.memory_space<vmem>>, vector<32x16xbf16>
    tpu.vector_store %arg4[%c0_6, %c0_7], %8 {strides = array<i32>} : memref<32x16xbf16, #tpu.memory_space<vmem>>, vector<32x16xbf16>,
    return
  }
  func.func @transform_0(%arg0: i32) -> (i32, i32) {
    %c0_i32 = arith.constant 0 : i32
    %c0_i32_0 = arith.constant 0 : i32
    return %arg0, %c0_i32 : i32, i32
  }
  func.func @transform_1(%arg0: i32) -> (i32, i32) {
    %c0_i32 = arith.constant 0 : i32
    %c0_i32_0 = arith.constant 0 : i32
    %c0_i32_1 = arith.constant 0 : i32
    return %c0_i32, %c0_i32_0 : i32, i32
  }
  func.func @transform_2(%arg0: i32) -> (i32, i32) {
    %c0_i32 = arith.constant 0 : i32
    %c0_i32_0 = arith.constant 0 : i32
    %c0_i32_1 = arith.constant 0 : i32
    return %c0_i32, %c0_i32_0 : i32, i32
  }
  func.func @transform_3(%arg0: i32) -> (i32, i32) {
    %c0_i32 = arith.constant 0 : i32
    %c0_i32_0 = arith.constant 0 : i32
    return %arg0, %c0_i32 : i32, i32
  }
}

module attributes {stable_mosaic.version = 11 : i64} {
  func.func @_conv_s1_kernel(%arg0: i32, %arg1: memref<1x38x16xbf16, #tpu.memory_space<vmem>>, %arg2: memref<144x16xbf16, #tpu.memory_space<vmem>>, %arg3: memref<1x16xf32, #tpu.memory_space<vmem>>, %arg4: memref<1x24x16xbf16, #tpu.memory_space<vmem>>) attributes {dimension_semantics = [#tpu.dimension_semantics<parallel>], iteration_bounds = array<i64: 2>, scalar_prefetch = 0 : i64, scratch_operands = 0 : i64, tpu.core_type = #tpu.core_type<tc>, window_params = [{transform_indices = @transform_0, window_bounds = array<i64: 1, 38, 16>}, {pipeline_mode = #tpu.pipeline_mode<synchronous>, transform_indices = @transform_1, window_bounds = array<i64: 144, 16>}, {pipeline_mode = #tpu.pipeline_mode<synchronous>, transform_indices = @transform_2, window_bounds = array<i64: 1, 16>}, {transform_indices = @transform_3, window_bounds = array<i64: 1, 24, 16>}]} {
    %c0 = arith.constant 0 : index
    %c0_0 = arith.constant 0 : index
    %c0_1 = arith.constant 0 : index
    %0 = vector.load %arg1[%c0, %c0_0, %c0_1] : memref<1x38x16xbf16, #tpu.memory_space<vmem>>, vector<1x24x16xbf16>
    %1 = vector.shape_cast %0 : vector<1x24x16xbf16> to vector<24x16xbf16>
    %c0_2 = arith.constant 0 : index
    %c1 = arith.constant 1 : index
    %c0_3 = arith.constant 0 : index
    %2 = vector.load %arg1[%c0_2, %c1, %c0_3] : memref<1x38x16xbf16, #tpu.memory_space<vmem>>, vector<1x24x16xbf16>
    %3 = vector.shape_cast %2 : vector<1x24x16xbf16> to vector<24x16xbf16>
    %c0_4 = arith.constant 0 : index
    %c2 = arith.constant 2 : index
    %c0_5 = arith.constant 0 : index
    %4 = vector.load %arg1[%c0_4, %c2, %c0_5] : memref<1x38x16xbf16, #tpu.memory_space<vmem>>, vector<1x24x16xbf16>
    %5 = vector.shape_cast %4 : vector<1x24x16xbf16> to vector<24x16xbf16>
    %c0_6 = arith.constant 0 : index
    %c6 = arith.constant 6 : index
    %c0_7 = arith.constant 0 : index
    %6 = vector.load %arg1[%c0_6, %c6, %c0_7] : memref<1x38x16xbf16, #tpu.memory_space<vmem>>, vector<1x24x16xbf16>
    %7 = vector.shape_cast %6 : vector<1x24x16xbf16> to vector<24x16xbf16>
    %c0_8 = arith.constant 0 : index
    %c7 = arith.constant 7 : index
    %c0_9 = arith.constant 0 : index
    %8 = vector.load %arg1[%c0_8, %c7, %c0_9] : memref<1x38x16xbf16, #tpu.memory_space<vmem>>, vector<1x24x16xbf16>
    %9 = vector.shape_cast %8 : vector<1x24x16xbf16> to vector<24x16xbf16>
    %c0_10 = arith.constant 0 : index
    %c8 = arith.constant 8 : index
    %c0_11 = arith.constant 0 : index
    %10 = vector.load %arg1[%c0_10, %c8, %c0_11] : memref<1x38x16xbf16, #tpu.memory_space<vmem>>, vector<1x24x16xbf16>
    %11 = vector.shape_cast %10 : vector<1x24x16xbf16> to vector<24x16xbf16>
    %c0_12 = arith.constant 0 : index
    %c12 = arith.constant 12 : index
    %c0_13 = arith.constant 0 : index
    %12 = vector.load %arg1[%c0_12, %c12, %c0_13] : memref<1x38x16xbf16, #tpu.memory_space<vmem>>, vector<1x24x16xbf16>
    %13 = vector.shape_cast %12 : vector<1x24x16xbf16> to vector<24x16xbf16>
    %c0_14 = arith.constant 0 : index
    %c13 = arith.constant 13 : index
    %c0_15 = arith.constant 0 : index
    %14 = vector.load %arg1[%c0_14, %c13, %c0_15] : memref<1x38x16xbf16, #tpu.memory_space<vmem>>, vector<1x24x16xbf16>
    %15 = vector.shape_cast %14 : vector<1x24x16xbf16> to vector<24x16xbf16>
    %c0_16 = arith.constant 0 : index
    %c14 = arith.constant 14 : index
    %c0_17 = arith.constant 0 : index
    %16 = vector.load %arg1[%c0_16, %c14, %c0_17] : memref<1x38x16xbf16, #tpu.memory_space<vmem>>, vector<1x24x16xbf16>
    %17 = vector.shape_cast %16 : vector<1x24x16xbf16> to vector<24x16xbf16>
    %18 = tpu.concatenate %1, %3, %5, %7, %9, %11, %13, %15, %17 in 1 : vector<24x16xbf16>, vector<24x16xbf16>, vector<24x16xbf16>, vector<24x16xbf16>, vector<24x16xbf16>, vector<24x16xbf16>, vector<24x16xbf16>, vector<24x16xbf16>, vector<24x16xbf16> -> vector<24x144xbf16>
    %c0_18 = arith.constant 0 : index
    %c0_19 = arith.constant 0 : index
    %19 = vector.load %arg2[%c0_18, %c0_19] : memref<144x16xbf16, #tpu.memory_space<vmem>>, vector<144x16xbf16>
    %cst = arith.constant dense<0.000000e+00> : vector<24x16xf32>
    %20 = tpu.matmul %18, %19, %cst {dimension_numbers = #tpu.dot_dimension_numbers<[1], [0], [0], [1], [0, 0, 1, 1], [], []>} : vector<24x144xbf16>, vector<144x16xbf16>, vector<24x16xf32> -> vector<24x16xf32>
    %c0_20 = arith.constant 0 : index
    %c0_21 = arith.constant 0 : index
    %21 = vector.load %arg3[%c0_20, %c0_21] : memref<1x16xf32, #tpu.memory_space<vmem>>, vector<1x16xf32>
    %22 = vector.broadcast %21 : vector<1x16xf32> to vector<24x16xf32>
    %23 = arith.addf %20, %22 : vector<24x16xf32>
    %cst_22 = arith.constant 0.000000e+00 : f32
    %24 = vector.broadcast %cst_22 : f32 to vector<24x16xf32>
    %25 = arith.maximumf %23, %24 : vector<24x16xf32>
    %26 = arith.truncf %25 : vector<24x16xf32> to vector<24x16xbf16>
    %c0_23 = arith.constant 0 : index
    %c0_24 = arith.constant 0 : index
    %c0_25 = arith.constant 0 : index
    %27 = vector.load %arg4[%c0_23, %c0_24, %c0_25] : memref<1x24x16xbf16, #tpu.memory_space<vmem>>, vector<1x24x16xbf16>
    %28 = vector.shape_cast %27 : vector<1x24x16xbf16> to vector<24x16xbf16>
    %29 = vector.shape_cast %26 : vector<24x16xbf16> to vector<1x24x16xbf16>
    tpu.vector_store %arg4[%c0_23, %c0_24, %c0_25], %29 {strides = array<i32>} : memref<1x24x16xbf16, #tpu.memory_space<vmem>>, vector<1x24x16xbf16>,
    return
  }
  func.func @transform_0(%arg0: i32) -> (i32, i32, i32) {
    %c0_i32 = arith.constant 0 : i32
    %c0_i32_0 = arith.constant 0 : i32
    %c0_i32_1 = arith.constant 0 : i32
    return %arg0, %c0_i32, %c0_i32_0 : i32, i32, i32
  }
  func.func @transform_1(%arg0: i32) -> (i32, i32) {
    %c0_i32 = arith.constant 0 : i32
    %c0_i32_0 = arith.constant 0 : i32
    %c0_i32_1 = arith.constant 0 : i32
    return %c0_i32, %c0_i32_0 : i32, i32
  }
  func.func @transform_2(%arg0: i32) -> (i32, i32) {
    %c0_i32 = arith.constant 0 : i32
    %c0_i32_0 = arith.constant 0 : i32
    %c0_i32_1 = arith.constant 0 : i32
    return %c0_i32, %c0_i32_0 : i32, i32
  }
  func.func @transform_3(%arg0: i32) -> (i32, i32, i32) {
    %c0_i32 = arith.constant 0 : i32
    %c0_i32_0 = arith.constant 0 : i32
    %c0_i32_1 = arith.constant 0 : i32
    return %arg0, %c0_i32, %c0_i32_0 : i32, i32, i32
  }
}

module attributes {stable_mosaic.version = 11 : i64} {
  func.func @_conv_s1_kernel(%arg0: i32, %arg1: memref<1x38x16xbf16, #tpu.memory_space<vmem>>, %arg2: memref<144x16xbf16, #tpu.memory_space<vmem>>, %arg3: memref<1x16xf32, #tpu.memory_space<vmem>>, %arg4: memref<1x24x16xbf16, #tpu.memory_space<vmem>>, %arg5: memref<1x24x16xbf16, #tpu.memory_space<vmem>>) attributes {dimension_semantics = [#tpu.dimension_semantics<parallel>], iteration_bounds = array<i64: 2>, scalar_prefetch = 0 : i64, scratch_operands = 0 : i64, tpu.core_type = #tpu.core_type<tc>, window_params = [{transform_indices = @transform_0, window_bounds = array<i64: 1, 38, 16>}, {pipeline_mode = #tpu.pipeline_mode<synchronous>, transform_indices = @transform_1, window_bounds = array<i64: 144, 16>}, {pipeline_mode = #tpu.pipeline_mode<synchronous>, transform_indices = @transform_2, window_bounds = array<i64: 1, 16>}, {transform_indices = @transform_3, window_bounds = array<i64: 1, 24, 16>}, {transform_indices = @transform_4, window_bounds = array<i64: 1, 24, 16>}]} {
    %c0 = arith.constant 0 : index
    %c0_0 = arith.constant 0 : index
    %c0_1 = arith.constant 0 : index
    %0 = vector.load %arg1[%c0, %c0_0, %c0_1] : memref<1x38x16xbf16, #tpu.memory_space<vmem>>, vector<1x24x16xbf16>
    %1 = vector.shape_cast %0 : vector<1x24x16xbf16> to vector<24x16xbf16>
    %c0_2 = arith.constant 0 : index
    %c1 = arith.constant 1 : index
    %c0_3 = arith.constant 0 : index
    %2 = vector.load %arg1[%c0_2, %c1, %c0_3] : memref<1x38x16xbf16, #tpu.memory_space<vmem>>, vector<1x24x16xbf16>
    %3 = vector.shape_cast %2 : vector<1x24x16xbf16> to vector<24x16xbf16>
    %c0_4 = arith.constant 0 : index
    %c2 = arith.constant 2 : index
    %c0_5 = arith.constant 0 : index
    %4 = vector.load %arg1[%c0_4, %c2, %c0_5] : memref<1x38x16xbf16, #tpu.memory_space<vmem>>, vector<1x24x16xbf16>
    %5 = vector.shape_cast %4 : vector<1x24x16xbf16> to vector<24x16xbf16>
    %c0_6 = arith.constant 0 : index
    %c6 = arith.constant 6 : index
    %c0_7 = arith.constant 0 : index
    %6 = vector.load %arg1[%c0_6, %c6, %c0_7] : memref<1x38x16xbf16, #tpu.memory_space<vmem>>, vector<1x24x16xbf16>
    %7 = vector.shape_cast %6 : vector<1x24x16xbf16> to vector<24x16xbf16>
    %c0_8 = arith.constant 0 : index
    %c7 = arith.constant 7 : index
    %c0_9 = arith.constant 0 : index
    %8 = vector.load %arg1[%c0_8, %c7, %c0_9] : memref<1x38x16xbf16, #tpu.memory_space<vmem>>, vector<1x24x16xbf16>
    %9 = vector.shape_cast %8 : vector<1x24x16xbf16> to vector<24x16xbf16>
    %c0_10 = arith.constant 0 : index
    %c8 = arith.constant 8 : index
    %c0_11 = arith.constant 0 : index
    %10 = vector.load %arg1[%c0_10, %c8, %c0_11] : memref<1x38x16xbf16, #tpu.memory_space<vmem>>, vector<1x24x16xbf16>
    %11 = vector.shape_cast %10 : vector<1x24x16xbf16> to vector<24x16xbf16>
    %c0_12 = arith.constant 0 : index
    %c12 = arith.constant 12 : index
    %c0_13 = arith.constant 0 : index
    %12 = vector.load %arg1[%c0_12, %c12, %c0_13] : memref<1x38x16xbf16, #tpu.memory_space<vmem>>, vector<1x24x16xbf16>
    %13 = vector.shape_cast %12 : vector<1x24x16xbf16> to vector<24x16xbf16>
    %c0_14 = arith.constant 0 : index
    %c13 = arith.constant 13 : index
    %c0_15 = arith.constant 0 : index
    %14 = vector.load %arg1[%c0_14, %c13, %c0_15] : memref<1x38x16xbf16, #tpu.memory_space<vmem>>, vector<1x24x16xbf16>
    %15 = vector.shape_cast %14 : vector<1x24x16xbf16> to vector<24x16xbf16>
    %c0_16 = arith.constant 0 : index
    %c14 = arith.constant 14 : index
    %c0_17 = arith.constant 0 : index
    %16 = vector.load %arg1[%c0_16, %c14, %c0_17] : memref<1x38x16xbf16, #tpu.memory_space<vmem>>, vector<1x24x16xbf16>
    %17 = vector.shape_cast %16 : vector<1x24x16xbf16> to vector<24x16xbf16>
    %18 = tpu.concatenate %1, %3, %5, %7, %9, %11, %13, %15, %17 in 1 : vector<24x16xbf16>, vector<24x16xbf16>, vector<24x16xbf16>, vector<24x16xbf16>, vector<24x16xbf16>, vector<24x16xbf16>, vector<24x16xbf16>, vector<24x16xbf16>, vector<24x16xbf16> -> vector<24x144xbf16>
    %c0_18 = arith.constant 0 : index
    %c0_19 = arith.constant 0 : index
    %19 = vector.load %arg2[%c0_18, %c0_19] : memref<144x16xbf16, #tpu.memory_space<vmem>>, vector<144x16xbf16>
    %cst = arith.constant dense<0.000000e+00> : vector<24x16xf32>
    %20 = tpu.matmul %18, %19, %cst {dimension_numbers = #tpu.dot_dimension_numbers<[1], [0], [0], [1], [0, 0, 1, 1], [], []>} : vector<24x144xbf16>, vector<144x16xbf16>, vector<24x16xf32> -> vector<24x16xf32>
    %c0_20 = arith.constant 0 : index
    %c0_21 = arith.constant 0 : index
    %21 = vector.load %arg3[%c0_20, %c0_21] : memref<1x16xf32, #tpu.memory_space<vmem>>, vector<1x16xf32>
    %22 = vector.broadcast %21 : vector<1x16xf32> to vector<24x16xf32>
    %23 = arith.addf %20, %22 : vector<24x16xf32>
    %c0_22 = arith.constant 0 : index
    %c0_23 = arith.constant 0 : index
    %c0_24 = arith.constant 0 : index
    %24 = vector.load %arg4[%c0_22, %c0_23, %c0_24] : memref<1x24x16xbf16, #tpu.memory_space<vmem>>, vector<1x24x16xbf16>
    %25 = vector.shape_cast %24 : vector<1x24x16xbf16> to vector<24x16xbf16>
    %26 = arith.extf %25 : vector<24x16xbf16> to vector<24x16xf32>
    %27 = arith.addf %23, %26 : vector<24x16xf32>
    %cst_25 = arith.constant 0.000000e+00 : f32
    %28 = vector.broadcast %cst_25 : f32 to vector<24x16xf32>
    %29 = arith.maximumf %27, %28 : vector<24x16xf32>
    %30 = arith.truncf %29 : vector<24x16xf32> to vector<24x16xbf16>
    %c0_26 = arith.constant 0 : index
    %c0_27 = arith.constant 0 : index
    %c0_28 = arith.constant 0 : index
    %31 = vector.load %arg5[%c0_26, %c0_27, %c0_28] : memref<1x24x16xbf16, #tpu.memory_space<vmem>>, vector<1x24x16xbf16>
    %32 = vector.shape_cast %31 : vector<1x24x16xbf16> to vector<24x16xbf16>
    %33 = vector.shape_cast %30 : vector<24x16xbf16> to vector<1x24x16xbf16>
    tpu.vector_store %arg5[%c0_26, %c0_27, %c0_28], %33 {strides = array<i32>} : memref<1x24x16xbf16, #tpu.memory_space<vmem>>, vector<1x24x16xbf16>,
    return
  }
  func.func @transform_0(%arg0: i32) -> (i32, i32, i32) {
    %c0_i32 = arith.constant 0 : i32
    %c0_i32_0 = arith.constant 0 : i32
    %c0_i32_1 = arith.constant 0 : i32
    return %arg0, %c0_i32, %c0_i32_0 : i32, i32, i32
  }
  func.func @transform_1(%arg0: i32) -> (i32, i32) {
    %c0_i32 = arith.constant 0 : i32
    %c0_i32_0 = arith.constant 0 : i32
    %c0_i32_1 = arith.constant 0 : i32
    return %c0_i32, %c0_i32_0 : i32, i32
  }
  func.func @transform_2(%arg0: i32) -> (i32, i32) {
    %c0_i32 = arith.constant 0 : i32
    %c0_i32_0 = arith.constant 0 : i32
    %c0_i32_1 = arith.constant 0 : i32
    return %c0_i32, %c0_i32_0 : i32, i32
  }
  func.func @transform_3(%arg0: i32) -> (i32, i32, i32) {
    %c0_i32 = arith.constant 0 : i32
    %c0_i32_0 = arith.constant 0 : i32
    %c0_i32_1 = arith.constant 0 : i32
    return %arg0, %c0_i32, %c0_i32_0 : i32, i32, i32
  }
  func.func @transform_4(%arg0: i32) -> (i32, i32, i32) {
    %c0_i32 = arith.constant 0 : i32
    %c0_i32_0 = arith.constant 0 : i32
    %c0_i32_1 = arith.constant 0 : i32
    return %arg0, %c0_i32, %c0_i32_0 : i32, i32, i32
  }
}

module attributes {stable_mosaic.version = 11 : i64} {
  func.func @_conv_s1_kernel(%arg0: i32, %arg1: memref<1x16x16xbf16, #tpu.memory_space<vmem>>, %arg2: memref<16x8xbf16, #tpu.memory_space<vmem>>, %arg3: memref<1x8xf32, #tpu.memory_space<vmem>>, %arg4: memref<1x16x8xbf16, #tpu.memory_space<vmem>>) attributes {dimension_semantics = [#tpu.dimension_semantics<parallel>], iteration_bounds = array<i64: 2>, scalar_prefetch = 0 : i64, scratch_operands = 0 : i64, tpu.core_type = #tpu.core_type<tc>, window_params = [{transform_indices = @transform_0, window_bounds = array<i64: 1, 16, 16>}, {pipeline_mode = #tpu.pipeline_mode<synchronous>, transform_indices = @transform_1, window_bounds = array<i64: 16, 8>}, {pipeline_mode = #tpu.pipeline_mode<synchronous>, transform_indices = @transform_2, window_bounds = array<i64: 1, 8>}, {transform_indices = @transform_3, window_bounds = array<i64: 1, 16, 8>}]} {
    %c0 = arith.constant 0 : index
    %c0_0 = arith.constant 0 : index
    %c0_1 = arith.constant 0 : index
    %0 = vector.load %arg1[%c0, %c0_0, %c0_1] : memref<1x16x16xbf16, #tpu.memory_space<vmem>>, vector<1x16x16xbf16>
    %1 = vector.shape_cast %0 : vector<1x16x16xbf16> to vector<16x16xbf16>
    %c0_2 = arith.constant 0 : index
    %c0_3 = arith.constant 0 : index
    %2 = vector.load %arg2[%c0_2, %c0_3] : memref<16x8xbf16, #tpu.memory_space<vmem>>, vector<16x8xbf16>
    %cst = arith.constant dense<0.000000e+00> : vector<16x8xf32>
    %3 = tpu.matmul %1, %2, %cst {dimension_numbers = #tpu.dot_dimension_numbers<[1], [0], [0], [1], [0, 0, 1, 1], [], []>} : vector<16x16xbf16>, vector<16x8xbf16>, vector<16x8xf32> -> vector<16x8xf32>
    %c0_4 = arith.constant 0 : index
    %c0_5 = arith.constant 0 : index
    %4 = vector.load %arg3[%c0_4, %c0_5] : memref<1x8xf32, #tpu.memory_space<vmem>>, vector<1x8xf32>
    %5 = vector.broadcast %4 : vector<1x8xf32> to vector<16x8xf32>
    %6 = arith.addf %3, %5 : vector<16x8xf32>
    %7 = arith.truncf %6 : vector<16x8xf32> to vector<16x8xbf16>
    %c0_6 = arith.constant 0 : index
    %c0_7 = arith.constant 0 : index
    %c0_8 = arith.constant 0 : index
    %8 = vector.load %arg4[%c0_6, %c0_7, %c0_8] : memref<1x16x8xbf16, #tpu.memory_space<vmem>>, vector<1x16x8xbf16>
    %9 = vector.shape_cast %8 : vector<1x16x8xbf16> to vector<16x8xbf16>
    %10 = vector.shape_cast %7 : vector<16x8xbf16> to vector<1x16x8xbf16>
    tpu.vector_store %arg4[%c0_6, %c0_7, %c0_8], %10 {strides = array<i32>} : memref<1x16x8xbf16, #tpu.memory_space<vmem>>, vector<1x16x8xbf16>,
    return
  }
  func.func @transform_0(%arg0: i32) -> (i32, i32, i32) {
    %c0_i32 = arith.constant 0 : i32
    %c0_i32_0 = arith.constant 0 : i32
    %c0_i32_1 = arith.constant 0 : i32
    return %arg0, %c0_i32, %c0_i32_0 : i32, i32, i32
  }
  func.func @transform_1(%arg0: i32) -> (i32, i32) {
    %c0_i32 = arith.constant 0 : i32
    %c0_i32_0 = arith.constant 0 : i32
    %c0_i32_1 = arith.constant 0 : i32
    return %c0_i32, %c0_i32_0 : i32, i32
  }
  func.func @transform_2(%arg0: i32) -> (i32, i32) {
    %c0_i32 = arith.constant 0 : i32
    %c0_i32_0 = arith.constant 0 : i32
    %c0_i32_1 = arith.constant 0 : i32
    return %c0_i32, %c0_i32_0 : i32, i32
  }
  func.func @transform_3(%arg0: i32) -> (i32, i32, i32) {
    %c0_i32 = arith.constant 0 : i32
    %c0_i32_0 = arith.constant 0 : i32
    %c0_i32_1 = arith.constant 0 : i32
    return %arg0, %c0_i32, %c0_i32_0 : i32, i32, i32
  }
}

module attributes {stable_mosaic.version = 11 : i64} {
  func.func @_mm_bn_kernel(%arg0: i32, %arg1: memref<32x72xbf16, #tpu.memory_space<vmem>>, %arg2: memref<72x16xbf16, #tpu.memory_space<vmem>>, %arg3: memref<1x16xf32, #tpu.memory_space<vmem>>, %arg4: memref<32x16xbf16, #tpu.memory_space<vmem>>, %arg5: memref<32x16xbf16, #tpu.memory_space<vmem>>) attributes {dimension_semantics = [#tpu.dimension_semantics<parallel>], iteration_bounds = array<i64: 1>, scalar_prefetch = 0 : i64, scratch_operands = 0 : i64, tpu.core_type = #tpu.core_type<tc>, window_params = [{transform_indices = @transform_0, window_bounds = array<i64: 32, 72>}, {pipeline_mode = #tpu.pipeline_mode<synchronous>, transform_indices = @transform_1, window_bounds = array<i64: 72, 16>}, {pipeline_mode = #tpu.pipeline_mode<synchronous>, transform_indices = @transform_2, window_bounds = array<i64: 1, 16>}, {transform_indices = @transform_3, window_bounds = array<i64: 32, 16>}, {transform_indices = @transform_4, window_bounds = array<i64: 32, 16>}]} {
    %c0 = arith.constant 0 : index
    %c0_0 = arith.constant 0 : index
    %0 = vector.load %arg1[%c0, %c0_0] : memref<32x72xbf16, #tpu.memory_space<vmem>>, vector<32x72xbf16>
    %c0_1 = arith.constant 0 : index
    %c0_2 = arith.constant 0 : index
    %1 = vector.load %arg2[%c0_1, %c0_2] : memref<72x16xbf16, #tpu.memory_space<vmem>>, vector<72x16xbf16>
    %cst = arith.constant dense<0.000000e+00> : vector<32x16xf32>
    %2 = tpu.matmul %0, %1, %cst {dimension_numbers = #tpu.dot_dimension_numbers<[1], [0], [0], [1], [0, 0, 1, 1], [], []>} : vector<32x72xbf16>, vector<72x16xbf16>, vector<32x16xf32> -> vector<32x16xf32>
    %c0_3 = arith.constant 0 : index
    %c0_4 = arith.constant 0 : index
    %3 = vector.load %arg3[%c0_3, %c0_4] : memref<1x16xf32, #tpu.memory_space<vmem>>, vector<1x16xf32>
    %4 = vector.broadcast %3 : vector<1x16xf32> to vector<32x16xf32>
    %5 = arith.addf %2, %4 : vector<32x16xf32>
    %c0_5 = arith.constant 0 : index
    %c0_6 = arith.constant 0 : index
    %6 = vector.load %arg4[%c0_5, %c0_6] : memref<32x16xbf16, #tpu.memory_space<vmem>>, vector<32x16xbf16>
    %7 = arith.extf %6 : vector<32x16xbf16> to vector<32x16xf32>
    %8 = arith.addf %5, %7 : vector<32x16xf32>
    %cst_7 = arith.constant 0.000000e+00 : f32
    %9 = vector.broadcast %cst_7 : f32 to vector<32x16xf32>
    %10 = arith.maximumf %8, %9 : vector<32x16xf32>
    %11 = arith.truncf %10 : vector<32x16xf32> to vector<32x16xbf16>
    %c0_8 = arith.constant 0 : index
    %c0_9 = arith.constant 0 : index
    %12 = vector.load %arg5[%c0_8, %c0_9] : memref<32x16xbf16, #tpu.memory_space<vmem>>, vector<32x16xbf16>
    tpu.vector_store %arg5[%c0_8, %c0_9], %11 {strides = array<i32>} : memref<32x16xbf16, #tpu.memory_space<vmem>>, vector<32x16xbf16>,
    return
  }
  func.func @transform_0(%arg0: i32) -> (i32, i32) {
    %c0_i32 = arith.constant 0 : i32
    %c0_i32_0 = arith.constant 0 : i32
    return %arg0, %c0_i32 : i32, i32
  }
  func.func @transform_1(%arg0: i32) -> (i32, i32) {
    %c0_i32 = arith.constant 0 : i32
    %c0_i32_0 = arith.constant 0 : i32
    %c0_i32_1 = arith.constant 0 : i32
    return %c0_i32, %c0_i32_0 : i32, i32
  }
  func.func @transform_2(%arg0: i32) -> (i32, i32) {
    %c0_i32 = arith.constant 0 : i32
    %c0_i32_0 = arith.constant 0 : i32
    %c0_i32_1 = arith.constant 0 : i32
    return %c0_i32, %c0_i32_0 : i32, i32
  }
  func.func @transform_3(%arg0: i32) -> (i32, i32) {
    %c0_i32 = arith.constant 0 : i32
    %c0_i32_0 = arith.constant 0 : i32
    return %arg0, %c0_i32 : i32, i32
  }
  func.func @transform_4(%arg0: i32) -> (i32, i32) {
    %c0_i32 = arith.constant 0 : i32
    %c0_i32_0 = arith.constant 0 : i32
    return %arg0, %c0_i32 : i32, i32
  }
}

module attributes {stable_mosaic.version = 11 : i64} {
  func.func @_mm_bn_kernel(%arg0: i32, %arg1: memref<8x144xbf16, #tpu.memory_space<vmem>>, %arg2: memref<144x32xbf16, #tpu.memory_space<vmem>>, %arg3: memref<1x32xf32, #tpu.memory_space<vmem>>, %arg4: memref<8x32xbf16, #tpu.memory_space<vmem>>) attributes {dimension_semantics = [#tpu.dimension_semantics<parallel>], iteration_bounds = array<i64: 1>, scalar_prefetch = 0 : i64, scratch_operands = 0 : i64, tpu.core_type = #tpu.core_type<tc>, window_params = [{transform_indices = @transform_0, window_bounds = array<i64: 8, 144>}, {pipeline_mode = #tpu.pipeline_mode<synchronous>, transform_indices = @transform_1, window_bounds = array<i64: 144, 32>}, {pipeline_mode = #tpu.pipeline_mode<synchronous>, transform_indices = @transform_2, window_bounds = array<i64: 1, 32>}, {transform_indices = @transform_3, window_bounds = array<i64: 8, 32>}]} {
    %c0 = arith.constant 0 : index
    %c0_0 = arith.constant 0 : index
    %0 = vector.load %arg1[%c0, %c0_0] : memref<8x144xbf16, #tpu.memory_space<vmem>>, vector<8x144xbf16>
    %c0_1 = arith.constant 0 : index
    %c0_2 = arith.constant 0 : index
    %1 = vector.load %arg2[%c0_1, %c0_2] : memref<144x32xbf16, #tpu.memory_space<vmem>>, vector<144x32xbf16>
    %cst = arith.constant dense<0.000000e+00> : vector<8x32xf32>
    %2 = tpu.matmul %0, %1, %cst {dimension_numbers = #tpu.dot_dimension_numbers<[1], [0], [0], [1], [0, 0, 1, 1], [], []>} : vector<8x144xbf16>, vector<144x32xbf16>, vector<8x32xf32> -> vector<8x32xf32>
    %c0_3 = arith.constant 0 : index
    %c0_4 = arith.constant 0 : index
    %3 = vector.load %arg3[%c0_3, %c0_4] : memref<1x32xf32, #tpu.memory_space<vmem>>, vector<1x32xf32>
    %4 = vector.broadcast %3 : vector<1x32xf32> to vector<8x32xf32>
    %5 = arith.addf %2, %4 : vector<8x32xf32>
    %cst_5 = arith.constant 0.000000e+00 : f32
    %6 = vector.broadcast %cst_5 : f32 to vector<8x32xf32>
    %7 = arith.maximumf %5, %6 : vector<8x32xf32>
    %8 = arith.truncf %7 : vector<8x32xf32> to vector<8x32xbf16>
    %c0_6 = arith.constant 0 : index
    %c0_7 = arith.constant 0 : index
    %9 = vector.load %arg4[%c0_6, %c0_7] : memref<8x32xbf16, #tpu.memory_space<vmem>>, vector<8x32xbf16>
    tpu.vector_store %arg4[%c0_6, %c0_7], %8 {strides = array<i32>} : memref<8x32xbf16, #tpu.memory_space<vmem>>, vector<8x32xbf16>,
    return
  }
  func.func @transform_0(%arg0: i32) -> (i32, i32) {
    %c0_i32 = arith.constant 0 : i32
    %c0_i32_0 = arith.constant 0 : i32
    return %arg0, %c0_i32 : i32, i32
  }
  func.func @transform_1(%arg0: i32) -> (i32, i32) {
    %c0_i32 = arith.constant 0 : i32
    %c0_i32_0 = arith.constant 0 : i32
    %c0_i32_1 = arith.constant 0 : i32
    return %c0_i32, %c0_i32_0 : i32, i32
  }
  func.func @transform_2(%arg0: i32) -> (i32, i32) {
    %c0_i32 = arith.constant 0 : i32
    %c0_i32_0 = arith.constant 0 : i32
    %c0_i32_1 = arith.constant 0 : i32
    return %c0_i32, %c0_i32_0 : i32, i32
  }
  func.func @transform_3(%arg0: i32) -> (i32, i32) {
    %c0_i32 = arith.constant 0 : i32
    %c0_i32_0 = arith.constant 0 : i32
    return %arg0, %c0_i32 : i32, i32
  }
}

module attributes {stable_mosaic.version = 11 : i64} {
  func.func @_conv_s1_kernel(%arg0: i32, %arg1: memref<1x18x32xbf16, #tpu.memory_space<vmem>>, %arg2: memref<288x32xbf16, #tpu.memory_space<vmem>>, %arg3: memref<1x32xf32, #tpu.memory_space<vmem>>, %arg4: memref<1x8x32xbf16, #tpu.memory_space<vmem>>) attributes {dimension_semantics = [#tpu.dimension_semantics<parallel>], iteration_bounds = array<i64: 2>, scalar_prefetch = 0 : i64, scratch_operands = 0 : i64, tpu.core_type = #tpu.core_type<tc>, window_params = [{transform_indices = @transform_0, window_bounds = array<i64: 1, 18, 32>}, {pipeline_mode = #tpu.pipeline_mode<synchronous>, transform_indices = @transform_1, window_bounds = array<i64: 288, 32>}, {pipeline_mode = #tpu.pipeline_mode<synchronous>, transform_indices = @transform_2, window_bounds = array<i64: 1, 32>}, {transform_indices = @transform_3, window_bounds = array<i64: 1, 8, 32>}]} {
    %c0 = arith.constant 0 : index
    %c0_0 = arith.constant 0 : index
    %c0_1 = arith.constant 0 : index
    %0 = vector.load %arg1[%c0, %c0_0, %c0_1] : memref<1x18x32xbf16, #tpu.memory_space<vmem>>, vector<1x8x32xbf16>
    %1 = vector.shape_cast %0 : vector<1x8x32xbf16> to vector<8x32xbf16>
    %c0_2 = arith.constant 0 : index
    %c1 = arith.constant 1 : index
    %c0_3 = arith.constant 0 : index
    %2 = vector.load %arg1[%c0_2, %c1, %c0_3] : memref<1x18x32xbf16, #tpu.memory_space<vmem>>, vector<1x8x32xbf16>
    %3 = vector.shape_cast %2 : vector<1x8x32xbf16> to vector<8x32xbf16>
    %c0_4 = arith.constant 0 : index
    %c2 = arith.constant 2 : index
    %c0_5 = arith.constant 0 : index
    %4 = vector.load %arg1[%c0_4, %c2, %c0_5] : memref<1x18x32xbf16, #tpu.memory_space<vmem>>, vector<1x8x32xbf16>
    %5 = vector.shape_cast %4 : vector<1x8x32xbf16> to vector<8x32xbf16>
    %c0_6 = arith.constant 0 : index
    %c4 = arith.constant 4 : index
    %c0_7 = arith.constant 0 : index
    %6 = vector.load %arg1[%c0_6, %c4, %c0_7] : memref<1x18x32xbf16, #tpu.memory_space<vmem>>, vector<1x8x32xbf16>
    %7 = vector.shape_cast %6 : vector<1x8x32xbf16> to vector<8x32xbf16>
    %c0_8 = arith.constant 0 : index
    %c5 = arith.constant 5 : index
    %c0_9 = arith.constant 0 : index
    %8 = vector.load %arg1[%c0_8, %c5, %c0_9] : memref<1x18x32xbf16, #tpu.memory_space<vmem>>, vector<1x8x32xbf16>
    %9 = vector.shape_cast %8 : vector<1x8x32xbf16> to vector<8x32xbf16>
    %c0_10 = arith.constant 0 : index
    %c6 = arith.constant 6 : index
    %c0_11 = arith.constant 0 : index
    %10 = vector.load %arg1[%c0_10, %c6, %c0_11] : memref<1x18x32xbf16, #tpu.memory_space<vmem>>, vector<1x8x32xbf16>
    %11 = vector.shape_cast %10 : vector<1x8x32xbf16> to vector<8x32xbf16>
    %c0_12 = arith.constant 0 : index
    %c8 = arith.constant 8 : index
    %c0_13 = arith.constant 0 : index
    %12 = vector.load %arg1[%c0_12, %c8, %c0_13] : memref<1x18x32xbf16, #tpu.memory_space<vmem>>, vector<1x8x32xbf16>
    %13 = vector.shape_cast %12 : vector<1x8x32xbf16> to vector<8x32xbf16>
    %c0_14 = arith.constant 0 : index
    %c9 = arith.constant 9 : index
    %c0_15 = arith.constant 0 : index
    %14 = vector.load %arg1[%c0_14, %c9, %c0_15] : memref<1x18x32xbf16, #tpu.memory_space<vmem>>, vector<1x8x32xbf16>
    %15 = vector.shape_cast %14 : vector<1x8x32xbf16> to vector<8x32xbf16>
    %c0_16 = arith.constant 0 : index
    %c10 = arith.constant 10 : index
    %c0_17 = arith.constant 0 : index
    %16 = vector.load %arg1[%c0_16, %c10, %c0_17] : memref<1x18x32xbf16, #tpu.memory_space<vmem>>, vector<1x8x32xbf16>
    %17 = vector.shape_cast %16 : vector<1x8x32xbf16> to vector<8x32xbf16>
    %18 = tpu.concatenate %1, %3, %5, %7, %9, %11, %13, %15, %17 in 1 : vector<8x32xbf16>, vector<8x32xbf16>, vector<8x32xbf16>, vector<8x32xbf16>, vector<8x32xbf16>, vector<8x32xbf16>, vector<8x32xbf16>, vector<8x32xbf16>, vector<8x32xbf16> -> vector<8x288xbf16>
    %c0_18 = arith.constant 0 : index
    %c0_19 = arith.constant 0 : index
    %19 = vector.load %arg2[%c0_18, %c0_19] : memref<288x32xbf16, #tpu.memory_space<vmem>>, vector<288x32xbf16>
    %cst = arith.constant dense<0.000000e+00> : vector<8x32xf32>
    %20 = tpu.matmul %18, %19, %cst {dimension_numbers = #tpu.dot_dimension_numbers<[1], [0], [0], [1], [0, 0, 1, 1], [], []>} : vector<8x288xbf16>, vector<288x32xbf16>, vector<8x32xf32> -> vector<8x32xf32>
    %c0_20 = arith.constant 0 : index
    %c0_21 = arith.constant 0 : index
    %21 = vector.load %arg3[%c0_20, %c0_21] : memref<1x32xf32, #tpu.memory_space<vmem>>, vector<1x32xf32>
    %22 = vector.broadcast %21 : vector<1x32xf32> to vector<8x32xf32>
    %23 = arith.addf %20, %22 : vector<8x32xf32>
    %cst_22 = arith.constant 0.000000e+00 : f32
    %24 = vector.broadcast %cst_22 : f32 to vector<8x32xf32>
    %25 = arith.maximumf %23, %24 : vector<8x32xf32>
    %26 = arith.truncf %25 : vector<8x32xf32> to vector<8x32xbf16>
    %c0_23 = arith.constant 0 : index
    %c0_24 = arith.constant 0 : index
    %c0_25 = arith.constant 0 : index
    %27 = vector.load %arg4[%c0_23, %c0_24, %c0_25] : memref<1x8x32xbf16, #tpu.memory_space<vmem>>, vector<1x8x32xbf16>
    %28 = vector.shape_cast %27 : vector<1x8x32xbf16> to vector<8x32xbf16>
    %29 = vector.shape_cast %26 : vector<8x32xbf16> to vector<1x8x32xbf16>
    tpu.vector_store %arg4[%c0_23, %c0_24, %c0_25], %29 {strides = array<i32>} : memref<1x8x32xbf16, #tpu.memory_space<vmem>>, vector<1x8x32xbf16>,
    return
  }
  func.func @transform_0(%arg0: i32) -> (i32, i32, i32) {
    %c0_i32 = arith.constant 0 : i32
    %c0_i32_0 = arith.constant 0 : i32
    %c0_i32_1 = arith.constant 0 : i32
    return %arg0, %c0_i32, %c0_i32_0 : i32, i32, i32
  }
  func.func @transform_1(%arg0: i32) -> (i32, i32) {
    %c0_i32 = arith.constant 0 : i32
    %c0_i32_0 = arith.constant 0 : i32
    %c0_i32_1 = arith.constant 0 : i32
    return %c0_i32, %c0_i32_0 : i32, i32
  }
  func.func @transform_2(%arg0: i32) -> (i32, i32) {
    %c0_i32 = arith.constant 0 : i32
    %c0_i32_0 = arith.constant 0 : i32
    %c0_i32_1 = arith.constant 0 : i32
    return %c0_i32, %c0_i32_0 : i32, i32
  }
  func.func @transform_3(%arg0: i32) -> (i32, i32, i32) {
    %c0_i32 = arith.constant 0 : i32
    %c0_i32_0 = arith.constant 0 : i32
    %c0_i32_1 = arith.constant 0 : i32
    return %arg0, %c0_i32, %c0_i32_0 : i32, i32, i32
  }
}

module attributes {stable_mosaic.version = 11 : i64} {
  func.func @_conv_s1_kernel(%arg0: i32, %arg1: memref<1x4x32xbf16, #tpu.memory_space<vmem>>, %arg2: memref<32x16xbf16, #tpu.memory_space<vmem>>, %arg3: memref<1x16xf32, #tpu.memory_space<vmem>>, %arg4: memref<1x4x16xbf16, #tpu.memory_space<vmem>>) attributes {dimension_semantics = [#tpu.dimension_semantics<parallel>], iteration_bounds = array<i64: 2>, scalar_prefetch = 0 : i64, scratch_operands = 0 : i64, tpu.core_type = #tpu.core_type<tc>, window_params = [{transform_indices = @transform_0, window_bounds = array<i64: 1, 4, 32>}, {pipeline_mode = #tpu.pipeline_mode<synchronous>, transform_indices = @transform_1, window_bounds = array<i64: 32, 16>}, {pipeline_mode = #tpu.pipeline_mode<synchronous>, transform_indices = @transform_2, window_bounds = array<i64: 1, 16>}, {transform_indices = @transform_3, window_bounds = array<i64: 1, 4, 16>}]} {
    %c0 = arith.constant 0 : index
    %c0_0 = arith.constant 0 : index
    %c0_1 = arith.constant 0 : index
    %0 = vector.load %arg1[%c0, %c0_0, %c0_1] : memref<1x4x32xbf16, #tpu.memory_space<vmem>>, vector<1x4x32xbf16>
    %1 = vector.shape_cast %0 : vector<1x4x32xbf16> to vector<4x32xbf16>
    %c0_2 = arith.constant 0 : index
    %c0_3 = arith.constant 0 : index
    %2 = vector.load %arg2[%c0_2, %c0_3] : memref<32x16xbf16, #tpu.memory_space<vmem>>, vector<32x16xbf16>
    %cst = arith.constant dense<0.000000e+00> : vector<4x16xf32>
    %3 = tpu.matmul %1, %2, %cst {dimension_numbers = #tpu.dot_dimension_numbers<[1], [0], [0], [1], [0, 0, 1, 1], [], []>} : vector<4x32xbf16>, vector<32x16xbf16>, vector<4x16xf32> -> vector<4x16xf32>
    %c0_4 = arith.constant 0 : index
    %c0_5 = arith.constant 0 : index
    %4 = vector.load %arg3[%c0_4, %c0_5] : memref<1x16xf32, #tpu.memory_space<vmem>>, vector<1x16xf32>
    %5 = vector.broadcast %4 : vector<1x16xf32> to vector<4x16xf32>
    %6 = arith.addf %3, %5 : vector<4x16xf32>
    %7 = arith.truncf %6 : vector<4x16xf32> to vector<4x16xbf16>
    %c0_6 = arith.constant 0 : index
    %c0_7 = arith.constant 0 : index
    %c0_8 = arith.constant 0 : index
    %8 = vector.load %arg4[%c0_6, %c0_7, %c0_8] : memref<1x4x16xbf16, #tpu.memory_space<vmem>>, vector<1x4x16xbf16>
    %9 = vector.shape_cast %8 : vector<1x4x16xbf16> to vector<4x16xbf16>
    %10 = vector.shape_cast %7 : vector<4x16xbf16> to vector<1x4x16xbf16>
    tpu.vector_store %arg4[%c0_6, %c0_7, %c0_8], %10 {strides = array<i32>} : memref<1x4x16xbf16, #tpu.memory_space<vmem>>, vector<1x4x16xbf16>,
    return
  }
  func.func @transform_0(%arg0: i32) -> (i32, i32, i32) {
    %c0_i32 = arith.constant 0 : i32
    %c0_i32_0 = arith.constant 0 : i32
    %c0_i32_1 = arith.constant 0 : i32
    return %arg0, %c0_i32, %c0_i32_0 : i32, i32, i32
  }
  func.func @transform_1(%arg0: i32) -> (i32, i32) {
    %c0_i32 = arith.constant 0 : i32
    %c0_i32_0 = arith.constant 0 : i32
    %c0_i32_1 = arith.constant 0 : i32
    return %c0_i32, %c0_i32_0 : i32, i32
  }
  func.func @transform_2(%arg0: i32) -> (i32, i32) {
    %c0_i32 = arith.constant 0 : i32
    %c0_i32_0 = arith.constant 0 : i32
    %c0_i32_1 = arith.constant 0 : i32
    return %c0_i32, %c0_i32_0 : i32, i32
  }
  func.func @transform_3(%arg0: i32) -> (i32, i32, i32) {
    %c0_i32 = arith.constant 0 : i32
    %c0_i32_0 = arith.constant 0 : i32
    %c0_i32_1 = arith.constant 0 : i32
    return %arg0, %c0_i32, %c0_i32_0 : i32, i32, i32
  }
}

module attributes {stable_mosaic.version = 11 : i64} {
  func.func @_conv_s1_kernel(%arg0: i32, %arg1: memref<1x18x32xbf16, #tpu.memory_space<vmem>>, %arg2: memref<288x32xbf16, #tpu.memory_space<vmem>>, %arg3: memref<1x32xf32, #tpu.memory_space<vmem>>, %arg4: memref<1x8x32xbf16, #tpu.memory_space<vmem>>, %arg5: memref<1x8x32xbf16, #tpu.memory_space<vmem>>) attributes {dimension_semantics = [#tpu.dimension_semantics<parallel>], iteration_bounds = array<i64: 2>, scalar_prefetch = 0 : i64, scratch_operands = 0 : i64, tpu.core_type = #tpu.core_type<tc>, window_params = [{transform_indices = @transform_0, window_bounds = array<i64: 1, 18, 32>}, {pipeline_mode = #tpu.pipeline_mode<synchronous>, transform_indices = @transform_1, window_bounds = array<i64: 288, 32>}, {pipeline_mode = #tpu.pipeline_mode<synchronous>, transform_indices = @transform_2, window_bounds = array<i64: 1, 32>}, {transform_indices = @transform_3, window_bounds = array<i64: 1, 8, 32>}, {transform_indices = @transform_4, window_bounds = array<i64: 1, 8, 32>}]} {
    %c0 = arith.constant 0 : index
    %c0_0 = arith.constant 0 : index
    %c0_1 = arith.constant 0 : index
    %0 = vector.load %arg1[%c0, %c0_0, %c0_1] : memref<1x18x32xbf16, #tpu.memory_space<vmem>>, vector<1x8x32xbf16>
    %1 = vector.shape_cast %0 : vector<1x8x32xbf16> to vector<8x32xbf16>
    %c0_2 = arith.constant 0 : index
    %c1 = arith.constant 1 : index
    %c0_3 = arith.constant 0 : index
    %2 = vector.load %arg1[%c0_2, %c1, %c0_3] : memref<1x18x32xbf16, #tpu.memory_space<vmem>>, vector<1x8x32xbf16>
    %3 = vector.shape_cast %2 : vector<1x8x32xbf16> to vector<8x32xbf16>
    %c0_4 = arith.constant 0 : index
    %c2 = arith.constant 2 : index
    %c0_5 = arith.constant 0 : index
    %4 = vector.load %arg1[%c0_4, %c2, %c0_5] : memref<1x18x32xbf16, #tpu.memory_space<vmem>>, vector<1x8x32xbf16>
    %5 = vector.shape_cast %4 : vector<1x8x32xbf16> to vector<8x32xbf16>
    %c0_6 = arith.constant 0 : index
    %c4 = arith.constant 4 : index
    %c0_7 = arith.constant 0 : index
    %6 = vector.load %arg1[%c0_6, %c4, %c0_7] : memref<1x18x32xbf16, #tpu.memory_space<vmem>>, vector<1x8x32xbf16>
    %7 = vector.shape_cast %6 : vector<1x8x32xbf16> to vector<8x32xbf16>
    %c0_8 = arith.constant 0 : index
    %c5 = arith.constant 5 : index
    %c0_9 = arith.constant 0 : index
    %8 = vector.load %arg1[%c0_8, %c5, %c0_9] : memref<1x18x32xbf16, #tpu.memory_space<vmem>>, vector<1x8x32xbf16>
    %9 = vector.shape_cast %8 : vector<1x8x32xbf16> to vector<8x32xbf16>
    %c0_10 = arith.constant 0 : index
    %c6 = arith.constant 6 : index
    %c0_11 = arith.constant 0 : index
    %10 = vector.load %arg1[%c0_10, %c6, %c0_11] : memref<1x18x32xbf16, #tpu.memory_space<vmem>>, vector<1x8x32xbf16>
    %11 = vector.shape_cast %10 : vector<1x8x32xbf16> to vector<8x32xbf16>
    %c0_12 = arith.constant 0 : index
    %c8 = arith.constant 8 : index
    %c0_13 = arith.constant 0 : index
    %12 = vector.load %arg1[%c0_12, %c8, %c0_13] : memref<1x18x32xbf16, #tpu.memory_space<vmem>>, vector<1x8x32xbf16>
    %13 = vector.shape_cast %12 : vector<1x8x32xbf16> to vector<8x32xbf16>
    %c0_14 = arith.constant 0 : index
    %c9 = arith.constant 9 : index
    %c0_15 = arith.constant 0 : index
    %14 = vector.load %arg1[%c0_14, %c9, %c0_15] : memref<1x18x32xbf16, #tpu.memory_space<vmem>>, vector<1x8x32xbf16>
    %15 = vector.shape_cast %14 : vector<1x8x32xbf16> to vector<8x32xbf16>
    %c0_16 = arith.constant 0 : index
    %c10 = arith.constant 10 : index
    %c0_17 = arith.constant 0 : index
    %16 = vector.load %arg1[%c0_16, %c10, %c0_17] : memref<1x18x32xbf16, #tpu.memory_space<vmem>>, vector<1x8x32xbf16>
    %17 = vector.shape_cast %16 : vector<1x8x32xbf16> to vector<8x32xbf16>
    %18 = tpu.concatenate %1, %3, %5, %7, %9, %11, %13, %15, %17 in 1 : vector<8x32xbf16>, vector<8x32xbf16>, vector<8x32xbf16>, vector<8x32xbf16>, vector<8x32xbf16>, vector<8x32xbf16>, vector<8x32xbf16>, vector<8x32xbf16>, vector<8x32xbf16> -> vector<8x288xbf16>
    %c0_18 = arith.constant 0 : index
    %c0_19 = arith.constant 0 : index
    %19 = vector.load %arg2[%c0_18, %c0_19] : memref<288x32xbf16, #tpu.memory_space<vmem>>, vector<288x32xbf16>
    %cst = arith.constant dense<0.000000e+00> : vector<8x32xf32>
    %20 = tpu.matmul %18, %19, %cst {dimension_numbers = #tpu.dot_dimension_numbers<[1], [0], [0], [1], [0, 0, 1, 1], [], []>} : vector<8x288xbf16>, vector<288x32xbf16>, vector<8x32xf32> -> vector<8x32xf32>
    %c0_20 = arith.constant 0 : index
    %c0_21 = arith.constant 0 : index
    %21 = vector.load %arg3[%c0_20, %c0_21] : memref<1x32xf32, #tpu.memory_space<vmem>>, vector<1x32xf32>
    %22 = vector.broadcast %21 : vector<1x32xf32> to vector<8x32xf32>
    %23 = arith.addf %20, %22 : vector<8x32xf32>
    %c0_22 = arith.constant 0 : index
    %c0_23 = arith.constant 0 : index
    %c0_24 = arith.constant 0 : index
    %24 = vector.load %arg4[%c0_22, %c0_23, %c0_24] : memref<1x8x32xbf16, #tpu.memory_space<vmem>>, vector<1x8x32xbf16>
    %25 = vector.shape_cast %24 : vector<1x8x32xbf16> to vector<8x32xbf16>
    %26 = arith.extf %25 : vector<8x32xbf16> to vector<8x32xf32>
    %27 = arith.addf %23, %26 : vector<8x32xf32>
    %cst_25 = arith.constant 0.000000e+00 : f32
    %28 = vector.broadcast %cst_25 : f32 to vector<8x32xf32>
    %29 = arith.maximumf %27, %28 : vector<8x32xf32>
    %30 = arith.truncf %29 : vector<8x32xf32> to vector<8x32xbf16>
    %c0_26 = arith.constant 0 : index
    %c0_27 = arith.constant 0 : index
    %c0_28 = arith.constant 0 : index
    %31 = vector.load %arg5[%c0_26, %c0_27, %c0_28] : memref<1x8x32xbf16, #tpu.memory_space<vmem>>, vector<1x8x32xbf16>
    %32 = vector.shape_cast %31 : vector<1x8x32xbf16> to vector<8x32xbf16>
    %33 = vector.shape_cast %30 : vector<8x32xbf16> to vector<1x8x32xbf16>
    tpu.vector_store %arg5[%c0_26, %c0_27, %c0_28], %33 {strides = array<i32>} : memref<1x8x32xbf16, #tpu.memory_space<vmem>>, vector<1x8x32xbf16>,
    return
  }
  func.func @transform_0(%arg0: i32) -> (i32, i32, i32) {
    %c0_i32 = arith.constant 0 : i32
    %c0_i32_0 = arith.constant 0 : i32
    %c0_i32_1 = arith.constant 0 : i32
    return %arg0, %c0_i32, %c0_i32_0 : i32, i32, i32
  }
  func.func @transform_1(%arg0: i32) -> (i32, i32) {
    %c0_i32 = arith.constant 0 : i32
    %c0_i32_0 = arith.constant 0 : i32
    %c0_i32_1 = arith.constant 0 : i32
    return %c0_i32, %c0_i32_0 : i32, i32
  }
  func.func @transform_2(%arg0: i32) -> (i32, i32) {
    %c0_i32 = arith.constant 0 : i32
    %c0_i32_0 = arith.constant 0 : i32
    %c0_i32_1 = arith.constant 0 : i32
    return %c0_i32, %c0_i32_0 : i32, i32
  }
  func.func @transform_3(%arg0: i32) -> (i32, i32, i32) {
    %c0_i32 = arith.constant 0 : i32
    %c0_i32_0 = arith.constant 0 : i32
    %c0_i32_1 = arith.constant 0 : i32
    return %arg0, %c0_i32, %c0_i32_0 : i32, i32, i32
  }
  func.func @transform_4(%arg0: i32) -> (i32, i32, i32) {
    %c0_i32 = arith.constant 0 : i32
    %c0_i32_0 = arith.constant 0 : i32
    %c0_i32_1 = arith.constant 0 : i32
    return %arg0, %c0_i32, %c0_i32_0 : i32, i32, i32
  }
}

module attributes {stable_mosaic.version = 11 : i64} {
  func.func @_conv_s1_kernel(%arg0: i32, %arg1: memref<1x4x32xbf16, #tpu.memory_space<vmem>>, %arg2: memref<32x8xbf16, #tpu.memory_space<vmem>>, %arg3: memref<1x8xf32, #tpu.memory_space<vmem>>, %arg4: memref<1x4x8xbf16, #tpu.memory_space<vmem>>) attributes {dimension_semantics = [#tpu.dimension_semantics<parallel>], iteration_bounds = array<i64: 2>, scalar_prefetch = 0 : i64, scratch_operands = 0 : i64, tpu.core_type = #tpu.core_type<tc>, window_params = [{transform_indices = @transform_0, window_bounds = array<i64: 1, 4, 32>}, {pipeline_mode = #tpu.pipeline_mode<synchronous>, transform_indices = @transform_1, window_bounds = array<i64: 32, 8>}, {pipeline_mode = #tpu.pipeline_mode<synchronous>, transform_indices = @transform_2, window_bounds = array<i64: 1, 8>}, {transform_indices = @transform_3, window_bounds = array<i64: 1, 4, 8>}]} {
    %c0 = arith.constant 0 : index
    %c0_0 = arith.constant 0 : index
    %c0_1 = arith.constant 0 : index
    %0 = vector.load %arg1[%c0, %c0_0, %c0_1] : memref<1x4x32xbf16, #tpu.memory_space<vmem>>, vector<1x4x32xbf16>
    %1 = vector.shape_cast %0 : vector<1x4x32xbf16> to vector<4x32xbf16>
    %c0_2 = arith.constant 0 : index
    %c0_3 = arith.constant 0 : index
    %2 = vector.load %arg2[%c0_2, %c0_3] : memref<32x8xbf16, #tpu.memory_space<vmem>>, vector<32x8xbf16>
    %cst = arith.constant dense<0.000000e+00> : vector<4x8xf32>
    %3 = tpu.matmul %1, %2, %cst {dimension_numbers = #tpu.dot_dimension_numbers<[1], [0], [0], [1], [0, 0, 1, 1], [], []>} : vector<4x32xbf16>, vector<32x8xbf16>, vector<4x8xf32> -> vector<4x8xf32>
    %c0_4 = arith.constant 0 : index
    %c0_5 = arith.constant 0 : index
    %4 = vector.load %arg3[%c0_4, %c0_5] : memref<1x8xf32, #tpu.memory_space<vmem>>, vector<1x8xf32>
    %5 = vector.broadcast %4 : vector<1x8xf32> to vector<4x8xf32>
    %6 = arith.addf %3, %5 : vector<4x8xf32>
    %7 = arith.truncf %6 : vector<4x8xf32> to vector<4x8xbf16>
    %c0_6 = arith.constant 0 : index
    %c0_7 = arith.constant 0 : index
    %c0_8 = arith.constant 0 : index
    %8 = vector.load %arg4[%c0_6, %c0_7, %c0_8] : memref<1x4x8xbf16, #tpu.memory_space<vmem>>, vector<1x4x8xbf16>
    %9 = vector.shape_cast %8 : vector<1x4x8xbf16> to vector<4x8xbf16>
    %10 = vector.shape_cast %7 : vector<4x8xbf16> to vector<1x4x8xbf16>
    tpu.vector_store %arg4[%c0_6, %c0_7, %c0_8], %10 {strides = array<i32>} : memref<1x4x8xbf16, #tpu.memory_space<vmem>>, vector<1x4x8xbf16>,
    return
  }
  func.func @transform_0(%arg0: i32) -> (i32, i32, i32) {
    %c0_i32 = arith.constant 0 : i32
    %c0_i32_0 = arith.constant 0 : i32
    %c0_i32_1 = arith.constant 0 : i32
    return %arg0, %c0_i32, %c0_i32_0 : i32, i32, i32
  }
  func.func @transform_1(%arg0: i32) -> (i32, i32) {
    %c0_i32 = arith.constant 0 : i32
    %c0_i32_0 = arith.constant 0 : i32
    %c0_i32_1 = arith.constant 0 : i32
    return %c0_i32, %c0_i32_0 : i32, i32
  }
  func.func @transform_2(%arg0: i32) -> (i32, i32) {
    %c0_i32 = arith.constant 0 : i32
    %c0_i32_0 = arith.constant 0 : i32
    %c0_i32_1 = arith.constant 0 : i32
    return %c0_i32, %c0_i32_0 : i32, i32
  }
  func.func @transform_3(%arg0: i32) -> (i32, i32, i32) {
    %c0_i32 = arith.constant 0 : i32
    %c0_i32_0 = arith.constant 0 : i32
    %c0_i32_1 = arith.constant 0 : i32
    return %arg0, %c0_i32, %c0_i32_0 : i32, i32, i32
  }
}

module attributes {stable_mosaic.version = 11 : i64} {
  func.func @_mm_bn_kernel(%arg0: i32, %arg1: memref<32x72xbf16, #tpu.memory_space<vmem>>, %arg2: memref<72x8xbf16, #tpu.memory_space<vmem>>, %arg3: memref<1x8xf32, #tpu.memory_space<vmem>>, %arg4: memref<32x8xbf16, #tpu.memory_space<vmem>>) attributes {dimension_semantics = [#tpu.dimension_semantics<parallel>], iteration_bounds = array<i64: 1>, scalar_prefetch = 0 : i64, scratch_operands = 0 : i64, tpu.core_type = #tpu.core_type<tc>, window_params = [{transform_indices = @transform_0, window_bounds = array<i64: 32, 72>}, {pipeline_mode = #tpu.pipeline_mode<synchronous>, transform_indices = @transform_1, window_bounds = array<i64: 72, 8>}, {pipeline_mode = #tpu.pipeline_mode<synchronous>, transform_indices = @transform_2, window_bounds = array<i64: 1, 8>}, {transform_indices = @transform_3, window_bounds = array<i64: 32, 8>}]} {
    %c0 = arith.constant 0 : index
    %c0_0 = arith.constant 0 : index
    %0 = vector.load %arg1[%c0, %c0_0] : memref<32x72xbf16, #tpu.memory_space<vmem>>, vector<32x72xbf16>
    %c0_1 = arith.constant 0 : index
    %c0_2 = arith.constant 0 : index
    %1 = vector.load %arg2[%c0_1, %c0_2] : memref<72x8xbf16, #tpu.memory_space<vmem>>, vector<72x8xbf16>
    %cst = arith.constant dense<0.000000e+00> : vector<32x8xf32>
    %2 = tpu.matmul %0, %1, %cst {dimension_numbers = #tpu.dot_dimension_numbers<[1], [0], [0], [1], [0, 0, 1, 1], [], []>} : vector<32x72xbf16>, vector<72x8xbf16>, vector<32x8xf32> -> vector<32x8xf32>
    %c0_3 = arith.constant 0 : index
    %c0_4 = arith.constant 0 : index
    %3 = vector.load %arg3[%c0_3, %c0_4] : memref<1x8xf32, #tpu.memory_space<vmem>>, vector<1x8xf32>
    %4 = vector.broadcast %3 : vector<1x8xf32> to vector<32x8xf32>
    %5 = arith.addf %2, %4 : vector<32x8xf32>
    %cst_5 = arith.constant 0.000000e+00 : f32
    %6 = vector.broadcast %cst_5 : f32 to vector<32x8xf32>
    %7 = arith.maximumf %5, %6 : vector<32x8xf32>
    %8 = arith.truncf %7 : vector<32x8xf32> to vector<32x8xbf16>
    %c0_6 = arith.constant 0 : index
    %c0_7 = arith.constant 0 : index
    %9 = vector.load %arg4[%c0_6, %c0_7] : memref<32x8xbf16, #tpu.memory_space<vmem>>, vector<32x8xbf16>
    tpu.vector_store %arg4[%c0_6, %c0_7], %8 {strides = array<i32>} : memref<32x8xbf16, #tpu.memory_space<vmem>>, vector<32x8xbf16>,
    return
  }
  func.func @transform_0(%arg0: i32) -> (i32, i32) {
    %c0_i32 = arith.constant 0 : i32
    %c0_i32_0 = arith.constant 0 : i32
    return %arg0, %c0_i32 : i32, i32
  }
  func.func @transform_1(%arg0: i32) -> (i32, i32) {
    %c0_i32 = arith.constant 0 : i32
    %c0_i32_0 = arith.constant 0 : i32
    %c0_i32_1 = arith.constant 0 : i32
    return %c0_i32, %c0_i32_0 : i32, i32
  }
  func.func @transform_2(%arg0: i32) -> (i32, i32) {
    %c0_i32 = arith.constant 0 : i32
    %c0_i32_0 = arith.constant 0 : i32
    %c0_i32_1 = arith.constant 0 : i32
    return %c0_i32, %c0_i32_0 : i32, i32
  }
  func.func @transform_3(%arg0: i32) -> (i32, i32) {
    %c0_i32 = arith.constant 0 : i32
    %c0_i32_0 = arith.constant 0 : i32
    return %arg0, %c0_i32 : i32, i32
  }
}

module attributes {stable_mosaic.version = 11 : i64} {
  func.func @_mm_bn_kernel(%arg0: i32, %arg1: memref<8x72xbf16, #tpu.memory_space<vmem>>, %arg2: memref<72x32xbf16, #tpu.memory_space<vmem>>, %arg3: memref<1x32xf32, #tpu.memory_space<vmem>>, %arg4: memref<8x32xbf16, #tpu.memory_space<vmem>>, %arg5: memref<8x32xbf16, #tpu.memory_space<vmem>>) attributes {dimension_semantics = [#tpu.dimension_semantics<parallel>], iteration_bounds = array<i64: 1>, scalar_prefetch = 0 : i64, scratch_operands = 0 : i64, tpu.core_type = #tpu.core_type<tc>, window_params = [{transform_indices = @transform_0, window_bounds = array<i64: 8, 72>}, {pipeline_mode = #tpu.pipeline_mode<synchronous>, transform_indices = @transform_1, window_bounds = array<i64: 72, 32>}, {pipeline_mode = #tpu.pipeline_mode<synchronous>, transform_indices = @transform_2, window_bounds = array<i64: 1, 32>}, {transform_indices = @transform_3, window_bounds = array<i64: 8, 32>}, {transform_indices = @transform_4, window_bounds = array<i64: 8, 32>}]} {
    %c0 = arith.constant 0 : index
    %c0_0 = arith.constant 0 : index
    %0 = vector.load %arg1[%c0, %c0_0] : memref<8x72xbf16, #tpu.memory_space<vmem>>, vector<8x72xbf16>
    %c0_1 = arith.constant 0 : index
    %c0_2 = arith.constant 0 : index
    %1 = vector.load %arg2[%c0_1, %c0_2] : memref<72x32xbf16, #tpu.memory_space<vmem>>, vector<72x32xbf16>
    %cst = arith.constant dense<0.000000e+00> : vector<8x32xf32>
    %2 = tpu.matmul %0, %1, %cst {dimension_numbers = #tpu.dot_dimension_numbers<[1], [0], [0], [1], [0, 0, 1, 1], [], []>} : vector<8x72xbf16>, vector<72x32xbf16>, vector<8x32xf32> -> vector<8x32xf32>
    %c0_3 = arith.constant 0 : index
    %c0_4 = arith.constant 0 : index
    %3 = vector.load %arg3[%c0_3, %c0_4] : memref<1x32xf32, #tpu.memory_space<vmem>>, vector<1x32xf32>
    %4 = vector.broadcast %3 : vector<1x32xf32> to vector<8x32xf32>
    %5 = arith.addf %2, %4 : vector<8x32xf32>
    %c0_5 = arith.constant 0 : index
    %c0_6 = arith.constant 0 : index
    %6 = vector.load %arg4[%c0_5, %c0_6] : memref<8x32xbf16, #tpu.memory_space<vmem>>, vector<8x32xbf16>
    %7 = arith.extf %6 : vector<8x32xbf16> to vector<8x32xf32>
    %8 = arith.addf %5, %7 : vector<8x32xf32>
    %9 = arith.truncf %8 : vector<8x32xf32> to vector<8x32xbf16>
    %c0_7 = arith.constant 0 : index
    %c0_8 = arith.constant 0 : index
    %10 = vector.load %arg5[%c0_7, %c0_8] : memref<8x32xbf16, #tpu.memory_space<vmem>>, vector<8x32xbf16>
    tpu.vector_store %arg5[%c0_7, %c0_8], %9 {strides = array<i32>} : memref<8x32xbf16, #tpu.memory_space<vmem>>, vector<8x32xbf16>,
    return
  }
  func.func @transform_0(%arg0: i32) -> (i32, i32) {
    %c0_i32 = arith.constant 0 : i32
    %c0_i32_0 = arith.constant 0 : i32
    return %arg0, %c0_i32 : i32, i32
  }
  func.func @transform_1(%arg0: i32) -> (i32, i32) {
    %c0_i32 = arith.constant 0 : i32
    %c0_i32_0 = arith.constant 0 : i32
    %c0_i32_1 = arith.constant 0 : i32
    return %c0_i32, %c0_i32_0 : i32, i32
  }
  func.func @transform_2(%arg0: i32) -> (i32, i32) {
    %c0_i32 = arith.constant 0 : i32
    %c0_i32_0 = arith.constant 0 : i32
    %c0_i32_1 = arith.constant 0 : i32
    return %c0_i32, %c0_i32_0 : i32, i32
  }
  func.func @transform_3(%arg0: i32) -> (i32, i32) {
    %c0_i32 = arith.constant 0 : i32
    %c0_i32_0 = arith.constant 0 : i32
    return %arg0, %c0_i32 : i32, i32
  }
  func.func @transform_4(%arg0: i32) -> (i32, i32) {
    %c0_i32 = arith.constant 0 : i32
    %c0_i32_0 = arith.constant 0 : i32
    return %arg0, %c0_i32 : i32, i32
  }
}

module attributes {stable_mosaic.version = 11 : i64} {
  func.func @_mm_bn_kernel(%arg0: i32, %arg1: memref<8x144xbf16, #tpu.memory_space<vmem>>, %arg2: memref<144x32xbf16, #tpu.memory_space<vmem>>, %arg3: memref<1x32xf32, #tpu.memory_space<vmem>>, %arg4: memref<8x32xbf16, #tpu.memory_space<vmem>>, %arg5: memref<8x32xbf16, #tpu.memory_space<vmem>>) attributes {dimension_semantics = [#tpu.dimension_semantics<parallel>], iteration_bounds = array<i64: 1>, scalar_prefetch = 0 : i64, scratch_operands = 0 : i64, tpu.core_type = #tpu.core_type<tc>, window_params = [{transform_indices = @transform_0, window_bounds = array<i64: 8, 144>}, {pipeline_mode = #tpu.pipeline_mode<synchronous>, transform_indices = @transform_1, window_bounds = array<i64: 144, 32>}, {pipeline_mode = #tpu.pipeline_mode<synchronous>, transform_indices = @transform_2, window_bounds = array<i64: 1, 32>}, {transform_indices = @transform_3, window_bounds = array<i64: 8, 32>}, {transform_indices = @transform_4, window_bounds = array<i64: 8, 32>}]} {
    %c0 = arith.constant 0 : index
    %c0_0 = arith.constant 0 : index
    %0 = vector.load %arg1[%c0, %c0_0] : memref<8x144xbf16, #tpu.memory_space<vmem>>, vector<8x144xbf16>
    %c0_1 = arith.constant 0 : index
    %c0_2 = arith.constant 0 : index
    %1 = vector.load %arg2[%c0_1, %c0_2] : memref<144x32xbf16, #tpu.memory_space<vmem>>, vector<144x32xbf16>
    %cst = arith.constant dense<0.000000e+00> : vector<8x32xf32>
    %2 = tpu.matmul %0, %1, %cst {dimension_numbers = #tpu.dot_dimension_numbers<[1], [0], [0], [1], [0, 0, 1, 1], [], []>} : vector<8x144xbf16>, vector<144x32xbf16>, vector<8x32xf32> -> vector<8x32xf32>
    %c0_3 = arith.constant 0 : index
    %c0_4 = arith.constant 0 : index
    %3 = vector.load %arg3[%c0_3, %c0_4] : memref<1x32xf32, #tpu.memory_space<vmem>>, vector<1x32xf32>
    %4 = vector.broadcast %3 : vector<1x32xf32> to vector<8x32xf32>
    %5 = arith.addf %2, %4 : vector<8x32xf32>
    %c0_5 = arith.constant 0 : index
    %c0_6 = arith.constant 0 : index
    %6 = vector.load %arg4[%c0_5, %c0_6] : memref<8x32xbf16, #tpu.memory_space<vmem>>, vector<8x32xbf16>
    %7 = arith.extf %6 : vector<8x32xbf16> to vector<8x32xf32>
    %8 = arith.addf %5, %7 : vector<8x32xf32>
    %cst_7 = arith.constant 0.000000e+00 : f32
    %9 = vector.broadcast %cst_7 : f32 to vector<8x32xf32>
    %10 = arith.maximumf %8, %9 : vector<8x32xf32>
    %11 = arith.truncf %10 : vector<8x32xf32> to vector<8x32xbf16>
    %c0_8 = arith.constant 0 : index
    %c0_9 = arith.constant 0 : index
    %12 = vector.load %arg5[%c0_8, %c0_9] : memref<8x32xbf16, #tpu.memory_space<vmem>>, vector<8x32xbf16>
    tpu.vector_store %arg5[%c0_8, %c0_9], %11 {strides = array<i32>} : memref<8x32xbf16, #tpu.memory_space<vmem>>, vector<8x32xbf16>,
    return
  }
  func.func @transform_0(%arg0: i32) -> (i32, i32) {
    %c0_i32 = arith.constant 0 : i32
    %c0_i32_0 = arith.constant 0 : i32
    return %arg0, %c0_i32 : i32, i32
  }
  func.func @transform_1(%arg0: i32) -> (i32, i32) {
    %c0_i32 = arith.constant 0 : i32
    %c0_i32_0 = arith.constant 0 : i32
    %c0_i32_1 = arith.constant 0 : i32
    return %c0_i32, %c0_i32_0 : i32, i32
  }
  func.func @transform_2(%arg0: i32) -> (i32, i32) {
    %c0_i32 = arith.constant 0 : i32
    %c0_i32_0 = arith.constant 0 : i32
    %c0_i32_1 = arith.constant 0 : i32
    return %c0_i32, %c0_i32_0 : i32, i32
  }
  func.func @transform_3(%arg0: i32) -> (i32, i32) {
    %c0_i32 = arith.constant 0 : i32
    %c0_i32_0 = arith.constant 0 : i32
    return %arg0, %c0_i32 : i32, i32
  }
  func.func @transform_4(%arg0: i32) -> (i32, i32) {
    %c0_i32 = arith.constant 0 : i32
    %c0_i32_0 = arith.constant 0 : i32
    return %arg0, %c0_i32 : i32, i32
  }
}

module attributes {stable_mosaic.version = 11 : i64} {
  func.func @_mm_bn_kernel(%arg0: i32, %arg1: memref<8x288xbf16, #tpu.memory_space<vmem>>, %arg2: memref<288x64xbf16, #tpu.memory_space<vmem>>, %arg3: memref<1x64xf32, #tpu.memory_space<vmem>>, %arg4: memref<8x64xbf16, #tpu.memory_space<vmem>>) attributes {dimension_semantics = [#tpu.dimension_semantics<parallel>], iteration_bounds = array<i64: 1>, scalar_prefetch = 0 : i64, scratch_operands = 0 : i64, tpu.core_type = #tpu.core_type<tc>, window_params = [{transform_indices = @transform_0, window_bounds = array<i64: 8, 288>}, {pipeline_mode = #tpu.pipeline_mode<synchronous>, transform_indices = @transform_1, window_bounds = array<i64: 288, 64>}, {pipeline_mode = #tpu.pipeline_mode<synchronous>, transform_indices = @transform_2, window_bounds = array<i64: 1, 64>}, {transform_indices = @transform_3, window_bounds = array<i64: 8, 64>}]} {
    %c0 = arith.constant 0 : index
    %c0_0 = arith.constant 0 : index
    %0 = vector.load %arg1[%c0, %c0_0] : memref<8x288xbf16, #tpu.memory_space<vmem>>, vector<8x288xbf16>
    %c0_1 = arith.constant 0 : index
    %c0_2 = arith.constant 0 : index
    %1 = vector.load %arg2[%c0_1, %c0_2] : memref<288x64xbf16, #tpu.memory_space<vmem>>, vector<288x64xbf16>
    %cst = arith.constant dense<0.000000e+00> : vector<8x64xf32>
    %2 = tpu.matmul %0, %1, %cst {dimension_numbers = #tpu.dot_dimension_numbers<[1], [0], [0], [1], [0, 0, 1, 1], [], []>} : vector<8x288xbf16>, vector<288x64xbf16>, vector<8x64xf32> -> vector<8x64xf32>
    %c0_3 = arith.constant 0 : index
    %c0_4 = arith.constant 0 : index
    %3 = vector.load %arg3[%c0_3, %c0_4] : memref<1x64xf32, #tpu.memory_space<vmem>>, vector<1x64xf32>
    %4 = vector.broadcast %3 : vector<1x64xf32> to vector<8x64xf32>
    %5 = arith.addf %2, %4 : vector<8x64xf32>
    %cst_5 = arith.constant 0.000000e+00 : f32
    %6 = vector.broadcast %cst_5 : f32 to vector<8x64xf32>
    %7 = arith.maximumf %5, %6 : vector<8x64xf32>
    %8 = arith.truncf %7 : vector<8x64xf32> to vector<8x64xbf16>
    %c0_6 = arith.constant 0 : index
    %c0_7 = arith.constant 0 : index
    %9 = vector.load %arg4[%c0_6, %c0_7] : memref<8x64xbf16, #tpu.memory_space<vmem>>, vector<8x64xbf16>
    tpu.vector_store %arg4[%c0_6, %c0_7], %8 {strides = array<i32>} : memref<8x64xbf16, #tpu.memory_space<vmem>>, vector<8x64xbf16>,
    return
  }
  func.func @transform_0(%arg0: i32) -> (i32, i32) {
    %c0_i32 = arith.constant 0 : i32
    %c0_i32_0 = arith.constant 0 : i32
    return %arg0, %c0_i32 : i32, i32
  }
  func.func @transform_1(%arg0: i32) -> (i32, i32) {
    %c0_i32 = arith.constant 0 : i32
    %c0_i32_0 = arith.constant 0 : i32
    %c0_i32_1 = arith.constant 0 : i32
    return %c0_i32, %c0_i32_0 : i32, i32
  }
  func.func @transform_2(%arg0: i32) -> (i32, i32) {
    %c0_i32 = arith.constant 0 : i32
    %c0_i32_0 = arith.constant 0 : i32
    %c0_i32_1 = arith.constant 0 : i32
    return %c0_i32, %c0_i32_0 : i32, i32
  }
  func.func @transform_3(%arg0: i32) -> (i32, i32) {
    %c0_i32 = arith.constant 0 : i32
    %c0_i32_0 = arith.constant 0 : i32
    return %arg0, %c0_i32 : i32, i32
  }
}

module attributes {stable_mosaic.version = 11 : i64} {
  func.func @_conv_s1_kernel(%arg0: i32, %arg1: memref<1x11x64xbf16, #tpu.memory_space<vmem>>, %arg2: memref<576x64xbf16, #tpu.memory_space<vmem>>, %arg3: memref<1x64xf32, #tpu.memory_space<vmem>>, %arg4: memref<1x3x64xbf16, #tpu.memory_space<vmem>>) attributes {dimension_semantics = [#tpu.dimension_semantics<parallel>], iteration_bounds = array<i64: 2>, scalar_prefetch = 0 : i64, scratch_operands = 0 : i64, tpu.core_type = #tpu.core_type<tc>, window_params = [{transform_indices = @transform_0, window_bounds = array<i64: 1, 11, 64>}, {pipeline_mode = #tpu.pipeline_mode<synchronous>, transform_indices = @transform_1, window_bounds = array<i64: 576, 64>}, {pipeline_mode = #tpu.pipeline_mode<synchronous>, transform_indices = @transform_2, window_bounds = array<i64: 1, 64>}, {transform_indices = @transform_3, window_bounds = array<i64: 1, 3, 64>}]} {
    %c0 = arith.constant 0 : index
    %c0_0 = arith.constant 0 : index
    %c0_1 = arith.constant 0 : index
    %0 = vector.load %arg1[%c0, %c0_0, %c0_1] : memref<1x11x64xbf16, #tpu.memory_space<vmem>>, vector<1x3x64xbf16>
    %1 = vector.shape_cast %0 : vector<1x3x64xbf16> to vector<3x64xbf16>
    %c0_2 = arith.constant 0 : index
    %c1 = arith.constant 1 : index
    %c0_3 = arith.constant 0 : index
    %2 = vector.load %arg1[%c0_2, %c1, %c0_3] : memref<1x11x64xbf16, #tpu.memory_space<vmem>>, vector<1x3x64xbf16>
    %3 = vector.shape_cast %2 : vector<1x3x64xbf16> to vector<3x64xbf16>
    %c0_4 = arith.constant 0 : index
    %c2 = arith.constant 2 : index
    %c0_5 = arith.constant 0 : index
    %4 = vector.load %arg1[%c0_4, %c2, %c0_5] : memref<1x11x64xbf16, #tpu.memory_space<vmem>>, vector<1x3x64xbf16>
    %5 = vector.shape_cast %4 : vector<1x3x64xbf16> to vector<3x64xbf16>
    %c0_6 = arith.constant 0 : index
    %c3 = arith.constant 3 : index
    %c0_7 = arith.constant 0 : index
    %6 = vector.load %arg1[%c0_6, %c3, %c0_7] : memref<1x11x64xbf16, #tpu.memory_space<vmem>>, vector<1x3x64xbf16>
    %7 = vector.shape_cast %6 : vector<1x3x64xbf16> to vector<3x64xbf16>
    %c0_8 = arith.constant 0 : index
    %c4 = arith.constant 4 : index
    %c0_9 = arith.constant 0 : index
    %8 = vector.load %arg1[%c0_8, %c4, %c0_9] : memref<1x11x64xbf16, #tpu.memory_space<vmem>>, vector<1x3x64xbf16>
    %9 = vector.shape_cast %8 : vector<1x3x64xbf16> to vector<3x64xbf16>
    %c0_10 = arith.constant 0 : index
    %c5 = arith.constant 5 : index
    %c0_11 = arith.constant 0 : index
    %10 = vector.load %arg1[%c0_10, %c5, %c0_11] : memref<1x11x64xbf16, #tpu.memory_space<vmem>>, vector<1x3x64xbf16>
    %11 = vector.shape_cast %10 : vector<1x3x64xbf16> to vector<3x64xbf16>
    %c0_12 = arith.constant 0 : index
    %c6 = arith.constant 6 : index
    %c0_13 = arith.constant 0 : index
    %12 = vector.load %arg1[%c0_12, %c6, %c0_13] : memref<1x11x64xbf16, #tpu.memory_space<vmem>>, vector<1x3x64xbf16>
    %13 = vector.shape_cast %12 : vector<1x3x64xbf16> to vector<3x64xbf16>
    %c0_14 = arith.constant 0 : index
    %c7 = arith.constant 7 : index
    %c0_15 = arith.constant 0 : index
    %14 = vector.load %arg1[%c0_14, %c7, %c0_15] : memref<1x11x64xbf16, #tpu.memory_space<vmem>>, vector<1x3x64xbf16>
    %15 = vector.shape_cast %14 : vector<1x3x64xbf16> to vector<3x64xbf16>
    %c0_16 = arith.constant 0 : index
    %c8 = arith.constant 8 : index
    %c0_17 = arith.constant 0 : index
    %16 = vector.load %arg1[%c0_16, %c8, %c0_17] : memref<1x11x64xbf16, #tpu.memory_space<vmem>>, vector<1x3x64xbf16>
    %17 = vector.shape_cast %16 : vector<1x3x64xbf16> to vector<3x64xbf16>
    %18 = tpu.concatenate %1, %3, %5, %7, %9, %11, %13, %15, %17 in 1 : vector<3x64xbf16>, vector<3x64xbf16>, vector<3x64xbf16>, vector<3x64xbf16>, vector<3x64xbf16>, vector<3x64xbf16>, vector<3x64xbf16>, vector<3x64xbf16>, vector<3x64xbf16> -> vector<3x576xbf16>
    %c0_18 = arith.constant 0 : index
    %c0_19 = arith.constant 0 : index
    %19 = vector.load %arg2[%c0_18, %c0_19] : memref<576x64xbf16, #tpu.memory_space<vmem>>, vector<576x64xbf16>
    %cst = arith.constant dense<0.000000e+00> : vector<3x64xf32>
    %20 = tpu.matmul %18, %19, %cst {dimension_numbers = #tpu.dot_dimension_numbers<[1], [0], [0], [1], [0, 0, 1, 1], [], []>} : vector<3x576xbf16>, vector<576x64xbf16>, vector<3x64xf32> -> vector<3x64xf32>
    %c0_20 = arith.constant 0 : index
    %c0_21 = arith.constant 0 : index
    %21 = vector.load %arg3[%c0_20, %c0_21] : memref<1x64xf32, #tpu.memory_space<vmem>>, vector<1x64xf32>
    %22 = vector.broadcast %21 : vector<1x64xf32> to vector<3x64xf32>
    %23 = arith.addf %20, %22 : vector<3x64xf32>
    %cst_22 = arith.constant 0.000000e+00 : f32
    %24 = vector.broadcast %cst_22 : f32 to vector<3x64xf32>
    %25 = arith.maximumf %23, %24 : vector<3x64xf32>
    %26 = arith.truncf %25 : vector<3x64xf32> to vector<3x64xbf16>
    %c0_23 = arith.constant 0 : index
    %c0_24 = arith.constant 0 : index
    %c0_25 = arith.constant 0 : index
    %27 = vector.load %arg4[%c0_23, %c0_24, %c0_25] : memref<1x3x64xbf16, #tpu.memory_space<vmem>>, vector<1x3x64xbf16>
    %28 = vector.shape_cast %27 : vector<1x3x64xbf16> to vector<3x64xbf16>
    %29 = vector.shape_cast %26 : vector<3x64xbf16> to vector<1x3x64xbf16>
    tpu.vector_store %arg4[%c0_23, %c0_24, %c0_25], %29 {strides = array<i32>} : memref<1x3x64xbf16, #tpu.memory_space<vmem>>, vector<1x3x64xbf16>,
    return
  }
  func.func @transform_0(%arg0: i32) -> (i32, i32, i32) {
    %c0_i32 = arith.constant 0 : i32
    %c0_i32_0 = arith.constant 0 : i32
    %c0_i32_1 = arith.constant 0 : i32
    return %arg0, %c0_i32, %c0_i32_0 : i32, i32, i32
  }
  func.func @transform_1(%arg0: i32) -> (i32, i32) {
    %c0_i32 = arith.constant 0 : i32
    %c0_i32_0 = arith.constant 0 : i32
    %c0_i32_1 = arith.constant 0 : i32
    return %c0_i32, %c0_i32_0 : i32, i32
  }
  func.func @transform_2(%arg0: i32) -> (i32, i32) {
    %c0_i32 = arith.constant 0 : i32
    %c0_i32_0 = arith.constant 0 : i32
    %c0_i32_1 = arith.constant 0 : i32
    return %c0_i32, %c0_i32_0 : i32, i32
  }
  func.func @transform_3(%arg0: i32) -> (i32, i32, i32) {
    %c0_i32 = arith.constant 0 : i32
    %c0_i32_0 = arith.constant 0 : i32
    %c0_i32_1 = arith.constant 0 : i32
    return %arg0, %c0_i32, %c0_i32_0 : i32, i32, i32
  }
}

module attributes {stable_mosaic.version = 11 : i64} {
  func.func @_conv_s1_kernel(%arg0: i32, %arg1: memref<1x11x64xbf16, #tpu.memory_space<vmem>>, %arg2: memref<576x64xbf16, #tpu.memory_space<vmem>>, %arg3: memref<1x64xf32, #tpu.memory_space<vmem>>, %arg4: memref<1x3x64xbf16, #tpu.memory_space<vmem>>, %arg5: memref<1x3x64xbf16, #tpu.memory_space<vmem>>) attributes {dimension_semantics = [#tpu.dimension_semantics<parallel>], iteration_bounds = array<i64: 2>, scalar_prefetch = 0 : i64, scratch_operands = 0 : i64, tpu.core_type = #tpu.core_type<tc>, window_params = [{transform_indices = @transform_0, window_bounds = array<i64: 1, 11, 64>}, {pipeline_mode = #tpu.pipeline_mode<synchronous>, transform_indices = @transform_1, window_bounds = array<i64: 576, 64>}, {pipeline_mode = #tpu.pipeline_mode<synchronous>, transform_indices = @transform_2, window_bounds = array<i64: 1, 64>}, {transform_indices = @transform_3, window_bounds = array<i64: 1, 3, 64>}, {transform_indices = @transform_4, window_bounds = array<i64: 1, 3, 64>}]} {
    %c0 = arith.constant 0 : index
    %c0_0 = arith.constant 0 : index
    %c0_1 = arith.constant 0 : index
    %0 = vector.load %arg1[%c0, %c0_0, %c0_1] : memref<1x11x64xbf16, #tpu.memory_space<vmem>>, vector<1x3x64xbf16>
    %1 = vector.shape_cast %0 : vector<1x3x64xbf16> to vector<3x64xbf16>
    %c0_2 = arith.constant 0 : index
    %c1 = arith.constant 1 : index
    %c0_3 = arith.constant 0 : index
    %2 = vector.load %arg1[%c0_2, %c1, %c0_3] : memref<1x11x64xbf16, #tpu.memory_space<vmem>>, vector<1x3x64xbf16>
    %3 = vector.shape_cast %2 : vector<1x3x64xbf16> to vector<3x64xbf16>
    %c0_4 = arith.constant 0 : index
    %c2 = arith.constant 2 : index
    %c0_5 = arith.constant 0 : index
    %4 = vector.load %arg1[%c0_4, %c2, %c0_5] : memref<1x11x64xbf16, #tpu.memory_space<vmem>>, vector<1x3x64xbf16>
    %5 = vector.shape_cast %4 : vector<1x3x64xbf16> to vector<3x64xbf16>
    %c0_6 = arith.constant 0 : index
    %c3 = arith.constant 3 : index
    %c0_7 = arith.constant 0 : index
    %6 = vector.load %arg1[%c0_6, %c3, %c0_7] : memref<1x11x64xbf16, #tpu.memory_space<vmem>>, vector<1x3x64xbf16>
    %7 = vector.shape_cast %6 : vector<1x3x64xbf16> to vector<3x64xbf16>
    %c0_8 = arith.constant 0 : index
    %c4 = arith.constant 4 : index
    %c0_9 = arith.constant 0 : index
    %8 = vector.load %arg1[%c0_8, %c4, %c0_9] : memref<1x11x64xbf16, #tpu.memory_space<vmem>>, vector<1x3x64xbf16>
    %9 = vector.shape_cast %8 : vector<1x3x64xbf16> to vector<3x64xbf16>
    %c0_10 = arith.constant 0 : index
    %c5 = arith.constant 5 : index
    %c0_11 = arith.constant 0 : index
    %10 = vector.load %arg1[%c0_10, %c5, %c0_11] : memref<1x11x64xbf16, #tpu.memory_space<vmem>>, vector<1x3x64xbf16>
    %11 = vector.shape_cast %10 : vector<1x3x64xbf16> to vector<3x64xbf16>
    %c0_12 = arith.constant 0 : index
    %c6 = arith.constant 6 : index
    %c0_13 = arith.constant 0 : index
    %12 = vector.load %arg1[%c0_12, %c6, %c0_13] : memref<1x11x64xbf16, #tpu.memory_space<vmem>>, vector<1x3x64xbf16>
    %13 = vector.shape_cast %12 : vector<1x3x64xbf16> to vector<3x64xbf16>
    %c0_14 = arith.constant 0 : index
    %c7 = arith.constant 7 : index
    %c0_15 = arith.constant 0 : index
    %14 = vector.load %arg1[%c0_14, %c7, %c0_15] : memref<1x11x64xbf16, #tpu.memory_space<vmem>>, vector<1x3x64xbf16>
    %15 = vector.shape_cast %14 : vector<1x3x64xbf16> to vector<3x64xbf16>
    %c0_16 = arith.constant 0 : index
    %c8 = arith.constant 8 : index
    %c0_17 = arith.constant 0 : index
    %16 = vector.load %arg1[%c0_16, %c8, %c0_17] : memref<1x11x64xbf16, #tpu.memory_space<vmem>>, vector<1x3x64xbf16>
    %17 = vector.shape_cast %16 : vector<1x3x64xbf16> to vector<3x64xbf16>
    %18 = tpu.concatenate %1, %3, %5, %7, %9, %11, %13, %15, %17 in 1 : vector<3x64xbf16>, vector<3x64xbf16>, vector<3x64xbf16>, vector<3x64xbf16>, vector<3x64xbf16>, vector<3x64xbf16>, vector<3x64xbf16>, vector<3x64xbf16>, vector<3x64xbf16> -> vector<3x576xbf16>
    %c0_18 = arith.constant 0 : index
    %c0_19 = arith.constant 0 : index
    %19 = vector.load %arg2[%c0_18, %c0_19] : memref<576x64xbf16, #tpu.memory_space<vmem>>, vector<576x64xbf16>
    %cst = arith.constant dense<0.000000e+00> : vector<3x64xf32>
    %20 = tpu.matmul %18, %19, %cst {dimension_numbers = #tpu.dot_dimension_numbers<[1], [0], [0], [1], [0, 0, 1, 1], [], []>} : vector<3x576xbf16>, vector<576x64xbf16>, vector<3x64xf32> -> vector<3x64xf32>
    %c0_20 = arith.constant 0 : index
    %c0_21 = arith.constant 0 : index
    %21 = vector.load %arg3[%c0_20, %c0_21] : memref<1x64xf32, #tpu.memory_space<vmem>>, vector<1x64xf32>
    %22 = vector.broadcast %21 : vector<1x64xf32> to vector<3x64xf32>
    %23 = arith.addf %20, %22 : vector<3x64xf32>
    %c0_22 = arith.constant 0 : index
    %c0_23 = arith.constant 0 : index
    %c0_24 = arith.constant 0 : index
    %24 = vector.load %arg4[%c0_22, %c0_23, %c0_24] : memref<1x3x64xbf16, #tpu.memory_space<vmem>>, vector<1x3x64xbf16>
    %25 = vector.shape_cast %24 : vector<1x3x64xbf16> to vector<3x64xbf16>
    %26 = arith.extf %25 : vector<3x64xbf16> to vector<3x64xf32>
    %27 = arith.addf %23, %26 : vector<3x64xf32>
    %cst_25 = arith.constant 0.000000e+00 : f32
    %28 = vector.broadcast %cst_25 : f32 to vector<3x64xf32>
    %29 = arith.maximumf %27, %28 : vector<3x64xf32>
    %30 = arith.truncf %29 : vector<3x64xf32> to vector<3x64xbf16>
    %c0_26 = arith.constant 0 : index
    %c0_27 = arith.constant 0 : index
    %c0_28 = arith.constant 0 : index
    %31 = vector.load %arg5[%c0_26, %c0_27, %c0_28] : memref<1x3x64xbf16, #tpu.memory_space<vmem>>, vector<1x3x64xbf16>
    %32 = vector.shape_cast %31 : vector<1x3x64xbf16> to vector<3x64xbf16>
    %33 = vector.shape_cast %30 : vector<3x64xbf16> to vector<1x3x64xbf16>
    tpu.vector_store %arg5[%c0_26, %c0_27, %c0_28], %33 {strides = array<i32>} : memref<1x3x64xbf16, #tpu.memory_space<vmem>>, vector<1x3x64xbf16>,
    return
  }
  func.func @transform_0(%arg0: i32) -> (i32, i32, i32) {
    %c0_i32 = arith.constant 0 : i32
    %c0_i32_0 = arith.constant 0 : i32
    %c0_i32_1 = arith.constant 0 : i32
    return %arg0, %c0_i32, %c0_i32_0 : i32, i32, i32
  }
  func.func @transform_1(%arg0: i32) -> (i32, i32) {
    %c0_i32 = arith.constant 0 : i32
    %c0_i32_0 = arith.constant 0 : i32
    %c0_i32_1 = arith.constant 0 : i32
    return %c0_i32, %c0_i32_0 : i32, i32
  }
  func.func @transform_2(%arg0: i32) -> (i32, i32) {
    %c0_i32 = arith.constant 0 : i32
    %c0_i32_0 = arith.constant 0 : i32
    %c0_i32_1 = arith.constant 0 : i32
    return %c0_i32, %c0_i32_0 : i32, i32
  }
  func.func @transform_3(%arg0: i32) -> (i32, i32, i32) {
    %c0_i32 = arith.constant 0 : i32
    %c0_i32_0 = arith.constant 0 : i32
    %c0_i32_1 = arith.constant 0 : i32
    return %arg0, %c0_i32, %c0_i32_0 : i32, i32, i32
  }
  func.func @transform_4(%arg0: i32) -> (i32, i32, i32) {
    %c0_i32 = arith.constant 0 : i32
    %c0_i32_0 = arith.constant 0 : i32
    %c0_i32_1 = arith.constant 0 : i32
    return %arg0, %c0_i32, %c0_i32_0 : i32, i32, i32
  }
}

module attributes {stable_mosaic.version = 11 : i64} {
  func.func @_conv_s1_kernel(%arg0: i32, %arg1: memref<1x1x64xbf16, #tpu.memory_space<vmem>>, %arg2: memref<64x8xbf16, #tpu.memory_space<vmem>>, %arg3: memref<1x8xf32, #tpu.memory_space<vmem>>, %arg4: memref<1x1x8xbf16, #tpu.memory_space<vmem>>) attributes {dimension_semantics = [#tpu.dimension_semantics<parallel>], iteration_bounds = array<i64: 2>, scalar_prefetch = 0 : i64, scratch_operands = 0 : i64, tpu.core_type = #tpu.core_type<tc>, window_params = [{transform_indices = @transform_0, window_bounds = array<i64: 1, 1, 64>}, {pipeline_mode = #tpu.pipeline_mode<synchronous>, transform_indices = @transform_1, window_bounds = array<i64: 64, 8>}, {pipeline_mode = #tpu.pipeline_mode<synchronous>, transform_indices = @transform_2, window_bounds = array<i64: 1, 8>}, {transform_indices = @transform_3, window_bounds = array<i64: 1, 1, 8>}]} {
    %c0 = arith.constant 0 : index
    %c0_0 = arith.constant 0 : index
    %c0_1 = arith.constant 0 : index
    %0 = vector.load %arg1[%c0, %c0_0, %c0_1] : memref<1x1x64xbf16, #tpu.memory_space<vmem>>, vector<1x1x64xbf16>
    %1 = vector.shape_cast %0 : vector<1x1x64xbf16> to vector<1x64xbf16>
    %c0_2 = arith.constant 0 : index
    %c0_3 = arith.constant 0 : index
    %2 = vector.load %arg2[%c0_2, %c0_3] : memref<64x8xbf16, #tpu.memory_space<vmem>>, vector<64x8xbf16>
    %cst = arith.constant dense<0.000000e+00> : vector<1x8xf32>
    %3 = tpu.matmul %1, %2, %cst {dimension_numbers = #tpu.dot_dimension_numbers<[1], [0], [0], [1], [0, 0, 1, 1], [], []>} : vector<1x64xbf16>, vector<64x8xbf16>, vector<1x8xf32> -> vector<1x8xf32>
    %c0_4 = arith.constant 0 : index
    %c0_5 = arith.constant 0 : index
    %4 = vector.load %arg3[%c0_4, %c0_5] : memref<1x8xf32, #tpu.memory_space<vmem>>, vector<1x8xf32>
    %5 = arith.addf %3, %4 : vector<1x8xf32>
    %6 = arith.truncf %5 : vector<1x8xf32> to vector<1x8xbf16>
    %c0_6 = arith.constant 0 : index
    %c0_7 = arith.constant 0 : index
    %c0_8 = arith.constant 0 : index
    %7 = vector.load %arg4[%c0_6, %c0_7, %c0_8] : memref<1x1x8xbf16, #tpu.memory_space<vmem>>, vector<1x1x8xbf16>
    %8 = vector.shape_cast %7 : vector<1x1x8xbf16> to vector<1x8xbf16>
    %9 = vector.shape_cast %6 : vector<1x8xbf16> to vector<1x1x8xbf16>
    tpu.vector_store %arg4[%c0_6, %c0_7, %c0_8], %9 {strides = array<i32>} : memref<1x1x8xbf16, #tpu.memory_space<vmem>>, vector<1x1x8xbf16>,
    return
  }
  func.func @transform_0(%arg0: i32) -> (i32, i32, i32) {
    %c0_i32 = arith.constant 0 : i32
    %c0_i32_0 = arith.constant 0 : i32
    %c0_i32_1 = arith.constant 0 : i32
    return %arg0, %c0_i32, %c0_i32_0 : i32, i32, i32
  }
  func.func @transform_1(%arg0: i32) -> (i32, i32) {
    %c0_i32 = arith.constant 0 : i32
    %c0_i32_0 = arith.constant 0 : i32
    %c0_i32_1 = arith.constant 0 : i32
    return %c0_i32, %c0_i32_0 : i32, i32
  }
  func.func @transform_2(%arg0: i32) -> (i32, i32) {
    %c0_i32 = arith.constant 0 : i32
    %c0_i32_0 = arith.constant 0 : i32
    %c0_i32_1 = arith.constant 0 : i32
    return %c0_i32, %c0_i32_0 : i32, i32
  }
  func.func @transform_3(%arg0: i32) -> (i32, i32, i32) {
    %c0_i32 = arith.constant 0 : i32
    %c0_i32_0 = arith.constant 0 : i32
    %c0_i32_1 = arith.constant 0 : i32
    return %arg0, %c0_i32, %c0_i32_0 : i32, i32, i32
  }
}

module attributes {stable_mosaic.version = 11 : i64} {
  func.func @_mm_bn_kernel(%arg0: i32, %arg1: memref<8x72xbf16, #tpu.memory_space<vmem>>, %arg2: memref<72x8xbf16, #tpu.memory_space<vmem>>, %arg3: memref<1x8xf32, #tpu.memory_space<vmem>>, %arg4: memref<8x8xbf16, #tpu.memory_space<vmem>>) attributes {dimension_semantics = [#tpu.dimension_semantics<parallel>], iteration_bounds = array<i64: 1>, scalar_prefetch = 0 : i64, scratch_operands = 0 : i64, tpu.core_type = #tpu.core_type<tc>, window_params = [{transform_indices = @transform_0, window_bounds = array<i64: 8, 72>}, {pipeline_mode = #tpu.pipeline_mode<synchronous>, transform_indices = @transform_1, window_bounds = array<i64: 72, 8>}, {pipeline_mode = #tpu.pipeline_mode<synchronous>, transform_indices = @transform_2, window_bounds = array<i64: 1, 8>}, {transform_indices = @transform_3, window_bounds = array<i64: 8, 8>}]} {
    %c0 = arith.constant 0 : index
    %c0_0 = arith.constant 0 : index
    %0 = vector.load %arg1[%c0, %c0_0] : memref<8x72xbf16, #tpu.memory_space<vmem>>, vector<8x72xbf16>
    %c0_1 = arith.constant 0 : index
    %c0_2 = arith.constant 0 : index
    %1 = vector.load %arg2[%c0_1, %c0_2] : memref<72x8xbf16, #tpu.memory_space<vmem>>, vector<72x8xbf16>
    %cst = arith.constant dense<0.000000e+00> : vector<8x8xf32>
    %2 = tpu.matmul %0, %1, %cst {dimension_numbers = #tpu.dot_dimension_numbers<[1], [0], [0], [1], [0, 0, 1, 1], [], []>} : vector<8x72xbf16>, vector<72x8xbf16>, vector<8x8xf32> -> vector<8x8xf32>
    %c0_3 = arith.constant 0 : index
    %c0_4 = arith.constant 0 : index
    %3 = vector.load %arg3[%c0_3, %c0_4] : memref<1x8xf32, #tpu.memory_space<vmem>>, vector<1x8xf32>
    %4 = vector.broadcast %3 : vector<1x8xf32> to vector<8x8xf32>
    %5 = arith.addf %2, %4 : vector<8x8xf32>
    %cst_5 = arith.constant 0.000000e+00 : f32
    %6 = vector.broadcast %cst_5 : f32 to vector<8x8xf32>
    %7 = arith.maximumf %5, %6 : vector<8x8xf32>
    %8 = arith.truncf %7 : vector<8x8xf32> to vector<8x8xbf16>
    %c0_6 = arith.constant 0 : index
    %c0_7 = arith.constant 0 : index
    %9 = vector.load %arg4[%c0_6, %c0_7] : memref<8x8xbf16, #tpu.memory_space<vmem>>, vector<8x8xbf16>
    tpu.vector_store %arg4[%c0_6, %c0_7], %8 {strides = array<i32>} : memref<8x8xbf16, #tpu.memory_space<vmem>>, vector<8x8xbf16>,
    return
  }
  func.func @transform_0(%arg0: i32) -> (i32, i32) {
    %c0_i32 = arith.constant 0 : i32
    %c0_i32_0 = arith.constant 0 : i32
    return %arg0, %c0_i32 : i32, i32
  }
  func.func @transform_1(%arg0: i32) -> (i32, i32) {
    %c0_i32 = arith.constant 0 : i32
    %c0_i32_0 = arith.constant 0 : i32
    %c0_i32_1 = arith.constant 0 : i32
    return %c0_i32, %c0_i32_0 : i32, i32
  }
  func.func @transform_2(%arg0: i32) -> (i32, i32) {
    %c0_i32 = arith.constant 0 : i32
    %c0_i32_0 = arith.constant 0 : i32
    %c0_i32_1 = arith.constant 0 : i32
    return %c0_i32, %c0_i32_0 : i32, i32
  }
  func.func @transform_3(%arg0: i32) -> (i32, i32) {
    %c0_i32 = arith.constant 0 : i32
    %c0_i32_0 = arith.constant 0 : i32
    return %arg0, %c0_i32 : i32, i32
  }
}

module attributes {stable_mosaic.version = 11 : i64} {
  func.func @_mm_bn_kernel(%arg0: i32, %arg1: memref<8x72xbf16, #tpu.memory_space<vmem>>, %arg2: memref<72x64xbf16, #tpu.memory_space<vmem>>, %arg3: memref<1x64xf32, #tpu.memory_space<vmem>>, %arg4: memref<8x64xbf16, #tpu.memory_space<vmem>>, %arg5: memref<8x64xbf16, #tpu.memory_space<vmem>>) attributes {dimension_semantics = [#tpu.dimension_semantics<parallel>], iteration_bounds = array<i64: 1>, scalar_prefetch = 0 : i64, scratch_operands = 0 : i64, tpu.core_type = #tpu.core_type<tc>, window_params = [{transform_indices = @transform_0, window_bounds = array<i64: 8, 72>}, {pipeline_mode = #tpu.pipeline_mode<synchronous>, transform_indices = @transform_1, window_bounds = array<i64: 72, 64>}, {pipeline_mode = #tpu.pipeline_mode<synchronous>, transform_indices = @transform_2, window_bounds = array<i64: 1, 64>}, {transform_indices = @transform_3, window_bounds = array<i64: 8, 64>}, {transform_indices = @transform_4, window_bounds = array<i64: 8, 64>}]} {
    %c0 = arith.constant 0 : index
    %c0_0 = arith.constant 0 : index
    %0 = vector.load %arg1[%c0, %c0_0] : memref<8x72xbf16, #tpu.memory_space<vmem>>, vector<8x72xbf16>
    %c0_1 = arith.constant 0 : index
    %c0_2 = arith.constant 0 : index
    %1 = vector.load %arg2[%c0_1, %c0_2] : memref<72x64xbf16, #tpu.memory_space<vmem>>, vector<72x64xbf16>
    %cst = arith.constant dense<0.000000e+00> : vector<8x64xf32>
    %2 = tpu.matmul %0, %1, %cst {dimension_numbers = #tpu.dot_dimension_numbers<[1], [0], [0], [1], [0, 0, 1, 1], [], []>} : vector<8x72xbf16>, vector<72x64xbf16>, vector<8x64xf32> -> vector<8x64xf32>
    %c0_3 = arith.constant 0 : index
    %c0_4 = arith.constant 0 : index
    %3 = vector.load %arg3[%c0_3, %c0_4] : memref<1x64xf32, #tpu.memory_space<vmem>>, vector<1x64xf32>
    %4 = vector.broadcast %3 : vector<1x64xf32> to vector<8x64xf32>
    %5 = arith.addf %2, %4 : vector<8x64xf32>
    %c0_5 = arith.constant 0 : index
    %c0_6 = arith.constant 0 : index
    %6 = vector.load %arg4[%c0_5, %c0_6] : memref<8x64xbf16, #tpu.memory_space<vmem>>, vector<8x64xbf16>
    %7 = arith.extf %6 : vector<8x64xbf16> to vector<8x64xf32>
    %8 = arith.addf %5, %7 : vector<8x64xf32>
    %9 = arith.truncf %8 : vector<8x64xf32> to vector<8x64xbf16>
    %c0_7 = arith.constant 0 : index
    %c0_8 = arith.constant 0 : index
    %10 = vector.load %arg5[%c0_7, %c0_8] : memref<8x64xbf16, #tpu.memory_space<vmem>>, vector<8x64xbf16>
    tpu.vector_store %arg5[%c0_7, %c0_8], %9 {strides = array<i32>} : memref<8x64xbf16, #tpu.memory_space<vmem>>, vector<8x64xbf16>,
    return
  }
  func.func @transform_0(%arg0: i32) -> (i32, i32) {
    %c0_i32 = arith.constant 0 : i32
    %c0_i32_0 = arith.constant 0 : i32
    return %arg0, %c0_i32 : i32, i32
  }
  func.func @transform_1(%arg0: i32) -> (i32, i32) {
    %c0_i32 = arith.constant 0 : i32
    %c0_i32_0 = arith.constant 0 : i32
    %c0_i32_1 = arith.constant 0 : i32
    return %c0_i32, %c0_i32_0 : i32, i32
  }
  func.func @transform_2(%arg0: i32) -> (i32, i32) {
    %c0_i32 = arith.constant 0 : i32
    %c0_i32_0 = arith.constant 0 : i32
    %c0_i32_1 = arith.constant 0 : i32
    return %c0_i32, %c0_i32_0 : i32, i32
  }
  func.func @transform_3(%arg0: i32) -> (i32, i32) {
    %c0_i32 = arith.constant 0 : i32
    %c0_i32_0 = arith.constant 0 : i32
    return %arg0, %c0_i32 : i32, i32
  }
  func.func @transform_4(%arg0: i32) -> (i32, i32) {
    %c0_i32 = arith.constant 0 : i32
    %c0_i32_0 = arith.constant 0 : i32
    return %arg0, %c0_i32 : i32, i32
  }
}

module attributes {stable_mosaic.version = 11 : i64} {
  func.func @_mm_bn_kernel(%arg0: i32, %arg1: memref<8x144xbf16, #tpu.memory_space<vmem>>, %arg2: memref<144x16xbf16, #tpu.memory_space<vmem>>, %arg3: memref<1x16xf32, #tpu.memory_space<vmem>>, %arg4: memref<8x16xbf16, #tpu.memory_space<vmem>>) attributes {dimension_semantics = [#tpu.dimension_semantics<parallel>], iteration_bounds = array<i64: 1>, scalar_prefetch = 0 : i64, scratch_operands = 0 : i64, tpu.core_type = #tpu.core_type<tc>, window_params = [{transform_indices = @transform_0, window_bounds = array<i64: 8, 144>}, {pipeline_mode = #tpu.pipeline_mode<synchronous>, transform_indices = @transform_1, window_bounds = array<i64: 144, 16>}, {pipeline_mode = #tpu.pipeline_mode<synchronous>, transform_indices = @transform_2, window_bounds = array<i64: 1, 16>}, {transform_indices = @transform_3, window_bounds = array<i64: 8, 16>}]} {
    %c0 = arith.constant 0 : index
    %c0_0 = arith.constant 0 : index
    %0 = vector.load %arg1[%c0, %c0_0] : memref<8x144xbf16, #tpu.memory_space<vmem>>, vector<8x144xbf16>
    %c0_1 = arith.constant 0 : index
    %c0_2 = arith.constant 0 : index
    %1 = vector.load %arg2[%c0_1, %c0_2] : memref<144x16xbf16, #tpu.memory_space<vmem>>, vector<144x16xbf16>
    %cst = arith.constant dense<0.000000e+00> : vector<8x16xf32>
    %2 = tpu.matmul %0, %1, %cst {dimension_numbers = #tpu.dot_dimension_numbers<[1], [0], [0], [1], [0, 0, 1, 1], [], []>} : vector<8x144xbf16>, vector<144x16xbf16>, vector<8x16xf32> -> vector<8x16xf32>
    %c0_3 = arith.constant 0 : index
    %c0_4 = arith.constant 0 : index
    %3 = vector.load %arg3[%c0_3, %c0_4] : memref<1x16xf32, #tpu.memory_space<vmem>>, vector<1x16xf32>
    %4 = vector.broadcast %3 : vector<1x16xf32> to vector<8x16xf32>
    %5 = arith.addf %2, %4 : vector<8x16xf32>
    %cst_5 = arith.constant 0.000000e+00 : f32
    %6 = vector.broadcast %cst_5 : f32 to vector<8x16xf32>
    %7 = arith.maximumf %5, %6 : vector<8x16xf32>
    %8 = arith.truncf %7 : vector<8x16xf32> to vector<8x16xbf16>
    %c0_6 = arith.constant 0 : index
    %c0_7 = arith.constant 0 : index
    %9 = vector.load %arg4[%c0_6, %c0_7] : memref<8x16xbf16, #tpu.memory_space<vmem>>, vector<8x16xbf16>
    tpu.vector_store %arg4[%c0_6, %c0_7], %8 {strides = array<i32>} : memref<8x16xbf16, #tpu.memory_space<vmem>>, vector<8x16xbf16>,
    return
  }
  func.func @transform_0(%arg0: i32) -> (i32, i32) {
    %c0_i32 = arith.constant 0 : i32
    %c0_i32_0 = arith.constant 0 : i32
    return %arg0, %c0_i32 : i32, i32
  }
  func.func @transform_1(%arg0: i32) -> (i32, i32) {
    %c0_i32 = arith.constant 0 : i32
    %c0_i32_0 = arith.constant 0 : i32
    %c0_i32_1 = arith.constant 0 : i32
    return %c0_i32, %c0_i32_0 : i32, i32
  }
  func.func @transform_2(%arg0: i32) -> (i32, i32) {
    %c0_i32 = arith.constant 0 : i32
    %c0_i32_0 = arith.constant 0 : i32
    %c0_i32_1 = arith.constant 0 : i32
    return %c0_i32, %c0_i32_0 : i32, i32
  }
  func.func @transform_3(%arg0: i32) -> (i32, i32) {
    %c0_i32 = arith.constant 0 : i32
    %c0_i32_0 = arith.constant 0 : i32
    return %arg0, %c0_i32 : i32, i32
  }
}

module attributes {stable_mosaic.version = 11 : i64} {
  func.func @_mm_bn_kernel(%arg0: i32, %arg1: memref<8x144xbf16, #tpu.memory_space<vmem>>, %arg2: memref<144x64xbf16, #tpu.memory_space<vmem>>, %arg3: memref<1x64xf32, #tpu.memory_space<vmem>>, %arg4: memref<8x64xbf16, #tpu.memory_space<vmem>>, %arg5: memref<8x64xbf16, #tpu.memory_space<vmem>>) attributes {dimension_semantics = [#tpu.dimension_semantics<parallel>], iteration_bounds = array<i64: 1>, scalar_prefetch = 0 : i64, scratch_operands = 0 : i64, tpu.core_type = #tpu.core_type<tc>, window_params = [{transform_indices = @transform_0, window_bounds = array<i64: 8, 144>}, {pipeline_mode = #tpu.pipeline_mode<synchronous>, transform_indices = @transform_1, window_bounds = array<i64: 144, 64>}, {pipeline_mode = #tpu.pipeline_mode<synchronous>, transform_indices = @transform_2, window_bounds = array<i64: 1, 64>}, {transform_indices = @transform_3, window_bounds = array<i64: 8, 64>}, {transform_indices = @transform_4, window_bounds = array<i64: 8, 64>}]} {
    %c0 = arith.constant 0 : index
    %c0_0 = arith.constant 0 : index
    %0 = vector.load %arg1[%c0, %c0_0] : memref<8x144xbf16, #tpu.memory_space<vmem>>, vector<8x144xbf16>
    %c0_1 = arith.constant 0 : index
    %c0_2 = arith.constant 0 : index
    %1 = vector.load %arg2[%c0_1, %c0_2] : memref<144x64xbf16, #tpu.memory_space<vmem>>, vector<144x64xbf16>
    %cst = arith.constant dense<0.000000e+00> : vector<8x64xf32>
    %2 = tpu.matmul %0, %1, %cst {dimension_numbers = #tpu.dot_dimension_numbers<[1], [0], [0], [1], [0, 0, 1, 1], [], []>} : vector<8x144xbf16>, vector<144x64xbf16>, vector<8x64xf32> -> vector<8x64xf32>
    %c0_3 = arith.constant 0 : index
    %c0_4 = arith.constant 0 : index
    %3 = vector.load %arg3[%c0_3, %c0_4] : memref<1x64xf32, #tpu.memory_space<vmem>>, vector<1x64xf32>
    %4 = vector.broadcast %3 : vector<1x64xf32> to vector<8x64xf32>
    %5 = arith.addf %2, %4 : vector<8x64xf32>
    %c0_5 = arith.constant 0 : index
    %c0_6 = arith.constant 0 : index
    %6 = vector.load %arg4[%c0_5, %c0_6] : memref<8x64xbf16, #tpu.memory_space<vmem>>, vector<8x64xbf16>
    %7 = arith.extf %6 : vector<8x64xbf16> to vector<8x64xf32>
    %8 = arith.addf %5, %7 : vector<8x64xf32>
    %9 = arith.truncf %8 : vector<8x64xf32> to vector<8x64xbf16>
    %c0_7 = arith.constant 0 : index
    %c0_8 = arith.constant 0 : index
    %10 = vector.load %arg5[%c0_7, %c0_8] : memref<8x64xbf16, #tpu.memory_space<vmem>>, vector<8x64xbf16>
    tpu.vector_store %arg5[%c0_7, %c0_8], %9 {strides = array<i32>} : memref<8x64xbf16, #tpu.memory_space<vmem>>, vector<8x64xbf16>,
    return
  }
  func.func @transform_0(%arg0: i32) -> (i32, i32) {
    %c0_i32 = arith.constant 0 : i32
    %c0_i32_0 = arith.constant 0 : i32
    return %arg0, %c0_i32 : i32, i32
  }
  func.func @transform_1(%arg0: i32) -> (i32, i32) {
    %c0_i32 = arith.constant 0 : i32
    %c0_i32_0 = arith.constant 0 : i32
    %c0_i32_1 = arith.constant 0 : i32
    return %c0_i32, %c0_i32_0 : i32, i32
  }
  func.func @transform_2(%arg0: i32) -> (i32, i32) {
    %c0_i32 = arith.constant 0 : i32
    %c0_i32_0 = arith.constant 0 : i32
    %c0_i32_1 = arith.constant 0 : i32
    return %c0_i32, %c0_i32_0 : i32, i32
  }
  func.func @transform_3(%arg0: i32) -> (i32, i32) {
    %c0_i32 = arith.constant 0 : i32
    %c0_i32_0 = arith.constant 0 : i32
    return %arg0, %c0_i32 : i32, i32
  }
  func.func @transform_4(%arg0: i32) -> (i32, i32) {
    %c0_i32 = arith.constant 0 : i32
    %c0_i32_0 = arith.constant 0 : i32
    return %arg0, %c0_i32 : i32, i32
  }
}

module attributes {stable_mosaic.version = 11 : i64} {
  func.func @_mm_bn_kernel(%arg0: i32, %arg1: memref<8x288xbf16, #tpu.memory_space<vmem>>, %arg2: memref<288x64xbf16, #tpu.memory_space<vmem>>, %arg3: memref<1x64xf32, #tpu.memory_space<vmem>>, %arg4: memref<8x64xbf16, #tpu.memory_space<vmem>>, %arg5: memref<8x64xbf16, #tpu.memory_space<vmem>>) attributes {dimension_semantics = [#tpu.dimension_semantics<parallel>], iteration_bounds = array<i64: 1>, scalar_prefetch = 0 : i64, scratch_operands = 0 : i64, tpu.core_type = #tpu.core_type<tc>, window_params = [{transform_indices = @transform_0, window_bounds = array<i64: 8, 288>}, {pipeline_mode = #tpu.pipeline_mode<synchronous>, transform_indices = @transform_1, window_bounds = array<i64: 288, 64>}, {pipeline_mode = #tpu.pipeline_mode<synchronous>, transform_indices = @transform_2, window_bounds = array<i64: 1, 64>}, {transform_indices = @transform_3, window_bounds = array<i64: 8, 64>}, {transform_indices = @transform_4, window_bounds = array<i64: 8, 64>}]} {
    %c0 = arith.constant 0 : index
    %c0_0 = arith.constant 0 : index
    %0 = vector.load %arg1[%c0, %c0_0] : memref<8x288xbf16, #tpu.memory_space<vmem>>, vector<8x288xbf16>
    %c0_1 = arith.constant 0 : index
    %c0_2 = arith.constant 0 : index
    %1 = vector.load %arg2[%c0_1, %c0_2] : memref<288x64xbf16, #tpu.memory_space<vmem>>, vector<288x64xbf16>
    %cst = arith.constant dense<0.000000e+00> : vector<8x64xf32>
    %2 = tpu.matmul %0, %1, %cst {dimension_numbers = #tpu.dot_dimension_numbers<[1], [0], [0], [1], [0, 0, 1, 1], [], []>} : vector<8x288xbf16>, vector<288x64xbf16>, vector<8x64xf32> -> vector<8x64xf32>
    %c0_3 = arith.constant 0 : index
    %c0_4 = arith.constant 0 : index
    %3 = vector.load %arg3[%c0_3, %c0_4] : memref<1x64xf32, #tpu.memory_space<vmem>>, vector<1x64xf32>
    %4 = vector.broadcast %3 : vector<1x64xf32> to vector<8x64xf32>
    %5 = arith.addf %2, %4 : vector<8x64xf32>
    %c0_5 = arith.constant 0 : index
    %c0_6 = arith.constant 0 : index
    %6 = vector.load %arg4[%c0_5, %c0_6] : memref<8x64xbf16, #tpu.memory_space<vmem>>, vector<8x64xbf16>
    %7 = arith.extf %6 : vector<8x64xbf16> to vector<8x64xf32>
    %8 = arith.addf %5, %7 : vector<8x64xf32>
    %cst_7 = arith.constant 0.000000e+00 : f32
    %9 = vector.broadcast %cst_7 : f32 to vector<8x64xf32>
    %10 = arith.maximumf %8, %9 : vector<8x64xf32>
    %11 = arith.truncf %10 : vector<8x64xf32> to vector<8x64xbf16>
    %c0_8 = arith.constant 0 : index
    %c0_9 = arith.constant 0 : index
    %12 = vector.load %arg5[%c0_8, %c0_9] : memref<8x64xbf16, #tpu.memory_space<vmem>>, vector<8x64xbf16>
    tpu.vector_store %arg5[%c0_8, %c0_9], %11 {strides = array<i32>} : memref<8x64xbf16, #tpu.memory_space<vmem>>, vector<8x64xbf16>,
    return
  }
  func.func @transform_0(%arg0: i32) -> (i32, i32) {
    %c0_i32 = arith.constant 0 : i32
    %c0_i32_0 = arith.constant 0 : i32
    return %arg0, %c0_i32 : i32, i32
  }
  func.func @transform_1(%arg0: i32) -> (i32, i32) {
    %c0_i32 = arith.constant 0 : i32
    %c0_i32_0 = arith.constant 0 : i32
    %c0_i32_1 = arith.constant 0 : i32
    return %c0_i32, %c0_i32_0 : i32, i32
  }
  func.func @transform_2(%arg0: i32) -> (i32, i32) {
    %c0_i32 = arith.constant 0 : i32
    %c0_i32_0 = arith.constant 0 : i32
    %c0_i32_1 = arith.constant 0 : i32
    return %c0_i32, %c0_i32_0 : i32, i32
  }
  func.func @transform_3(%arg0: i32) -> (i32, i32) {
    %c0_i32 = arith.constant 0 : i32
    %c0_i32_0 = arith.constant 0 : i32
    return %arg0, %c0_i32 : i32, i32
  }
  func.func @transform_4(%arg0: i32) -> (i32, i32) {
    %c0_i32 = arith.constant 0 : i32
    %c0_i32_0 = arith.constant 0 : i32
    return %arg0, %c0_i32 : i32, i32
  }
}

module attributes {stable_mosaic.version = 11 : i64} {
  func.func @_conv_s1_kernel(%arg0: i32, %arg1: memref<1x1x64xbf16, #tpu.memory_space<vmem>>, %arg2: memref<64x32xbf16, #tpu.memory_space<vmem>>, %arg3: memref<1x32xf32, #tpu.memory_space<vmem>>, %arg4: memref<1x1x32xbf16, #tpu.memory_space<vmem>>) attributes {dimension_semantics = [#tpu.dimension_semantics<parallel>], iteration_bounds = array<i64: 2>, scalar_prefetch = 0 : i64, scratch_operands = 0 : i64, tpu.core_type = #tpu.core_type<tc>, window_params = [{transform_indices = @transform_0, window_bounds = array<i64: 1, 1, 64>}, {pipeline_mode = #tpu.pipeline_mode<synchronous>, transform_indices = @transform_1, window_bounds = array<i64: 64, 32>}, {pipeline_mode = #tpu.pipeline_mode<synchronous>, transform_indices = @transform_2, window_bounds = array<i64: 1, 32>}, {transform_indices = @transform_3, window_bounds = array<i64: 1, 1, 32>}]} {
    %c0 = arith.constant 0 : index
    %c0_0 = arith.constant 0 : index
    %c0_1 = arith.constant 0 : index
    %0 = vector.load %arg1[%c0, %c0_0, %c0_1] : memref<1x1x64xbf16, #tpu.memory_space<vmem>>, vector<1x1x64xbf16>
    %1 = vector.shape_cast %0 : vector<1x1x64xbf16> to vector<1x64xbf16>
    %c0_2 = arith.constant 0 : index
    %c0_3 = arith.constant 0 : index
    %2 = vector.load %arg2[%c0_2, %c0_3] : memref<64x32xbf16, #tpu.memory_space<vmem>>, vector<64x32xbf16>
    %cst = arith.constant dense<0.000000e+00> : vector<1x32xf32>
    %3 = tpu.matmul %1, %2, %cst {dimension_numbers = #tpu.dot_dimension_numbers<[1], [0], [0], [1], [0, 0, 1, 1], [], []>} : vector<1x64xbf16>, vector<64x32xbf16>, vector<1x32xf32> -> vector<1x32xf32>
    %c0_4 = arith.constant 0 : index
    %c0_5 = arith.constant 0 : index
    %4 = vector.load %arg3[%c0_4, %c0_5] : memref<1x32xf32, #tpu.memory_space<vmem>>, vector<1x32xf32>
    %5 = arith.addf %3, %4 : vector<1x32xf32>
    %6 = arith.truncf %5 : vector<1x32xf32> to vector<1x32xbf16>
    %c0_6 = arith.constant 0 : index
    %c0_7 = arith.constant 0 : index
    %c0_8 = arith.constant 0 : index
    %7 = vector.load %arg4[%c0_6, %c0_7, %c0_8] : memref<1x1x32xbf16, #tpu.memory_space<vmem>>, vector<1x1x32xbf16>
    %8 = vector.shape_cast %7 : vector<1x1x32xbf16> to vector<1x32xbf16>
    %9 = vector.shape_cast %6 : vector<1x32xbf16> to vector<1x1x32xbf16>
    tpu.vector_store %arg4[%c0_6, %c0_7, %c0_8], %9 {strides = array<i32>} : memref<1x1x32xbf16, #tpu.memory_space<vmem>>, vector<1x1x32xbf16>,
    return
  }
  func.func @transform_0(%arg0: i32) -> (i32, i32, i32) {
    %c0_i32 = arith.constant 0 : i32
    %c0_i32_0 = arith.constant 0 : i32
    %c0_i32_1 = arith.constant 0 : i32
    return %arg0, %c0_i32, %c0_i32_0 : i32, i32, i32
  }
  func.func @transform_1(%arg0: i32) -> (i32, i32) {
    %c0_i32 = arith.constant 0 : i32
    %c0_i32_0 = arith.constant 0 : i32
    %c0_i32_1 = arith.constant 0 : i32
    return %c0_i32, %c0_i32_0 : i32, i32
  }
  func.func @transform_2(%arg0: i32) -> (i32, i32) {
    %c0_i32 = arith.constant 0 : i32
    %c0_i32_0 = arith.constant 0 : i32
    %c0_i32_1 = arith.constant 0 : i32
    return %c0_i32, %c0_i32_0 : i32, i32
  }
  func.func @transform_3(%arg0: i32) -> (i32, i32, i32) {
    %c0_i32 = arith.constant 0 : i32
    %c0_i32_0 = arith.constant 0 : i32
    %c0_i32_1 = arith.constant 0 : i32
    return %arg0, %c0_i32, %c0_i32_0 : i32, i32, i32
  }
}

module attributes {stable_mosaic.version = 11 : i64} {
  func.func @_conv_s1_kernel(%arg0: i32, %arg1: memref<1x1x64xbf16, #tpu.memory_space<vmem>>, %arg2: memref<64x16xbf16, #tpu.memory_space<vmem>>, %arg3: memref<1x16xf32, #tpu.memory_space<vmem>>, %arg4: memref<1x1x16xbf16, #tpu.memory_space<vmem>>) attributes {dimension_semantics = [#tpu.dimension_semantics<parallel>], iteration_bounds = array<i64: 2>, scalar_prefetch = 0 : i64, scratch_operands = 0 : i64, tpu.core_type = #tpu.core_type<tc>, window_params = [{transform_indices = @transform_0, window_bounds = array<i64: 1, 1, 64>}, {pipeline_mode = #tpu.pipeline_mode<synchronous>, transform_indices = @transform_1, window_bounds = array<i64: 64, 16>}, {pipeline_mode = #tpu.pipeline_mode<synchronous>, transform_indices = @transform_2, window_bounds = array<i64: 1, 16>}, {transform_indices = @transform_3, window_bounds = array<i64: 1, 1, 16>}]} {
    %c0 = arith.constant 0 : index
    %c0_0 = arith.constant 0 : index
    %c0_1 = arith.constant 0 : index
    %0 = vector.load %arg1[%c0, %c0_0, %c0_1] : memref<1x1x64xbf16, #tpu.memory_space<vmem>>, vector<1x1x64xbf16>
    %1 = vector.shape_cast %0 : vector<1x1x64xbf16> to vector<1x64xbf16>
    %c0_2 = arith.constant 0 : index
    %c0_3 = arith.constant 0 : index
    %2 = vector.load %arg2[%c0_2, %c0_3] : memref<64x16xbf16, #tpu.memory_space<vmem>>, vector<64x16xbf16>
    %cst = arith.constant dense<0.000000e+00> : vector<1x16xf32>
    %3 = tpu.matmul %1, %2, %cst {dimension_numbers = #tpu.dot_dimension_numbers<[1], [0], [0], [1], [0, 0, 1, 1], [], []>} : vector<1x64xbf16>, vector<64x16xbf16>, vector<1x16xf32> -> vector<1x16xf32>
    %c0_4 = arith.constant 0 : index
    %c0_5 = arith.constant 0 : index
    %4 = vector.load %arg3[%c0_4, %c0_5] : memref<1x16xf32, #tpu.memory_space<vmem>>, vector<1x16xf32>
    %5 = arith.addf %3, %4 : vector<1x16xf32>
    %6 = arith.truncf %5 : vector<1x16xf32> to vector<1x16xbf16>
    %c0_6 = arith.constant 0 : index
    %c0_7 = arith.constant 0 : index
    %c0_8 = arith.constant 0 : index
    %7 = vector.load %arg4[%c0_6, %c0_7, %c0_8] : memref<1x1x16xbf16, #tpu.memory_space<vmem>>, vector<1x1x16xbf16>
    %8 = vector.shape_cast %7 : vector<1x1x16xbf16> to vector<1x16xbf16>
    %9 = vector.shape_cast %6 : vector<1x16xbf16> to vector<1x1x16xbf16>
    tpu.vector_store %arg4[%c0_6, %c0_7, %c0_8], %9 {strides = array<i32>} : memref<1x1x16xbf16, #tpu.memory_space<vmem>>, vector<1x1x16xbf16>,
    return
  }
  func.func @transform_0(%arg0: i32) -> (i32, i32, i32) {
    %c0_i32 = arith.constant 0 : i32
    %c0_i32_0 = arith.constant 0 : i32
    %c0_i32_1 = arith.constant 0 : i32
    return %arg0, %c0_i32, %c0_i32_0 : i32, i32, i32
  }
  func.func @transform_1(%arg0: i32) -> (i32, i32) {
    %c0_i32 = arith.constant 0 : i32
    %c0_i32_0 = arith.constant 0 : i32
    %c0_i32_1 = arith.constant 0 : i32
    return %c0_i32, %c0_i32_0 : i32, i32
  }
  func.func @transform_2(%arg0: i32) -> (i32, i32) {
    %c0_i32 = arith.constant 0 : i32
    %c0_i32_0 = arith.constant 0 : i32
    %c0_i32_1 = arith.constant 0 : i32
    return %c0_i32, %c0_i32_0 : i32, i32
  }
  func.func @transform_3(%arg0: i32) -> (i32, i32, i32) {
    %c0_i32 = arith.constant 0 : i32
    %c0_i32_0 = arith.constant 0 : i32
    %c0_i32_1 = arith.constant 0 : i32
    return %arg0, %c0_i32, %c0_i32_0 : i32, i32, i32
  }
}

</mosaic_0001>

<bundles_post_ra>
// kernel: hrnet_forward.53
= control target key start
LH: loop header
LB: loop body
LE: loop exit
PB: predicated region body
PF: predicated region fallthrough
CT: control target
= control target key end

     0   :  { %vm259_vm0 = vcmask 261120   ;;  %vm653_vm1 = vcmask 519168   ;;  %s1410_s1 = inlined_call_operand.vmem [shape: bf16[32,64], index: 1, kind: input, shape index: {}]   ;;  %s1411_s0 = inlined_call_operand.vmem [shape: bf16[512,32], index: 0, kind: input, shape index: {}]   ;;  %s1412_s2 = inlined_call_operand.vmem [shape: f32[1,64], index: 2, kind: input, shape index: {}]   ;;  %s1413_s3 = inlined_call_operand.vmem [shape: bf16[512,64], index: 3, kind: output, shape index: {}]  }
   0x1   :  { %v923_v0 = vld [vmem:[%s1410_s1 + $0x8] sm:$0xff]  ;;  %v922_v1 = vld [vmem:[%s1410_s1] sm:$0xff]  ;;  %v892_v10 = vld [vmem:[%s1411_s0 + $0x10] sm:$0xff] }
   0x2   :  { %362 = vmatpush.bf16.msra.mxu0 %v923_v0  ;;  %924 = vmatpush.bf16.msra.mxu1 %v923_v0  ;;  %v890_v2 = vld [vmem:[%s1411_s0] sm:$0xff]  ;;  %v891_v6 = vld [vmem:[%s1411_s0 + $0x8] sm:$0xff]  ;;  %v900_v11 = vld [vmem:[%s1411_s0 + $0x50] sm:$0xff] }
   0x3   :  { %925 = vmatpush.bf16.msra.mxu2 %v923_v0  ;;  %926 = vmatpush.bf16.msra.mxu3 %v923_v0  ;;  %v898_v3 = vld [vmem:[%s1411_s0 + $0x40] sm:$0xff]  ;;  %v899_v7 = vld [vmem:[%s1411_s0 + $0x48] sm:$0xff]  ;;  %v908_v12 = vld [vmem:[%s1411_s0 + $0x90] sm:$0xff] }
   0x4   :  { %v906_v4 = vld [vmem:[%s1411_s0 + $0x80] sm:$0xff]  ;;  %v907_v8 = vld [vmem:[%s1411_s0 + $0x88] sm:$0xff]  ;;  %v916_v13 = vld [vmem:[%s1411_s0 + $0xd0] sm:$0xff] }
   0x5   :  { %v914_v5 = vld [vmem:[%s1411_s0 + $0xc0] sm:$0xff]  ;;  %v915_v9 = vld [vmem:[%s1411_s0 + $0xc8] sm:$0xff]  ;;  %v893_v14 = vld [vmem:[%s1411_s0 + $0x18] sm:$0xff] }
   0x6   :  { %363 = vmatpush.bf16.msra.mxu0 %v922_v1  ;;  %927 = vmatpush.bf16.msra.mxu1 %v922_v1  ;;  %v901_v15 = vld [vmem:[%s1411_s0 + $0x58] sm:$0xff]  ;;  %v894_v18 = vld [vmem:[%s1411_s0 + $0x20] sm:$0xff]  ;;  %v895_v22 = vld [vmem:[%s1411_s0 + $0x28] sm:$0xff] }
   0x7   :  { %928 = vmatpush.bf16.msra.mxu2 %v922_v1  ;;  %929 = vmatpush.bf16.msra.mxu3 %v922_v1  ;;  %v909_v16 = vld [vmem:[%s1411_s0 + $0x98] sm:$0xff]  ;;  %v902_v19 = vld [vmem:[%s1411_s0 + $0x60] sm:$0xff]  ;;  %v903_v23 = vld [vmem:[%s1411_s0 + $0x68] sm:$0xff] }
   0x8   :  { %v917_v17 = vld [vmem:[%s1411_s0 + $0xd8] sm:$0xff]  ;;  %v910_v20 = vld [vmem:[%s1411_s0 + $0xa0] sm:$0xff]  ;;  %v911_v24 = vld [vmem:[%s1411_s0 + $0xa8] sm:$0xff] }
   0x9   :  { %858 = vmatmul.msk.bf16.vlgmr.msra.gmra.mxu0 %vm259_vm0, %v890_v2  ;;  %866 = vmatmul.msk.bf16.vlgmr.msra.gmra.mxu1 %vm259_vm0, %v898_v3  ;;  %v918_v21 = vld [vmem:[%s1411_s0 + $0xe0] sm:$0xff]  ;;  %v919_v25 = vld [vmem:[%s1411_s0 + $0xe8] sm:$0xff]  ;;  %v896_v26 = vld [vmem:[%s1411_s0 + $0x30] sm:$0xff] }
   0xa   :  { %874 = vmatmul.msk.bf16.vlgmr.msra.gmra.mxu2 %vm259_vm0, %v906_v4  ;;  %882 = vmatmul.msk.bf16.vlgmr.msra.gmra.mxu3 %vm259_vm0, %v914_v5  ;;  %v904_v27 = vld [vmem:[%s1411_s0 + $0x70] sm:$0xff]  ;;  %v897_v30 = vld [vmem:[%s1411_s0 + $0x38] sm:$0xff]  ;;  %v1088_v34 = vld [vmem:[%s1412_s2] ss:$0 sm:$0xff] }
   0xb   :  { %v912_v28 = vld [vmem:[%s1411_s0 + $0xb0] sm:$0xff]  ;;  %v905_v31 = vld [vmem:[%s1411_s0 + $0x78] sm:$0xff] }
   0xc   :  { %v920_v29 = vld [vmem:[%s1411_s0 + $0xf0] sm:$0xff]  ;;  %v913_v32 = vld [vmem:[%s1411_s0 + $0xb8] sm:$0xff] }
   0xd   :  { %v921_v33 = vld [vmem:[%s1411_s0 + $0xf8] sm:$0xff] }
  0x19   :  { %859 = vmatmul.msk.bf16.gmra.mxu0 %vm259_vm0, %v891_v6  ;;  %867 = vmatmul.msk.bf16.gmra.mxu1 %vm259_vm0, %v899_v7 }
  0x1a   :  { %875 = vmatmul.msk.bf16.gmra.mxu2 %vm259_vm0, %v907_v8  ;;  %883 = vmatmul.msk.bf16.gmra.mxu3 %vm259_vm0, %v915_v9 }
  0x29   :  { %860 = vmatmul.msk.bf16.gmra.mxu0 %vm259_vm0, %v892_v10  ;;  %868 = vmatmul.msk.bf16.gmra.mxu1 %vm259_vm0, %v900_v11 }
  0x2a   :  { %876 = vmatmul.msk.bf16.gmra.mxu2 %vm259_vm0, %v908_v12  ;;  %884 = vmatmul.msk.bf16.gmra.mxu3 %vm259_vm0, %v916_v13 }
  0x39   :  { %861 = vmatmul.msk.bf16.gmra.mxu0 %vm259_vm0, %v893_v14  ;;  %869 = vmatmul.msk.bf16.gmra.mxu1 %vm259_vm0, %v901_v15 }
  0x3a   :  { %877 = vmatmul.msk.bf16.gmra.mxu2 %vm259_vm0, %v909_v16  ;;  %885 = vmatmul.msk.bf16.gmra.mxu3 %vm259_vm0, %v917_v17 }
  0x49   :  { %862 = vmatmul.msk.bf16.gmra.mxu0 %vm259_vm0, %v894_v18  ;;  %870 = vmatmul.msk.bf16.gmra.mxu1 %vm259_vm0, %v902_v19 }
  0x4a   :  { %878 = vmatmul.msk.bf16.gmra.mxu2 %vm259_vm0, %v910_v20  ;;  %886 = vmatmul.msk.bf16.gmra.mxu3 %vm259_vm0, %v918_v21 }
  0x59   :  { %863 = vmatmul.msk.bf16.gmra.mxu0 %vm259_vm0, %v895_v22  ;;  %871 = vmatmul.msk.bf16.gmra.mxu1 %vm259_vm0, %v903_v23 }
  0x5a   :  { %879 = vmatmul.msk.bf16.gmra.mxu2 %vm259_vm0, %v911_v24  ;;  %887 = vmatmul.msk.bf16.gmra.mxu3 %vm259_vm0, %v919_v25 }
  0x69   :  { %864 = vmatmul.msk.bf16.gmra.mxu0 %vm259_vm0, %v896_v26  ;;  %872 = vmatmul.msk.bf16.gmra.mxu1 %vm259_vm0, %v904_v27 }
  0x6a   :  { %880 = vmatmul.msk.bf16.gmra.mxu2 %vm259_vm0, %v912_v28  ;;  %888 = vmatmul.msk.bf16.gmra.mxu3 %vm259_vm0, %v920_v29 }
  0x79   :  { %865 = vmatmul.msk.bf16.gmra.mxu0 %vm259_vm0, %v897_v30  ;;  %873 = vmatmul.msk.bf16.gmra.mxu1 %vm259_vm0, %v905_v31 }
  0x7a   :  { %881 = vmatmul.msk.bf16.gmra.mxu2 %vm259_vm0, %v913_v32  ;;  %889 = vmatmul.msk.bf16.gmra.mxu3 %vm259_vm0, %v921_v33 }
  0x86   :  { %v365_v35 = vpop.f32.mrf.mxu0  ;;  %v405_v36 = vpop.f32.mrf.mxu1 }
  0x87   :  { %v366_v37 = vadd.f32 %v1088_v34, %v365_v35  ;;  %v406_v38 = vadd.f32 %v1088_v34, %v405_v36 }
  0x89   :  { %v525_v39 = vmax.f32 %v366_v37, 0.0  ;;  %v541_v40 = vmax.f32 %v406_v38, 0.0 }
  0x8b   :  { %v589_v41 = vpack.c.bf16 %v525_v39, %v525_v39  ;;  %v605_v42 = vpack.c.bf16 %v541_v40, %v541_v40 }
  0x8d   :  { %654 = vst.msk [vmem:[%s1413_s3] sm:$0xf] %vm653_vm1, %v589_v41  ;;  %v445_v43 = vpop.f32.mrf.mxu2  ;;  %v485_v44 = vpop.f32.mrf.mxu3 }
  0x8e   :  { %670 = vst.msk [vmem:[%s1413_s3 + $0x40] sm:$0xf] %vm653_vm1, %v605_v42  ;;  %v446_v45 = vadd.f32 %v1088_v34, %v445_v43  ;;  %v486_v46 = vadd.f32 %v1088_v34, %v485_v44  ;;  %v367_v47 = vpop.f32.mrf.mxu0  ;;  %v407_v48 = vpop.f32.mrf.mxu1 }
  0x8f   :  { %v368_v49 = vadd.f32 %v1088_v34, %v367_v47  ;;  %v408_v50 = vadd.f32 %v1088_v34, %v407_v48 }
  0x90   :  { %v557_v51 = vmax.f32 %v446_v45, 0.0  ;;  %v573_v52 = vmax.f32 %v486_v46, 0.0 }
  0x91   :  { %v526_v53 = vmax.f32 %v368_v49, 0.0  ;;  %v542_v54 = vmax.f32 %v408_v50, 0.0 }
  0x92   :  { %v621_v55 = vpack.c.bf16 %v557_v51, %v557_v51  ;;  %v637_v56 = vpack.c.bf16 %v573_v52, %v573_v52 }
  0x93   :  { %v590_v57 = vpack.c.bf16 %v526_v53, %v526_v53  ;;  %v606_v58 = vpack.c.bf16 %v542_v54, %v542_v54 }
  0x94   :  { %686 = vst.msk [vmem:[%s1413_s3 + $0x80] sm:$0xf] %vm653_vm1, %v621_v55 }
  0x95   :  { %702 = vst.msk [vmem:[%s1413_s3 + $0xc0] sm:$0xf] %vm653_vm1, %v637_v56  ;;  %v447_v59 = vpop.f32.mrf.mxu2  ;;  %v487_v60 = vpop.f32.mrf.mxu3 }
  0x96   :  { %655 = vst.msk [vmem:[%s1413_s3 + $0x4] sm:$0xf] %vm653_vm1, %v590_v57  ;;  %v448_v61 = vadd.f32 %v1088_v34, %v447_v59  ;;  %v488_v62 = vadd.f32 %v1088_v34, %v487_v60  ;;  %v370_v63 = vpop.f32.mrf.mxu0  ;;  %v410_v0 = vpop.f32.mrf.mxu1 }
  0x97   :  { %671 = vst.msk [vmem:[%s1413_s3 + $0x44] sm:$0xf] %vm653_vm1, %v606_v58  ;;  %v371_v1 = vadd.f32 %v1088_v34, %v370_v63  ;;  %v411_v2 = vadd.f32 %v1088_v34, %v410_v0 }
  0x98   :  { %v558_v3 = vmax.f32 %v448_v61, 0.0  ;;  %v574_v4 = vmax.f32 %v488_v62, 0.0 }
  0x99   :  { %v527_v5 = vmax.f32 %v371_v1, 0.0  ;;  %v543_v6 = vmax.f32 %v411_v2, 0.0 }
  0x9a   :  { %v622_v7 = vpack.c.bf16 %v558_v3, %v558_v3  ;;  %v638_v8 = vpack.c.bf16 %v574_v4, %v574_v4 }
  0x9b   :  { %v591_v9 = vpack.c.bf16 %v527_v5, %v527_v5  ;;  %v607_v10 = vpack.c.bf16 %v543_v6, %v543_v6 }
  0x9c   :  { %687 = vst.msk [vmem:[%s1413_s3 + $0x84] sm:$0xf] %vm653_vm1, %v622_v7 }
  0x9d   :  { %703 = vst.msk [vmem:[%s1413_s3 + $0xc4] sm:$0xf] %vm653_vm1, %v638_v8  ;;  %v450_v11 = vpop.f32.mrf.mxu2  ;;  %v490_v12 = vpop.f32.mrf.mxu3 }
  0x9e   :  { %656 = vst.msk [vmem:[%s1413_s3 + $0x8] sm:$0xf] %vm653_vm1, %v591_v9  ;;  %v451_v13 = vadd.f32 %v1088_v34, %v450_v11  ;;  %v491_v14 = vadd.f32 %v1088_v34, %v490_v12  ;;  %v372_v15 = vpop.f32.mrf.mxu0  ;;  %v412_v16 = vpop.f32.mrf.mxu1 }
  0x9f   :  { %672 = vst.msk [vmem:[%s1413_s3 + $0x48] sm:$0xf] %vm653_vm1, %v607_v10  ;;  %v373_v17 = vadd.f32 %v1088_v34, %v372_v15  ;;  %v413_v18 = vadd.f32 %v1088_v34, %v412_v16 }
  0xa0   :  { %v559_v19 = vmax.f32 %v451_v13, 0.0  ;;  %v575_v20 = vmax.f32 %v491_v14, 0.0 }
  0xa1   :  { %v528_v21 = vmax.f32 %v373_v17, 0.0  ;;  %v544_v22 = vmax.f32 %v413_v18, 0.0 }
  0xa2   :  { %v623_v23 = vpack.c.bf16 %v559_v19, %v559_v19  ;;  %v639_v24 = vpack.c.bf16 %v575_v20, %v575_v20 }
  0xa3   :  { %v592_v25 = vpack.c.bf16 %v528_v21, %v528_v21  ;;  %v608_v26 = vpack.c.bf16 %v544_v22, %v544_v22 }
  0xa4   :  { %688 = vst.msk [vmem:[%s1413_s3 + $0x88] sm:$0xf] %vm653_vm1, %v623_v23 }
  0xa5   :  { %704 = vst.msk [vmem:[%s1413_s3 + $0xc8] sm:$0xf] %vm653_vm1, %v639_v24  ;;  %v452_v27 = vpop.f32.mrf.mxu2  ;;  %v492_v28 = vpop.f32.mrf.mxu3 }
  0xa6   :  { %657 = vst.msk [vmem:[%s1413_s3 + $0xc] sm:$0xf] %vm653_vm1, %v592_v25  ;;  %v453_v29 = vadd.f32 %v1088_v34, %v452_v27  ;;  %v493_v30 = vadd.f32 %v1088_v34, %v492_v28  ;;  %v375_v31 = vpop.f32.mrf.mxu0  ;;  %v415_v32 = vpop.f32.mrf.mxu1 }
  0xa7   :  { %673 = vst.msk [vmem:[%s1413_s3 + $0x4c] sm:$0xf] %vm653_vm1, %v608_v26  ;;  %v376_v33 = vadd.f32 %v1088_v34, %v375_v31  ;;  %v416_v35 = vadd.f32 %v1088_v34, %v415_v32 }
  0xa8   :  { %v560_v36 = vmax.f32 %v453_v29, 0.0  ;;  %v576_v37 = vmax.f32 %v493_v30, 0.0 }
  0xa9   :  { %v529_v38 = vmax.f32 %v376_v33, 0.0  ;;  %v545_v39 = vmax.f32 %v416_v35, 0.0 }
  0xaa   :  { %v624_v40 = vpack.c.bf16 %v560_v36, %v560_v36  ;;  %v640_v41 = vpack.c.bf16 %v576_v37, %v576_v37 }
  0xab   :  { %v593_v42 = vpack.c.bf16 %v529_v38, %v529_v38  ;;  %v609_v43 = vpack.c.bf16 %v545_v39, %v545_v39 }
  0xac   :  { %689 = vst.msk [vmem:[%s1413_s3 + $0x8c] sm:$0xf] %vm653_vm1, %v624_v40 }
  0xad   :  { %705 = vst.msk [vmem:[%s1413_s3 + $0xcc] sm:$0xf] %vm653_vm1, %v640_v41  ;;  %v455_v44 = vpop.f32.mrf.mxu2  ;;  %v495_v45 = vpop.f32.mrf.mxu3 }
  0xae   :  { %658 = vst.msk [vmem:[%s1413_s3 + $0x10] sm:$0xf] %vm653_vm1, %v593_v42  ;;  %v456_v46 = vadd.f32 %v1088_v34, %v455_v44  ;;  %v496_v47 = vadd.f32 %v1088_v34, %v495_v45  ;;  %v377_v48 = vpop.f32.mrf.mxu0  ;;  %v417_v49 = vpop.f32.mrf.mxu1 }
  0xaf   :  { %674 = vst.msk [vmem:[%s1413_s3 + $0x50] sm:$0xf] %vm653_vm1, %v609_v43  ;;  %v378_v50 = vadd.f32 %v1088_v34, %v377_v48  ;;  %v418_v51 = vadd.f32 %v1088_v34, %v417_v49 }
  0xb0   :  { %v561_v52 = vmax.f32 %v456_v46, 0.0  ;;  %v577_v53 = vmax.f32 %v496_v47, 0.0 }
  0xb1   :  { %v530_v54 = vmax.f32 %v378_v50, 0.0  ;;  %v546_v55 = vmax.f32 %v418_v51, 0.0 }
  0xb2   :  { %v625_v56 = vpack.c.bf16 %v561_v52, %v561_v52  ;;  %v641_v57 = vpack.c.bf16 %v577_v53, %v577_v53 }
  0xb3   :  { %v594_v58 = vpack.c.bf16 %v530_v54, %v530_v54  ;;  %v610_v59 = vpack.c.bf16 %v546_v55, %v546_v55 }
  0xb4   :  { %690 = vst.msk [vmem:[%s1413_s3 + $0x90] sm:$0xf] %vm653_vm1, %v625_v56 }
  0xb5   :  { %706 = vst.msk [vmem:[%s1413_s3 + $0xd0] sm:$0xf] %vm653_vm1, %v641_v57  ;;  %v457_v60 = vpop.f32.mrf.mxu2  ;;  %v497_v61 = vpop.f32.mrf.mxu3 }
  0xb6   :  { %659 = vst.msk [vmem:[%s1413_s3 + $0x14] sm:$0xf] %vm653_vm1, %v594_v58  ;;  %v458_v62 = vadd.f32 %v1088_v34, %v457_v60  ;;  %v498_v63 = vadd.f32 %v1088_v34, %v497_v61  ;;  %v380_v0 = vpop.f32.mrf.mxu0  ;;  %v420_v1 = vpop.f32.mrf.mxu1 }
  0xb7   :  { %675 = vst.msk [vmem:[%s1413_s3 + $0x54] sm:$0xf] %vm653_vm1, %v610_v59  ;;  %v381_v2 = vadd.f32 %v1088_v34, %v380_v0  ;;  %v421_v3 = vadd.f32 %v1088_v34, %v420_v1 }
  0xb8   :  { %v562_v4 = vmax.f32 %v458_v62, 0.0  ;;  %v578_v5 = vmax.f32 %v498_v63, 0.0 }
  0xb9   :  { %v531_v6 = vmax.f32 %v381_v2, 0.0  ;;  %v547_v7 = vmax.f32 %v421_v3, 0.0 }
  0xba   :  { %v626_v8 = vpack.c.bf16 %v562_v4, %v562_v4  ;;  %v642_v9 = vpack.c.bf16 %v578_v5, %v578_v5 }
  0xbb   :  { %v595_v10 = vpack.c.bf16 %v531_v6, %v531_v6  ;;  %v611_v11 = vpack.c.bf16 %v547_v7, %v547_v7 }
  0xbc   :  { %691 = vst.msk [vmem:[%s1413_s3 + $0x94] sm:$0xf] %vm653_vm1, %v626_v8 }
  0xbd   :  { %707 = vst.msk [vmem:[%s1413_s3 + $0xd4] sm:$0xf] %vm653_vm1, %v642_v9  ;;  %v460_v12 = vpop.f32.mrf.mxu2  ;;  %v500_v13 = vpop.f32.mrf.mxu3 }
  0xbe   :  { %660 = vst.msk [vmem:[%s1413_s3 + $0x18] sm:$0xf] %vm653_vm1, %v595_v10  ;;  %v461_v14 = vadd.f32 %v1088_v34, %v460_v12  ;;  %v501_v15 = vadd.f32 %v1088_v34, %v500_v13  ;;  %v382_v16 = vpop.f32.mrf.mxu0  ;;  %v422_v17 = vpop.f32.mrf.mxu1 }
  0xbf   :  { %676 = vst.msk [vmem:[%s1413_s3 + $0x58] sm:$0xf] %vm653_vm1, %v611_v11  ;;  %v383_v18 = vadd.f32 %v1088_v34, %v382_v16  ;;  %v423_v19 = vadd.f32 %v1088_v34, %v422_v17 }
  0xc0   :  { %v563_v20 = vmax.f32 %v461_v14, 0.0  ;;  %v579_v21 = vmax.f32 %v501_v15, 0.0 }
  0xc1   :  { %v532_v22 = vmax.f32 %v383_v18, 0.0  ;;  %v548_v23 = vmax.f32 %v423_v19, 0.0 }
  0xc2   :  { %v627_v24 = vpack.c.bf16 %v563_v20, %v563_v20  ;;  %v643_v25 = vpack.c.bf16 %v579_v21, %v579_v21 }
  0xc3   :  { %v596_v26 = vpack.c.bf16 %v532_v22, %v532_v22  ;;  %v612_v27 = vpack.c.bf16 %v548_v23, %v548_v23 }
  0xc4   :  { %692 = vst.msk [vmem:[%s1413_s3 + $0x98] sm:$0xf] %vm653_vm1, %v627_v24 }
  0xc5   :  { %708 = vst.msk [vmem:[%s1413_s3 + $0xd8] sm:$0xf] %vm653_vm1, %v643_v25  ;;  %v462_v28 = vpop.f32.mrf.mxu2  ;;  %v502_v29 = vpop.f32.mrf.mxu3 }
  0xc6   :  { %661 = vst.msk [vmem:[%s1413_s3 + $0x1c] sm:$0xf] %vm653_vm1, %v596_v26  ;;  %v463_v30 = vadd.f32 %v1088_v34, %v462_v28  ;;  %v503_v31 = vadd.f32 %v1088_v34, %v502_v29  ;;  %v385_v32 = vpop.f32.mrf.mxu0  ;;  %v425_v33 = vpop.f32.mrf.mxu1 }
  0xc7   :  { %677 = vst.msk [vmem:[%s1413_s3 + $0x5c] sm:$0xf] %vm653_vm1, %v612_v27  ;;  %v386_v35 = vadd.f32 %v1088_v34, %v385_v32  ;;  %v426_v36 = vadd.f32 %v1088_v34, %v425_v33 }
  0xc8   :  { %v564_v37 = vmax.f32 %v463_v30, 0.0  ;;  %v580_v38 = vmax.f32 %v503_v31, 0.0 }
  0xc9   :  { %v533_v39 = vmax.f32 %v386_v35, 0.0  ;;  %v549_v40 = vmax.f32 %v426_v36, 0.0 }
  0xca   :  { %v628_v41 = vpack.c.bf16 %v564_v37, %v564_v37  ;;  %v644_v42 = vpack.c.bf16 %v580_v38, %v580_v38 }
  0xcb   :  { %v597_v43 = vpack.c.bf16 %v533_v39, %v533_v39  ;;  %v613_v44 = vpack.c.bf16 %v549_v40, %v549_v40 }
  0xcc   :  { %693 = vst.msk [vmem:[%s1413_s3 + $0x9c] sm:$0xf] %vm653_vm1, %v628_v41 }
  0xcd   :  { %709 = vst.msk [vmem:[%s1413_s3 + $0xdc] sm:$0xf] %vm653_vm1, %v644_v42  ;;  %v465_v45 = vpop.f32.mrf.mxu2  ;;  %v505_v46 = vpop.f32.mrf.mxu3 }
  0xce   :  { %662 = vst.msk [vmem:[%s1413_s3 + $0x20] sm:$0xf] %vm653_vm1, %v597_v43  ;;  %v466_v47 = vadd.f32 %v1088_v34, %v465_v45  ;;  %v506_v48 = vadd.f32 %v1088_v34, %v505_v46  ;;  %v387_v49 = vpop.f32.mrf.mxu0  ;;  %v427_v50 = vpop.f32.mrf.mxu1 }
  0xcf   :  { %678 = vst.msk [vmem:[%s1413_s3 + $0x60] sm:$0xf] %vm653_vm1, %v613_v44  ;;  %v388_v51 = vadd.f32 %v1088_v34, %v387_v49  ;;  %v428_v52 = vadd.f32 %v1088_v34, %v427_v50 }
  0xd0   :  { %v565_v53 = vmax.f32 %v466_v47, 0.0  ;;  %v581_v54 = vmax.f32 %v506_v48, 0.0 }
  0xd1   :  { %v534_v55 = vmax.f32 %v388_v51, 0.0  ;;  %v550_v56 = vmax.f32 %v428_v52, 0.0 }
  0xd2   :  { %v629_v57 = vpack.c.bf16 %v565_v53, %v565_v53  ;;  %v645_v58 = vpack.c.bf16 %v581_v54, %v581_v54 }
  0xd3   :  { %v598_v59 = vpack.c.bf16 %v534_v55, %v534_v55  ;;  %v614_v60 = vpack.c.bf16 %v550_v56, %v550_v56 }
  0xd4   :  { %694 = vst.msk [vmem:[%s1413_s3 + $0xa0] sm:$0xf] %vm653_vm1, %v629_v57 }
  0xd5   :  { %710 = vst.msk [vmem:[%s1413_s3 + $0xe0] sm:$0xf] %vm653_vm1, %v645_v58  ;;  %v467_v61 = vpop.f32.mrf.mxu2  ;;  %v507_v62 = vpop.f32.mrf.mxu3 }
  0xd6   :  { %663 = vst.msk [vmem:[%s1413_s3 + $0x24] sm:$0xf] %vm653_vm1, %v598_v59  ;;  %v468_v63 = vadd.f32 %v1088_v34, %v467_v61  ;;  %v508_v0 = vadd.f32 %v1088_v34, %v507_v62  ;;  %v390_v1 = vpop.f32.mrf.mxu0  ;;  %v430_v2 = vpop.f32.mrf.mxu1 }
  0xd7   :  { %679 = vst.msk [vmem:[%s1413_s3 + $0x64] sm:$0xf] %vm653_vm1, %v614_v60  ;;  %v391_v3 = vadd.f32 %v1088_v34, %v390_v1  ;;  %v431_v4 = vadd.f32 %v1088_v34, %v430_v2 }
  0xd8   :  { %v566_v5 = vmax.f32 %v468_v63, 0.0  ;;  %v582_v6 = vmax.f32 %v508_v0, 0.0 }
  0xd9   :  { %v535_v7 = vmax.f32 %v391_v3, 0.0  ;;  %v551_v8 = vmax.f32 %v431_v4, 0.0 }
  0xda   :  { %v630_v9 = vpack.c.bf16 %v566_v5, %v566_v5  ;;  %v646_v10 = vpack.c.bf16 %v582_v6, %v582_v6 }
  0xdb   :  { %v599_v11 = vpack.c.bf16 %v535_v7, %v535_v7  ;;  %v615_v12 = vpack.c.bf16 %v551_v8, %v551_v8 }
  0xdc   :  { %695 = vst.msk [vmem:[%s1413_s3 + $0xa4] sm:$0xf] %vm653_vm1, %v630_v9 }
  0xdd   :  { %711 = vst.msk [vmem:[%s1413_s3 + $0xe4] sm:$0xf] %vm653_vm1, %v646_v10  ;;  %v470_v13 = vpop.f32.mrf.mxu2  ;;  %v510_v14 = vpop.f32.mrf.mxu3 }
  0xde   :  { %664 = vst.msk [vmem:[%s1413_s3 + $0x28] sm:$0xf] %vm653_vm1, %v599_v11  ;;  %v471_v15 = vadd.f32 %v1088_v34, %v470_v13  ;;  %v511_v16 = vadd.f32 %v1088_v34, %v510_v14  ;;  %v392_v17 = vpop.f32.mrf.mxu0  ;;  %v432_v18 = vpop.f32.mrf.mxu1 }
  0xdf   :  { %680 = vst.msk [vmem:[%s1413_s3 + $0x68] sm:$0xf] %vm653_vm1, %v615_v12  ;;  %v393_v19 = vadd.f32 %v1088_v34, %v392_v17  ;;  %v433_v20 = vadd.f32 %v1088_v34, %v432_v18 }
  0xe0   :  { %v567_v21 = vmax.f32 %v471_v15, 0.0  ;;  %v583_v22 = vmax.f32 %v511_v16, 0.0 }
  0xe1   :  { %v536_v23 = vmax.f32 %v393_v19, 0.0  ;;  %v552_v24 = vmax.f32 %v433_v20, 0.0 }
  0xe2   :  { %v631_v25 = vpack.c.bf16 %v567_v21, %v567_v21  ;;  %v647_v26 = vpack.c.bf16 %v583_v22, %v583_v22 }
  0xe3   :  { %v600_v27 = vpack.c.bf16 %v536_v23, %v536_v23  ;;  %v616_v28 = vpack.c.bf16 %v552_v24, %v552_v24 }
  0xe4   :  { %696 = vst.msk [vmem:[%s1413_s3 + $0xa8] sm:$0xf] %vm653_vm1, %v631_v25 }
  0xe5   :  { %712 = vst.msk [vmem:[%s1413_s3 + $0xe8] sm:$0xf] %vm653_vm1, %v647_v26  ;;  %v472_v29 = vpop.f32.mrf.mxu2  ;;  %v512_v30 = vpop.f32.mrf.mxu3 }
  0xe6   :  { %665 = vst.msk [vmem:[%s1413_s3 + $0x2c] sm:$0xf] %vm653_vm1, %v600_v27  ;;  %v473_v31 = vadd.f32 %v1088_v34, %v472_v29  ;;  %v513_v32 = vadd.f32 %v1088_v34, %v512_v30  ;;  %v395_v33 = vpop.f32.mrf.mxu0  ;;  %v435_v35 = vpop.f32.mrf.mxu1 }
  0xe7   :  { %681 = vst.msk [vmem:[%s1413_s3 + $0x6c] sm:$0xf] %vm653_vm1, %v616_v28  ;;  %v396_v36 = vadd.f32 %v1088_v34, %v395_v33  ;;  %v436_v37 = vadd.f32 %v1088_v34, %v435_v35 }
  0xe8   :  { %v568_v38 = vmax.f32 %v473_v31, 0.0  ;;  %v584_v39 = vmax.f32 %v513_v32, 0.0 }
  0xe9   :  { %v537_v40 = vmax.f32 %v396_v36, 0.0  ;;  %v553_v41 = vmax.f32 %v436_v37, 0.0 }
  0xea   :  { %v632_v42 = vpack.c.bf16 %v568_v38, %v568_v38  ;;  %v648_v43 = vpack.c.bf16 %v584_v39, %v584_v39 }
  0xeb   :  { %v601_v44 = vpack.c.bf16 %v537_v40, %v537_v40  ;;  %v617_v45 = vpack.c.bf16 %v553_v41, %v553_v41 }
  0xec   :  { %697 = vst.msk [vmem:[%s1413_s3 + $0xac] sm:$0xf] %vm653_vm1, %v632_v42 }
  0xed   :  { %713 = vst.msk [vmem:[%s1413_s3 + $0xec] sm:$0xf] %vm653_vm1, %v648_v43  ;;  %v475_v46 = vpop.f32.mrf.mxu2  ;;  %v515_v47 = vpop.f32.mrf.mxu3 }
  0xee   :  { %666 = vst.msk [vmem:[%s1413_s3 + $0x30] sm:$0xf] %vm653_vm1, %v601_v44  ;;  %v476_v48 = vadd.f32 %v1088_v34, %v475_v46  ;;  %v516_v49 = vadd.f32 %v1088_v34, %v515_v47  ;;  %v397_v50 = vpop.f32.mrf.mxu0  ;;  %v437_v51 = vpop.f32.mrf.mxu1 }
  0xef   :  { %682 = vst.msk [vmem:[%s1413_s3 + $0x70] sm:$0xf] %vm653_vm1, %v617_v45  ;;  %v398_v52 = vadd.f32 %v1088_v34, %v397_v50  ;;  %v438_v53 = vadd.f32 %v1088_v34, %v437_v51 }
  0xf0   :  { %v569_v54 = vmax.f32 %v476_v48, 0.0  ;;  %v585_v55 = vmax.f32 %v516_v49, 0.0 }
  0xf1   :  { %v538_v56 = vmax.f32 %v398_v52, 0.0  ;;  %v554_v57 = vmax.f32 %v438_v53, 0.0 }
  0xf2   :  { %v633_v58 = vpack.c.bf16 %v569_v54, %v569_v54  ;;  %v649_v59 = vpack.c.bf16 %v585_v55, %v585_v55 }
  0xf3   :  { %v602_v60 = vpack.c.bf16 %v538_v56, %v538_v56  ;;  %v618_v61 = vpack.c.bf16 %v554_v57, %v554_v57 }
  0xf4   :  { %698 = vst.msk [vmem:[%s1413_s3 + $0xb0] sm:$0xf] %vm653_vm1, %v633_v58 }
  0xf5   :  { %714 = vst.msk [vmem:[%s1413_s3 + $0xf0] sm:$0xf] %vm653_vm1, %v649_v59  ;;  %v477_v62 = vpop.f32.mrf.mxu2  ;;  %v517_v63 = vpop.f32.mrf.mxu3 }
  0xf6   :  { %667 = vst.msk [vmem:[%s1413_s3 + $0x34] sm:$0xf] %vm653_vm1, %v602_v60  ;;  %v478_v0 = vadd.f32 %v1088_v34, %v477_v62  ;;  %v518_v1 = vadd.f32 %v1088_v34, %v517_v63  ;;  %v400_v2 = vpop.f32.mrf.mxu0  ;;  %v440_v3 = vpop.f32.mrf.mxu1 }
  0xf7   :  { %683 = vst.msk [vmem:[%s1413_s3 + $0x74] sm:$0xf] %vm653_vm1, %v618_v61  ;;  %v401_v4 = vadd.f32 %v1088_v34, %v400_v2  ;;  %v441_v5 = vadd.f32 %v1088_v34, %v440_v3 }
  0xf8   :  { %v570_v6 = vmax.f32 %v478_v0, 0.0  ;;  %v586_v7 = vmax.f32 %v518_v1, 0.0 }
  0xf9   :  { %v539_v8 = vmax.f32 %v401_v4, 0.0  ;;  %v555_v9 = vmax.f32 %v441_v5, 0.0 }
  0xfa   :  { %v634_v10 = vpack.c.bf16 %v570_v6, %v570_v6  ;;  %v650_v11 = vpack.c.bf16 %v586_v7, %v586_v7 }
  0xfb   :  { %v603_v12 = vpack.c.bf16 %v539_v8, %v539_v8  ;;  %v619_v13 = vpack.c.bf16 %v555_v9, %v555_v9 }
  0xfc   :  { %699 = vst.msk [vmem:[%s1413_s3 + $0xb4] sm:$0xf] %vm653_vm1, %v634_v10 }
  0xfd   :  { %715 = vst.msk [vmem:[%s1413_s3 + $0xf4] sm:$0xf] %vm653_vm1, %v650_v11  ;;  %v480_v14 = vpop.f32.mrf.mxu2  ;;  %v520_v15 = vpop.f32.mrf.mxu3 }
  0xfe   :  { %668 = vst.msk [vmem:[%s1413_s3 + $0x38] sm:$0xf] %vm653_vm1, %v603_v12  ;;  %v481_v16 = vadd.f32 %v1088_v34, %v480_v14  ;;  %v521_v17 = vadd.f32 %v1088_v34, %v520_v15  ;;  %v402_v18 = vpop.f32.mrf.mxu0  ;;  %v442_v19 = vpop.f32.mrf.mxu1 }
  0xff   :  { %684 = vst.msk [vmem:[%s1413_s3 + $0x78] sm:$0xf] %vm653_vm1, %v619_v13  ;;  %v403_v20 = vadd.f32 %v1088_v34, %v402_v18  ;;  %v443_v21 = vadd.f32 %v1088_v34, %v442_v19 }
 0x100   :  { %v571_v22 = vmax.f32 %v481_v16, 0.0  ;;  %v587_v23 = vmax.f32 %v521_v17, 0.0 }
 0x101   :  { %v540_v24 = vmax.f32 %v403_v20, 0.0  ;;  %v556_v25 = vmax.f32 %v443_v21, 0.0 }
 0x102   :  { %v635_v26 = vpack.c.bf16 %v571_v22, %v571_v22  ;;  %v651_v27 = vpack.c.bf16 %v587_v23, %v587_v23 }
 0x103   :  { %v604_v28 = vpack.c.bf16 %v540_v24, %v540_v24  ;;  %v620_v29 = vpack.c.bf16 %v556_v25, %v556_v25 }
 0x104   :  { %700 = vst.msk [vmem:[%s1413_s3 + $0xb8] sm:$0xf] %vm653_vm1, %v635_v26 }
 0x105   :  { %716 = vst.msk [vmem:[%s1413_s3 + $0xf8] sm:$0xf] %vm653_vm1, %v651_v27  ;;  %v482_v30 = vpop.f32.mrf.mxu2  ;;  %v522_v31 = vpop.f32.mrf.mxu3 }
 0x106   :  { %669 = vst.msk [vmem:[%s1413_s3 + $0x3c] sm:$0xf] %vm653_vm1, %v604_v28  ;;  %v483_v32 = vadd.f32 %v1088_v34, %v482_v30  ;;  %v523_v33 = vadd.f32 %v1088_v34, %v522_v31 }
 0x107   :  { %685 = vst.msk [vmem:[%s1413_s3 + $0x7c] sm:$0xf] %vm653_vm1, %v620_v29 }
 0x108   :  { %v572_v35 = vmax.f32 %v483_v32, 0.0  ;;  %v588_v36 = vmax.f32 %v523_v33, 0.0 }
 0x10a   :  { %v636_v37 = vpack.c.bf16 %v572_v35, %v572_v35  ;;  %v652_v38 = vpack.c.bf16 %v588_v36, %v588_v36 }
 0x10c   :  { %701 = vst.msk [vmem:[%s1413_s3 + $0xbc] sm:$0xf] %vm653_vm1, %v636_v37 }
 0x10d   :  { %717 = vst.msk [vmem:[%s1413_s3 + $0xfc] sm:$0xf] %vm653_vm1, %v652_v38 }

// kernel: hrnet_forward.54
= control target key start
LH: loop header
LB: loop body
LE: loop exit
PB: predicated region body
PF: predicated region fallthrough
CT: control target
= control target key end

     0   :  { %vm555_vm0 = vcmask 523264   ;;  %vm857_vm1 = vcmask 519168   ;;  %s1788_s1 = inlined_call_operand.vmem [shape: bf16[576,64], index: 1, kind: input, shape index: {}]   ;;  %s1789_s2 = inlined_call_operand.vmem [shape: f32[1,64], index: 2, kind: input, shape index: {}]   ;;  %s1790_s0 = inlined_call_operand.vmem [shape: bf16[128,576], index: 0, kind: input, shape index: {}]   ;;  %s1791_s3 = inlined_call_operand.vmem [shape: bf16[128,64], index: 3, kind: output, shape index: {}]  }
   0x1   :  { %v1237_v0 = vld [vmem:[%s1788_s1 + $0x38] sm:$0xff]  ;;  %v1236_v1 = vld [vmem:[%s1788_s1 + $0x30] sm:$0xff]  ;;  %v1235_v2 = vld [vmem:[%s1788_s1 + $0x28] sm:$0xff] }
   0x2   :  { %1266 = vmatpush.bf16.msra.mxu1 %v1237_v0  ;;  %1267 = vmatpush.bf16.msra.mxu2 %v1237_v0  ;;  %v1234_v3 = vld [vmem:[%s1788_s1 + $0x20] sm:$0xff]  ;;  %v1233_v4 = vld [vmem:[%s1788_s1 + $0x18] sm:$0xff]  ;;  %v1232_v5 = vld [vmem:[%s1788_s1 + $0x10] sm:$0xff] }
   0x3   :  { %1268 = vmatpush.bf16.msra.mxu3 %v1237_v0  ;;  %580 = vmatpush.bf16.msra.mxu0 %v1237_v0  ;;  %v1231_v6 = vld [vmem:[%s1788_s1 + $0x8] sm:$0xff]  ;;  %v1230_v7 = vld [vmem:[%s1788_s1] sm:$0xff]  ;;  %v920_v8 = vld [vmem:[%s1790_s0 + $0x50] sm:$0xf] }
   0x4   :  { %v1202_v9 = vld [vmem:[%s1790_s0 + $0x60] sm:$0xf0]  ;;  %v960_v10 = vld [vmem:[%s1790_s0 + $0xa0] sm:$0xf]  ;;  %v1212_v11 = vld [vmem:[%s1790_s0 + $0xb0] sm:$0xf0] }
   0x5   :  { %v1000_v12 = vld [vmem:[%s1790_s0 + $0xf0] sm:$0xf]  ;;  %v1222_v13 = vld [vmem:[%s1790_s0 + $0x100] sm:$0xf0]  ;;  %v880_v14 = vld [vmem:[%s1790_s0] sm:$0xf]  ;;  %v921_v18 = vor.u32 %v1202_v9, %v920_v8  ;;  %v961_v19 = vor.u32 %v1212_v11, %v960_v10 }
   0x6   :  { %1269 = vmatpush.bf16.msra.mxu1 %v1236_v1  ;;  %1270 = vmatpush.bf16.msra.mxu2 %v1236_v1  ;;  %v1192_v15 = vld [vmem:[%s1790_s0 + $0x10] sm:$0xf0]  ;;  %v1253_v16 = vld [vmem:[%s1788_s1 + $0xb8] sm:$0xff]  ;;  %v1001_v20 = vor.u32 %v1222_v13, %v1000_v12  ;;  %v1251_v28 = vld [vmem:[%s1788_s1 + $0xa8] sm:$0xff] }
   0x7   :  { %1271 = vmatpush.bf16.msra.mxu3 %v1236_v1  ;;  %581 = vmatpush.bf16.msra.mxu0 %v1236_v1  ;;  %v1245_v17 = vld [vmem:[%s1788_s1 + $0x78] sm:$0xff]  ;;  %v881_v21 = vor.u32 %v1192_v15, %v880_v14  ;;  %v1252_v24 = vld [vmem:[%s1788_s1 + $0xb0] sm:$0xff]  ;;  %v1243_v29 = vld [vmem:[%s1788_s1 + $0x68] sm:$0xff] }
   0x8   :  { %v1261_v22 = vld [vmem:[%s1788_s1 + $0xf8] sm:$0xff]  ;;  %v1244_v25 = vld [vmem:[%s1788_s1 + $0x70] sm:$0xff]  ;;  %v1259_v30 = vld [vmem:[%s1788_s1 + $0xe8] sm:$0xff] }
   0x9   :  { %v1265_v23 = vld [vmem:[%s1788_s1 + $0x118] sm:$0xff]  ;;  %v1260_v26 = vld [vmem:[%s1788_s1 + $0xf0] sm:$0xff]  ;;  %v1263_v31 = vld [vmem:[%s1788_s1 + $0x108] sm:$0xff] }
   0xa   :  { %1272 = vmatpush.bf16.msra.mxu1 %v1235_v2  ;;  %1273 = vmatpush.bf16.msra.mxu2 %v1235_v2  ;;  %v1264_v27 = vld [vmem:[%s1788_s1 + $0x110] sm:$0xff]  ;;  %v1250_v32 = vld [vmem:[%s1788_s1 + $0xa0] sm:$0xff]  ;;  %v940_v35 = vld [vmem:[%s1790_s0 + $0x78] sm:$0xf] }
   0xb   :  { %1274 = vmatpush.bf16.msra.mxu3 %v1235_v2  ;;  %582 = vmatpush.bf16.msra.mxu0 %v1235_v2  ;;  %v1242_v33 = vld [vmem:[%s1788_s1 + $0x60] sm:$0xff]  ;;  %v1207_v36 = vld [vmem:[%s1790_s0 + $0x88] sm:$0xf0]  ;;  %v980_v37 = vld [vmem:[%s1790_s0 + $0xc8] sm:$0xf] }
   0xc   :  { %v1258_v34 = vld [vmem:[%s1788_s1 + $0xe0] sm:$0xff]  ;;  %v1217_v38 = vld [vmem:[%s1790_s0 + $0xd8] sm:$0xf0]  ;;  %v1020_v39 = vld [vmem:[%s1790_s0 + $0x118] sm:$0xf]  ;;  %v941_v46 = vor.u32 %v1207_v36, %v940_v35 }
   0xd   :  { %v1227_v40 = vld [vmem:[%s1790_s0 + $0x128] sm:$0xf0]  ;;  %v900_v41 = vld [vmem:[%s1790_s0 + $0x28] sm:$0xf]  ;;  %v1197_v42 = vld [vmem:[%s1790_s0 + $0x38] sm:$0xf0]  ;;  %v981_v47 = vor.u32 %v1217_v38, %v980_v37 }
   0xe   :  { %1275 = vmatpush.bf16.msra.mxu1 %v1234_v3  ;;  %1276 = vmatpush.bf16.msra.mxu2 %v1234_v3  ;;  %v1262_v43 = vld [vmem:[%s1788_s1 + $0x100] sm:$0xff]  ;;  %v1249_v44 = vld [vmem:[%s1788_s1 + $0x98] sm:$0xff]  ;;  %v1021_v48 = vor.u32 %v1227_v40, %v1020_v39  ;;  %v901_v49 = vor.u32 %v1197_v42, %v900_v41  ;;  %v1248_v51 = vld [vmem:[%s1788_s1 + $0x90] sm:$0xff] }
   0xf   :  { %1277 = vmatpush.bf16.msra.mxu3 %v1234_v3  ;;  %583 = vmatpush.bf16.msra.mxu0 %v1234_v3  ;;  %v1241_v45 = vld [vmem:[%s1788_s1 + $0x58] sm:$0xff]  ;;  %v1240_v52 = vld [vmem:[%s1788_s1 + $0x50] sm:$0xff]  ;;  %v1247_v54 = vld [vmem:[%s1788_s1 + $0x88] sm:$0xff] }
  0x10   :  { %v1257_v50 = vld [vmem:[%s1788_s1 + $0xd8] sm:$0xff]  ;;  %v1256_v53 = vld [vmem:[%s1788_s1 + $0xd0] sm:$0xff]  ;;  %v1239_v55 = vld [vmem:[%s1788_s1 + $0x48] sm:$0xff] }
  0x11   :  { %v1255_v56 = vld [vmem:[%s1788_s1 + $0xc8] sm:$0xff]  ;;  %v1246_v57 = vld [vmem:[%s1788_s1 + $0x80] sm:$0xff]  ;;  %v882_v61 = vld [vmem:[%s1790_s0 + $0x14] sm:$0xf0] }
  0x12   :  { %1278 = vmatpush.bf16.msra.mxu1 %v1233_v4  ;;  %1279 = vmatpush.bf16.msra.mxu2 %v1233_v4  ;;  %v1238_v58 = vld [vmem:[%s1788_s1 + $0x40] sm:$0xff]  ;;  %v888_v62 = vld [vmem:[%s1790_s0 + $0x8] sm:$0xf]  ;;  %v1193_v63 = vld [vmem:[%s1790_s0 + $0x18] sm:$0xf0] }
  0x13   :  { %1280 = vmatpush.bf16.msra.mxu3 %v1233_v4  ;;  %584 = vmatpush.bf16.msra.mxu0 %v1233_v4  ;;  %v1254_v59 = vld [vmem:[%s1788_s1 + $0xc0] sm:$0xff]  ;;  %v1191_v0 = vld [vmem:[%s1790_s0 + $0xc] sm:$0xf]  ;;  %v896_v2 = vld [vmem:[%s1790_s0 + $0x10] sm:$0xf] }
  0x14   :  { %v1190_v60 = vld [vmem:[%s1790_s0 + $0x4] sm:$0xf]  ;;  %v890_v1 = vld [vmem:[%s1790_s0 + $0x1c] sm:$0xf0]  ;;  %v1195_v8 = vld [vmem:[%s1790_s0 + $0x2c] sm:$0xf] }
  0x15   :  { %v1194_v3 = vld [vmem:[%s1790_s0 + $0x20] sm:$0xf0]  ;;  %v885_v4 = vor.u32 %v1190_v60, %v882_v61  ;;  %v902_v9 = vld [vmem:[%s1790_s0 + $0x3c] sm:$0xf0]  ;;  %v908_v10 = vld [vmem:[%s1790_s0 + $0x30] sm:$0xf] }
  0x16   :  { %1281 = vmatpush.bf16.msra.mxu1 %v1232_v5  ;;  %1282 = vmatpush.bf16.msra.mxu2 %v1232_v5  ;;  %v1198_v11 = vld [vmem:[%s1790_s0 + $0x40] sm:$0xf0]  ;;  %v1196_v12 = vld [vmem:[%s1790_s0 + $0x34] sm:$0xf]  ;;  %v910_v13 = vld [vmem:[%s1790_s0 + $0x44] sm:$0xf0] }
  0x17   :  { %1283 = vmatpush.bf16.msra.mxu3 %v1232_v5  ;;  %585 = vmatpush.bf16.msra.mxu0 %v1232_v5  ;;  %v889_v5 = vor.u32 %v1193_v63, %v888_v62  ;;  %v916_v14 = vld [vmem:[%s1790_s0 + $0x38] sm:$0xf]  ;;  %v1199_v15 = vld [vmem:[%s1790_s0 + $0x48] sm:$0xf0]  ;;  %v1208_v35 = vld [vmem:[%s1790_s0 + $0x90] sm:$0xf0] }
  0x18   :  { %v1206_v36 = vld [vmem:[%s1790_s0 + $0x84] sm:$0xf]  ;;  %v950_v37 = vld [vmem:[%s1790_s0 + $0x94] sm:$0xf0]  ;;  %v956_v38 = vld [vmem:[%s1790_s0 + $0x88] sm:$0xf] }
  0x19   :  { %v1209_v39 = vld [vmem:[%s1790_s0 + $0x98] sm:$0xf0]  ;;  %v953_v42 = vor.u32 %v1206_v36, %v950_v37  ;;  %v1216_v60 = vld [vmem:[%s1790_s0 + $0xd4] sm:$0xf]  ;;  %v990_v61 = vld [vmem:[%s1790_s0 + $0xe4] sm:$0xf0] }
  0x1a   :  { %1284 = vmatpush.bf16.msra.mxu1 %v1231_v6  ;;  %1285 = vmatpush.bf16.msra.mxu2 %v1231_v6  ;;  %v996_v62 = vld [vmem:[%s1790_s0 + $0xd8] sm:$0xf]  ;;  %v1219_v63 = vld [vmem:[%s1790_s0 + $0xe8] sm:$0xf0] }
  0x1b   :  { %1286 = vmatpush.bf16.msra.mxu3 %v1231_v6  ;;  %586 = vmatpush.bf16.msra.mxu0 %v1231_v6  ;;  %v893_v6 = vor.u32 %v1191_v0, %v890_v1 }
  0x1e   :  { %1287 = vmatpush.bf16.msra.mxu1 %v1230_v7  ;;  %1288 = vmatpush.bf16.msra.mxu2 %v1230_v7 }
  0x1f   :  { %1289 = vmatpush.bf16.msra.mxu3 %v1230_v7  ;;  %587 = vmatpush.bf16.msra.mxu0 %v1230_v7  ;;  %v897_v7 = vor.u32 %v1194_v3, %v896_v2  ;;  %v993_v2 = vor.u32 %v1216_v60, %v990_v61  ;;  %v997_v3 = vor.u32 %v1219_v63, %v996_v62 }
  0x21   :  { %598 = vmatmul.bf16.vlgmr.msra.gmra.mxu1 %v921_v18  ;;  %608 = vmatmul.bf16.vlgmr.msra.gmra.mxu2 %v961_v19  ;;  %v913_v18 = vor.u32 %v1196_v12, %v910_v13  ;;  %v917_v19 = vor.u32 %v1199_v15, %v916_v14 }
  0x22   :  { %678 = vmatpush.bf16.msrb.mxu2 %v1253_v16  ;;  %629 = vmatpush.bf16.msrb.mxu1 %v1245_v17  ;;  %v905_v16 = vor.u32 %v1195_v8, %v902_v9  ;;  %v909_v17 = vor.u32 %v1198_v11, %v908_v10  ;;  %v1221_v8 = vld [vmem:[%s1790_s0 + $0xfc] sm:$0xf]  ;;  %v1010_v9 = vld [vmem:[%s1790_s0 + $0x10c] sm:$0xf0]  ;;  %v1016_v10 = vld [vmem:[%s1790_s0 + $0x100] sm:$0xf] }
  0x23   :  { %618 = vmatmul.bf16.vlgmr.msra.gmra.mxu3 %v1001_v20  ;;  %588 = vmatmul.bf16.vlgmr.msra.gmra.mxu0 %v881_v21  ;;  %v1200_v20 = vld [vmem:[%s1790_s0 + $0x54] sm:$0xf]  ;;  %v922_v21 = vld [vmem:[%s1790_s0 + $0x64] sm:$0xf0]  ;;  %v1013_v15 = vor.u32 %v1221_v8, %v1010_v9 }
  0x24   :  { %727 = vmatpush.bf16.msrb.mxu3 %v1261_v22  ;;  %780 = vmatpush.bf16.msrb.mxu0 %v1265_v23  ;;  %v928_v22 = vld [vmem:[%s1790_s0 + $0x58] sm:$0xf]  ;;  %v1203_v23 = vld [vmem:[%s1790_s0 + $0x68] sm:$0xf0]  ;;  %v1224_v11 = vld [vmem:[%s1790_s0 + $0x110] sm:$0xf0] }
  0x26   :  { %679 = vmatpush.bf16.msrb.mxu2 %v1252_v24  ;;  %630 = vmatpush.bf16.msrb.mxu1 %v1244_v25  ;;  %v1201_v24 = vld [vmem:[%s1790_s0 + $0x5c] sm:$0xf]  ;;  %v930_v25 = vld [vmem:[%s1790_s0 + $0x6c] sm:$0xf0] }
  0x28   :  { %728 = vmatpush.bf16.msrb.mxu3 %v1260_v26  ;;  %781 = vmatpush.bf16.msrb.mxu0 %v1264_v27  ;;  %v936_v26 = vld [vmem:[%s1790_s0 + $0x60] sm:$0xf]  ;;  %v1204_v27 = vld [vmem:[%s1790_s0 + $0x70] sm:$0xf0] }
  0x2a   :  { %680 = vmatpush.bf16.msrb.mxu2 %v1251_v28  ;;  %631 = vmatpush.bf16.msrb.mxu1 %v1243_v29  ;;  %v925_v28 = vor.u32 %v1200_v20, %v922_v21  ;;  %v929_v29 = vor.u32 %v1203_v23, %v928_v22 }
  0x2c   :  { %729 = vmatpush.bf16.msrb.mxu3 %v1259_v30  ;;  %782 = vmatpush.bf16.msrb.mxu0 %v1263_v31  ;;  %v933_v30 = vor.u32 %v1201_v24, %v930_v25  ;;  %v937_v31 = vor.u32 %v1204_v27, %v936_v26  ;;  %v1225_v25 = vld [vmem:[%s1790_s0 + $0x11c] sm:$0xf]  ;;  %v1022_v26 = vld [vmem:[%s1790_s0 + $0x12c] sm:$0xf0]  ;;  %v1028_v27 = vld [vmem:[%s1790_s0 + $0x120] sm:$0xf] }
  0x2d   :  { %v1025_v36 = vor.u32 %v1225_v25, %v1022_v26 }
  0x2e   :  { %681 = vmatpush.bf16.msrb.mxu2 %v1250_v32  ;;  %632 = vmatpush.bf16.msrb.mxu1 %v1242_v33  ;;  %v1205_v32 = vld [vmem:[%s1790_s0 + $0x7c] sm:$0xf]  ;;  %v942_v33 = vld [vmem:[%s1790_s0 + $0x8c] sm:$0xf0] }
  0x2f   :  { %v945_v40 = vor.u32 %v1205_v32, %v942_v33  ;;  %v1229_v32 = vld [vmem:[%s1790_s0 + $0x138] sm:$0xf0] }
  0x30   :  { %730 = vmatpush.bf16.msrb.mxu3 %v1258_v34  ;;  %783 = vmatpush.bf16.msrb.mxu0 %v1262_v43  ;;  %v948_v34 = vld [vmem:[%s1790_s0 + $0x80] sm:$0xf]  ;;  %v957_v43 = vor.u32 %v1209_v39, %v956_v38 }
  0x31   :  { %603 = vmatmul.bf16.gmra.mxu1 %v941_v46  ;;  %613 = vmatmul.bf16.gmra.mxu2 %v981_v47  ;;  %v949_v41 = vor.u32 %v1208_v35, %v948_v34  ;;  %v968_v46 = vld [vmem:[%s1790_s0 + $0xa8] sm:$0xf]  ;;  %v1213_v47 = vld [vmem:[%s1790_s0 + $0xb8] sm:$0xf0] }
  0x32   :  { %682 = vmatpush.bf16.msrb.mxu2 %v1249_v44  ;;  %633 = vmatpush.bf16.msrb.mxu1 %v1241_v45  ;;  %v1210_v44 = vld [vmem:[%s1790_s0 + $0xa4] sm:$0xf]  ;;  %v962_v45 = vld [vmem:[%s1790_s0 + $0xb4] sm:$0xf0] }
  0x33   :  { %623 = vmatmul.bf16.gmra.mxu3 %v1021_v48  ;;  %593 = vmatmul.bf16.gmra.mxu0 %v901_v49  ;;  %v1211_v48 = vld [vmem:[%s1790_s0 + $0xac] sm:$0xf]  ;;  %v970_v49 = vld [vmem:[%s1790_s0 + $0xbc] sm:$0xf0] }
  0x34   :  { %731 = vmatpush.bf16.msrb.mxu3 %v1257_v50  ;;  %v976_v50 = vld [vmem:[%s1790_s0 + $0xb0] sm:$0xf] }
  0x36   :  { %683 = vmatpush.bf16.msrb.mxu2 %v1248_v51  ;;  %634 = vmatpush.bf16.msrb.mxu1 %v1240_v52  ;;  %v1214_v51 = vld [vmem:[%s1790_s0 + $0xc0] sm:$0xf0]  ;;  %v965_v52 = vor.u32 %v1210_v44, %v962_v45 }
  0x38   :  { %732 = vmatpush.bf16.msrb.mxu3 %v1256_v53  ;;  %v969_v53 = vor.u32 %v1213_v47, %v968_v46 }
  0x3a   :  { %684 = vmatpush.bf16.msrb.mxu2 %v1247_v54  ;;  %635 = vmatpush.bf16.msrb.mxu1 %v1239_v55  ;;  %v973_v54 = vor.u32 %v1211_v48, %v970_v49  ;;  %v977_v55 = vor.u32 %v1214_v51, %v976_v50 }
  0x3c   :  { %733 = vmatpush.bf16.msrb.mxu3 %v1255_v56  ;;  %v1215_v56 = vld [vmem:[%s1790_s0 + $0xcc] sm:$0xf] }
  0x3e   :  { %685 = vmatpush.bf16.msrb.mxu2 %v1246_v57  ;;  %636 = vmatpush.bf16.msrb.mxu1 %v1238_v58  ;;  %v982_v57 = vld [vmem:[%s1790_s0 + $0xdc] sm:$0xf0]  ;;  %v988_v58 = vld [vmem:[%s1790_s0 + $0xd0] sm:$0xf] }
  0x3f   :  { %v985_v0 = vor.u32 %v1215_v56, %v982_v57 }
  0x40   :  { %734 = vmatpush.bf16.msrb.mxu3 %v1254_v59  ;;  %v1218_v59 = vld [vmem:[%s1790_s0 + $0xe0] sm:$0xf0] }
  0x41   :  { %637 = vmatmul.bf16.vlgmr.msrb.gmra.mxu1 %v885_v4  ;;  %686 = vmatmul.bf16.vlgmr.msrb.gmra.mxu2 %v889_v5  ;;  %v989_v1 = vor.u32 %v1218_v59, %v988_v58  ;;  %v1220_v4 = vld [vmem:[%s1790_s0 + $0xf4] sm:$0xf]  ;;  %v1002_v5 = vld [vmem:[%s1790_s0 + $0x104] sm:$0xf0] }
  0x42   :  { %v1005_v12 = vor.u32 %v1220_v4, %v1002_v5 }
  0x43   :  { %735 = vmatmul.bf16.vlgmr.msrb.gmra.mxu3 %v893_v6  ;;  %1182 = vmatmul.msk.bf16.vlgmr.msrb.gmra.mxu0 %vm555_vm0, %v897_v7  ;;  %v1008_v6 = vld [vmem:[%s1790_s0 + $0xf8] sm:$0xf]  ;;  %v1223_v7 = vld [vmem:[%s1790_s0 + $0x108] sm:$0xf0] }
  0x44   :  { %v1009_v13 = vor.u32 %v1223_v7, %v1008_v6 }
  0x51   :  { %642 = vmatmul.bf16.gmra.mxu1 %v905_v16  ;;  %691 = vmatmul.bf16.gmra.mxu2 %v909_v17  ;;  %v1017_v16 = vor.u32 %v1224_v11, %v1016_v10 }
  0x53   :  { %740 = vmatmul.bf16.gmra.mxu3 %v913_v18  ;;  %1183 = vmatmul.msk.bf16.gmra.mxu0 %vm555_vm0, %v917_v19  ;;  %v1647_v18 = vld [vmem:[%s1789_s2] ss:$0 sm:$0xff] }
  0x61   :  { %647 = vmatmul.bf16.gmra.mxu1 %v925_v28  ;;  %696 = vmatmul.bf16.gmra.mxu2 %v929_v29  ;;  %v1228_v28 = vld [vmem:[%s1790_s0 + $0x130] sm:$0xf0]  ;;  %v1226_v29 = vld [vmem:[%s1790_s0 + $0x124] sm:$0xf] }
  0x62   :  { %v1029_v37 = vor.u32 %v1228_v28, %v1028_v27 }
  0x63   :  { %745 = vmatmul.bf16.gmra.mxu3 %v933_v30  ;;  %1184 = vmatmul.msk.bf16.gmra.mxu0 %vm555_vm0, %v937_v31  ;;  %v1030_v30 = vld [vmem:[%s1790_s0 + $0x134] sm:$0xf0]  ;;  %v1036_v31 = vld [vmem:[%s1790_s0 + $0x128] sm:$0xf] }
  0x71   :  { %652 = vmatmul.bf16.gmra.mxu1 %v945_v40  ;;  %701 = vmatmul.bf16.gmra.mxu2 %v949_v41  ;;  %v1033_v40 = vor.u32 %v1226_v29, %v1030_v30  ;;  %v1037_v41 = vor.u32 %v1229_v32, %v1036_v31 }
  0x73   :  { %750 = vmatmul.bf16.gmra.mxu3 %v953_v42  ;;  %1185 = vmatmul.msk.bf16.gmra.mxu0 %vm555_vm0, %v957_v43 }
  0x81   :  { %657 = vmatmul.bf16.gmra.mxu1 %v965_v52  ;;  %706 = vmatmul.bf16.gmra.mxu2 %v969_v53 }
  0x83   :  { %755 = vmatmul.bf16.gmra.mxu3 %v973_v54  ;;  %1186 = vmatmul.msk.bf16.gmra.mxu0 %vm555_vm0, %v977_v55 }
  0x91   :  { %662 = vmatmul.bf16.gmra.mxu1 %v985_v0  ;;  %711 = vmatmul.bf16.gmra.mxu2 %v989_v1 }
  0x93   :  { %760 = vmatmul.bf16.gmra.mxu3 %v993_v2  ;;  %1187 = vmatmul.msk.bf16.gmra.mxu0 %vm555_vm0, %v997_v3 }
  0x9e   :  { %v1641_v14 = vpop.f32.mrf.mxu1 }
  0xa0   :  { %v589_v17 = vpop.f32.mrf.mxu0 }
  0xa1   :  { %667 = vmatmul.bf16.gmra.mxu1 %v1005_v12  ;;  %716 = vmatmul.bf16.gmra.mxu2 %v1009_v13  ;;  %v590_v55 = vadd.f32 %v1647_v18, %v589_v17 }
  0xa3   :  { %765 = vmatmul.bf16.gmra.mxu3 %v1013_v15  ;;  %1188 = vmatmul.msk.bf16.gmra.mxu0 %vm555_vm0, %v1017_v16 }
  0xa4   :  { %v609_v19 = vpop.f32.mrf.mxu2 }
  0xa5   :  { %v1650_v20 = vadd.f32 %v1647_v18, %v609_v19 }
  0xa6   :  { %v619_v21 = vpop.f32.mrf.mxu3  ;;  %v1655_v23 = vpop.f32.mrf.mxu1 }
  0xa7   :  { %v1653_v22 = vadd.f32 %v1647_v18, %v619_v21 }
  0xa8   :  { %v591_v24 = vpop.f32.mrf.mxu0 }
  0xa9   :  { %v592_v63 = vadd.f32 %v1647_v18, %v591_v24 }
  0xac   :  { %v611_v33 = vpop.f32.mrf.mxu2 }
  0xad   :  { %v1682_v34 = vadd.f32 %v1647_v18, %v611_v33 }
  0xae   :  { %v621_v35 = vpop.f32.mrf.mxu3  ;;  %v1687_v39 = vpop.f32.mrf.mxu1 }
  0xaf   :  { %v1685_v38 = vadd.f32 %v1647_v18, %v621_v35 }
  0xb0   :  { %v594_v42 = vpop.f32.mrf.mxu0 }
  0xb1   :  { %672 = vmatmul.bf16.gmra.mxu1 %v1025_v36  ;;  %721 = vmatmul.bf16.gmra.mxu2 %v1029_v37  ;;  %v595_v10 = vadd.f32 %v1647_v18, %v594_v42 }
  0xb3   :  { %770 = vmatmul.bf16.gmra.mxu3 %v1033_v40  ;;  %1189 = vmatmul.msk.bf16.gmra.mxu0 %vm555_vm0, %v1037_v41  ;;  %v600_v40 = vadd.f32 %v1647_v18, %v1641_v14 }
  0xb4   :  { %v614_v43 = vpop.f32.mrf.mxu2 }
  0xb5   :  { %v1691_v44 = vadd.f32 %v1647_v18, %v614_v43 }
  0xb6   :  { %v624_v45 = vpop.f32.mrf.mxu3  ;;  %v1696_v47 = vpop.f32.mrf.mxu1 }
  0xb7   :  { %v1694_v46 = vadd.f32 %v1647_v18, %v624_v45 }
  0xb8   :  { %v596_v48 = vpop.f32.mrf.mxu0 }
  0xb9   :  { %v597_v26 = vadd.f32 %v1647_v18, %v596_v48 }
  0xbc   :  { %v616_v49 = vpop.f32.mrf.mxu2 }
  0xbd   :  { %v1699_v50 = vadd.f32 %v1647_v18, %v616_v49 }
  0xbe   :  { %v626_v51 = vpop.f32.mrf.mxu3  ;;  %v638_v53 = vpop.f32.mrf.mxu1 }
  0xbf   :  { %v1702_v52 = vadd.f32 %v1647_v18, %v626_v51  ;;  %v639_v56 = vadd.f32 %v638_v53, %v590_v55 }
  0xc0   :  { %v785_v54 = vpop.f32.mrf.mxu0 }
  0xc4   :  { %v687_v57 = vpop.f32.mrf.mxu2 }
  0xc5   :  { %v688_v58 = vadd.f32 %v687_v57, %v639_v56  ;;  %v602_v56 = vadd.f32 %v1647_v18, %v1655_v23 }
  0xc6   :  { %v736_v59 = vpop.f32.mrf.mxu3  ;;  %v640_v60 = vpop.f32.mrf.mxu1 }
  0xc7   :  { %v737_v61 = vadd.f32 %v736_v59, %v688_v58  ;;  %v641_v2 = vadd.f32 %v640_v60, %v592_v63 }
  0xc8   :  { %v787_v62 = vpop.f32.mrf.mxu0 }
  0xc9   :  { %v786_v0 = vadd.f32 %v785_v54, %v737_v61 }
  0xcb   :  { %v825_v1 = vmax.f32 %v786_v0, 0.0 }
  0xcc   :  { %v689_v3 = vpop.f32.mrf.mxu2 }
  0xcd   :  { %v841_v4 = vpack.c.bf16 %v825_v1, %v825_v1  ;;  %v690_v5 = vadd.f32 %v689_v3, %v641_v2  ;;  %v605_v2 = vadd.f32 %v1647_v18, %v1687_v39 }
  0xce   :  { %v738_v6 = vpop.f32.mrf.mxu3  ;;  %v643_v7 = vpop.f32.mrf.mxu1 }
  0xcf   :  { %858 = vst.msk [vmem:[%s1791_s3] sm:$0xf] %vm857_vm1, %v841_v4  ;;  %v739_v8 = vadd.f32 %v738_v6, %v690_v5  ;;  %v644_v13 = vadd.f32 %v643_v7, %v595_v10 }
  0xd0   :  { %v790_v9 = vpop.f32.mrf.mxu0 }
  0xd1   :  { %v788_v11 = vadd.f32 %v787_v62, %v739_v8 }
  0xd3   :  { %v826_v12 = vmax.f32 %v788_v11, 0.0 }
  0xd4   :  { %v692_v15 = vpop.f32.mrf.mxu2 }
  0xd5   :  { %v842_v16 = vpack.c.bf16 %v826_v12, %v826_v12  ;;  %v693_v17 = vadd.f32 %v692_v15, %v644_v13  ;;  %v607_v12 = vadd.f32 %v1647_v18, %v1696_v47 }
  0xd6   :  { %v741_v19 = vpop.f32.mrf.mxu3  ;;  %v645_v21 = vpop.f32.mrf.mxu1 }
  0xd7   :  { %859 = vst.msk [vmem:[%s1791_s3 + $0x4] sm:$0xf] %vm857_vm1, %v842_v16  ;;  %v742_v24 = vadd.f32 %v741_v19, %v693_v17  ;;  %v646_v29 = vadd.f32 %v645_v21, %v597_v26 }
  0xd8   :  { %v792_v25 = vpop.f32.mrf.mxu0 }
  0xd9   :  { %v791_v27 = vadd.f32 %v790_v9, %v742_v24 }
  0xdb   :  { %v827_v28 = vmax.f32 %v791_v27, 0.0 }
  0xdc   :  { %v694_v30 = vpop.f32.mrf.mxu2 }
  0xdd   :  { %v843_v31 = vpack.c.bf16 %v827_v28, %v827_v28  ;;  %v695_v32 = vadd.f32 %v694_v30, %v646_v29 }
  0xde   :  { %v743_v33 = vpop.f32.mrf.mxu3  ;;  %v648_v35 = vpop.f32.mrf.mxu1 }
  0xdf   :  { %860 = vst.msk [vmem:[%s1791_s3 + $0x8] sm:$0xf] %vm857_vm1, %v843_v31  ;;  %v744_v36 = vadd.f32 %v743_v33, %v695_v32  ;;  %v649_v43 = vadd.f32 %v648_v35, %v600_v40 }
  0xe0   :  { %v795_v37 = vpop.f32.mrf.mxu0 }
  0xe1   :  { %v793_v41 = vadd.f32 %v792_v25, %v744_v36 }
  0xe3   :  { %v828_v42 = vmax.f32 %v793_v41, 0.0 }
  0xe4   :  { %v697_v45 = vpop.f32.mrf.mxu2 }
  0xe5   :  { %v844_v48 = vpack.c.bf16 %v828_v42, %v828_v42  ;;  %v698_v49 = vadd.f32 %v697_v45, %v649_v43 }
  0xe6   :  { %v746_v51 = vpop.f32.mrf.mxu3  ;;  %v650_v53 = vpop.f32.mrf.mxu1 }
  0xe7   :  { %861 = vst.msk [vmem:[%s1791_s3 + $0xc] sm:$0xf] %vm857_vm1, %v844_v48  ;;  %v747_v54 = vadd.f32 %v746_v51, %v698_v49  ;;  %v651_v58 = vadd.f32 %v650_v53, %v602_v56 }
  0xe8   :  { %v797_v55 = vpop.f32.mrf.mxu0 }
  0xe9   :  { %v796_v57 = vadd.f32 %v795_v37, %v747_v54 }
  0xeb   :  { %v829_v14 = vmax.f32 %v796_v57, 0.0 }
  0xec   :  { %v699_v59 = vpop.f32.mrf.mxu2 }
  0xed   :  { %v845_v60 = vpack.c.bf16 %v829_v14, %v829_v14  ;;  %v700_v61 = vadd.f32 %v699_v59, %v651_v58 }
  0xee   :  { %v748_v62 = vpop.f32.mrf.mxu3  ;;  %v653_v63 = vpop.f32.mrf.mxu1 }
  0xef   :  { %862 = vst.msk [vmem:[%s1791_s3 + $0x10] sm:$0xf] %vm857_vm1, %v845_v60  ;;  %v749_v0 = vadd.f32 %v748_v62, %v700_v61  ;;  %v654_v4 = vadd.f32 %v653_v63, %v605_v2 }
  0xf0   :  { %v800_v1 = vpop.f32.mrf.mxu0 }
  0xf1   :  { %v798_v3 = vadd.f32 %v797_v55, %v749_v0 }
  0xf3   :  { %v830_v23 = vmax.f32 %v798_v3, 0.0 }
  0xf4   :  { %v702_v5 = vpop.f32.mrf.mxu2 }
  0xf5   :  { %v846_v6 = vpack.c.bf16 %v830_v23, %v830_v23  ;;  %v703_v7 = vadd.f32 %v702_v5, %v654_v4 }
  0xf6   :  { %v751_v8 = vpop.f32.mrf.mxu3  ;;  %v655_v9 = vpop.f32.mrf.mxu1 }
  0xf7   :  { %863 = vst.msk [vmem:[%s1791_s3 + $0x14] sm:$0xf] %vm857_vm1, %v846_v6  ;;  %v752_v10 = vadd.f32 %v751_v8, %v703_v7  ;;  %v656_v15 = vadd.f32 %v655_v9, %v607_v12 }
  0xf8   :  { %v802_v11 = vpop.f32.mrf.mxu0 }
  0xf9   :  { %v801_v13 = vadd.f32 %v800_v1, %v752_v10 }
  0xfb   :  { %v831_v39 = vmax.f32 %v801_v13, 0.0 }
  0xfc   :  { %v704_v16 = vpop.f32.mrf.mxu2 }
  0xfd   :  { %v847_v17 = vpack.c.bf16 %v831_v39, %v831_v39  ;;  %v705_v19 = vadd.f32 %v704_v16, %v656_v15 }
  0xfe   :  { %v753_v21 = vpop.f32.mrf.mxu3  ;;  %v658_v24 = vpop.f32.mrf.mxu1 }
  0xff   :  { %864 = vst.msk [vmem:[%s1791_s3 + $0x18] sm:$0xf] %vm857_vm1, %v847_v17  ;;  %v754_v25 = vadd.f32 %v753_v21, %v705_v19  ;;  %v659_v29 = vadd.f32 %v658_v24, %v1650_v20 }
 0x100   :  { %v805_v26 = vpop.f32.mrf.mxu0 }
 0x101   :  { %v803_v27 = vadd.f32 %v802_v11, %v754_v25 }
 0x103   :  { %v832_v28 = vmax.f32 %v803_v27, 0.0 }
 0x104   :  { %v707_v18 = vpop.f32.mrf.mxu2 }
 0x105   :  { %v848_v47 = vpack.c.bf16 %v832_v28, %v832_v28  ;;  %v708_v30 = vadd.f32 %v707_v18, %v659_v29 }
 0x106   :  { %v756_v31 = vpop.f32.mrf.mxu3  ;;  %v660_v32 = vpop.f32.mrf.mxu1 }
 0x107   :  { %865 = vst.msk [vmem:[%s1791_s3 + $0x1c] sm:$0xf] %vm857_vm1, %v848_v47  ;;  %v757_v33 = vadd.f32 %v756_v31, %v708_v30  ;;  %v661_v40 = vadd.f32 %v660_v32, %v1682_v34 }
 0x108   :  { %v807_v35 = vpop.f32.mrf.mxu0 }
 0x109   :  { %v806_v36 = vadd.f32 %v805_v26, %v757_v33 }
 0x10b   :  { %v833_v37 = vmax.f32 %v806_v36, 0.0 }
 0x10c   :  { %v709_v41 = vpop.f32.mrf.mxu2 }
 0x10d   :  { %v849_v42 = vpack.c.bf16 %v833_v37, %v833_v37  ;;  %v710_v43 = vadd.f32 %v709_v41, %v661_v40 }
 0x10e   :  { %v758_v20 = vpop.f32.mrf.mxu3  ;;  %v663_v45 = vpop.f32.mrf.mxu1 }
 0x10f   :  { %866 = vst.msk [vmem:[%s1791_s3 + $0x20] sm:$0xf] %vm857_vm1, %v849_v42  ;;  %v759_v48 = vadd.f32 %v758_v20, %v710_v43  ;;  %v664_v54 = vadd.f32 %v663_v45, %v1691_v44 }
 0x110   :  { %v810_v49 = vpop.f32.mrf.mxu0 }
 0x111   :  { %v808_v51 = vadd.f32 %v807_v35, %v759_v48 }
 0x113   :  { %v834_v53 = vmax.f32 %v808_v51, 0.0 }
 0x114   :  { %v712_v55 = vpop.f32.mrf.mxu2 }
 0x115   :  { %v850_v56 = vpack.c.bf16 %v834_v53, %v834_v53  ;;  %v713_v57 = vadd.f32 %v712_v55, %v664_v54 }
 0x116   :  { %v761_v34 = vpop.f32.mrf.mxu3  ;;  %v665_v14 = vpop.f32.mrf.mxu1 }
 0x117   :  { %867 = vst.msk [vmem:[%s1791_s3 + $0x24] sm:$0xf] %vm857_vm1, %v850_v56  ;;  %v762_v58 = vadd.f32 %v761_v34, %v713_v57  ;;  %v666_v62 = vadd.f32 %v665_v14, %v1699_v50 }
 0x118   :  { %v812_v59 = vpop.f32.mrf.mxu0 }
 0x119   :  { %v811_v60 = vadd.f32 %v810_v49, %v762_v58 }
 0x11b   :  { %v835_v61 = vmax.f32 %v811_v60, 0.0 }
 0x11c   :  { %v714_v63 = vpop.f32.mrf.mxu2 }
 0x11d   :  { %v851_v0 = vpack.c.bf16 %v835_v61, %v835_v61  ;;  %v715_v1 = vadd.f32 %v714_v63, %v666_v62 }
 0x11e   :  { %v763_v44 = vpop.f32.mrf.mxu3  ;;  %v668_v2 = vpop.f32.mrf.mxu1 }
 0x11f   :  { %868 = vst.msk [vmem:[%s1791_s3 + $0x28] sm:$0xf] %vm857_vm1, %v851_v0  ;;  %v764_v3 = vadd.f32 %v763_v44, %v715_v1  ;;  %v669_v6 = vadd.f32 %v668_v2, %v1653_v22 }
 0x120   :  { %v815_v4 = vpop.f32.mrf.mxu0 }
 0x121   :  { %v813_v23 = vadd.f32 %v812_v59, %v764_v3 }
 0x123   :  { %v836_v5 = vmax.f32 %v813_v23, 0.0 }
 0x124   :  { %v717_v7 = vpop.f32.mrf.mxu2 }
 0x125   :  { %v852_v8 = vpack.c.bf16 %v836_v5, %v836_v5  ;;  %v718_v9 = vadd.f32 %v717_v7, %v669_v6 }
 0x126   :  { %v766_v50 = vpop.f32.mrf.mxu3  ;;  %v670_v10 = vpop.f32.mrf.mxu1 }
 0x127   :  { %869 = vst.msk [vmem:[%s1791_s3 + $0x2c] sm:$0xf] %vm857_vm1, %v852_v8  ;;  %v767_v11 = vadd.f32 %v766_v50, %v718_v9  ;;  %v671_v39 = vadd.f32 %v670_v10, %v1685_v38 }
 0x128   :  { %v817_v15 = vpop.f32.mrf.mxu0 }
 0x129   :  { %v816_v12 = vadd.f32 %v815_v4, %v767_v11 }
 0x12b   :  { %v837_v13 = vmax.f32 %v816_v12, 0.0 }
 0x12c   :  { %v719_v16 = vpop.f32.mrf.mxu2 }
 0x12d   :  { %v853_v17 = vpack.c.bf16 %v837_v13, %v837_v13  ;;  %v720_v19 = vadd.f32 %v719_v16, %v671_v39 }
 0x12e   :  { %v768_v22 = vpop.f32.mrf.mxu3  ;;  %v673_v21 = vpop.f32.mrf.mxu1 }
 0x12f   :  { %870 = vst.msk [vmem:[%s1791_s3 + $0x30] sm:$0xf] %vm857_vm1, %v853_v17  ;;  %v769_v24 = vadd.f32 %v768_v22, %v720_v19  ;;  %v674_v27 = vadd.f32 %v673_v21, %v1694_v46 }
 0x130   :  { %v820_v47 = vpop.f32.mrf.mxu0 }
 0x131   :  { %v818_v25 = vadd.f32 %v817_v15, %v769_v24 }
 0x133   :  { %v838_v26 = vmax.f32 %v818_v25, 0.0 }
 0x134   :  { %v722_v28 = vpop.f32.mrf.mxu2 }
 0x135   :  { %v854_v29 = vpack.c.bf16 %v838_v26, %v838_v26  ;;  %v723_v18 = vadd.f32 %v722_v28, %v674_v27 }
 0x136   :  { %v771_v38 = vpop.f32.mrf.mxu3  ;;  %v675_v31 = vpop.f32.mrf.mxu1 }
 0x137   :  { %871 = vst.msk [vmem:[%s1791_s3 + $0x34] sm:$0xf] %vm857_vm1, %v854_v29  ;;  %v772_v30 = vadd.f32 %v771_v38, %v723_v18  ;;  %v676_v35 = vadd.f32 %v675_v31, %v1702_v52 }
 0x138   :  { %v822_v42 = vpop.f32.mrf.mxu0 }
 0x139   :  { %v821_v32 = vadd.f32 %v820_v47, %v772_v30 }
 0x13b   :  { %v839_v33 = vmax.f32 %v821_v32, 0.0 }
 0x13c   :  { %v724_v36 = vpop.f32.mrf.mxu2 }
 0x13d   :  { %v855_v37 = vpack.c.bf16 %v839_v33, %v839_v33  ;;  %v725_v40 = vadd.f32 %v724_v36, %v676_v35 }
 0x13e   :  { %v773_v46 = vpop.f32.mrf.mxu3 }
 0x13f   :  { %872 = vst.msk [vmem:[%s1791_s3 + $0x38] sm:$0xf] %vm857_vm1, %v855_v37  ;;  %v774_v41 = vadd.f32 %v773_v46, %v725_v40 }
 0x141   :  { %v823_v43 = vadd.f32 %v822_v42, %v774_v41 }
 0x143   :  { %v840_v20 = vmax.f32 %v823_v43, 0.0 }
 0x145   :  { %v856_v45 = vpack.c.bf16 %v840_v20, %v840_v20 }
 0x147   :  { %873 = vst.msk [vmem:[%s1791_s3 + $0x3c] sm:$0xf] %vm857_vm1, %v856_v45 }

// kernel: hrnet_forward.56
= control target key start
LH: loop header
LB: loop body
LE: loop exit
PB: predicated region body
PF: predicated region fallthrough
CT: control target
= control target key end

     0   :  { %s464_s12 = smov 0   ;;  %s517_s0 = inlined_call_operand.vmem [shape: bf16[2,64,64], index: 0, kind: input, shape index: {}]   ;;  %s518_s1 = inlined_call_operand.vmem [shape: bf16[64,8], index: 1, kind: input, shape index: {}]   ;;  %s519_s2 = inlined_call_operand.vmem [shape: f32[1,8], index: 2, kind: input, shape index: {}]   ;;  %s520_s3 = inlined_call_operand.vmem [shape: bf16[2,64,8], index: 3, kind: output, shape index: {}]  }
   0x1 LB: > { %s358_s13 = sadd.s32 4294967295, %s442_s12   ;;  %p362_p0 = scmp.ge.s32.totalorder %s442_s12, 1  ;;  %s442_s12 = sphi %s464_s12, %s13_s12  }
   0x2   : > { %p137_p1 = scmp.lt.s32.totalorder %s442_s12, 3 }
   0x4   : > { %p138_p2 = pnand %p362_p0, %p137_p1 }
   0x5   : > { %p161_p3 = scmp.lt.s32.totalorder (!%p138_p2), %s358_s13, 1 }
   0x6   : > { %141 = sbr.rel (%p138_p2) target bundleno = 176 (0xb0), region = 32 }
   0xb   : > { %v414_v0 = vld [vmem:[%s518_s1 + $0x18] sm:$0xff]  ;;  %v413_v1 = vld [vmem:[%s518_s1 + $0x10] sm:$0xff]  ;;  %s522_s13 = smov (!%p161_p3, %s358_s13), 1  ;;  %v412_v2 = vld [vmem:[%s518_s1 + $0x8] sm:$0xff]  ;;  %vm236_vm0 = vcmask 523264   ;;  %vm294_vm1 = vcmask 60416  }
   0xc   : > { %253 = vmatpush.bf16.msra.mxu0 %v414_v0  ;;  %415 = vmatpush.bf16.msra.mxu1 %v414_v0  ;;  %s405_s20 = sshll.u32 %s522_s13, 5  ;;  %v411_v3 = vld [vmem:[%s518_s1] sm:$0xff] }
   0xd   : > { %416 = vmatpush.bf16.msra.mxu2 %v414_v0  ;;  %417 = vmatpush.bf16.msra.mxu3 %v414_v0  ;;  %s165_s25 = scalar_lea.vmem %s517_s0, %s405_s20  ;;  %v435_v8 = vld [vmem:[%s519_s2] ss:$0 sm:$0xff]  ;;  %s496_s30 = scalar_lea.vmem %s520_s3, %s405_s20 }
   0xe   : > { %v407_v4 = vld [vmem:[%s165_s25] sm:$0xff]  ;;  %v408_v5 = vld [vmem:[%s165_s25 + $0x8] sm:$0xff]  ;;  %v409_v6 = vld [vmem:[%s165_s25 + $0x10] sm:$0xff] }
   0xf   : > { %v410_v7 = vld [vmem:[%s165_s25 + $0x18] sm:$0xff] }
  0x10   : > { %254 = vmatpush.bf16.msra.mxu0 %v413_v1  ;;  %418 = vmatpush.bf16.msra.mxu1 %v413_v1 }
  0x11   : > { %419 = vmatpush.bf16.msra.mxu2 %v413_v1  ;;  %420 = vmatpush.bf16.msra.mxu3 %v413_v1 }
  0x14   : > { %255 = vmatpush.bf16.msra.mxu0 %v412_v2  ;;  %421 = vmatpush.bf16.msra.mxu1 %v412_v2 }
  0x15   : > { %422 = vmatpush.bf16.msra.mxu2 %v412_v2  ;;  %423 = vmatpush.bf16.msra.mxu3 %v412_v2 }
  0x18   : > { %256 = vmatpush.bf16.msra.mxu0 %v411_v3  ;;  %424 = vmatpush.bf16.msra.mxu1 %v411_v3 }
  0x19   : > { %425 = vmatpush.bf16.msra.mxu2 %v411_v3  ;;  %426 = vmatpush.bf16.msra.mxu3 %v411_v3 }
  0x1b   : > { %399 = vmatmul.msk.bf16.vlgmr.msra.gmra.mxu0 %vm236_vm0, %v407_v4  ;;  %400 = vmatmul.msk.bf16.vlgmr.msra.gmra.mxu1 %vm236_vm0, %v408_v5 }
  0x1c   : > { %401 = vmatmul.msk.bf16.vlgmr.msra.gmra.mxu2 %vm236_vm0, %v409_v6  ;;  %402 = vmatmul.msk.bf16.vlgmr.msra.gmra.mxu3 %vm236_vm0, %v410_v7 }
  0x98   : > { %v258_v9 = vpop.f32.mrf.mxu0  ;;  %v263_v10 = vpop.f32.mrf.mxu1 }
  0x99   : > { %v259_v11 = vadd.f32 %v435_v8, %v258_v9  ;;  %v264_v12 = vadd.f32 %v435_v8, %v263_v10 }
  0x9b   : > { %v278_v13 = vmax.f32 %v259_v11, 0.0  ;;  %v280_v14 = vmax.f32 %v264_v12, 0.0 }
  0x9d   : > { %v286_v15 = vpack.c.bf16 %v278_v13, %v278_v13  ;;  %v288_v16 = vpack.c.bf16 %v280_v14, %v280_v14 }
  0x9f   : > { %295 = vst.msk [vmem:[%s496_s30] sm:$0xf] %vm294_vm1, %v286_v15  ;;  %v268_v17 = vpop.f32.mrf.mxu2  ;;  %v273_v18 = vpop.f32.mrf.mxu3 }
  0xa0   : > { %297 = vst.msk [vmem:[%s496_s30 + $0x8] sm:$0xf] %vm294_vm1, %v288_v16  ;;  %v269_v19 = vadd.f32 %v435_v8, %v268_v17  ;;  %v274_v20 = vadd.f32 %v435_v8, %v273_v18  ;;  %v260_v21 = vpop.f32.mrf.mxu0  ;;  %v265_v22 = vpop.f32.mrf.mxu1 }
  0xa1   : > { %v261_v23 = vadd.f32 %v435_v8, %v260_v21  ;;  %v266_v24 = vadd.f32 %v435_v8, %v265_v22 }
  0xa2   : > { %v282_v25 = vmax.f32 %v269_v19, 0.0  ;;  %v284_v26 = vmax.f32 %v274_v20, 0.0 }
  0xa3   : > { %v279_v27 = vmax.f32 %v261_v23, 0.0  ;;  %v281_v28 = vmax.f32 %v266_v24, 0.0 }
  0xa4   : > { %v290_v29 = vpack.c.bf16 %v282_v25, %v282_v25  ;;  %v292_v30 = vpack.c.bf16 %v284_v26, %v284_v26 }
  0xa5   : > { %v287_v31 = vpack.c.bf16 %v279_v27, %v279_v27  ;;  %v289_v32 = vpack.c.bf16 %v281_v28, %v281_v28 }
  0xa6   : > { %299 = vst.msk [vmem:[%s496_s30 + $0x10] sm:$0xf] %vm294_vm1, %v290_v29 }
  0xa7   : > { %301 = vst.msk [vmem:[%s496_s30 + $0x18] sm:$0xf] %vm294_vm1, %v292_v30  ;;  %v270_v33 = vpop.f32.mrf.mxu2  ;;  %v275_v34 = vpop.f32.mrf.mxu3 }
  0xa8   : > { %296 = vst.msk [vmem:[%s496_s30 + $0x4] sm:$0xf] %vm294_vm1, %v287_v31  ;;  %v271_v35 = vadd.f32 %v435_v8, %v270_v33  ;;  %v276_v36 = vadd.f32 %v435_v8, %v275_v34 }
  0xa9   : > { %298 = vst.msk [vmem:[%s496_s30 + $0xc] sm:$0xf] %vm294_vm1, %v289_v32 }
  0xaa   : > { %v283_v37 = vmax.f32 %v271_v35, 0.0  ;;  %v285_v38 = vmax.f32 %v276_v36, 0.0 }
  0xac   : > { %v291_v39 = vpack.c.bf16 %v283_v37, %v283_v37  ;;  %v293_v40 = vpack.c.bf16 %v285_v38, %v285_v38 }
  0xae   : > { %300 = vst.msk [vmem:[%s496_s30 + $0x14] sm:$0xf] %vm294_vm1, %v291_v39 }
  0xaf   : > { %302 = vst.msk [vmem:[%s496_s30 + $0x1c] sm:$0xf] %vm294_vm1, %v293_v40 }
  0xb0 PF: > { %s13_s12 = sadd.s32 1, %s442_s12  }
  0xb1   : > { %p10_p4 = scmp.ge.s32.totalorder %s13_s12, 4  }
  0xb3   :  { %12 = sbr.rel (!%p10_p4) target bundleno = 1 (0x1), region = 62 }

// kernel: hrnet_forward.55
= control target key start
LH: loop header
LB: loop body
LE: loop exit
PB: predicated region body
PF: predicated region fallthrough
CT: control target
= control target key end

     0   :  { %s456_s12 = smov 0   ;;  %s499_s0 = inlined_call_operand.vmem [shape: bf16[2,64,64], index: 0, kind: input, shape index: {}]   ;;  %s500_s1 = inlined_call_operand.vmem [shape: bf16[64,32], index: 1, kind: input, shape index: {}]   ;;  %s501_s2 = inlined_call_operand.vmem [shape: f32[1,32], index: 2, kind: input, shape index: {}]   ;;  %s502_s3 = inlined_call_operand.vmem [shape: bf16[2,64,32], index: 3, kind: output, shape index: {}]  }
   0x1 LB: > { %s350_s13 = sadd.s32 4294967295, %s434_s12   ;;  %p354_p0 = scmp.ge.s32.totalorder %s434_s12, 1  ;;  %s434_s12 = sphi %s456_s12, %s13_s12  }
   0x2   : > { %p137_p1 = scmp.lt.s32.totalorder %s434_s12, 3 }
   0x4   : > { %p138_p2 = pnand %p354_p0, %p137_p1 }
   0x5   : > { %p161_p3 = scmp.lt.s32.totalorder (!%p138_p2), %s350_s13, 1 }
   0x6   : > { %141 = sbr.rel (%p138_p2) target bundleno = 174 (0xae), region = 32 }
   0xb   : > { %v406_v0 = vld [vmem:[%s500_s1 + $0x18] sm:$0xff]  ;;  %v405_v1 = vld [vmem:[%s500_s1 + $0x10] sm:$0xff]  ;;  %s504_s13 = smov (!%p161_p3, %s350_s13), 1  ;;  %v404_v2 = vld [vmem:[%s500_s1 + $0x8] sm:$0xff]  ;;  %vm236_vm0 = vcmask 523264   ;;  %vm286_vm1 = vcmask 257024  }
   0xc   : > { %253 = vmatpush.bf16.msra.mxu0 %v406_v0  ;;  %407 = vmatpush.bf16.msra.mxu1 %v406_v0  ;;  %s397_s20 = sshll.u32 %s504_s13, 5  ;;  %v403_v3 = vld [vmem:[%s500_s1] sm:$0xff] }
   0xd   : > { %408 = vmatpush.bf16.msra.mxu2 %v406_v0  ;;  %409 = vmatpush.bf16.msra.mxu3 %v406_v0  ;;  %s165_s25 = scalar_lea.vmem %s499_s0, %s397_s20  ;;  %v427_v8 = vld [vmem:[%s501_s2] ss:$0 sm:$0xff]  ;;  %s170_s30 = scalar_lea.vmem %s502_s3, %s397_s20 }
   0xe   : > { %v399_v4 = vld [vmem:[%s165_s25] sm:$0xff]  ;;  %v400_v5 = vld [vmem:[%s165_s25 + $0x8] sm:$0xff]  ;;  %v401_v6 = vld [vmem:[%s165_s25 + $0x10] sm:$0xff] }
   0xf   : > { %v402_v7 = vld [vmem:[%s165_s25 + $0x18] sm:$0xff] }
  0x10   : > { %254 = vmatpush.bf16.msra.mxu0 %v405_v1  ;;  %410 = vmatpush.bf16.msra.mxu1 %v405_v1 }
  0x11   : > { %411 = vmatpush.bf16.msra.mxu2 %v405_v1  ;;  %412 = vmatpush.bf16.msra.mxu3 %v405_v1 }
  0x14   : > { %255 = vmatpush.bf16.msra.mxu0 %v404_v2  ;;  %413 = vmatpush.bf16.msra.mxu1 %v404_v2 }
  0x15   : > { %414 = vmatpush.bf16.msra.mxu2 %v404_v2  ;;  %415 = vmatpush.bf16.msra.mxu3 %v404_v2 }
  0x18   : > { %256 = vmatpush.bf16.msra.mxu0 %v403_v3  ;;  %416 = vmatpush.bf16.msra.mxu1 %v403_v3 }
  0x19   : > { %417 = vmatpush.bf16.msra.mxu2 %v403_v3  ;;  %418 = vmatpush.bf16.msra.mxu3 %v403_v3 }
  0x1b   : > { %391 = vmatmul.msk.bf16.vlgmr.msra.gmra.mxu0 %vm236_vm0, %v399_v4  ;;  %392 = vmatmul.msk.bf16.vlgmr.msra.gmra.mxu1 %vm236_vm0, %v400_v5 }
  0x1c   : > { %393 = vmatmul.msk.bf16.vlgmr.msra.gmra.mxu2 %vm236_vm0, %v401_v6  ;;  %394 = vmatmul.msk.bf16.vlgmr.msra.gmra.mxu3 %vm236_vm0, %v402_v7 }
  0x98   : > { %v258_v9 = vpop.f32.mrf.mxu0  ;;  %v263_v10 = vpop.f32.mrf.mxu1 }
  0x99   : > { %v259_v11 = vadd.f32 %v427_v8, %v258_v9  ;;  %v264_v12 = vadd.f32 %v427_v8, %v263_v10 }
  0x9b   : > { %v278_v13 = vpack.c.bf16 %v259_v11, %v259_v11  ;;  %v280_v14 = vpack.c.bf16 %v264_v12, %v264_v12 }
  0x9d   : > { %287 = vst.msk [vmem:[%s170_s30] sm:$0xf] %vm286_vm1, %v278_v13 }
  0x9e   : > { %289 = vst.msk [vmem:[%s170_s30 + $0x8] sm:$0xf] %vm286_vm1, %v280_v14 }
  0x9f   : > { %v268_v15 = vpop.f32.mrf.mxu2  ;;  %v273_v16 = vpop.f32.mrf.mxu3 }
  0xa0   : > { %v269_v17 = vadd.f32 %v427_v8, %v268_v15  ;;  %v274_v18 = vadd.f32 %v427_v8, %v273_v16  ;;  %v260_v19 = vpop.f32.mrf.mxu0  ;;  %v265_v20 = vpop.f32.mrf.mxu1 }
  0xa1   : > { %v261_v21 = vadd.f32 %v427_v8, %v260_v19  ;;  %v266_v22 = vadd.f32 %v427_v8, %v265_v20 }
  0xa2   : > { %v282_v23 = vpack.c.bf16 %v269_v17, %v269_v17  ;;  %v284_v24 = vpack.c.bf16 %v274_v18, %v274_v18 }
  0xa3   : > { %v279_v25 = vpack.c.bf16 %v261_v21, %v261_v21  ;;  %v281_v26 = vpack.c.bf16 %v266_v22, %v266_v22 }
  0xa4   : > { %291 = vst.msk [vmem:[%s170_s30 + $0x10] sm:$0xf] %vm286_vm1, %v282_v23 }
  0xa5   : > { %293 = vst.msk [vmem:[%s170_s30 + $0x18] sm:$0xf] %vm286_vm1, %v284_v24 }
  0xa6   : > { %288 = vst.msk [vmem:[%s170_s30 + $0x4] sm:$0xf] %vm286_vm1, %v279_v25 }
  0xa7   : > { %290 = vst.msk [vmem:[%s170_s30 + $0xc] sm:$0xf] %vm286_vm1, %v281_v26  ;;  %v270_v27 = vpop.f32.mrf.mxu2  ;;  %v275_v28 = vpop.f32.mrf.mxu3 }
  0xa8   : > { %v271_v29 = vadd.f32 %v427_v8, %v270_v27  ;;  %v276_v30 = vadd.f32 %v427_v8, %v275_v28 }
  0xaa   : > { %v283_v31 = vpack.c.bf16 %v271_v29, %v271_v29  ;;  %v285_v32 = vpack.c.bf16 %v276_v30, %v276_v30 }
  0xac   : > { %292 = vst.msk [vmem:[%s170_s30 + $0x14] sm:$0xf] %vm286_vm1, %v283_v31 }
  0xad   : > { %294 = vst.msk [vmem:[%s170_s30 + $0x1c] sm:$0xf] %vm286_vm1, %v285_v32 }
  0xae PF: > { %s13_s12 = sadd.s32 1, %s434_s12  }
  0xaf   : > { %p10_p4 = scmp.ge.s32.totalorder %s13_s12, 4  }
  0xb1   :  { %12 = sbr.rel (!%p10_p4) target bundleno = 1 (0x1), region = 62 }

// kernel: hrnet_forward.57
= control target key start
LH: loop header
LB: loop body
LE: loop exit
PB: predicated region body
PF: predicated region fallthrough
CT: control target
= control target key end

     0   :  { %s949_s12 = smov 0   ;;  %s1329_s0 = inlined_call_operand.vmem [shape: bf16[2,102,8], index: 0, kind: input, shape index: {}]   ;;  %s1330_s1 = inlined_call_operand.vmem [shape: bf16[72,8], index: 1, kind: input, shape index: {}]   ;;  %s1331_s2 = inlined_call_operand.vmem [shape: f32[1,8], index: 2, kind: input, shape index: {}]   ;;  %s1332_s3 = inlined_call_operand.vmem [shape: bf16[2,80,8], index: 3, kind: output, shape index: {}]  }
   0x1 LB: > { %s797_s13 = sadd.s32 4294967295, %s919_s12   ;;  %p801_p0 = scmp.ge.s32.totalorder %s919_s12, 1  ;;  %s919_s12 = sphi %s949_s12, %s13_s12  }
   0x2   : > { %p137_p1 = scmp.lt.s32.totalorder %s919_s12, 3 }
   0x4   : > { %p138_p2 = pnand %p801_p0, %p137_p1 }
   0x5   : > { %p161_p3 = scmp.lt.s32.totalorder (!%p138_p2), %s797_s13, 1  ;;  %s921_s18 = smov (!%p138_p2), 16  }
   0x6   : > { %141 = sbr.rel (%p138_p2) target bundleno = 380 (0x17c), region = 32  ;;  %s922_s19 = smov (!%p138_p2), 24  }
   0x7   : > { %s923_s20 = smov (!%p138_p2), 8   ;;  %s924_s21 = smov (!%p138_p2), 40  }
   0x8   : > { %s925_s22 = smov (!%p138_p2), 64   ;;  %s926_s23 = smov (!%p138_p2), 56  }
   0x9   : > { %s927_s24 = smov (!%p138_p2), 48   ;;  %s928_s25 = smov (!%p138_p2), 32  }
   0xb   : > { %s1334_s13 = smov (!%p161_p3, %s797_s13), 1  ;;  %vm280_vm0 = vcmask 1046528   ;;  %vm222_vm1 = vsmask.f32 7424  ;;  %vm405_vm2 = vcmask 1045504   ;;  %vm512_vm3 = vcmask 1044480  }
   0xc   : > { %s887_s14 = smul.u32 52, %s1334_s13  ;;  %vm460_vm4 = vsmask.f32 5376  ;;  %vm338_vm5 = vsmask.f32 6400  ;;  %vm673_vm6 = vcmask 1043456  }
   0xd   : > { %vm534_vm7 = vcmask 64512   ;;  %vm545_vm8 = vcmask 130048   ;;  %vm556_vm9 = vcmask 195584   ;;  %vm567_vm10 = vcmask 261120   ;;  %s888_s11 = smul.u32 40, %s1334_s13 }
   0xe   : > { %s963_s17 = scalar_lea.vmem %s1329_s0, %s887_s14  ;;  %vm578_vm11 = vcmask 326656   ;;  %vm589_vm12 = vcmask 392192   ;;  %vm600_vm13 = vcmask 457728   ;;  %vm611_vm14 = vcmask 523264  }
   0xf   : > { %v966_v0 = vld [vmem:[%s963_s17 + $0x18] sm:$0xff]   ;;  %v969_v1 = vld [vmem:[%s963_s17 + $0x20] sm:$0xff]   ;;  %v978_v6 = vld [vmem:[%s963_s17 + $0x28] sm:$0xff]   ;;  %vm662_vm15 = vcmask 588800   ;;  %s1304_s16 = scalar_lea.vmem %s1332_s3, %s888_s11 }
  0x10   : > { %v915_v2 = vld [vmem:[%s963_s17 + $0x24] sm:$0xf]  ;;  %v973_v3 = vld [vmem:[%s963_s17 + $0x1c] sm:$0xff]   ;;  %v286_v4 = vrot.slane %v966_v0, 1  ;;  %v288_v5 = vrot.slane %v969_v1, 1  ;;  %v247_v8 = vshll.u32 %v966_v0, 16 }
  0x11   : > { %v916_v7 = vld [vmem:[%s963_s17 + $0x24] sm:$0xf0]   ;;  %v251_v9 = vshrl.u32 %v966_v0, 16  ;;  %v255_v10 = vshll.u32 %v969_v1, 16  ;;  %v319_v14 = vrot.slane %v973_v3, 1  ;;  %v259_v15 = vshrl.u32 %v969_v1, 16 }
  0x12   : > { %v289_v11 = vsel %vm280_vm0, %v286_v4, %v288_v5  ;;  %v991_v12 = vrot.slane %v247_v8, 1  ;;  %v994_v13 = vor.u32 %v916_v7, %v915_v2  ;;  %v518_v19 = vrot.slane %v969_v1, 3  ;;  %v182_v28 = vld [vmem:[%s963_s17 + $0x28] sm:$0x1]  ;;  %v1037_v45 = vld [vmem:[%s963_s17 + $0x10] sm:$0xff]  }
  0x13   : > { %298 = vrot.lane.b32.xlu0 %v289_v11, %s921_s18  ;;  %v257_v17 = vrot.slane %v255_v10, 1  ;;  %v478_v20 = vrot.slane %v255_v10, 3  ;;  %v482_v21 = vshrl.u32 %v978_v6, 16  ;;  %v485_v22 = vshll.u32 %v978_v6, 16  ;;  %v187_v57 = vld [vmem:[%s963_s17 + $0x2c] sm:$0x3] }
  0x14   : > { %v253_v16 = vor.u32 %v251_v9, %v991_v12  ;;  %v321_v18 = vrot.slane %v994_v13, 1  ;;  %v366_v23 = vshrl.u32 %v973_v3, 16  ;;  %v477_v25 = vrot.slane %v259_v15, 2  ;;  %v186_v63 = vld [vmem:[%s963_s17 + $0x2c] sm:$0x1]  ;;  %v1068_v10 = vld [vmem:[%s963_s17 + $0x14] sm:$0xff]  }
  0x15   : > { %v369_v26 = vshll.u32 %v973_v3, 16  ;;  %v375_v27 = vshrl.u32 %v994_v13, 16  ;;  %v520_v30 = vrot.slane %v978_v6, 3  ;;  %v484_v31 = vrot.slane %v482_v21, 2 }
  0x16   : > { %v322_v24 = vsel %vm280_vm0, %v319_v14, %v321_v18  ;;  %v258_v29 = vsel %vm222_vm1, %v253_v16, %v257_v17  ;;  %v487_v32 = vrot.slane %v485_v22, 3  ;;  %v378_v33 = vshll.u32 %v994_v13, 16 }
  0x17   : > { %331 = vrot.lane.b32.xlu1 %v322_v24, %s922_s19  ;;  %v411_v34 = vrot.slane %v973_v3, 2  ;;  %v413_v35 = vrot.slane %v994_v13, 2  ;;  %v220_v36 = vunpack.c.l.b16 %v182_v28  ;;  %v1021_v37 = vor.u32 %v478_v20, %v477_v25 }
  0x18   : > { %v368_v38 = vrot.slane %v366_v23, 1  ;;  %v371_v39 = vrot.slane %v369_v26, 2  ;;  %v521_v41 = vsel %vm512_vm3, %v518_v19, %v520_v30  ;;  %v1033_v42 = vor.u32 %v487_v32, %v484_v31 }
  0x19   : > { %v414_v40 = vsel %vm405_vm2, %v411_v34, %v413_v35  ;;  %v377_v43 = vrot.slane %v375_v27, 1  ;;  %v221_v44 = vpack.c.b16 %v220_v36, %v220_v36  ;;  %v380_v46 = vrot.slane %v378_v33, 2 }
  0x1a   : > { %423 = vrot.lane.b32.xlu2 %v414_v40, %s924_s21  ;;  %v441_v47 = vrot.slane %v969_v1, 2  ;;  %v443_v48 = vrot.slane %v978_v6, 2  ;;  %v239_v49 = vshll.u32 %v1037_v45, 16  ;;  %v489_v50 = vsel %vm460_vm4, %v1021_v37, %v1033_v42 }
  0x1b   : > { %273 = vrot.lane.b32.xlu0 %v258_v29, %s923_s20  ;;  %v372_v51 = vor.u32 %v371_v39, %v368_v38  ;;  %v263_v52 = vshll.u32 %v221_v44, 16  ;;  %v381_v53 = vor.u32 %v380_v46, %v377_v43  ;;  %v243_v56 = vshrl.u32 %v1037_v45, 16  ;;  %v191_v38 = vld [vmem:[%s963_s17 + $0x30] sm:$0x3]  ;;  %v1105_v43 = vld [vmem:[%s963_s17 + $0x8] sm:$0xff]  }
  0x1c   : > { %v444_v54 = vsel %vm405_vm2, %v441_v47, %v443_v48  ;;  %v1053_v55 = vrot.slane %v239_v49, 1  ;;  %v261_v58 = vor.u32 %v259_v15, %v257_v17  ;;  %v336_v60 = vunpack.c.l.b16 %v187_v57  ;;  %v192_v46 = vld [vmem:[%s963_s17 + $0x30] sm:$0x7] }
  0x1d   : > { %v265_v59 = vrot.slane %v263_v52, 1  ;;  %v382_v61 = vsel %vm338_vm5, %v372_v51, %v381_v53  ;;  %v284_v7 = vrot.slane %v1037_v45, 1  ;;  %v307_v15 = vunpack.c.l.b16 %v186_v63 }
  0x1e   : > { %v245_v62 = vor.u32 %v243_v56, %v1053_v55  ;;  %v337_v11 = vpack.c.b16 %v336_v60, %v336_v60  ;;  %v317_v20 = vrot.slane %v1068_v10, 1  ;;  %v290_v24 = vrot.slane %v221_v44, 1  ;;  %v1108_v44 = vld [vmem:[%s963_s17] sm:$0xff]  }
  0x1f   : > { %530 = vrot.lane.b32.xlu1 %v521_v41, %s925_s22  ;;  %v266_v2 = vsel %vm222_vm1, %v261_v58, %v265_v59  ;;  %v287_v17 = vsel %vm280_vm0, %v284_v7, %v286_v4  ;;  %v313_v23 = vpack.c.b16 %v307_v15, %v307_v15  ;;  %v357_v25 = vshrl.u32 %v1068_v10, 16 }
  0x20   : > { %v250_v16 = vsel %vm222_vm1, %v245_v62, %v991_v12  ;;  %v384_v21 = vshrl.u32 %v337_v11, 16  ;;  %v387_v22 = vshll.u32 %v337_v11, 16  ;;  %v360_v12 = vshll.u32 %v1068_v10, 16 }
  0x21   : > { %v320_v4 = vsel %vm280_vm0, %v317_v20, %v319_v14  ;;  %v323_v28 = vrot.slane %v313_v23, 1  ;;  %v291_v29 = vsel %vm280_vm0, %v288_v5, %v290_v24  ;;  %v359_v31 = vrot.slane %v357_v25, 1  ;;  %v189_v24 = vld [vmem:[%s963_s17 + $0x8] sm:$0xc] }
  0x22   : > { %453 = vrot.lane.b32.xlu2 %v444_v54, %s927_s24  ;;  %v386_v26 = vrot.slane %v384_v21, 1  ;;  %v389_v27 = vrot.slane %v387_v22, 2  ;;  %v362_v32 = vrot.slane %v360_v12, 2  ;;  %v409_v5 = vrot.slane %v1068_v10, 2  ;;  %v184_v12 = vld [vmem:[%s963_s17 + $0x4] sm:$0xe] }
  0x23   : > { %505 = vrot.lane.b32.xlu0 %v489_v50, %s926_s23  ;;  %v324_v14 = vsel %vm280_vm0, %v321_v18, %v323_v28  ;;  %v432_v40 = vunpack.c.l.b16 %v191_v38  ;;  %v439_v18 = vrot.slane %v966_v0, 2  ;;  %v231_v50 = vshll.u32 %v1105_v43, 16 }
  0x24   : > { %v390_v33 = vor.u32 %v389_v27, %v386_v26  ;;  %v1096_v36 = vor.u32 %v362_v32, %v359_v31  ;;  %v226_v52 = vshll.u32 %v1108_v44, 16  ;;  %v415_v54 = vrot.slane %v337_v11, 2 }
  0x25   : > { %v458_v57 = vunpack.c.l.b16 %v192_v46  ;;  %v442_v58 = vsel %vm405_vm2, %v439_v18, %v441_v47  ;;  %v233_v59 = vrot.slane %v231_v50, 1  ;;  %v235_v3 = vshrl.u32 %v1105_v43, 16 }
  0x26   : > { %v391_v39 = vsel %vm338_vm5, %v381_v53, %v390_v33  ;;  %v373_v41 = vsel %vm338_vm5, %v1096_v36, %v372_v51  ;;  %v412_v51 = vsel %vm405_vm2, %v409_v5, %v411_v34  ;;  %v435_v53 = vpack.c.b16 %v432_v40, %v432_v40 }
  0x27   : > { %398 = vrot.lane.b32.xlu1 %v382_v61, %s928_s25  ;;  %v224_v60 = vshrl.u32 %v1108_v44, 16  ;;  %v228_v61 = vrot.slane %v226_v52, 1  ;;  %v416_v62 = vsel %vm405_vm2, %v413_v35, %v415_v54  ;;  %v459_v63 = vpack.c.b16 %v458_v57, %v458_v57  ;;  %v855_v35 = vld [vmem:[%s963_s17] sm:$0xf0] }
  0x28   : > { %v445_v34 = vrot.slane %v435_v53, 2  ;;  %v237_v47 = vor.u32 %v235_v3, %v233_v59  ;;  %v474_v11 = vrot.slane %v247_v8, 3  ;;  %v1149_v25 = vunpack.c.h.b16 %v1105_v43 }
  0x29   : > { %v229_v15 = vor.u32 %v228_v61, %v224_v60  ;;  %v494_v21 = vshll.u32 %v459_v63, 16  ;;  %v430_v26 = vunpack.c.l.b16 %v189_v24  ;;  %v841_v27 = vunpack.c.l.b16 %v1037_v45  ;;  %v630_v24 = vld [vmem:[%s1330_s1 + $0x20] sm:$0xf] }
  0x2a   : > { %271 = vrot.lane.b32.xlu2 %v250_v16, %s923_s20  ;;  %v446_v13 = vsel %vm405_vm2, %v443_v48, %v445_v34  ;;  %v856_v16 = vld [vmem:[%s963_s17] sm:$0xe]  ;;  %v837_v31 = vunpack.c.l.b16 %v1105_v43  ;;  %v305_v32 = vunpack.c.l.b16 %v184_v12  ;;  %v469_v50 = vrot.slane %v243_v56, 2 }
  0x2b   : > { %275 = vrot.lane.b32.xlu0 %v266_v2, %s923_s20  ;;  %v473_v2 = vrot.slane %v251_v9, 2  ;;  %v242_v9 = vsel %vm222_vm1, %v237_v47, %v1053_v55  ;;  %v857_v23 = vor.u32 %v856_v16, %v855_v35  ;;  %v234_v8 = vsel %vm222_vm1, %v229_v15, %v233_v59  ;;  %v188_v35 = vld [vmem:[%s963_s17 + $0x4] sm:$0xc] }
  0x2c   : > { %v496_v48 = vrot.slane %v494_v21, 3  ;;  %v1155_v28 = vpack.c.b16 %v1149_v25, %v430_v26  ;;  %v309_v40 = vpack.c.b16 %v841_v27, %v1149_v25  ;;  %v652_v12 = vunpack.c.l.b16 %v630_v24 }
  0x2d   : > { %v475_v22 = vor.u32 %v474_v11, %v473_v2  ;;  %v281_v55 = vrot.slane %v857_v23, 1 }
  0x2e   : > { %v462_v38 = vshrl.u32 %v1155_v28, 16  ;;  %v348_v59 = vshrl.u32 %v309_v40, 16  ;;  %v351_v3 = vshll.u32 %v309_v40, 16  ;;  %v657_v27 = vpack.c.b16 %v652_v12, %v652_v12 }
  0x2f   : > { %296 = vrot.lane.b32.xlu1 %v287_v17, %s921_s18  ;;  %v491_v17 = vshrl.u32 %v459_v63, 16  ;;  %v480_v33 = vsel %vm460_vm4, %v475_v22, %v1021_v37  ;;  %v470_v37 = vrot.slane %v239_v49, 3  ;;  %v516_v49 = vrot.slane %v966_v0, 3 }
  0x30   : > { %v350_v2 = vrot.slane %v348_v59, 1  ;;  %v353_v11 = vrot.slane %v351_v3, 2 }
  0x31   : > { %v471_v57 = vor.u32 %v470_v37, %v469_v50 }
  0x32   : > { %300 = vrot.lane.b32.xlu2 %v291_v29, %s921_s18  ;;  %v282_v29 = vrot.slane %v1105_v43, 1  ;;  %v354_v16 = vor.u32 %v353_v11, %v350_v2 }
  0x33   : > { %329 = vrot.lane.b32.xlu0 %v320_v4, %s922_s19  ;;  %v493_v4 = vrot.slane %v491_v17, 2  ;;  %v1177_v34 = vsel %vm460_vm4, %v471_v57, %v475_v22  ;;  %v403_v17 = vunpack.c.l.b16 %v188_v35  ;;  %v407_v22 = vrot.slane %v309_v40, 2 }
  0x34   : > { %v283_v52 = vsel %vm280_vm0, %v281_v55, %v282_v29  ;;  %v364_v23 = vsel %vm338_vm5, %v354_v16, %v1096_v36  ;;  %v193_v36 = vld [vmem:[%s963_s17 + $0x8] sm:$0x8]  ;;  %v675_v55 = vsel %vm673_vm6, %v657_v27, 0 }
  0x35   : > { %874 = vmatpush.bf16.msra.mxu3 %v675_v55  ;;  %v510_v10 = vunpack.c.l.b16 %v193_v36  ;;  %873 = vmatpush.bf16.msra.mxu2 %v675_v55 }
  0x36   : > { %680 = vmatpush.bf16.msra.mxu0 %v675_v55  ;;  %872 = vmatpush.bf16.msra.mxu1 %v675_v55 }
  0x37   : > { %333 = vrot.lane.b32.xlu1 %v324_v14, %s922_s19  ;;  %v497_v14 = vor.u32 %v496_v48, %v493_v4  ;;  %v436_v4 = vrot.slane %v1155_v28, 2  ;;  %v437_v48 = vrot.slane %v1037_v45, 2 }
  0x39   : > { %v498_v53 = vsel %vm460_vm4, %v1033_v42, %v497_v14  ;;  %v285_v42 = vsel %vm280_vm0, %v282_v29, %v284_v7  ;;  %v519_v7 = vsel %vm512_vm3, %v516_v49, %v518_v19  ;;  %v404_v19 = vpack.c.b16 %v837_v31, %v403_v17 }
  0x3a   : > { %396 = vrot.lane.b32.xlu2 %v373_v41, %s928_s25  ;;  %v464_v41 = vrot.slane %v462_v38, 2  ;;  %v438_v29 = vsel %vm405_vm2, %v436_v4, %v437_v48 }
  0x3b   : > { %400 = vrot.lane.b32.xlu0 %v391_v39, %s928_s25  ;;  %v465_v39 = vshll.u32 %v1155_v28, 16  ;;  %v440_v28 = vsel %vm405_vm2, %v437_v48, %v439_v18  ;;  %v828_v18 = vld [vmem:[%s1330_s1 + $0x8] sm:$0xff] }
  0x3d   : > { %v467_v46 = vrot.slane %v465_v39, 3 }
  0x3f   : > { %421 = vrot.lane.b32.xlu1 %v412_v51, %s924_s21  ;;  %v308_v51 = vpack.c.b16 %v837_v31, %v305_v32  ;;  %v468_v54 = vor.u32 %v467_v46, %v464_v41  ;;  %v511_v31 = vpack.c.b16 %v1149_v25, %v510_v10  ;;  %v829_v32 = vld [vmem:[%s1330_s1 + $0x10] sm:$0xff] }
  0x41   : > { %v340_v56 = vshrl.u32 %v308_v51, 16  ;;  %v343_v60 = vshll.u32 %v308_v51, 16  ;;  %v472_v61 = vsel %vm460_vm4, %v468_v54, %v471_v57  ;;  %v314_v15 = vrot.slane %v308_v51, 1 }
  0x42   : > { %425 = vrot.lane.b32.xlu2 %v416_v62, %s924_s21  ;;  %v513_v14 = vrot.slane %v511_v31, 3 }
  0x43   : > { %451 = vrot.lane.b32.xlu0 %v442_v58, %s927_s24  ;;  %v522_v58 = vrot.slane %v459_v63, 3  ;;  %v342_v63 = vrot.slane %v340_v56, 1  ;;  %v345_v47 = vrot.slane %v343_v60, 2 }
  0x45   : > { %v523_v62 = vsel %vm512_vm3, %v520_v30, %v522_v58  ;;  %v346_v6 = vor.u32 %v345_v47, %v342_v63 }
  0x47   : > { %455 = vrot.lane.b32.xlu1 %v446_v13, %s927_s24  ;;  %v315_v13 = vrot.slane %v309_v40, 1  ;;  %v355_v21 = vsel %vm338_vm5, %v346_v6, %v354_v16  ;;  %v827_v40 = vld [vmem:[%s1330_s1] sm:$0xff] }
  0x49   : > { %v316_v30 = vsel %vm280_vm0, %v314_v15, %v315_v13 }
  0x4a   : > { %267 = vrot.lane.b32.xlu2 %v234_v8, %s923_s20  ;;  %v406_v8 = vrot.slane %v404_v19, 2 }
  0x4b   : > { %269 = vrot.lane.b32.xlu0 %v242_v9, %s923_s20  ;;  %v318_v9 = vsel %vm280_vm0, %v315_v13, %v317_v20  ;;  %v410_v20 = vsel %vm405_vm2, %v407_v22, %v409_v5  ;;  %v830_v5 = vld [vmem:[%s1330_s1 + $0x18] sm:$0xff]  ;;  %vm731_vm0 = vcmask 60416  }
  0x4c   : > { %v408_v26 = vsel %vm405_vm2, %v406_v8, %v407_v22  ;;  %877 = vmatpush.bf16.msra.mxu3 %v830_v5  ;;  %876 = vmatpush.bf16.msra.mxu2 %v830_v5 }
  0x4d   : > { %681 = vmatpush.bf16.msra.mxu0 %v830_v5  ;;  %875 = vmatpush.bf16.msra.mxu1 %v830_v5 }
  0x4f   : > { %503 = vrot.lane.b32.xlu1 %v480_v33, %s926_s23  ;;  %v514_v33 = vrot.slane %v1037_v45, 3 }
  0x50   : > { %880 = vmatpush.bf16.msra.mxu3 %v829_v32  ;;  %879 = vmatpush.bf16.msra.mxu2 %v829_v32 }
  0x51   : > { %682 = vmatpush.bf16.msra.mxu0 %v829_v32  ;;  %878 = vmatpush.bf16.msra.mxu1 %v829_v32  ;;  %v517_v38 = vsel %vm512_vm3, %v514_v33, %v516_v49  ;;  %v515_v39 = vsel %vm512_vm3, %v513_v14, %v514_v33 }
  0x52   : > { %507 = vrot.lane.b32.xlu2 %v498_v53, %s926_s23 }
  0x53   : > { %292 = vrot.lane.b32.xlu0 %v283_v52, %s921_s18 }
  0x54   : > { %883 = vmatpush.bf16.msra.mxu3 %v828_v18  ;;  %882 = vmatpush.bf16.msra.mxu2 %v828_v18 }
  0x55   : > { %683 = vmatpush.bf16.msra.mxu0 %v828_v18  ;;  %881 = vmatpush.bf16.msra.mxu1 %v828_v18 }
  0x57   : > { %294 = vrot.lane.b32.xlu1 %v285_v42, %s921_s18 }
  0x58   : > { %886 = vmatpush.bf16.msra.mxu3 %v827_v40  ;;  %885 = vmatpush.bf16.msra.mxu2 %v827_v40 }
  0x59   : > { %684 = vmatpush.bf16.msra.mxu0 %v827_v40  ;;  %884 = vmatpush.bf16.msra.mxu1 %v827_v40 }
  0x5a   : > { %528 = vrot.lane.b32.xlu2 %v519_v7, %s925_s22 }
  0x5b   : > { %532 = vrot.lane.b32.xlu0 %v523_v62, %s925_s22 }
  0x5f   : > { %325 = vrot.lane.b32.xlu1 %v316_v30, %s922_s19 }
  0x62   : > { %327 = vrot.lane.b32.xlu2 %v318_v9, %s922_s19 }
  0x63   : > { %392 = vrot.lane.b32.xlu0 %v355_v21, %s928_s25 }
  0x67   : > { %394 = vrot.lane.b32.xlu1 %v364_v23, %s928_s25 }
  0x6a   : > { %417 = vrot.lane.b32.xlu2 %v408_v26, %s924_s21 }
  0x6b   : > { %419 = vrot.lane.b32.xlu0 %v410_v20, %s924_s21 }
  0x6f   : > { %447 = vrot.lane.b32.xlu1 %v438_v29, %s927_s24 }
  0x72   : > { %449 = vrot.lane.b32.xlu2 %v440_v28, %s927_s24 }
  0x73   : > { %499 = vrot.lane.b32.xlu0 %v472_v61, %s926_s23 }
  0x74   : > { %v424_v25 = vpop.permute.xlu2 %423 }
  0x77   : > { %501 = vrot.lane.b32.xlu1 %v1177_v34, %s926_s23 }
  0x7a   : > { %524 = vrot.lane.b32.xlu2 %v515_v39, %s925_s22 }
  0x7b   : > { %526 = vrot.lane.b32.xlu0 %v517_v38, %s925_s22 }
  0x7c   : > { %v454_v41 = vpop.permute.xlu2 %453 }
  0x84   : > { %v272_v50 = vpop.permute.xlu2 %271 }
  0x85   : > { %v299_v46 = vpop.permute.xlu0 %298  ;;  %v540_v16 = vsel %vm534_vm7, %v1037_v45, %v272_v50 }
  0x89   : > { %v332_v52 = vpop.permute.xlu1 %331 }
  0x8c   : > { %v301_v37 = vpop.permute.xlu2 %300 }
  0x8d   : > { %v274_v51 = vpop.permute.xlu0 %273 }
  0x8e   : > { %v542_v54 = vsel %vm534_vm7, %v966_v0, %v274_v51 }
  0x8f   : > { %v553_v59 = vsel %vm545_vm8, %v542_v54, %v299_v46 }
  0x90   : > { %v564_v56 = vsel %vm556_vm9, %v553_v59, %v332_v52 }
  0x91   : > { %v531_v53 = vpop.permute.xlu1 %530 }
  0x94   : > { %v397_v58 = vpop.permute.xlu2 %396 }
  0x95   : > { %v506_v57 = vpop.permute.xlu0 %505 }
  0x99   : > { %v399_v3 = vpop.permute.xlu1 %398 }
  0x9a   : > { %v575_v60 = vsel %vm567_vm10, %v564_v56, %v399_v3 }
  0x9b   : > { %v586_v61 = vsel %vm578_vm11, %v575_v60, %v424_v25 }
  0x9c   : > { %v597_v0 = vsel %vm589_vm12, %v586_v61, %v454_v41  ;;  %v426_v62 = vpop.permute.xlu2 %425 }
  0x9d   : > { %v276_v34 = vpop.permute.xlu0 %275  ;;  %v608_v42 = vsel %vm600_vm13, %v597_v0, %v506_v57 }
  0x9e   : > { %v619_v49 = vsel %vm611_vm14, %v608_v42, %v531_v53  ;;  %v544_v22 = vsel %vm534_vm7, %v969_v1, %v276_v34  ;;  %v905_v34 = vld [vmem:[%s1331_s2] ss:$0 sm:$0xff] }
  0x9f   : > { %823 = vmatmul.msk.bf16.vlgmr.msra.gmra.mxu3 %vm662_vm15, %v619_v49  ;;  %v555_v45 = vsel %vm545_vm8, %v544_v22, %v301_v37 }
  0xa1   : > { %v297_v63 = vpop.permute.xlu1 %296 }
  0xa2   : > { %v551_v30 = vsel %vm545_vm8, %v540_v16, %v297_v63 }
  0xa4   : > { %v268_v11 = vpop.permute.xlu2 %267 }
  0xa5   : > { %v330_v47 = vpop.permute.xlu0 %329  ;;  %v536_v48 = vsel %vm534_vm7, %v1108_v44, %v268_v11 }
  0xa6   : > { %v562_v17 = vsel %vm556_vm9, %v551_v30, %v330_v47 }
  0xa7   : > { %v573_v19 = vsel %vm567_vm10, %v562_v17, %v397_v58 }
  0xa9   : > { %v334_v2 = vpop.permute.xlu1 %333 }
  0xaa   : > { %v566_v4 = vsel %vm556_vm9, %v555_v45, %v334_v2 }
  0xac   : > { %v508_v7 = vpop.permute.xlu2 %507 }
  0xad   : > { %v401_v15 = vpop.permute.xlu0 %400 }
  0xae   : > { %v577_v1 = vsel %vm567_vm10, %v566_v4, %v401_v15 }
  0xaf   : > { %v588_v55 = vsel %vm578_vm11, %v577_v1, %v426_v62 }
  0xb1   : > { %v422_v13 = vpop.permute.xlu1 %421 }
  0xb2   : > { %v584_v23 = vsel %vm578_vm11, %v573_v19, %v422_v13 }
  0xb4   : > { %v529_v9 = vpop.permute.xlu2 %528 }
  0xb5   : > { %v452_v35 = vpop.permute.xlu0 %451 }
  0xb6   : > { %v595_v8 = vsel %vm589_vm12, %v584_v23, %v452_v35 }
  0xb9   : > { %v456_v6 = vpop.permute.xlu1 %455 }
  0xba   : > { %v599_v29 = vsel %vm589_vm12, %v588_v55, %v456_v6 }
  0xbb   : > { %v610_v44 = vsel %vm600_vm13, %v599_v29, %v508_v7 }
  0xbc   : > { %v328_v36 = vpop.permute.xlu2 %327 }
  0xbd   : > { %v270_v21 = vpop.permute.xlu0 %269 }
  0xbe   : > { %v538_v10 = vsel %vm534_vm7, %v1105_v43, %v270_v21 }
  0xc1   : > { %v504_v24 = vpop.permute.xlu1 %503 }
  0xc2   : > { %v606_v20 = vsel %vm600_vm13, %v595_v8, %v504_v24 }
  0xc3   : > { %v617_v12 = vsel %vm611_vm14, %v606_v20, %v529_v9 }
  0xc4   : > { %822 = vmatmul.msk.bf16.vlgmr.msra.gmra.mxu2 %vm662_vm15, %v617_v12  ;;  %v418_v33 = vpop.permute.xlu2 %417 }
  0xc5   : > { %v293_v26 = vpop.permute.xlu0 %292 }
  0xc6   : > { %v547_v27 = vsel %vm545_vm8, %v536_v48, %v293_v26 }
  0xc9   : > { %v295_v5 = vpop.permute.xlu1 %294 }
  0xca   : > { %v549_v28 = vsel %vm545_vm8, %v538_v10, %v295_v5 }
  0xcb   : > { %v560_v39 = vsel %vm556_vm9, %v549_v28, %v328_v36 }
  0xcc   : > { %v450_v40 = vpop.permute.xlu2 %449 }
  0xcd   : > { %v533_v31 = vpop.permute.xlu0 %532 }
  0xce   : > { %v621_v32 = vsel %vm611_vm14, %v610_v44, %v533_v31 }
  0xcf   : > { %824 = vmatmul.msk.bf16.gmra.mxu3 %vm662_vm15, %v621_v32 }
  0xd1   : > { %v326_v14 = vpop.permute.xlu1 %325 }
  0xd2   : > { %v558_v18 = vsel %vm556_vm9, %v547_v27, %v326_v14 }
  0xd4   : > { %v525_v51 = vpop.permute.xlu2 %524 }
  0xd5   : > { %v393_v25 = vpop.permute.xlu0 %392 }
  0xd6   : > { %v569_v38 = vsel %vm567_vm10, %v558_v18, %v393_v25 }
  0xd7   : > { %v580_v52 = vsel %vm578_vm11, %v569_v38, %v418_v33 }
  0xd9   : > { %v395_v43 = vpop.permute.xlu1 %394 }
  0xda   : > { %v571_v41 = vsel %vm567_vm10, %v560_v39, %v395_v43 }
  0xdd   : > { %v420_v46 = vpop.permute.xlu0 %419 }
  0xde   : > { %v582_v58 = vsel %vm578_vm11, %v571_v41, %v420_v46 }
  0xdf   : > { %v593_v3 = vsel %vm589_vm12, %v582_v58, %v450_v40 }
  0xe1   : > { %v448_v50 = vpop.permute.xlu1 %447 }
  0xe2   : > { %v591_v37 = vsel %vm589_vm12, %v580_v52, %v448_v50 }
  0xe5   : > { %v500_v53 = vpop.permute.xlu0 %499 }
  0xe6   : > { %v602_v54 = vsel %vm600_vm13, %v591_v37, %v500_v53 }
  0xe7   : > { %v613_v57 = vsel %vm611_vm14, %v602_v54, %v525_v51 }
  0xe8   : > { %820 = vmatmul.msk.bf16.vlgmr.msra.gmra.mxu0 %vm662_vm15, %v613_v57 }
  0xe9   : > { %v502_v59 = vpop.permute.xlu1 %501 }
  0xea   : > { %v604_v56 = vsel %vm600_vm13, %v593_v3, %v502_v59 }
  0xed   : > { %v527_v60 = vpop.permute.xlu0 %526 }
  0xee   : > { %v615_v61 = vsel %vm611_vm14, %v604_v56, %v527_v60 }
  0xef   : > { %821 = vmatmul.msk.bf16.vlgmr.msra.gmra.mxu1 %vm662_vm15, %v615_v61 }
 0x122   : > { %v701_v0 = vpop.f32.mrf.mxu3 }
 0x123   : > { %v702_v42 = vadd.f32 %v905_v34, %v701_v0 }
 0x125   : > { %v717_v49 = vmax.f32 %v702_v42, 0.0 }
 0x127   : > { %v727_v62 = vpack.c.bf16 %v717_v49, %v717_v49 }
 0x129   : > { %738 = vst.msk [vmem:[%s1304_s16 + $0x18] sm:$0xf] %vm731_vm0, %v727_v62 }
 0x12a   : > { %v703_v63 = vpop.f32.mrf.mxu3 }
 0x12b   : > { %v704_v47 = vadd.f32 %v905_v34, %v703_v63 }
 0x12d   : > { %v718_v2 = vmax.f32 %v704_v47, 0.0 }
 0x12f   : > { %v728_v11 = vpack.c.bf16 %v718_v2, %v718_v2 }
 0x131   : > { %739 = vst.msk [vmem:[%s1304_s16 + $0x1c] sm:$0xf] %vm731_vm0, %v728_v11 }
 0x147   : > { %v696_v15 = vpop.f32.mrf.mxu2 }
 0x148   : > { %v697_v13 = vadd.f32 %v905_v34, %v696_v15 }
 0x14a   : > { %v715_v7 = vmax.f32 %v697_v13, 0.0 }
 0x14c   : > { %v725_v35 = vpack.c.bf16 %v715_v7, %v715_v7 }
 0x14e   : > { %736 = vst.msk [vmem:[%s1304_s16 + $0x10] sm:$0xf] %vm731_vm0, %v725_v35 }
 0x14f   : > { %v698_v6 = vpop.f32.mrf.mxu2 }
 0x150   : > { %v699_v16 = vadd.f32 %v905_v34, %v698_v6 }
 0x152   : > { %v706_v30 = vpop.f32.mrf.mxu3  ;;  %v716_v17 = vmax.f32 %v699_v16, 0.0 }
 0x153   : > { %v707_v21 = vadd.f32 %v905_v34, %v706_v30 }
 0x154   : > { %v726_v9 = vpack.c.bf16 %v716_v17, %v716_v17 }
 0x155   : > { %v719_v19 = vmax.f32 %v707_v21, 0.0 }
 0x156   : > { %737 = vst.msk [vmem:[%s1304_s16 + $0x14] sm:$0xf] %vm731_vm0, %v726_v9 }
 0x157   : > { %v729_v22 = vpack.c.bf16 %v719_v19, %v719_v19 }
 0x159   : > { %740 = vst.msk [vmem:[%s1304_s16 + $0x20] sm:$0xf] %vm731_vm0, %v729_v22 }
 0x15a   : > { %v708_v23 = vpop.f32.mrf.mxu3 }
 0x15b   : > { %v709_v8 = vadd.f32 %v905_v34, %v708_v23 }
 0x15d   : > { %v720_v24 = vmax.f32 %v709_v8, 0.0 }
 0x15f   : > { %v730_v20 = vpack.c.bf16 %v720_v24, %v720_v24 }
 0x161   : > { %741 = vst.msk [vmem:[%s1304_s16 + $0x24] sm:$0xf] %vm731_vm0, %v730_v20 }
 0x165   : > { %v686_v45 = vpop.f32.mrf.mxu0 }
 0x166   : > { %v687_v12 = vadd.f32 %v905_v34, %v686_v45 }
 0x168   : > { %v711_v4 = vmax.f32 %v687_v12, 0.0 }
 0x16a   : > { %v721_v48 = vpack.c.bf16 %v711_v4, %v711_v4 }
 0x16c   : > { %732 = vst.msk [vmem:[%s1304_s16] sm:$0xf] %vm731_vm0, %v721_v48  ;;  %v691_v26 = vpop.f32.mrf.mxu1 }
 0x16d   : > { %v692_v1 = vadd.f32 %v905_v34, %v691_v26  ;;  %v688_v27 = vpop.f32.mrf.mxu0 }
 0x16e   : > { %v689_v36 = vadd.f32 %v905_v34, %v688_v27 }
 0x16f   : > { %v713_v55 = vmax.f32 %v692_v1, 0.0 }
 0x170   : > { %v712_v29 = vmax.f32 %v689_v36, 0.0 }
 0x171   : > { %v723_v10 = vpack.c.bf16 %v713_v55, %v713_v55 }
 0x172   : > { %v722_v5 = vpack.c.bf16 %v712_v29, %v712_v29 }
 0x173   : > { %734 = vst.msk [vmem:[%s1304_s16 + $0x8] sm:$0xf] %vm731_vm0, %v723_v10 }
 0x174   : > { %733 = vst.msk [vmem:[%s1304_s16 + $0x4] sm:$0xf] %vm731_vm0, %v722_v5  ;;  %v693_v28 = vpop.f32.mrf.mxu1 }
 0x175   : > { %v694_v44 = vadd.f32 %v905_v34, %v693_v28 }
 0x177   : > { %v714_v31 = vmax.f32 %v694_v44, 0.0 }
 0x179   : > { %v724_v32 = vpack.c.bf16 %v714_v31, %v714_v31 }
 0x17b   : > { %735 = vst.msk [vmem:[%s1304_s16 + $0xc] sm:$0xf] %vm731_vm0, %v724_v32 }
 0x17c PF: > { %s13_s12 = sadd.s32 1, %s919_s12  }
 0x17d   : > { %p10_p4 = scmp.ge.s32.totalorder %s13_s12, 4  }
 0x17f   :  { %12 = sbr.rel (!%p10_p4) target bundleno = 1 (0x1), region = 62 }

// kernel: hrnet_forward.58
= control target key start
LH: loop header
LB: loop body
LE: loop exit
PB: predicated region body
PF: predicated region fallthrough
CT: control target
= control target key end

     0   :  { %s518_s15 = smov 0   ;;  %s562_s0 = inlined_call_operand.vmem [shape: bf16[2,64,8], index: 0, kind: input, shape index: {}]   ;;  %s563_s1 = inlined_call_operand.vmem [shape: bf16[8,32], index: 1, kind: input, shape index: {}]   ;;  %s564_s2 = inlined_call_operand.vmem [shape: f32[1,32], index: 2, kind: input, shape index: {}]   ;;  %s565_s3 = inlined_call_operand.vmem [shape: bf16[2,64,32], index: 3, kind: input, shape index: {}]   ;;  %s566_s4 = inlined_call_operand.vmem [shape: bf16[2,64,32], index: 4, kind: output, shape index: {}]  }
   0x1 LB: > { %s414_s16 = sadd.s32 4294967295, %s491_s15   ;;  %p418_p0 = scmp.ge.s32.totalorder %s491_s15, 1  ;;  %s491_s15 = sphi %s518_s15, %s14_s15  }
   0x2   : > { %p172_p1 = scmp.lt.s32.totalorder %s491_s15, 3 }
   0x4   : > { %p173_p2 = pnand %p418_p0, %p172_p1 }
   0x5   : > { %p203_p3 = scmp.lt.s32.totalorder (!%p173_p2), %s414_s16, 1 }
   0x6   : > { %176 = sbr.rel (%p173_p2) target bundleno = 167 (0xa7), region = 36 }
   0xb   : > { %v227_v0 = vld [vmem:[%s563_s1] sm:$0xf]  ;;  %vm265_vm0 = vcmask 1043456   ;;  %s568_s16 = smov (!%p203_p3, %s414_s16), 1  ;;  %vm252_vm1 = vcmask 64512   ;;  %vm338_vm2 = vcmask 257024  }
   0xc   : > { %v267_v1 = vsel %vm265_vm0, %v227_v0, 0  ;;  %s447_s19 = sshll.u32 %s568_s16, 5  ;;  %v484_v8 = vld [vmem:[%s564_s2] ss:$0 sm:$0xff] }
   0xd   : > { %276 = vmatpush.bf16.msra.mxu0 %v267_v1  ;;  %473 = vmatpush.bf16.msra.mxu1 %v267_v1  ;;  %s207_s22 = scalar_lea.vmem %s562_s0, %s447_s19  ;;  %s212_s25 = scalar_lea.vmem %s565_s3, %s447_s19 }
   0xe   : > { %474 = vmatpush.bf16.msra.mxu2 %v267_v1  ;;  %475 = vmatpush.bf16.msra.mxu3 %v267_v1  ;;  %v450_v2 = vld [vmem:[%s207_s22] sm:$0xff]  ;;  %v451_v3 = vld [vmem:[%s207_s22 + $0x8] sm:$0xff]  ;;  %v452_v4 = vld [vmem:[%s207_s22 + $0x10] sm:$0xff]  ;;  %s541_s30 = scalar_lea.vmem %s566_s4, %s447_s19 }
   0xf   : > { %v453_v5 = vld [vmem:[%s207_s22 + $0x18] sm:$0xff]  ;;  %v455_v6 = vld [vmem:[%s212_s25] sm:$0xff]   ;;  %v470_v7 = vld [vmem:[%s212_s25 + $0x8] sm:$0xff]  }
  0x10   : > { %441 = vmatmul.msk.bf16.vlgmr.msra.gmra.mxu0 %vm252_vm1, %v450_v2  ;;  %442 = vmatmul.msk.bf16.vlgmr.msra.gmra.mxu1 %vm252_vm1, %v451_v3  ;;  %v456_v9 = vunpack.c.l.bf16 %v455_v6  ;;  %v460_v10 = vunpack.c.l.bf16 %v470_v7  ;;  %v471_v17 = vld [vmem:[%s212_s25 + $0x10] sm:$0xff]   ;;  %v472_v18 = vld [vmem:[%s212_s25 + $0x18] sm:$0xff]   ;;  %v457_v27 = vunpack.c.h.bf16 %v455_v6  ;;  %v461_v28 = vunpack.c.h.bf16 %v470_v7 }
  0x11   : > { %443 = vmatmul.msk.bf16.vlgmr.msra.gmra.mxu2 %vm252_vm1, %v452_v4  ;;  %444 = vmatmul.msk.bf16.vlgmr.msra.gmra.mxu3 %vm252_vm1, %v453_v5  ;;  %v464_v21 = vunpack.c.l.bf16 %v471_v17  ;;  %v468_v22 = vunpack.c.l.bf16 %v472_v18  ;;  %v465_v45 = vunpack.c.h.bf16 %v471_v17  ;;  %v469_v46 = vunpack.c.h.bf16 %v472_v18 }
  0x8d   : > { %v278_v11 = vpop.f32.mrf.mxu0  ;;  %v283_v12 = vpop.f32.mrf.mxu1 }
  0x8e   : > { %v279_v13 = vadd.f32 %v484_v8, %v278_v11  ;;  %v284_v14 = vadd.f32 %v484_v8, %v283_v12 }
  0x90   : > { %v314_v15 = vadd.f32 %v456_v9, %v279_v13  ;;  %v316_v16 = vadd.f32 %v460_v10, %v284_v14 }
  0x92   : > { %v322_v19 = vmax.f32 %v314_v15, 0.0  ;;  %v324_v20 = vmax.f32 %v316_v16, 0.0 }
  0x94   : > { %v330_v23 = vpack.c.bf16 %v322_v19, %v322_v19  ;;  %v332_v24 = vpack.c.bf16 %v324_v20, %v324_v20  ;;  %v288_v25 = vpop.f32.mrf.mxu2  ;;  %v293_v26 = vpop.f32.mrf.mxu3 }
  0x95   : > { %v289_v29 = vadd.f32 %v484_v8, %v288_v25  ;;  %v294_v30 = vadd.f32 %v484_v8, %v293_v26  ;;  %v280_v31 = vpop.f32.mrf.mxu0  ;;  %v285_v32 = vpop.f32.mrf.mxu1 }
  0x96   : > { %339 = vst.msk [vmem:[%s541_s30] sm:$0xf] %vm338_vm2, %v330_v23  ;;  %v281_v33 = vadd.f32 %v484_v8, %v280_v31  ;;  %v286_v34 = vadd.f32 %v484_v8, %v285_v32 }
  0x97   : > { %341 = vst.msk [vmem:[%s541_s30 + $0x8] sm:$0xf] %vm338_vm2, %v332_v24  ;;  %v318_v35 = vadd.f32 %v464_v21, %v289_v29  ;;  %v320_v36 = vadd.f32 %v468_v22, %v294_v30 }
  0x98   : > { %v315_v37 = vadd.f32 %v457_v27, %v281_v33  ;;  %v317_v38 = vadd.f32 %v461_v28, %v286_v34 }
  0x99   : > { %v326_v39 = vmax.f32 %v318_v35, 0.0  ;;  %v328_v40 = vmax.f32 %v320_v36, 0.0 }
  0x9a   : > { %v323_v41 = vmax.f32 %v315_v37, 0.0  ;;  %v325_v42 = vmax.f32 %v317_v38, 0.0 }
  0x9b   : > { %v334_v43 = vpack.c.bf16 %v326_v39, %v326_v39  ;;  %v336_v44 = vpack.c.bf16 %v328_v40, %v328_v40 }
  0x9c   : > { %v331_v47 = vpack.c.bf16 %v323_v41, %v323_v41  ;;  %v333_v48 = vpack.c.bf16 %v325_v42, %v325_v42  ;;  %v290_v49 = vpop.f32.mrf.mxu2  ;;  %v295_v50 = vpop.f32.mrf.mxu3 }
  0x9d   : > { %343 = vst.msk [vmem:[%s541_s30 + $0x10] sm:$0xf] %vm338_vm2, %v334_v43  ;;  %v291_v51 = vadd.f32 %v484_v8, %v290_v49  ;;  %v296_v52 = vadd.f32 %v484_v8, %v295_v50 }
  0x9e   : > { %345 = vst.msk [vmem:[%s541_s30 + $0x18] sm:$0xf] %vm338_vm2, %v336_v44 }
  0x9f   : > { %340 = vst.msk [vmem:[%s541_s30 + $0x4] sm:$0xf] %vm338_vm2, %v331_v47  ;;  %v319_v53 = vadd.f32 %v465_v45, %v291_v51  ;;  %v321_v54 = vadd.f32 %v469_v46, %v296_v52 }
  0xa0   : > { %342 = vst.msk [vmem:[%s541_s30 + $0xc] sm:$0xf] %vm338_vm2, %v333_v48 }
  0xa1   : > { %v327_v55 = vmax.f32 %v319_v53, 0.0  ;;  %v329_v56 = vmax.f32 %v321_v54, 0.0 }
  0xa3   : > { %v335_v57 = vpack.c.bf16 %v327_v55, %v327_v55  ;;  %v337_v58 = vpack.c.bf16 %v329_v56, %v329_v56 }
  0xa5   : > { %344 = vst.msk [vmem:[%s541_s30 + $0x14] sm:$0xf] %vm338_vm2, %v335_v57 }
  0xa6   : > { %346 = vst.msk [vmem:[%s541_s30 + $0x1c] sm:$0xf] %vm338_vm2, %v337_v58 }
  0xa7 PF: > { %s14_s15 = sadd.s32 1, %s491_s15  }
  0xa8   : > { %p11_p4 = scmp.ge.s32.totalorder %s14_s15, 4  }
  0xaa   :  { %13 = sbr.rel (!%p11_p4) target bundleno = 1 (0x1), region = 69 }

// kernel: hrnet_forward.59
= control target key start
LH: loop header
LB: loop body
LE: loop exit
PB: predicated region body
PF: predicated region fallthrough
CT: control target
= control target key end

     0   :  { %s1156_s12 = smov 0   ;;  %s1574_s0 = inlined_call_operand.vmem [shape: bf16[2,102,32], index: 0, kind: input, shape index: {}]   ;;  %s1575_s1 = inlined_call_operand.vmem [shape: bf16[288,8], index: 1, kind: input, shape index: {}]   ;;  %s1576_s2 = inlined_call_operand.vmem [shape: f32[1,8], index: 2, kind: input, shape index: {}]   ;;  %s1577_s3 = inlined_call_operand.vmem [shape: bf16[2,80,8], index: 3, kind: output, shape index: {}]  }
   0x1 LB: > { %s943_s13 = sadd.s32 4294967295, %s1131_s12   ;;  %p947_p0 = scmp.ge.s32.totalorder %s1131_s12, 1  ;;  %s1131_s12 = sphi %s1156_s12, %s13_s12  }
   0x2   : > { %p137_p1 = scmp.lt.s32.totalorder %s1131_s12, 3 }
   0x4   : > { %p138_p2 = pnand %p947_p0, %p137_p1 }
   0x5   : > { %p161_p3 = scmp.lt.s32.totalorder (!%p138_p2), %s943_s13, 1  ;;  %s1133_s18 = smov (!%p138_p2), 64  }
   0x6   : > { %141 = sbr.rel (%p138_p2) target bundleno = 354 (0x162), region = 32  ;;  %s1134_s19 = smov (!%p138_p2), 96  }
   0x7   : > { %s1135_s20 = smov (!%p138_p2), 32  }
   0xb   : > { %s1579_s13 = smov (!%p161_p3, %s943_s13), 1  ;;  %vm280_vm0 = vcmask 1046528   ;;  %vm222_vm1 = vsmask.f32 7424  ;;  %vm395_vm2 = vcmask 1045504   ;;  %vm502_vm4 = vcmask 1044480  }
   0xc   : > { %s1104_s14 = smul.u32 52, %s1579_s13  ;;  %vm450_vm3 = vsmask.f32 5376  ;;  %vm514_vm5 = vcmask 261120   ;;  %vm525_vm6 = vcmask 523264   ;;  %vm536_vm8 = vcmask 785408  }
   0xd   : > { %vm338_vm7 = vsmask.f32 6400  ;;  %s1105_s7 = smul.u32 40, %s1579_s13  ;;  %vm877_vm9 = vcmask 60416  }
   0xe   : > { %s1170_s17 = scalar_lea.vmem %s1574_s0, %s1104_s14 }
   0xf   : > { %v1173_v0 = vld [vmem:[%s1170_s17 + $0x8] sm:$0xff]   ;;  %v1176_v1 = vld [vmem:[%s1170_s17 + $0x10] sm:$0xff]   ;;  %v1202_v16 = vld [vmem:[%s1170_s17 + $0x18] sm:$0xff]   ;;  %s1538_s10 = scalar_lea.vmem %s1577_s3, %s1105_s7 }
  0x10   : > { %v1179_v2 = vld [vmem:[%s1170_s17 + $0x14] sm:$0xff]   ;;  %v282_v3 = vrot.slane %v1173_v0, 1  ;;  %v284_v4 = vrot.slane %v1176_v1, 1  ;;  %v1184_v5 = vunpack.c.h.b16 %v1173_v0  ;;  %v1057_v6 = vunpack.c.l.b16 %v1176_v1  ;;  %v1233_v40 = vld [vmem:[%s1170_s17 + $0x1c] sm:$0xff]   ;;  %v1127_v42 = vld [vmem:[%s1170_s17 + $0x24] sm:$0xf] }
  0x11   : > { %v231_v7 = vshll.u32 %v1173_v0, 16  ;;  %v235_v8 = vshrl.u32 %v1173_v0, 16  ;;  %v239_v9 = vshll.u32 %v1176_v1, 16  ;;  %v317_v12 = vrot.slane %v1179_v2, 1  ;;  %v1236_v41 = vld [vmem:[%s1170_s17 + $0x20] sm:$0xff]   ;;  %v1257_v54 = vld [vmem:[%s1170_s17 + $0x28] sm:$0xff]  }
  0x12   : > { %v285_v10 = vsel %vm280_vm0, %v282_v3, %v284_v4  ;;  %v1194_v11 = vpack.c.b16 %v1057_v6, %v1184_v5  ;;  %v427_v17 = vrot.slane %v1176_v1, 2  ;;  %v243_v20 = vshrl.u32 %v1176_v1, 16  ;;  %v1253_v53 = vld [vmem:[%s1170_s17] sm:$0xff]   ;;  %v1128_v55 = vld [vmem:[%s1170_s17 + $0x24] sm:$0xf0]  }
  0x13   : > { %294 = vrot.lane.b32.xlu0 %v285_v10, %s1133_s18  ;;  %v1198_v13 = vrot.slane %v231_v7, 1  ;;  %v241_v15 = vrot.slane %v239_v9, 1  ;;  %v429_v21 = vrot.slane %v1202_v16, 2  ;;  %v399_v22 = vrot.slane %v1179_v2, 2  ;;  %v1072_v10 = vld [vmem:[%s1170_s17] sm:$0xe] }
  0x14   : > { %v315_v14 = vrot.slane %v1194_v11, 1  ;;  %v247_v23 = vshll.u32 %v1202_v16, 16  ;;  %v251_v24 = vshrl.u32 %v1202_v16, 16  ;;  %v397_v26 = vrot.slane %v1194_v11, 2 }
  0x15   : > { %v237_v18 = vor.u32 %v235_v8, %v1198_v13  ;;  %v430_v27 = vsel %vm395_vm2, %v427_v17, %v429_v21  ;;  %v459_v28 = vrot.slane %v243_v20, 2  ;;  %v460_v29 = vrot.slane %v239_v9, 3  ;;  %v1071_v9 = vld [vmem:[%s1170_s17] sm:$0xf0] }
  0x16   : > { %v318_v19 = vsel %vm280_vm0, %v315_v14, %v317_v12  ;;  %439 = vrot.lane.b32.xlu2 %v430_v27, %s1133_s18  ;;  %v463_v30 = vrot.slane %v251_v24, 2  ;;  %v464_v31 = vrot.slane %v247_v23, 3  ;;  %v400_v33 = vsel %vm395_vm2, %v397_v26, %v399_v22 }
  0x17   : > { %327 = vrot.lane.b32.xlu1 %v318_v19, %s1134_s19  ;;  %v242_v25 = vsel %vm222_vm1, %v237_v18, %v241_v15  ;;  %v1222_v32 = vor.u32 %v460_v29, %v459_v28  ;;  %v245_v34 = vor.u32 %v243_v20, %v241_v15  ;;  %v249_v35 = vrot.slane %v247_v23, 1  ;;  %v184_v18 = vld [vmem:[%s1170_s17 + $0x4] sm:$0xe]  ;;  %v182_v19 = vld [vmem:[%s1170_s17 + $0x28] sm:$0x1] }
  0x18   : > { %v465_v36 = vor.u32 %v464_v31, %v463_v30  ;;  %v286_v39 = vrot.slane %v1202_v16, 1  ;;  %v319_v43 = vrot.slane %v1233_v40, 1  ;;  %v259_v44 = vshrl.u32 %v1236_v41, 16 }
  0x19   : > { %v250_v38 = vsel %vm222_vm1, %v245_v34, %v249_v35  ;;  %v401_v46 = vrot.slane %v1233_v40, 2  ;;  %v255_v47 = vshll.u32 %v1236_v41, 16  ;;  %v431_v51 = vrot.slane %v1236_v41, 2 }
  0x1a   : > { %v466_v37 = vsel %vm450_vm3, %v1222_v32, %v465_v36  ;;  %v287_v45 = vsel %vm280_vm0, %v284_v4, %v286_v39  ;;  %v320_v48 = vsel %vm280_vm0, %v317_v12, %v319_v43  ;;  %v467_v49 = vrot.slane %v259_v44, 2 }
  0x1b   : > { %269 = vrot.lane.b32.xlu0 %v242_v25, %s1135_s20  ;;  %v468_v50 = vrot.slane %v255_v47, 3  ;;  %v402_v52 = vsel %vm395_vm2, %v399_v22, %v401_v46  ;;  %v432_v57 = vsel %vm395_vm2, %v429_v21, %v431_v51  ;;  %v253_v58 = vor.u32 %v251_v24, %v249_v35  ;;  %v189_v22 = vld [vmem:[%s1170_s17 + $0x8] sm:$0xc] }
  0x1c   : > { %v1264_v59 = vrot.slane %v255_v47, 1  ;;  %v226_v60 = vshll.u32 %v1253_v53, 16  ;;  %v288_v62 = vrot.slane %v1236_v41, 1  ;;  %v224_v4 = vshrl.u32 %v1253_v53, 16 }
  0x1d   : > { %v1260_v56 = vor.u32 %v468_v50, %v467_v49  ;;  %v1274_v7 = vor.u32 %v1128_v55, %v1127_v42  ;;  %v1073_v21 = vor.u32 %v1072_v10, %v1071_v9  ;;  %v1053_v25 = vunpack.c.l.b16 %v1173_v0  ;;  %v188_v50 = vld [vmem:[%s1170_s17 + $0x4] sm:$0xc]  ;;  %v1034_v9 = vld [vmem:[%s1575_s1 + $0x28] sm:$0xff] }
  0x1e   : > { %491 = vrot.lane.b32.xlu2 %v466_v37, %s1134_s19  ;;  %v258_v63 = vsel %vm222_vm1, %v253_v58, %v1264_v59  ;;  %v228_v6 = vrot.slane %v226_v60, 1  ;;  %v289_v12 = vsel %vm280_vm0, %v286_v39, %v288_v62  ;;  %v305_v27 = vunpack.c.l.b16 %v184_v18  ;;  %v1046_v60 = vld [vmem:[%s1575_s1 + $0x88] sm:$0xff] }
  0x1f   : > { %409 = vrot.lane.b32.xlu1 %v400_v33, %s1135_s20  ;;  %v470_v61 = vsel %vm450_vm3, %v465_v36, %v1260_v56  ;;  %v321_v8 = vrot.slane %v1274_v7, 1  ;;  %v403_v23 = vrot.slane %v1274_v7, 2  ;;  %v220_v28 = vunpack.c.l.b16 %v182_v19  ;;  %829 = vmatpush.bf16.msra.mxu2 %v1046_v60 }
  0x20   : > { %v229_v15 = vor.u32 %v228_v6, %v224_v4  ;;  %v420_v29 = vunpack.c.l.b16 %v189_v22  ;;  %v281_v30 = vrot.slane %v1073_v21, 1  ;;  %v472_v31 = vshrl.u32 %v1257_v54, 16  ;;  %v187_v6 = vld [vmem:[%s1170_s17 + $0x2c] sm:$0x3]  ;;  %v1033_v21 = vld [vmem:[%s1575_s1 + $0x20] sm:$0xff] }
  0x21   : > { %v322_v20 = vsel %vm280_vm0, %v319_v43, %v321_v8  ;;  %v475_v33 = vshll.u32 %v1257_v54, 16  ;;  %v433_v34 = vrot.slane %v1257_v54, 2  ;;  %v1303_v35 = vpack.c.b16 %v1053_v25, %v305_v27  ;;  %v186_v43 = vld [vmem:[%s1170_s17 + $0x2c] sm:$0x1]  ;;  %v1383_v27 = vld [vmem:[%s1575_s1 + $0x60] sm:$0xff] }
  0x22   : > { %v234_v24 = vsel %vm222_vm1, %v229_v15, %v1198_v13  ;;  %v404_v13 = vsel %vm395_vm2, %v401_v46, %v403_v23  ;;  %v221_v36 = vpack.c.b16 %v220_v28, %v220_v28  ;;  %v1306_v37 = vpack.c.b16 %v1184_v5, %v420_v29  ;;  %v1036_v46 = vld [vmem:[%s1575_s1 + $0x38] sm:$0xff]  ;;  %v1370_v15 = vld [vmem:[%s1575_s1 + $0x68] sm:$0xff] }
  0x23   : > { %271 = vrot.lane.b32.xlu0 %v250_v38, %s1135_s20  ;;  %v283_v38 = vsel %vm280_vm0, %v281_v30, %v282_v3  ;;  %v474_v39 = vrot.slane %v472_v31, 2  ;;  %v477_v42 = vrot.slane %v475_v33, 3  ;;  %v434_v47 = vsel %vm395_vm2, %v431_v51, %v433_v34  ;;  %1088 = vmatpush.bf16.msra.mxu3 %v1036_v46  ;;  %v1334_v51 = vld [vmem:[%s1575_s1 + $0x78] sm:$0xff] }
  0x24   : > { %v263_v49 = vshll.u32 %v221_v36, 16  ;;  %755 = vmatpush.bf16.msra.mxu0 %v1036_v46  ;;  %v393_v58 = vunpack.c.l.b16 %v188_v50  ;;  %1096 = vmatpush.bf16.msra.mxu1 %v1334_v51  ;;  %v336_v19 = vunpack.c.l.b16 %v187_v6  ;;  %v1032_v31 = vld [vmem:[%s1575_s1 + $0x18] sm:$0xff]  ;;  %v1029_v6 = vld [vmem:[%s1575_s1] sm:$0xff] }
  0x25   : > { %v1336_v55 = vor.u32 %v477_v42, %v474_v39  ;;  %v452_v39 = vshrl.u32 %v1306_v37, 16  ;;  %v455_v42 = vshll.u32 %v1306_v37, 16 }
  0x26   : > { %329 = vrot.lane.b32.xlu2 %v320_v48, %s1134_s19  ;;  %v314_v48 = vrot.slane %v1303_v35, 1  ;;  %v265_v4 = vrot.slane %v263_v49, 1  ;;  %v1388_v29 = vpack.c.b16 %v336_v19, %v336_v19  ;;  %v357_v19 = vshrl.u32 %v1179_v2, 16 }
  0x27   : > { %296 = vrot.lane.b32.xlu1 %v287_v45, %s1133_s18  ;;  %v426_v45 = vrot.slane %v1306_v37, 2  ;;  %v479_v10 = vsel %vm450_vm3, %v1260_v56, %v1336_v55  ;;  %v290_v56 = vrot.slane %v221_v36, 1  ;;  %v454_v46 = vrot.slane %v452_v39, 2 }
  0x28   : > { %v405_v36 = vrot.slane %v1388_v29, 2  ;;  %v369_v39 = vshll.u32 %v1233_v40, 16 }
  0x29   : > { %v1326_v3 = vsel %vm395_vm2, %v426_v45, %v427_v17  ;;  %v1343_v17 = vld [vmem:[%s1575_s1 + $0x70] sm:$0xff]  ;;  %v291_v28 = vsel %vm280_vm0, %v288_v62, %v290_v56  ;;  %v351_v56 = vshll.u32 %v1194_v11, 16 }
  0x2a   : > { %1097 = vmatpush.bf16.msra.mxu1 %v1343_v17 }
  0x2b   : > { %411 = vrot.lane.b32.xlu0 %v402_v52, %s1135_s20  ;;  %v1035_v52 = vld [vmem:[%s1575_s1 + $0x30] sm:$0xff] }
  0x2c   : > { %1089 = vmatpush.bf16.msra.mxu3 %v1035_v52  ;;  %756 = vmatpush.bf16.msra.mxu0 %v1035_v52 }
  0x2e   : > { %493 = vrot.lane.b32.xlu2 %v470_v61, %s1134_s19  ;;  %v316_v61 = vsel %vm280_vm0, %v314_v48, %v315_v14  ;;  %v1045_v14 = vld [vmem:[%s1575_s1 + $0x80] sm:$0xff]  ;;  %1098 = vmatpush.bf16.msra.mxu1 %v1370_v15 }
  0x2f   : > { %441 = vrot.lane.b32.xlu1 %v432_v57, %s1133_s18  ;;  %v307_v57 = vunpack.c.l.b16 %v186_v43  ;;  %830 = vmatpush.bf16.msra.mxu2 %v1045_v14 }
  0x30   : > { %1090 = vmatpush.bf16.msra.mxu3 %v1034_v9  ;;  %757 = vmatpush.bf16.msra.mxu0 %v1034_v9  ;;  %v1038_v9 = vld [vmem:[%s1575_s1 + $0x48] sm:$0xff] }
  0x32   : > { %1099 = vmatpush.bf16.msra.mxu1 %v1383_v27 }
  0x33   : > { %273 = vrot.lane.b32.xlu0 %v258_v63, %s1135_s20  ;;  %v261_v63 = vor.u32 %v259_v44, %v1264_v59  ;;  %v394_v44 = vpack.c.b16 %v1053_v25, %v393_v58  ;;  %v192_v59 = vld [vmem:[%s1170_s17 + $0x30] sm:$0x7] }
  0x34   : > { %1091 = vmatpush.bf16.msra.mxu3 %v1033_v21  ;;  %758 = vmatpush.bf16.msra.mxu0 %v1033_v21 }
  0x35   : > { %v266_v18 = vsel %vm222_vm1, %v261_v63, %v265_v4  ;;  %v396_v25 = vrot.slane %v394_v44, 2  ;;  %v1039_v4 = vld [vmem:[%s1575_s1 + $0x50] sm:$0xff] }
  0x36   : > { %331 = vrot.lane.b32.xlu2 %v322_v20, %s1134_s19  ;;  %v191_v20 = vld [vmem:[%s1170_s17 + $0x30] sm:$0x3] }
  0x37   : > { %298 = vrot.lane.b32.xlu1 %v289_v12, %s1133_s18  ;;  %v313_v12 = vpack.c.b16 %v307_v57, %v307_v57  ;;  %v422_v30 = vunpack.c.l.b16 %v191_v20  ;;  %v398_v62 = vsel %vm395_vm2, %v396_v25, %v397_v26  ;;  %v406_v26 = vsel %vm395_vm2, %v403_v23, %v405_v36  ;;  %v193_v57 = vld [vmem:[%s1170_s17 + $0x8] sm:$0x8] }
  0x38   : > { %1092 = vmatpush.bf16.msra.mxu3 %v1032_v31  ;;  %759 = vmatpush.bf16.msra.mxu0 %v1032_v31  ;;  %v500_v60 = vunpack.c.l.b16 %v193_v57  ;;  %v360_v20 = vshll.u32 %v1179_v2, 16  ;;  %v359_v25 = vrot.slane %v357_v19, 1 }
  0x39   : > { %v323_v22 = vrot.slane %v313_v12, 1  ;;  %v506_v12 = vrot.slane %v1202_v16, 3 }
  0x3b   : > { %267 = vrot.lane.b32.xlu0 %v234_v24, %s1135_s20  ;;  %v448_v24 = vunpack.c.l.b16 %v192_v59  ;;  %v324_v33 = vsel %vm280_vm0, %v321_v8, %v323_v22 }
  0x3e   : > { %292 = vrot.lane.b32.xlu2 %v283_v38, %s1133_s18  ;;  %v425_v38 = vpack.c.b16 %v422_v30, %v422_v30 }
  0x3f   : > { %413 = vrot.lane.b32.xlu1 %v404_v13, %s1135_s20  ;;  %v1396_v13 = vpack.c.b16 %v448_v24, %v448_v24  ;;  %v353_v24 = vrot.slane %v351_v56, 2 }
  0x40   : > { %v435_v45 = vrot.slane %v425_v38, 2  ;;  %v366_v38 = vshrl.u32 %v1233_v40, 16 }
  0x41   : > { %v481_v8 = vshrl.u32 %v1396_v13, 16  ;;  %v484_v43 = vshll.u32 %v1396_v13, 16 }
  0x42   : > { %v436_v49 = vsel %vm395_vm2, %v433_v34, %v435_v45 }
  0x43   : > { %443 = vrot.lane.b32.xlu0 %v434_v47, %s1133_s18  ;;  %v457_v47 = vrot.slane %v455_v42, 3  ;;  %v483_v48 = vrot.slane %v481_v8, 2  ;;  %v486_v37 = vrot.slane %v484_v43, 3 }
  0x45   : > { %v458_v50 = vor.u32 %v457_v47, %v454_v46  ;;  %v487_v52 = vor.u32 %v486_v37, %v483_v48  ;;  %v368_v46 = vrot.slane %v366_v38, 1  ;;  %v371_v47 = vrot.slane %v369_v39, 2 }
  0x46   : > { %495 = vrot.lane.b32.xlu2 %v479_v10, %s1134_s19  ;;  %v1037_v10 = vld [vmem:[%s1575_s1 + $0x40] sm:$0xff] }
  0x47   : > { %325 = vrot.lane.b32.xlu1 %v316_v61, %s1134_s19  ;;  %v462_v23 = vsel %vm450_vm3, %v458_v50, %v1222_v32  ;;  %v488_v58 = vsel %vm450_vm3, %v1336_v55, %v487_v52  ;;  %v501_v61 = vpack.c.b16 %v1184_v5, %v500_v60  ;;  %v1031_v32 = vld [vmem:[%s1575_s1 + $0x10] sm:$0xff]  ;;  %v1040_v55 = vld [vmem:[%s1575_s1 + $0x58] sm:$0xff]  ;;  %v1030_v5 = vld [vmem:[%s1575_s1 + $0x8] sm:$0xff]  ;;  %v372_v40 = vor.u32 %v371_v47, %v368_v46 }
  0x48   : > { %1093 = vmatpush.bf16.msra.mxu3 %v1031_v32  ;;  %1100 = vmatpush.bf16.msra.mxu1 %v1040_v55 }
  0x49   : > { %v503_v34 = vrot.slane %v501_v61, 3  ;;  %760 = vmatpush.bf16.msra.mxu0 %v1031_v32  ;;  %v512_v32 = vrot.slane %v1396_v13, 3 }
  0x4b   : > { %275 = vrot.lane.b32.xlu0 %v266_v18, %s1135_s20  ;;  %v508_v18 = vrot.slane %v1236_v41, 3 }
  0x4c   : > { %1094 = vmatpush.bf16.msra.mxu3 %v1030_v5  ;;  %1101 = vmatpush.bf16.msra.mxu1 %v1039_v4 }
  0x4d   : > { %761 = vmatpush.bf16.msra.mxu0 %v1030_v5  ;;  %v378_v5 = vshll.u32 %v1274_v7, 16 }
  0x4e   : > { %333 = vrot.lane.b32.xlu2 %v324_v33, %s1134_s19 }
  0x4f   : > { %300 = vrot.lane.b32.xlu1 %v291_v28, %s1133_s18 }
  0x50   : > { %1095 = vmatpush.bf16.msra.mxu3 %v1029_v6  ;;  %1102 = vmatpush.bf16.msra.mxu1 %v1038_v9 }
  0x51   : > { %762 = vmatpush.bf16.msra.mxu0 %v1029_v6 }
  0x53   : > { %407 = vrot.lane.b32.xlu0 %v398_v62, %s1135_s20 }
  0x54   : > { %1103 = vmatpush.bf16.msra.mxu1 %v1037_v10 }
  0x55   : > { %789 = vmatpush.bf16.msrb.mxu0 %v1334_v51  ;;  %v348_v51 = vshrl.u32 %v1194_v11, 16 }
  0x56   : > { %437 = vrot.lane.b32.xlu2 %v1326_v3, %s1133_s18  ;;  %v504_v3 = vrot.slane %v1176_v1, 3 }
  0x57   : > { %415 = vrot.lane.b32.xlu1 %v406_v26, %s1135_s20  ;;  %v350_v22 = vrot.slane %v348_v51, 1  ;;  %v510_v26 = vrot.slane %v1257_v54, 3 }
  0x58   : > { %v505_v63 = vsel %vm502_vm4, %v503_v34, %v504_v3  ;;  %v507_v44 = vsel %vm502_vm4, %v504_v3, %v506_v12 }
  0x59   : > { %1022 = vmatmul.msk.bf16.vlgmr.msra.gmra.mxu2 %vm514_vm5, %v505_v63  ;;  %790 = vmatpush.bf16.msrb.mxu0 %v1343_v17  ;;  %v509_v17 = vsel %vm502_vm4, %v506_v12, %v508_v18  ;;  %v1466_v30 = vor.u32 %v353_v24, %v350_v22  ;;  %v511_v48 = vsel %vm502_vm4, %v508_v18, %v510_v26  ;;  %v380_v12 = vrot.slane %v378_v5, 2 }
  0x5b   : > { %445 = vrot.lane.b32.xlu0 %v436_v49, %s1133_s18 }
  0x5d   : > { %791 = vmatpush.bf16.msrb.mxu0 %v1370_v15 }
  0x5e   : > { %497 = vrot.lane.b32.xlu2 %v488_v58, %s1134_s19 }
  0x5f   : > { %489 = vrot.lane.b32.xlu1 %v462_v23, %s1134_s19 }
  0x61   : > { %792 = vmatpush.bf16.msrb.mxu0 %v1383_v27  ;;  %v362_v27 = vrot.slane %v360_v20, 2 }
  0x63   : > { %v363_v11 = vor.u32 %v362_v27, %v359_v25  ;;  %v384_v27 = vshrl.u32 %v1388_v29, 16 }
  0x65   : > { %793 = vmatpush.bf16.msrb.mxu0 %v1040_v55  ;;  %v364_v62 = vsel %vm338_vm7, %v1466_v30, %v363_v11  ;;  %v373_v54 = vsel %vm338_vm7, %v363_v11, %v372_v40  ;;  %v375_v55 = vshrl.u32 %v1274_v7, 16  ;;  %v340_v11 = vshrl.u32 %v1303_v35, 16 }
  0x69   : > { %1023 = vmatmul.msk.bf16.gmra.mxu2 %vm514_vm5, %v507_v44  ;;  %794 = vmatpush.bf16.msrb.mxu0 %v1039_v4  ;;  %v513_v4 = vsel %vm502_vm4, %v510_v26, %v512_v32 }
  0x6d   : > { %795 = vmatpush.bf16.msrb.mxu0 %v1038_v9 }
  0x70   : > { %v440_v14 = vpop.permute.xlu2 %439 }
  0x71   : > { %796 = vmatpush.bf16.msrb.mxu0 %v1037_v10  ;;  %v377_v10 = vrot.slane %v375_v55, 1 }
  0x73   : > { %v381_v13 = vor.u32 %v380_v12, %v377_v10 }
  0x75   : > { %v382_v7 = vsel %vm338_vm7, %v372_v40, %v381_v13 }
  0x78   : > { %v492_v59 = vpop.permute.xlu2 %491 }
  0x79   : > { %1024 = vmatmul.msk.bf16.gmra.mxu2 %vm514_vm5, %v509_v17 }
  0x80   : > { %v330_v15 = vpop.permute.xlu2 %329 }
  0x85   : > { %v295_v21 = vpop.permute.xlu0 %294 }
  0x88   : > { %v494_v42 = vpop.permute.xlu2 %493 }
  0x89   : > { %v328_v28 = vpop.permute.xlu1 %327  ;;  %1025 = vmatmul.msk.bf16.gmra.mxu2 %vm514_vm5, %v511_v48 }
  0x8d   : > { %v270_v2 = vpop.permute.xlu0 %269 }
  0x8e   : > { %v518_v31 = vsel %vm514_vm5, %v1173_v0, %v270_v2  ;;  %v343_v2 = vshll.u32 %v1303_v35, 16 }
  0x8f   : > { %v529_v33 = vsel %vm525_vm6, %v518_v31, %v295_v21 }
  0x90   : > { %v541_v36 = vsel %vm536_vm8, %v529_v33, %v328_v28  ;;  %v332_v52 = vpop.permute.xlu2 %331  ;;  %v387_v28 = vshll.u32 %v1388_v29, 16 }
  0x91   : > { %768 = vmatmul.bf16.vlgmr.msra.gmra.mxu3 %v541_v36  ;;  %v410_v8 = vpop.permute.xlu1 %409  ;;  %v386_v36 = vrot.slane %v384_v27, 1 }
  0x92   : > { %v557_v43 = vsel %vm514_vm5, %v364_v62, %v410_v8  ;;  %v389_v38 = vrot.slane %v387_v28, 2  ;;  %v345_v8 = vrot.slane %v343_v2, 2 }
  0x93   : > { %v570_v0 = vsel %vm525_vm6, %v557_v43, %v440_v14 }
  0x94   : > { %v581_v45 = vsel %vm536_vm8, %v570_v0, %v492_v59  ;;  %v390_v29 = vor.u32 %v389_v38, %v386_v36 }
  0x95   : > { %v272_v37 = vpop.permute.xlu0 %271  ;;  %802 = vmatmul.bf16.vlgmr.msra.gmra.mxu1 %v581_v45 }
  0x96   : > { %v520_v50 = vsel %vm514_vm5, %v1176_v1, %v272_v37 }
  0x98   : > { %v293_v63 = vpop.permute.xlu2 %292 }
  0x99   : > { %v297_v49 = vpop.permute.xlu1 %296  ;;  %1026 = vmatmul.msk.bf16.gmra.mxu2 %vm514_vm5, %v513_v4 }
  0x9a   : > { %v531_v23 = vsel %vm525_vm6, %v520_v50, %v297_v49 }
  0x9b   : > { %v544_v60 = vsel %vm536_vm8, %v531_v23, %v330_v15 }
  0x9d   : > { %v412_v57 = vpop.permute.xlu0 %411 }
  0x9e   : > { %v560_v58 = vsel %vm514_vm5, %v373_v54, %v412_v57  ;;  %v1531_v57 = vld [vmem:[%s1576_s2] ss:$0 sm:$0xff] }
  0xa0   : > { %v496_v59 = vpop.permute.xlu2 %495 }
  0xa1   : > { %773 = vmatmul.bf16.gmra.mxu3 %v544_v60  ;;  %v442_v61 = vpop.permute.xlu1 %441 }
  0xa2   : > { %v572_v34 = vsel %vm525_vm6, %v560_v58, %v442_v61 }
  0xa3   : > { %v584_v3 = vsel %vm536_vm8, %v572_v34, %v494_v42  ;;  %v342_v42 = vrot.slane %v340_v11, 1 }
  0xa5   : > { %v274_v1 = vpop.permute.xlu0 %273  ;;  %807 = vmatmul.bf16.gmra.mxu1 %v584_v3  ;;  %v346_v26 = vor.u32 %v345_v8, %v342_v42 }
  0xa6   : > { %v522_v9 = vsel %vm514_vm5, %v1202_v16, %v274_v1 }
  0xa7   : > { %v355_v35 = vsel %vm338_vm7, %v346_v26, %v1466_v30 }
  0xa8   : > { %v334_v21 = vpop.permute.xlu2 %333 }
  0xa9   : > { %v299_v6 = vpop.permute.xlu1 %298 }
  0xaa   : > { %v533_v14 = vsel %vm525_vm6, %v522_v9, %v299_v6 }
  0xab   : > { %v547_v18 = vsel %vm536_vm8, %v533_v14, %v332_v52 }
  0xad   : > { %v268_v44 = vpop.permute.xlu0 %267 }
  0xae   : > { %v516_v20 = vsel %vm514_vm5, %v1253_v53, %v268_v44 }
  0xaf   : > { %v527_v15 = vsel %vm525_vm6, %v516_v20, %v293_v63 }
  0xb0   : > { %v438_v62 = vpop.permute.xlu2 %437 }
  0xb1   : > { %778 = vmatmul.bf16.gmra.mxu3 %v547_v18  ;;  %v414_v51 = vpop.permute.xlu1 %413 }
  0xb2   : > { %v563_v56 = vsel %vm514_vm5, %v382_v7, %v414_v51 }
  0xb5   : > { %v444_v19 = vpop.permute.xlu0 %443 }
  0xb6   : > { %v574_v16 = vsel %vm525_vm6, %v563_v56, %v444_v19 }
  0xb7   : > { %v587_v17 = vsel %vm536_vm8, %v574_v16, %v496_v59 }
  0xb8   : > { %812 = vmatmul.bf16.gmra.mxu1 %v587_v17  ;;  %v498_v45 = vpop.permute.xlu2 %497 }
  0xb9   : > { %v326_v22 = vpop.permute.xlu1 %325 }
  0xba   : > { %v538_v24 = vsel %vm536_vm8, %v527_v15, %v326_v22 }
  0xbb   : > { %763 = vmatmul.bf16.vlgmr.msra.gmra.mxu0 %v538_v24 }
  0xbd   : > { %v276_v25 = vpop.permute.xlu0 %275 }
  0xbe   : > { %v524_v53 = vsel %vm514_vm5, %v1236_v41, %v276_v25  ;;  %v391_v41 = vsel %vm338_vm7, %v381_v13, %v390_v29 }
  0xc1   : > { %v301_v31 = vpop.permute.xlu1 %300 }
  0xc2   : > { %v535_v33 = vsel %vm525_vm6, %v524_v53, %v301_v31 }
  0xc3   : > { %v550_v39 = vsel %vm536_vm8, %v535_v33, %v334_v21 }
  0xc4   : > { %783 = vmatmul.bf16.gmra.mxu3 %v550_v39 }
  0xc5   : > { %v408_v43 = vpop.permute.xlu0 %407 }
  0xc6   : > { %v554_v48 = vsel %vm514_vm5, %v355_v35, %v408_v43 }
  0xc7   : > { %v568_v49 = vsel %vm525_vm6, %v554_v48, %v438_v62 }
  0xc9   : > { %v416_v0 = vpop.permute.xlu1 %415 }
  0xca   : > { %v566_v46 = vsel %vm514_vm5, %v391_v41, %v416_v0 }
  0xcd   : > { %v446_v47 = vpop.permute.xlu0 %445 }
  0xce   : > { %v576_v37 = vsel %vm525_vm6, %v566_v46, %v446_v47 }
  0xcf   : > { %v590_v40 = vsel %vm536_vm8, %v576_v37, %v498_v45 }
  0xd0   : > { %817 = vmatmul.bf16.gmra.mxu1 %v590_v40 }
  0xd1   : > { %v490_v50 = vpop.permute.xlu1 %489 }
  0xd2   : > { %v578_v52 = vsel %vm536_vm8, %v568_v49, %v490_v50 }
  0xd3   : > { %797 = vmatmul.bf16.vlgmr.msrb.gmra.mxu0 %v578_v52 }
  0xdc   : > { %v1524_v54 = vpop.f32.mrf.mxu2 }
  0xe4   : > { %v1526_v30 = vpop.f32.mrf.mxu2 }
  0xec   : > { %v837_v23 = vpop.f32.mrf.mxu2 }
  0xf4   : > { %v839_v34 = vpop.f32.mrf.mxu2 }
  0xfc   : > { %v842_v9 = vpop.f32.mrf.mxu2 }
 0x104   : > { %v844_v7 = vpop.f32.mrf.mxu2 }
 0x10c   : > { %v847_v25 = vpop.f32.mrf.mxu2 }
 0x112   : > { %v803_v58 = vpop.f32.mrf.mxu1 }
 0x114   : > { %v769_v60 = vpop.f32.mrf.mxu3  ;;  %v849_v42 = vpop.f32.mrf.mxu2 }
 0x115   : > { %v770_v61 = vadd.f32 %v1531_v57, %v769_v60 }
 0x117   : > { %v804_v3 = vadd.f32 %v803_v58, %v770_v61 }
 0x119   : > { %v838_v63 = vadd.f32 %v837_v23, %v804_v3 }
 0x11a   : > { %v805_v32 = vpop.f32.mrf.mxu1 }
 0x11b   : > { %v859_v1 = vmax.f32 %v838_v63, 0.0 }
 0x11c   : > { %v771_v55 = vpop.f32.mrf.mxu3  ;;  %v852_v45 = vpop.f32.mrf.mxu2 }
 0x11d   : > { %v869_v5 = vpack.c.bf16 %v859_v1, %v859_v1  ;;  %v772_v4 = vadd.f32 %v1531_v57, %v771_v55 }
 0x11f   : > { %880 = vst.msk [vmem:[%s1538_s10 + $0x8] sm:$0xf] %vm877_vm9, %v869_v5  ;;  %v806_v6 = vadd.f32 %v805_v32, %v772_v4 }
 0x121   : > { %v840_v10 = vadd.f32 %v839_v34, %v806_v6 }
 0x122   : > { %v808_v14 = vpop.f32.mrf.mxu1 }
 0x123   : > { %v860_v12 = vmax.f32 %v840_v10, 0.0 }
 0x124   : > { %v774_v44 = vpop.f32.mrf.mxu3  ;;  %v854_v1 = vpop.f32.mrf.mxu2 }
 0x125   : > { %v870_v13 = vpack.c.bf16 %v860_v12, %v860_v12  ;;  %v775_v59 = vadd.f32 %v1531_v57, %v774_v44 }
 0x127   : > { %881 = vst.msk [vmem:[%s1538_s10 + $0xc] sm:$0xf] %vm877_vm9, %v870_v13  ;;  %v809_v18 = vadd.f32 %v808_v14, %v775_v59 }
 0x129   : > { %v843_v51 = vadd.f32 %v842_v9, %v809_v18 }
 0x12a   : > { %v810_v16 = vpop.f32.mrf.mxu1 }
 0x12b   : > { %v861_v56 = vmax.f32 %v843_v51, 0.0 }
 0x12c   : > { %v776_v19 = vpop.f32.mrf.mxu3 }
 0x12d   : > { %v871_v20 = vpack.c.bf16 %v861_v56, %v861_v56  ;;  %v777_v17 = vadd.f32 %v1531_v57, %v776_v19 }
 0x12f   : > { %882 = vst.msk [vmem:[%s1538_s10 + $0x10] sm:$0xf] %vm877_vm9, %v871_v20  ;;  %v811_v21 = vadd.f32 %v810_v16, %v777_v17 }
 0x131   : > { %v845_v15 = vadd.f32 %v844_v7, %v811_v21 }
 0x133   : > { %v862_v22 = vmax.f32 %v845_v15, 0.0 }
 0x134   : > { %v779_v24 = vpop.f32.mrf.mxu3 }
 0x135   : > { %v872_v27 = vpack.c.bf16 %v862_v22, %v862_v22  ;;  %v780_v28 = vadd.f32 %v1531_v57, %v779_v24  ;;  %v813_v53 = vpop.f32.mrf.mxu1 }
 0x137   : > { %883 = vst.msk [vmem:[%s1538_s10 + $0x14] sm:$0xf] %vm877_vm9, %v872_v27  ;;  %v814_v11 = vadd.f32 %v813_v53, %v780_v28 }
 0x138   : > { %v764_v39 = vpop.f32.mrf.mxu0 }
 0x139   : > { %v848_v2 = vadd.f32 %v847_v25, %v814_v11  ;;  %v765_v48 = vadd.f32 %v1531_v57, %v764_v39 }
 0x13b   : > { %v863_v31 = vmax.f32 %v848_v2, 0.0 }
 0x13c   : > { %v781_v33 = vpop.f32.mrf.mxu3 }
 0x13d   : > { %v873_v62 = vpack.c.bf16 %v863_v31, %v863_v31  ;;  %v782_v36 = vadd.f32 %v1531_v57, %v781_v33  ;;  %v815_v38 = vpop.f32.mrf.mxu1 }
 0x13f   : > { %884 = vst.msk [vmem:[%s1538_s10 + $0x18] sm:$0xf] %vm877_vm9, %v873_v62  ;;  %v816_v8 = vadd.f32 %v815_v38, %v782_v36 }
 0x140   : > { %v766_v41 = vpop.f32.mrf.mxu0 }
 0x141   : > { %v850_v43 = vadd.f32 %v849_v42, %v816_v8  ;;  %v767_v63 = vadd.f32 %v1531_v57, %v766_v41 }
 0x143   : > { %v864_v29 = vmax.f32 %v850_v43, 0.0 }
 0x145   : > { %v874_v26 = vpack.c.bf16 %v864_v29, %v864_v29 }
 0x147   : > { %885 = vst.msk [vmem:[%s1538_s10 + $0x1c] sm:$0xf] %vm877_vm9, %v874_v26  ;;  %v784_v0 = vpop.f32.mrf.mxu3 }
 0x148   : > { %v785_v35 = vadd.f32 %v1531_v57, %v784_v0 }
 0x14d   : > { %v818_v46 = vpop.f32.mrf.mxu1 }
 0x14e   : > { %v819_v47 = vadd.f32 %v818_v46, %v785_v35 }
 0x14f   : > { %v786_v49 = vpop.f32.mrf.mxu3 }
 0x150   : > { %v853_v37 = vadd.f32 %v852_v45, %v819_v47  ;;  %v798_v40 = vpop.f32.mrf.mxu0  ;;  %v787_v60 = vadd.f32 %v1531_v57, %v786_v49 }
 0x151   : > { %v799_v50 = vadd.f32 %v798_v40, %v765_v48 }
 0x152   : > { %v865_v52 = vmax.f32 %v853_v37, 0.0 }
 0x153   : > { %v833_v23 = vadd.f32 %v1524_v54, %v799_v50 }
 0x154   : > { %v875_v58 = vpack.c.bf16 %v865_v52, %v865_v52 }
 0x155   : > { %v857_v61 = vmax.f32 %v833_v23, 0.0  ;;  %v820_v34 = vpop.f32.mrf.mxu1 }
 0x156   : > { %886 = vst.msk [vmem:[%s1538_s10 + $0x20] sm:$0xf] %vm877_vm9, %v875_v58  ;;  %v821_v3 = vadd.f32 %v820_v34, %v787_v60 }
 0x157   : > { %v867_v32 = vpack.c.bf16 %v857_v61, %v857_v61 }
 0x158   : > { %v855_v55 = vadd.f32 %v854_v1, %v821_v3  ;;  %v800_v5 = vpop.f32.mrf.mxu0 }
 0x159   : > { %878 = vst.msk [vmem:[%s1538_s10] sm:$0xf] %vm877_vm9, %v867_v32  ;;  %v801_v4 = vadd.f32 %v800_v5, %v767_v63 }
 0x15a   : > { %v866_v54 = vmax.f32 %v855_v55, 0.0 }
 0x15b   : > { %v835_v6 = vadd.f32 %v1526_v30, %v801_v4 }
 0x15c   : > { %v876_v9 = vpack.c.bf16 %v866_v54, %v866_v54 }
 0x15d   : > { %v858_v10 = vmax.f32 %v835_v6, 0.0 }
 0x15e   : > { %887 = vst.msk [vmem:[%s1538_s10 + $0x24] sm:$0xf] %vm877_vm9, %v876_v9 }
 0x15f   : > { %v868_v12 = vpack.c.bf16 %v858_v10, %v858_v10 }
 0x161   : > { %879 = vst.msk [vmem:[%s1538_s10 + $0x4] sm:$0xf] %vm877_vm9, %v868_v12 }
 0x162 PF: > { %s13_s12 = sadd.s32 1, %s1131_s12  }
 0x163   : > { %p10_p4 = scmp.ge.s32.totalorder %s13_s12, 4  }
 0x165   :  { %12 = sbr.rel (!%p10_p4) target bundleno = 1 (0x1), region = 62 }

// kernel: hrnet_forward.62
= control target key start
LH: loop header
LB: loop body
LE: loop exit
PB: predicated region body
PF: predicated region fallthrough
CT: control target
= control target key end

     0   :  { %s1068_s15 = smov 0   ;;  %s1470_s0 = inlined_call_operand.vmem [shape: bf16[2,102,8], index: 0, kind: input, shape index: {}]   ;;  %s1471_s1 = inlined_call_operand.vmem [shape: bf16[72,8], index: 1, kind: input, shape index: {}]   ;;  %s1472_s2 = inlined_call_operand.vmem [shape: f32[1,8], index: 2, kind: input, shape index: {}]   ;;  %s1473_s3 = inlined_call_operand.vmem [shape: bf16[2,80,8], index: 3, kind: input, shape index: {}]   ;;  %s1474_s4 = inlined_call_operand.vmem [shape: bf16[2,80,8], index: 4, kind: output, shape index: {}]  }
   0x1 LB: > { %s886_s16 = sadd.s32 4294967295, %s1033_s15   ;;  %p890_p0 = scmp.ge.s32.totalorder %s1033_s15, 1  ;;  %s1033_s15 = sphi %s1068_s15, %s14_s15  }
   0x2   : > { %p172_p1 = scmp.lt.s32.totalorder %s1033_s15, 3 }
   0x4   : > { %p173_p2 = pnand %p890_p0, %p172_p1 }
   0x5   : > { %p203_p3 = scmp.lt.s32.totalorder (!%p173_p2), %s886_s16, 1  ;;  %s1035_s21 = smov (!%p173_p2), 16  }
   0x6   : > { %176 = sbr.rel (%p173_p2) target bundleno = 382 (0x17e), region = 36  ;;  %s1036_s22 = smov (!%p173_p2), 24  }
   0x7   : > { %s1037_s23 = smov (!%p173_p2), 8   ;;  %s1038_s24 = smov (!%p173_p2), 40  }
   0x8   : > { %s1039_s25 = smov (!%p173_p2), 64   ;;  %s1040_s26 = smov (!%p173_p2), 56  }
   0x9   : > { %s1041_s27 = smov (!%p173_p2), 48   ;;  %s1042_s28 = smov (!%p173_p2), 32  }
   0xb   : > { %s1476_s16 = smov (!%p203_p3, %s886_s16), 1  ;;  %vm327_vm0 = vcmask 1046528   ;;  %vm269_vm1 = vsmask.f32 7424  ;;  %vm452_vm2 = vcmask 1045504   ;;  %vm559_vm3 = vcmask 1044480  }
   0xc   : > { %s1001_s17 = smul.u32 52, %s1476_s16  ;;  %vm507_vm4 = vsmask.f32 5376  ;;  %vm385_vm5 = vsmask.f32 6400  ;;  %vm720_vm6 = vcmask 1043456  }
   0xd   : > { %vm581_vm7 = vcmask 64512   ;;  %vm592_vm8 = vcmask 130048   ;;  %vm603_vm9 = vcmask 195584   ;;  %vm614_vm10 = vcmask 261120   ;;  %s1002_s13 = smul.u32 40, %s1476_s16 }
   0xe   : > { %s1082_s20 = scalar_lea.vmem %s1470_s0, %s1001_s17  ;;  %vm625_vm11 = vcmask 326656   ;;  %vm636_vm12 = vcmask 392192   ;;  %vm647_vm13 = vcmask 457728   ;;  %vm658_vm14 = vcmask 523264  }
   0xf   : > { %v1085_v0 = vld [vmem:[%s1082_s20 + $0x18] sm:$0xff]   ;;  %v1088_v1 = vld [vmem:[%s1082_s20 + $0x20] sm:$0xff]   ;;  %v1097_v6 = vld [vmem:[%s1082_s20 + $0x28] sm:$0xff]   ;;  %vm709_vm15 = vcmask 588800   ;;  %s1420_s18 = scalar_lea.vmem %s1473_s3, %s1002_s13 }
  0x10   : > { %v1029_v2 = vld [vmem:[%s1082_s20 + $0x24] sm:$0xf]  ;;  %v1092_v3 = vld [vmem:[%s1082_s20 + $0x1c] sm:$0xff]   ;;  %v333_v4 = vrot.slane %v1085_v0, 1  ;;  %v335_v5 = vrot.slane %v1088_v1, 1  ;;  %v294_v8 = vshll.u32 %v1085_v0, 16 }
  0x11   : > { %v1030_v7 = vld [vmem:[%s1082_s20 + $0x24] sm:$0xf0]   ;;  %v298_v9 = vshrl.u32 %v1085_v0, 16  ;;  %v302_v10 = vshll.u32 %v1088_v1, 16  ;;  %v366_v14 = vrot.slane %v1092_v3, 1  ;;  %v306_v15 = vshrl.u32 %v1088_v1, 16 }
  0x12   : > { %v336_v11 = vsel %vm327_vm0, %v333_v4, %v335_v5  ;;  %v1110_v12 = vrot.slane %v294_v8, 1  ;;  %v1113_v13 = vor.u32 %v1030_v7, %v1029_v2  ;;  %v565_v19 = vrot.slane %v1088_v1, 3  ;;  %v229_v28 = vld [vmem:[%s1082_s20 + $0x28] sm:$0x1]  ;;  %v1156_v45 = vld [vmem:[%s1082_s20 + $0x10] sm:$0xff]  }
  0x13   : > { %345 = vrot.lane.b32.xlu0 %v336_v11, %s1035_s21  ;;  %v304_v17 = vrot.slane %v302_v10, 1  ;;  %v525_v20 = vrot.slane %v302_v10, 3  ;;  %v529_v21 = vshrl.u32 %v1097_v6, 16  ;;  %v532_v22 = vshll.u32 %v1097_v6, 16  ;;  %v234_v57 = vld [vmem:[%s1082_s20 + $0x2c] sm:$0x3] }
  0x14   : > { %v300_v16 = vor.u32 %v298_v9, %v1110_v12  ;;  %v368_v18 = vrot.slane %v1113_v13, 1  ;;  %v413_v23 = vshrl.u32 %v1092_v3, 16  ;;  %v524_v25 = vrot.slane %v306_v15, 2  ;;  %v233_v63 = vld [vmem:[%s1082_s20 + $0x2c] sm:$0x1]  ;;  %v1187_v10 = vld [vmem:[%s1082_s20 + $0x14] sm:$0xff]  }
  0x15   : > { %v416_v26 = vshll.u32 %v1092_v3, 16  ;;  %v422_v27 = vshrl.u32 %v1113_v13, 16  ;;  %v567_v30 = vrot.slane %v1097_v6, 3  ;;  %v531_v31 = vrot.slane %v529_v21, 2 }
  0x16   : > { %v369_v24 = vsel %vm327_vm0, %v366_v14, %v368_v18  ;;  %v305_v29 = vsel %vm269_vm1, %v300_v16, %v304_v17  ;;  %v534_v32 = vrot.slane %v532_v22, 3  ;;  %v425_v33 = vshll.u32 %v1113_v13, 16 }
  0x17   : > { %378 = vrot.lane.b32.xlu1 %v369_v24, %s1036_s22  ;;  %v458_v34 = vrot.slane %v1092_v3, 2  ;;  %v460_v35 = vrot.slane %v1113_v13, 2  ;;  %v267_v36 = vunpack.c.l.b16 %v229_v28  ;;  %v1140_v37 = vor.u32 %v525_v20, %v524_v25 }
  0x18   : > { %v415_v38 = vrot.slane %v413_v23, 1  ;;  %v418_v39 = vrot.slane %v416_v26, 2  ;;  %v568_v41 = vsel %vm559_vm3, %v565_v19, %v567_v30  ;;  %v1152_v42 = vor.u32 %v534_v32, %v531_v31 }
  0x19   : > { %v461_v40 = vsel %vm452_vm2, %v458_v34, %v460_v35  ;;  %v424_v43 = vrot.slane %v422_v27, 1  ;;  %v268_v44 = vpack.c.b16 %v267_v36, %v267_v36  ;;  %v427_v46 = vrot.slane %v425_v33, 2 }
  0x1a   : > { %470 = vrot.lane.b32.xlu2 %v461_v40, %s1038_s24  ;;  %v488_v47 = vrot.slane %v1088_v1, 2  ;;  %v490_v48 = vrot.slane %v1097_v6, 2  ;;  %v286_v49 = vshll.u32 %v1156_v45, 16  ;;  %v536_v50 = vsel %vm507_vm4, %v1140_v37, %v1152_v42 }
  0x1b   : > { %320 = vrot.lane.b32.xlu0 %v305_v29, %s1037_s23  ;;  %v419_v51 = vor.u32 %v418_v39, %v415_v38  ;;  %v310_v52 = vshll.u32 %v268_v44, 16  ;;  %v428_v53 = vor.u32 %v427_v46, %v424_v43  ;;  %v290_v56 = vshrl.u32 %v1156_v45, 16  ;;  %v238_v38 = vld [vmem:[%s1082_s20 + $0x30] sm:$0x3]  ;;  %v1224_v43 = vld [vmem:[%s1082_s20 + $0x8] sm:$0xff]  }
  0x1c   : > { %v491_v54 = vsel %vm452_vm2, %v488_v47, %v490_v48  ;;  %v1172_v55 = vrot.slane %v286_v49, 1  ;;  %v308_v58 = vor.u32 %v306_v15, %v304_v17  ;;  %v383_v60 = vunpack.c.l.b16 %v234_v57  ;;  %v239_v46 = vld [vmem:[%s1082_s20 + $0x30] sm:$0x7] }
  0x1d   : > { %v312_v59 = vrot.slane %v310_v52, 1  ;;  %v429_v61 = vsel %vm385_vm5, %v419_v51, %v428_v53  ;;  %v331_v7 = vrot.slane %v1156_v45, 1  ;;  %v354_v15 = vunpack.c.l.b16 %v233_v63 }
  0x1e   : > { %v292_v62 = vor.u32 %v290_v56, %v1172_v55  ;;  %v384_v11 = vpack.c.b16 %v383_v60, %v383_v60  ;;  %v364_v20 = vrot.slane %v1187_v10, 1  ;;  %v337_v24 = vrot.slane %v268_v44, 1  ;;  %v1227_v44 = vld [vmem:[%s1082_s20] sm:$0xff]  }
  0x1f   : > { %577 = vrot.lane.b32.xlu1 %v568_v41, %s1039_s25  ;;  %v313_v2 = vsel %vm269_vm1, %v308_v58, %v312_v59  ;;  %v334_v17 = vsel %vm327_vm0, %v331_v7, %v333_v4  ;;  %v360_v23 = vpack.c.b16 %v354_v15, %v354_v15  ;;  %v404_v25 = vshrl.u32 %v1187_v10, 16 }
  0x20   : > { %v297_v16 = vsel %vm269_vm1, %v292_v62, %v1110_v12  ;;  %v431_v21 = vshrl.u32 %v384_v11, 16  ;;  %v434_v22 = vshll.u32 %v384_v11, 16  ;;  %v407_v12 = vshll.u32 %v1187_v10, 16 }
  0x21   : > { %v367_v4 = vsel %vm327_vm0, %v364_v20, %v366_v14  ;;  %v370_v28 = vrot.slane %v360_v23, 1  ;;  %v338_v29 = vsel %vm327_vm0, %v335_v5, %v337_v24  ;;  %v406_v31 = vrot.slane %v404_v25, 1  ;;  %v236_v24 = vld [vmem:[%s1082_s20 + $0x8] sm:$0xc] }
  0x22   : > { %500 = vrot.lane.b32.xlu2 %v491_v54, %s1041_s27  ;;  %v433_v26 = vrot.slane %v431_v21, 1  ;;  %v436_v27 = vrot.slane %v434_v22, 2  ;;  %v409_v32 = vrot.slane %v407_v12, 2  ;;  %v456_v5 = vrot.slane %v1187_v10, 2  ;;  %v231_v12 = vld [vmem:[%s1082_s20 + $0x4] sm:$0xe] }
  0x23   : > { %552 = vrot.lane.b32.xlu0 %v536_v50, %s1040_s26  ;;  %v371_v14 = vsel %vm327_vm0, %v368_v18, %v370_v28  ;;  %v479_v40 = vunpack.c.l.b16 %v238_v38  ;;  %v486_v18 = vrot.slane %v1085_v0, 2  ;;  %v278_v50 = vshll.u32 %v1224_v43, 16 }
  0x24   : > { %v437_v33 = vor.u32 %v436_v27, %v433_v26  ;;  %v1215_v36 = vor.u32 %v409_v32, %v406_v31  ;;  %v273_v52 = vshll.u32 %v1227_v44, 16  ;;  %v462_v54 = vrot.slane %v384_v11, 2 }
  0x25   : > { %v505_v57 = vunpack.c.l.b16 %v239_v46  ;;  %v489_v58 = vsel %vm452_vm2, %v486_v18, %v488_v47  ;;  %v280_v59 = vrot.slane %v278_v50, 1  ;;  %v282_v3 = vshrl.u32 %v1224_v43, 16 }
  0x26   : > { %v438_v39 = vsel %vm385_vm5, %v428_v53, %v437_v33  ;;  %v420_v41 = vsel %vm385_vm5, %v1215_v36, %v419_v51  ;;  %v459_v51 = vsel %vm452_vm2, %v456_v5, %v458_v34  ;;  %v482_v53 = vpack.c.b16 %v479_v40, %v479_v40 }
  0x27   : > { %445 = vrot.lane.b32.xlu1 %v429_v61, %s1042_s28  ;;  %v271_v60 = vshrl.u32 %v1227_v44, 16  ;;  %v275_v61 = vrot.slane %v273_v52, 1  ;;  %v463_v62 = vsel %vm452_vm2, %v460_v35, %v462_v54  ;;  %v506_v63 = vpack.c.b16 %v505_v57, %v505_v57  ;;  %v965_v35 = vld [vmem:[%s1082_s20] sm:$0xf0] }
  0x28   : > { %v492_v34 = vrot.slane %v482_v53, 2  ;;  %v284_v47 = vor.u32 %v282_v3, %v280_v59  ;;  %v521_v11 = vrot.slane %v294_v8, 3  ;;  %v1268_v25 = vunpack.c.h.b16 %v1224_v43 }
  0x29   : > { %v276_v15 = vor.u32 %v275_v61, %v271_v60  ;;  %v541_v21 = vshll.u32 %v506_v63, 16  ;;  %v477_v26 = vunpack.c.l.b16 %v236_v24  ;;  %v931_v27 = vunpack.c.l.b16 %v1156_v45  ;;  %v677_v24 = vld [vmem:[%s1471_s1 + $0x20] sm:$0xf] }
  0x2a   : > { %318 = vrot.lane.b32.xlu2 %v297_v16, %s1037_s23  ;;  %v493_v13 = vsel %vm452_vm2, %v490_v48, %v492_v34  ;;  %v966_v16 = vld [vmem:[%s1082_s20] sm:$0xe]  ;;  %v927_v31 = vunpack.c.l.b16 %v1224_v43  ;;  %v352_v32 = vunpack.c.l.b16 %v231_v12  ;;  %v516_v50 = vrot.slane %v290_v56, 2 }
  0x2b   : > { %322 = vrot.lane.b32.xlu0 %v313_v2, %s1037_s23  ;;  %v520_v2 = vrot.slane %v298_v9, 2  ;;  %v289_v9 = vsel %vm269_vm1, %v284_v47, %v1172_v55  ;;  %v967_v23 = vor.u32 %v966_v16, %v965_v35  ;;  %v281_v8 = vsel %vm269_vm1, %v276_v15, %v280_v59  ;;  %v235_v35 = vld [vmem:[%s1082_s20 + $0x4] sm:$0xc] }
  0x2c   : > { %v543_v48 = vrot.slane %v541_v21, 3  ;;  %v1274_v28 = vpack.c.b16 %v1268_v25, %v477_v26  ;;  %v356_v40 = vpack.c.b16 %v931_v27, %v1268_v25  ;;  %v699_v12 = vunpack.c.l.b16 %v677_v24 }
  0x2d   : > { %v522_v22 = vor.u32 %v521_v11, %v520_v2  ;;  %v328_v55 = vrot.slane %v967_v23, 1 }
  0x2e   : > { %v509_v38 = vshrl.u32 %v1274_v28, 16  ;;  %v395_v59 = vshrl.u32 %v356_v40, 16  ;;  %v398_v3 = vshll.u32 %v356_v40, 16  ;;  %v704_v27 = vpack.c.b16 %v699_v12, %v699_v12 }
  0x2f   : > { %343 = vrot.lane.b32.xlu1 %v334_v17, %s1035_s21  ;;  %v538_v17 = vshrl.u32 %v506_v63, 16  ;;  %v527_v33 = vsel %vm507_vm4, %v522_v22, %v1140_v37  ;;  %v517_v37 = vrot.slane %v286_v49, 3  ;;  %v563_v49 = vrot.slane %v1085_v0, 3 }
  0x30   : > { %v397_v2 = vrot.slane %v395_v59, 1  ;;  %v400_v11 = vrot.slane %v398_v3, 2 }
  0x31   : > { %v518_v57 = vor.u32 %v517_v37, %v516_v50 }
  0x32   : > { %347 = vrot.lane.b32.xlu2 %v338_v29, %s1035_s21  ;;  %v329_v29 = vrot.slane %v1224_v43, 1  ;;  %v401_v16 = vor.u32 %v400_v11, %v397_v2 }
  0x33   : > { %376 = vrot.lane.b32.xlu0 %v367_v4, %s1036_s22  ;;  %v540_v4 = vrot.slane %v538_v17, 2  ;;  %v1296_v34 = vsel %vm507_vm4, %v518_v57, %v522_v22  ;;  %v450_v17 = vunpack.c.l.b16 %v235_v35  ;;  %v454_v22 = vrot.slane %v356_v40, 2 }
  0x34   : > { %v330_v52 = vsel %vm327_vm0, %v328_v55, %v329_v29  ;;  %v411_v23 = vsel %vm385_vm5, %v401_v16, %v1215_v36  ;;  %v240_v36 = vld [vmem:[%s1082_s20 + $0x8] sm:$0x8]  ;;  %v722_v55 = vsel %vm720_vm6, %v704_v27, 0 }
  0x35   : > { %988 = vmatpush.bf16.msra.mxu3 %v722_v55  ;;  %v557_v10 = vunpack.c.l.b16 %v240_v36  ;;  %987 = vmatpush.bf16.msra.mxu2 %v722_v55 }
  0x36   : > { %727 = vmatpush.bf16.msra.mxu0 %v722_v55  ;;  %986 = vmatpush.bf16.msra.mxu1 %v722_v55 }
  0x37   : > { %380 = vrot.lane.b32.xlu1 %v371_v14, %s1036_s22  ;;  %v544_v14 = vor.u32 %v543_v48, %v540_v4  ;;  %v483_v4 = vrot.slane %v1274_v28, 2  ;;  %v484_v48 = vrot.slane %v1156_v45, 2 }
  0x39   : > { %v545_v53 = vsel %vm507_vm4, %v1152_v42, %v544_v14  ;;  %v332_v42 = vsel %vm327_vm0, %v329_v29, %v331_v7  ;;  %v566_v7 = vsel %vm559_vm3, %v563_v49, %v565_v19  ;;  %v451_v19 = vpack.c.b16 %v927_v31, %v450_v17 }
  0x3a   : > { %443 = vrot.lane.b32.xlu2 %v420_v41, %s1042_s28  ;;  %v511_v41 = vrot.slane %v509_v38, 2  ;;  %v485_v29 = vsel %vm452_vm2, %v483_v4, %v484_v48 }
  0x3b   : > { %447 = vrot.lane.b32.xlu0 %v438_v39, %s1042_s28  ;;  %v512_v39 = vshll.u32 %v1274_v28, 16  ;;  %v487_v28 = vsel %vm452_vm2, %v484_v48, %v486_v18  ;;  %v918_v18 = vld [vmem:[%s1471_s1 + $0x8] sm:$0xff] }
  0x3d   : > { %v514_v46 = vrot.slane %v512_v39, 3 }
  0x3f   : > { %468 = vrot.lane.b32.xlu1 %v459_v51, %s1038_s24  ;;  %v355_v51 = vpack.c.b16 %v927_v31, %v352_v32  ;;  %v515_v54 = vor.u32 %v514_v46, %v511_v41  ;;  %v558_v31 = vpack.c.b16 %v1268_v25, %v557_v10  ;;  %v919_v32 = vld [vmem:[%s1471_s1 + $0x10] sm:$0xff] }
  0x41   : > { %v387_v56 = vshrl.u32 %v355_v51, 16  ;;  %v390_v60 = vshll.u32 %v355_v51, 16  ;;  %v519_v61 = vsel %vm507_vm4, %v515_v54, %v518_v57  ;;  %v361_v15 = vrot.slane %v355_v51, 1 }
  0x42   : > { %472 = vrot.lane.b32.xlu2 %v463_v62, %s1038_s24  ;;  %v560_v14 = vrot.slane %v558_v31, 3 }
  0x43   : > { %498 = vrot.lane.b32.xlu0 %v489_v58, %s1041_s27  ;;  %v569_v58 = vrot.slane %v506_v63, 3  ;;  %v389_v63 = vrot.slane %v387_v56, 1  ;;  %v392_v47 = vrot.slane %v390_v60, 2 }
  0x45   : > { %v570_v62 = vsel %vm559_vm3, %v567_v30, %v569_v58  ;;  %v393_v6 = vor.u32 %v392_v47, %v389_v63 }
  0x47   : > { %502 = vrot.lane.b32.xlu1 %v493_v13, %s1041_s27  ;;  %v362_v13 = vrot.slane %v356_v40, 1  ;;  %v402_v21 = vsel %vm385_vm5, %v393_v6, %v401_v16  ;;  %v917_v40 = vld [vmem:[%s1471_s1] sm:$0xff] }
  0x49   : > { %v363_v30 = vsel %vm327_vm0, %v361_v15, %v362_v13 }
  0x4a   : > { %314 = vrot.lane.b32.xlu2 %v281_v8, %s1037_s23  ;;  %v453_v8 = vrot.slane %v451_v19, 2 }
  0x4b   : > { %316 = vrot.lane.b32.xlu0 %v289_v9, %s1037_s23  ;;  %v365_v9 = vsel %vm327_vm0, %v362_v13, %v364_v20  ;;  %v457_v20 = vsel %vm452_vm2, %v454_v22, %v456_v5  ;;  %v920_v5 = vld [vmem:[%s1471_s1 + $0x18] sm:$0xff]  ;;  %vm808_vm0 = vcmask 60416  }
  0x4c   : > { %v455_v26 = vsel %vm452_vm2, %v453_v8, %v454_v22  ;;  %991 = vmatpush.bf16.msra.mxu3 %v920_v5  ;;  %990 = vmatpush.bf16.msra.mxu2 %v920_v5 }
  0x4d   : > { %728 = vmatpush.bf16.msra.mxu0 %v920_v5  ;;  %989 = vmatpush.bf16.msra.mxu1 %v920_v5 }
  0x4f   : > { %550 = vrot.lane.b32.xlu1 %v527_v33, %s1040_s26  ;;  %v561_v33 = vrot.slane %v1156_v45, 3 }
  0x50   : > { %994 = vmatpush.bf16.msra.mxu3 %v919_v32  ;;  %993 = vmatpush.bf16.msra.mxu2 %v919_v32 }
  0x51   : > { %729 = vmatpush.bf16.msra.mxu0 %v919_v32  ;;  %992 = vmatpush.bf16.msra.mxu1 %v919_v32  ;;  %v564_v38 = vsel %vm559_vm3, %v561_v33, %v563_v49  ;;  %v562_v39 = vsel %vm559_vm3, %v560_v14, %v561_v33 }
  0x52   : > { %554 = vrot.lane.b32.xlu2 %v545_v53, %s1040_s26 }
  0x53   : > { %339 = vrot.lane.b32.xlu0 %v330_v52, %s1035_s21 }
  0x54   : > { %997 = vmatpush.bf16.msra.mxu3 %v918_v18  ;;  %996 = vmatpush.bf16.msra.mxu2 %v918_v18 }
  0x55   : > { %730 = vmatpush.bf16.msra.mxu0 %v918_v18  ;;  %995 = vmatpush.bf16.msra.mxu1 %v918_v18 }
  0x57   : > { %341 = vrot.lane.b32.xlu1 %v332_v42, %s1035_s21 }
  0x58   : > { %1000 = vmatpush.bf16.msra.mxu3 %v917_v40  ;;  %999 = vmatpush.bf16.msra.mxu2 %v917_v40 }
  0x59   : > { %731 = vmatpush.bf16.msra.mxu0 %v917_v40  ;;  %998 = vmatpush.bf16.msra.mxu1 %v917_v40 }
  0x5a   : > { %575 = vrot.lane.b32.xlu2 %v566_v7, %s1039_s25 }
  0x5b   : > { %579 = vrot.lane.b32.xlu0 %v570_v62, %s1039_s25 }
  0x5f   : > { %372 = vrot.lane.b32.xlu1 %v363_v30, %s1036_s22 }
  0x62   : > { %374 = vrot.lane.b32.xlu2 %v365_v9, %s1036_s22  ;;  %s1432_s22 = scalar_lea.vmem %s1474_s4, %s1002_s13 }
  0x63   : > { %439 = vrot.lane.b32.xlu0 %v402_v21, %s1042_s28 }
  0x67   : > { %441 = vrot.lane.b32.xlu1 %v411_v23, %s1042_s28 }
  0x6a   : > { %464 = vrot.lane.b32.xlu2 %v455_v26, %s1038_s24 }
  0x6b   : > { %466 = vrot.lane.b32.xlu0 %v457_v20, %s1038_s24 }
  0x6f   : > { %494 = vrot.lane.b32.xlu1 %v485_v29, %s1041_s27 }
  0x72   : > { %496 = vrot.lane.b32.xlu2 %v487_v28, %s1041_s27 }
  0x73   : > { %546 = vrot.lane.b32.xlu0 %v519_v61, %s1040_s26 }
  0x74   : > { %v471_v25 = vpop.permute.xlu2 %470 }
  0x77   : > { %548 = vrot.lane.b32.xlu1 %v1296_v34, %s1040_s26 }
  0x7a   : > { %571 = vrot.lane.b32.xlu2 %v562_v39, %s1039_s25 }
  0x7b   : > { %573 = vrot.lane.b32.xlu0 %v564_v38, %s1039_s25 }
  0x7c   : > { %v501_v41 = vpop.permute.xlu2 %500 }
  0x84   : > { %v319_v50 = vpop.permute.xlu2 %318 }
  0x85   : > { %v346_v46 = vpop.permute.xlu0 %345  ;;  %v587_v16 = vsel %vm581_vm7, %v1156_v45, %v319_v50 }
  0x89   : > { %v379_v52 = vpop.permute.xlu1 %378 }
  0x8c   : > { %v348_v37 = vpop.permute.xlu2 %347 }
  0x8d   : > { %v321_v51 = vpop.permute.xlu0 %320 }
  0x8e   : > { %v589_v54 = vsel %vm581_vm7, %v1085_v0, %v321_v51 }
  0x8f   : > { %v600_v59 = vsel %vm592_vm8, %v589_v54, %v346_v46 }
  0x90   : > { %v611_v56 = vsel %vm603_vm9, %v600_v59, %v379_v52 }
  0x91   : > { %v578_v53 = vpop.permute.xlu1 %577 }
  0x94   : > { %v444_v58 = vpop.permute.xlu2 %443 }
  0x95   : > { %v553_v57 = vpop.permute.xlu0 %552 }
  0x99   : > { %v446_v3 = vpop.permute.xlu1 %445 }
  0x9a   : > { %v622_v60 = vsel %vm614_vm10, %v611_v56, %v446_v3 }
  0x9b   : > { %v633_v61 = vsel %vm625_vm11, %v622_v60, %v471_v25 }
  0x9c   : > { %v644_v0 = vsel %vm636_vm12, %v633_v61, %v501_v41  ;;  %v473_v62 = vpop.permute.xlu2 %472 }
  0x9d   : > { %v323_v34 = vpop.permute.xlu0 %322  ;;  %v655_v42 = vsel %vm647_vm13, %v644_v0, %v553_v57  ;;  %v1426_v0 = vld [vmem:[%s1472_s2] ss:$0 sm:$0xff] }
  0x9e   : > { %v666_v49 = vsel %vm658_vm14, %v655_v42, %v578_v53  ;;  %v591_v22 = vsel %vm581_vm7, %v1088_v1, %v323_v34  ;;  %v980_v34 = vld [vmem:[%s1420_s18 + $0x18] sm:$0xff]  }
  0x9f   : > { %913 = vmatmul.msk.bf16.vlgmr.msra.gmra.mxu3 %vm709_vm15, %v666_v49  ;;  %v602_v45 = vsel %vm592_vm8, %v591_v22, %v348_v37  ;;  %v955_v42 = vunpack.c.l.bf16 %v980_v34  ;;  %v981_v22 = vld [vmem:[%s1420_s18 + $0x20] sm:$0xff]  }
  0xa1   : > { %v344_v63 = vpop.permute.xlu1 %343 }
  0xa2   : > { %v598_v30 = vsel %vm592_vm8, %v587_v16, %v344_v63  ;;  %v979_v16 = vld [vmem:[%s1420_s18 + $0x10] sm:$0xff]  }
  0xa4   : > { %v315_v11 = vpop.permute.xlu2 %314 }
  0xa5   : > { %v377_v47 = vpop.permute.xlu0 %376  ;;  %v583_v48 = vsel %vm581_vm7, %v1227_v44, %v315_v11  ;;  %v956_v11 = vunpack.c.h.bf16 %v980_v34 }
  0xa6   : > { %v609_v17 = vsel %vm603_vm9, %v598_v30, %v377_v47  ;;  %v951_v30 = vunpack.c.l.bf16 %v979_v16 }
  0xa7   : > { %v620_v19 = vsel %vm614_vm10, %v609_v17, %v444_v58 }
  0xa9   : > { %v381_v2 = vpop.permute.xlu1 %380 }
  0xaa   : > { %v613_v4 = vsel %vm603_vm9, %v602_v45, %v381_v2  ;;  %v959_v45 = vunpack.c.l.bf16 %v981_v22 }
  0xac   : > { %v555_v7 = vpop.permute.xlu2 %554 }
  0xad   : > { %v448_v15 = vpop.permute.xlu0 %447 }
  0xae   : > { %v624_v1 = vsel %vm614_vm10, %v613_v4, %v448_v15 }
  0xaf   : > { %v635_v55 = vsel %vm625_vm11, %v624_v1, %v473_v62 }
  0xb1   : > { %v469_v13 = vpop.permute.xlu1 %468 }
  0xb2   : > { %v631_v23 = vsel %vm625_vm11, %v620_v19, %v469_v13 }
  0xb4   : > { %v576_v9 = vpop.permute.xlu2 %575 }
  0xb5   : > { %v499_v35 = vpop.permute.xlu0 %498 }
  0xb6   : > { %v642_v8 = vsel %vm636_vm12, %v631_v23, %v499_v35 }
  0xb9   : > { %v503_v6 = vpop.permute.xlu1 %502 }
  0xba   : > { %v646_v29 = vsel %vm636_vm12, %v635_v55, %v503_v6 }
  0xbb   : > { %v657_v44 = vsel %vm647_vm13, %v646_v29, %v555_v7  ;;  %v960_v29 = vunpack.c.h.bf16 %v981_v22 }
  0xbc   : > { %v375_v36 = vpop.permute.xlu2 %374 }
  0xbd   : > { %v317_v21 = vpop.permute.xlu0 %316 }
  0xbe   : > { %v585_v10 = vsel %vm581_vm7, %v1224_v43, %v317_v21 }
  0xc1   : > { %v551_v24 = vpop.permute.xlu1 %550 }
  0xc2   : > { %v653_v20 = vsel %vm647_vm13, %v642_v8, %v551_v24  ;;  %v952_v8 = vunpack.c.h.bf16 %v979_v16 }
  0xc3   : > { %v664_v12 = vsel %vm658_vm14, %v653_v20, %v576_v9 }
  0xc4   : > { %912 = vmatmul.msk.bf16.vlgmr.msra.gmra.mxu2 %vm709_vm15, %v664_v12  ;;  %v465_v33 = vpop.permute.xlu2 %464 }
  0xc5   : > { %v340_v26 = vpop.permute.xlu0 %339 }
  0xc6   : > { %v594_v27 = vsel %vm592_vm8, %v583_v48, %v340_v26 }
  0xc9   : > { %v342_v5 = vpop.permute.xlu1 %341 }
  0xca   : > { %v596_v28 = vsel %vm592_vm8, %v585_v10, %v342_v5 }
  0xcb   : > { %v607_v39 = vsel %vm603_vm9, %v596_v28, %v375_v36 }
  0xcc   : > { %v497_v40 = vpop.permute.xlu2 %496 }
  0xcd   : > { %v580_v31 = vpop.permute.xlu0 %579 }
  0xce   : > { %v668_v32 = vsel %vm658_vm14, %v657_v44, %v580_v31 }
  0xcf   : > { %914 = vmatmul.msk.bf16.gmra.mxu3 %vm709_vm15, %v668_v32  ;;  %v942_v32 = vld [vmem:[%s1420_s18] sm:$0xff]  }
  0xd1   : > { %v373_v14 = vpop.permute.xlu1 %372 }
  0xd2   : > { %v605_v18 = vsel %vm603_vm9, %v594_v27, %v373_v14 }
  0xd4   : > { %v572_v51 = vpop.permute.xlu2 %571 }
  0xd5   : > { %v440_v25 = vpop.permute.xlu0 %439 }
  0xd6   : > { %v616_v38 = vsel %vm614_vm10, %v605_v18, %v440_v25 }
  0xd7   : > { %v627_v52 = vsel %vm625_vm11, %v616_v38, %v465_v33  ;;  %v943_v33 = vunpack.c.l.bf16 %v942_v32  ;;  %v978_v38 = vld [vmem:[%s1420_s18 + $0x8] sm:$0xff]  }
  0xd9   : > { %v442_v43 = vpop.permute.xlu1 %441 }
  0xda   : > { %v618_v41 = vsel %vm614_vm10, %v607_v39, %v442_v43  ;;  %v947_v43 = vunpack.c.l.bf16 %v978_v38 }
  0xdd   : > { %v467_v46 = vpop.permute.xlu0 %466 }
  0xde   : > { %v629_v58 = vsel %vm625_vm11, %v618_v41, %v467_v46  ;;  %v944_v46 = vunpack.c.h.bf16 %v942_v32 }
  0xdf   : > { %v640_v3 = vsel %vm636_vm12, %v629_v58, %v497_v40 }
  0xe1   : > { %v495_v50 = vpop.permute.xlu1 %494 }
  0xe2   : > { %v638_v37 = vsel %vm636_vm12, %v627_v52, %v495_v50 }
  0xe5   : > { %v547_v53 = vpop.permute.xlu0 %546 }
  0xe6   : > { %v649_v54 = vsel %vm647_vm13, %v638_v37, %v547_v53 }
  0xe7   : > { %v660_v57 = vsel %vm658_vm14, %v649_v54, %v572_v51 }
  0xe8   : > { %910 = vmatmul.msk.bf16.vlgmr.msra.gmra.mxu0 %vm709_vm15, %v660_v57 }
  0xe9   : > { %v549_v59 = vpop.permute.xlu1 %548 }
  0xea   : > { %v651_v56 = vsel %vm647_vm13, %v640_v3, %v549_v59  ;;  %v948_v59 = vunpack.c.h.bf16 %v978_v38 }
  0xed   : > { %v574_v60 = vpop.permute.xlu0 %573 }
  0xee   : > { %v662_v61 = vsel %vm658_vm14, %v651_v56, %v574_v60 }
  0xef   : > { %911 = vmatmul.msk.bf16.vlgmr.msra.gmra.mxu1 %vm709_vm15, %v662_v61 }
 0x122   : > { %v748_v49 = vpop.f32.mrf.mxu3 }
 0x123   : > { %v749_v62 = vadd.f32 %v1426_v0, %v748_v49 }
 0x125   : > { %v784_v63 = vadd.f32 %v955_v42, %v749_v62 }
 0x127   : > { %v794_v47 = vmax.f32 %v784_v63, 0.0 }
 0x129   : > { %v804_v2 = vpack.c.bf16 %v794_v47, %v794_v47 }
 0x12a   : > { %v750_v15 = vpop.f32.mrf.mxu3 }
 0x12b   : > { %815 = vst.msk [vmem:[%s1432_s22 + $0x18] sm:$0xf] %vm808_vm0, %v804_v2  ;;  %v751_v13 = vadd.f32 %v1426_v0, %v750_v15 }
 0x12d   : > { %v785_v7 = vadd.f32 %v956_v11, %v751_v13 }
 0x12f   : > { %v795_v35 = vmax.f32 %v785_v7, 0.0 }
 0x131   : > { %v805_v6 = vpack.c.bf16 %v795_v35, %v795_v35 }
 0x133   : > { %816 = vst.msk [vmem:[%s1432_s22 + $0x1c] sm:$0xf] %vm808_vm0, %v805_v6 }
 0x147   : > { %v743_v17 = vpop.f32.mrf.mxu2 }
 0x148   : > { %v744_v21 = vadd.f32 %v1426_v0, %v743_v17 }
 0x14a   : > { %v782_v9 = vadd.f32 %v951_v30, %v744_v21 }
 0x14c   : > { %v792_v19 = vmax.f32 %v782_v9, 0.0 }
 0x14e   : > { %v802_v23 = vpack.c.bf16 %v792_v19, %v792_v19 }
 0x14f   : > { %v745_v24 = vpop.f32.mrf.mxu2 }
 0x150   : > { %813 = vst.msk [vmem:[%s1432_s22 + $0x10] sm:$0xf] %vm808_vm0, %v802_v23  ;;  %v746_v20 = vadd.f32 %v1426_v0, %v745_v24 }
 0x152   : > { %v753_v12 = vpop.f32.mrf.mxu3  ;;  %v783_v4 = vadd.f32 %v952_v8, %v746_v20 }
 0x153   : > { %v754_v48 = vadd.f32 %v1426_v0, %v753_v12 }
 0x154   : > { %v793_v26 = vmax.f32 %v783_v4, 0.0 }
 0x155   : > { %v786_v1 = vadd.f32 %v959_v45, %v754_v48 }
 0x156   : > { %v803_v27 = vpack.c.bf16 %v793_v26, %v793_v26 }
 0x157   : > { %v796_v36 = vmax.f32 %v786_v1, 0.0 }
 0x158   : > { %814 = vst.msk [vmem:[%s1432_s22 + $0x14] sm:$0xf] %vm808_vm0, %v803_v27 }
 0x159   : > { %v806_v55 = vpack.c.bf16 %v796_v36, %v796_v36 }
 0x15a   : > { %v755_v10 = vpop.f32.mrf.mxu3 }
 0x15b   : > { %817 = vst.msk [vmem:[%s1432_s22 + $0x20] sm:$0xf] %vm808_vm0, %v806_v55  ;;  %v756_v5 = vadd.f32 %v1426_v0, %v755_v10 }
 0x15d   : > { %v787_v28 = vadd.f32 %v960_v29, %v756_v5 }
 0x15f   : > { %v797_v44 = vmax.f32 %v787_v28, 0.0 }
 0x161   : > { %v807_v31 = vpack.c.bf16 %v797_v44, %v797_v44 }
 0x163   : > { %818 = vst.msk [vmem:[%s1432_s22 + $0x24] sm:$0xf] %vm808_vm0, %v807_v31 }
 0x165   : > { %v733_v14 = vpop.f32.mrf.mxu0 }
 0x166   : > { %v734_v18 = vadd.f32 %v1426_v0, %v733_v14 }
 0x168   : > { %v778_v25 = vadd.f32 %v943_v33, %v734_v18 }
 0x16a   : > { %v788_v39 = vmax.f32 %v778_v25, 0.0 }
 0x16c   : > { %v798_v40 = vpack.c.bf16 %v788_v39, %v788_v39  ;;  %v738_v41 = vpop.f32.mrf.mxu1 }
 0x16d   : > { %v739_v50 = vadd.f32 %v1426_v0, %v738_v41  ;;  %v735_v52 = vpop.f32.mrf.mxu0 }
 0x16e   : > { %809 = vst.msk [vmem:[%s1432_s22] sm:$0xf] %vm808_vm0, %v798_v40  ;;  %v736_v51 = vadd.f32 %v1426_v0, %v735_v52 }
 0x16f   : > { %v780_v37 = vadd.f32 %v947_v43, %v739_v50 }
 0x170   : > { %v779_v53 = vadd.f32 %v944_v46, %v736_v51 }
 0x171   : > { %v790_v54 = vmax.f32 %v780_v37, 0.0 }
 0x172   : > { %v789_v57 = vmax.f32 %v779_v53, 0.0 }
 0x173   : > { %v800_v58 = vpack.c.bf16 %v790_v54, %v790_v54 }
 0x174   : > { %v799_v3 = vpack.c.bf16 %v789_v57, %v789_v57  ;;  %v740_v56 = vpop.f32.mrf.mxu1 }
 0x175   : > { %811 = vst.msk [vmem:[%s1432_s22 + $0x8] sm:$0xf] %vm808_vm0, %v800_v58  ;;  %v741_v60 = vadd.f32 %v1426_v0, %v740_v56 }
 0x176   : > { %810 = vst.msk [vmem:[%s1432_s22 + $0x4] sm:$0xf] %vm808_vm0, %v799_v3 }
 0x177   : > { %v781_v61 = vadd.f32 %v948_v59, %v741_v60 }
 0x179   : > { %v791_v34 = vmax.f32 %v781_v61, 0.0 }
 0x17b   : > { %v801_v42 = vpack.c.bf16 %v791_v34, %v791_v34 }
 0x17d   : > { %812 = vst.msk [vmem:[%s1432_s22 + $0xc] sm:$0xf] %vm808_vm0, %v801_v42 }
 0x17e PF: > { %s14_s15 = sadd.s32 1, %s1033_s15  }
 0x17f   : > { %p11_p4 = scmp.ge.s32.totalorder %s14_s15, 4  }
 0x181   :  { %13 = sbr.rel (!%p11_p4) target bundleno = 1 (0x1), region = 69 }

// kernel: hrnet_forward.60
= control target key start
LH: loop header
LB: loop body
LE: loop exit
PB: predicated region body
PF: predicated region fallthrough
CT: control target
= control target key end

     0   :  { %vm201_vm0 = vcmask 261120   ;;  %vm273_vm1 = vcmask 125952   ;;  %s544_s1 = inlined_call_operand.vmem [shape: bf16[288,16], index: 1, kind: input, shape index: {}]   ;;  %s545_s0 = inlined_call_operand.vmem [shape: bf16[32,288], index: 0, kind: input, shape index: {}]   ;;  %s546_s2 = inlined_call_operand.vmem [shape: f32[1,16], index: 2, kind: input, shape index: {}]   ;;  %s547_s3 = inlined_call_operand.vmem [shape: bf16[32,16], index: 3, kind: output, shape index: {}]  }
   0x1   :  { %v393_v0 = vld [vmem:[%s544_s1 + $0x38] sm:$0xff]  ;;  %v392_v2 = vld [vmem:[%s544_s1 + $0x30] sm:$0xff]  ;;  %v403_v3 = vld [vmem:[%s544_s1 + $0x88] sm:$0xff] }
   0x2   :  { %v401_v1 = vld [vmem:[%s544_s1 + $0x78] sm:$0xff]  ;;  %208 = vmatpush.bf16.msra.mxu0 %v393_v0  ;;  %404 = vmatpush.bf16.msra.mxu3 %v393_v0  ;;  %v400_v4 = vld [vmem:[%s544_s1 + $0x70] sm:$0xff]  ;;  %v402_v5 = vld [vmem:[%s544_s1 + $0x80] sm:$0xff] }
   0x3   :  { %227 = vmatpush.bf16.msra.mxu1 %v401_v1  ;;  %252 = vmatpush.bf16.msra.mxu2 %v403_v3  ;;  %v292_v6 = vld [vmem:[%s545_s0 + $0x8] sm:$0xf]  ;;  %v382_v7 = vld [vmem:[%s545_s0 + $0x10] sm:$0xf0]  ;;  %v390_v11 = vld [vmem:[%s544_s1 + $0x20] sm:$0xff] }
   0x4   :  { %v391_v8 = vld [vmem:[%s544_s1 + $0x28] sm:$0xff]  ;;  %v293_v10 = vor.u32 %v382_v7, %v292_v6  ;;  %v398_v12 = vld [vmem:[%s544_s1 + $0x60] sm:$0xff]  ;;  %v389_v13 = vld [vmem:[%s544_s1 + $0x18] sm:$0xff] }
   0x5   :  { %v399_v9 = vld [vmem:[%s544_s1 + $0x68] sm:$0xff]  ;;  %v397_v14 = vld [vmem:[%s544_s1 + $0x58] sm:$0xff]  ;;  %v388_v15 = vld [vmem:[%s544_s1 + $0x10] sm:$0xff] }
   0x6   :  { %209 = vmatpush.bf16.msra.mxu0 %v392_v2  ;;  %405 = vmatpush.bf16.msra.mxu3 %v392_v2  ;;  %v396_v16 = vld [vmem:[%s544_s1 + $0x50] sm:$0xff]  ;;  %v304_v17 = vld [vmem:[%s545_s0 + $0x20] sm:$0xf]  ;;  %v385_v18 = vld [vmem:[%s545_s0 + $0x28] sm:$0xf0] }
   0x7   :  { %228 = vmatpush.bf16.msra.mxu1 %v400_v4  ;;  %253 = vmatpush.bf16.msra.mxu2 %v402_v5  ;;  %v387_v19 = vld [vmem:[%s544_s1 + $0x8] sm:$0xff]  ;;  %v305_v21 = vor.u32 %v385_v18, %v304_v17  ;;  %v386_v22 = vld [vmem:[%s544_s1] sm:$0xff]  ;;  %v296_v25 = vld [vmem:[%s545_s0 + $0x18] sm:$0xf] }
   0x8   :  { %v395_v20 = vld [vmem:[%s544_s1 + $0x48] sm:$0xff]  ;;  %v284_v23 = vld [vmem:[%s545_s0] sm:$0xf]  ;;  %v384_v26 = vld [vmem:[%s545_s0 + $0x20] sm:$0xf0] }
   0x9   :  { %v381_v24 = vld [vmem:[%s545_s0 + $0x8] sm:$0xf0]  ;;  %v394_v27 = vld [vmem:[%s544_s1 + $0x40] sm:$0xff]  ;;  %v286_v29 = vld [vmem:[%s545_s0 + $0xc] sm:$0xf0]  ;;  %v297_v31 = vor.u32 %v384_v26, %v296_v25 }
   0xa   :  { %210 = vmatpush.bf16.msra.mxu0 %v391_v8  ;;  %406 = vmatpush.bf16.msra.mxu3 %v391_v8  ;;  %v380_v28 = vld [vmem:[%s545_s0 + $0x4] sm:$0xf]  ;;  %v285_v30 = vor.u32 %v381_v24, %v284_v23  ;;  %v383_v33 = vld [vmem:[%s545_s0 + $0x1c] sm:$0xf]  ;;  %v298_v34 = vld [vmem:[%s545_s0 + $0x24] sm:$0xf0] }
   0xb   :  { %229 = vmatpush.bf16.msra.mxu1 %v399_v9  ;;  %378 = vmatmul.msk.bf16.vlgmr.msra.gmra.mxu2 %vm201_vm0, %v293_v10  ;;  %v289_v32 = vor.u32 %v380_v28, %v286_v29  ;;  %v301_v35 = vor.u32 %v383_v33, %v298_v34  ;;  %v412_v37 = vld [vmem:[%s546_s2] ss:$0 sm:$0xff] }
   0xe   :  { %211 = vmatpush.bf16.msra.mxu0 %v390_v11  ;;  %407 = vmatpush.bf16.msra.mxu3 %v390_v11 }
   0xf   :  { %230 = vmatpush.bf16.msra.mxu1 %v398_v12 }
  0x12   :  { %212 = vmatpush.bf16.msra.mxu0 %v389_v13  ;;  %408 = vmatpush.bf16.msra.mxu3 %v389_v13 }
  0x13   :  { %231 = vmatpush.bf16.msra.mxu1 %v397_v14 }
  0x16   :  { %213 = vmatpush.bf16.msra.mxu0 %v388_v15  ;;  %409 = vmatpush.bf16.msra.mxu3 %v388_v15 }
  0x17   :  { %232 = vmatpush.bf16.msra.mxu1 %v396_v16 }
  0x1a   :  { %214 = vmatpush.bf16.msra.mxu0 %v387_v19  ;;  %410 = vmatpush.bf16.msra.mxu3 %v387_v19 }
  0x1b   :  { %233 = vmatpush.bf16.msra.mxu1 %v395_v20  ;;  %379 = vmatmul.msk.bf16.gmra.mxu2 %vm201_vm0, %v305_v21 }
  0x1e   :  { %215 = vmatpush.bf16.msra.mxu0 %v386_v22  ;;  %411 = vmatpush.bf16.msra.mxu3 %v386_v22 }
  0x1f   :  { %234 = vmatpush.bf16.msra.mxu1 %v394_v27 }
  0x21   :  { %216 = vmatmul.bf16.vlgmr.msra.gmra.mxu0 %v285_v30  ;;  %221 = vmatmul.bf16.vlgmr.msra.gmra.mxu3 %v297_v31 }
  0x22   :  { %235 = vmatmul.bf16.vlgmr.msra.gmra.mxu1 %v289_v32 }
  0x32   :  { %240 = vmatmul.bf16.gmra.mxu1 %v301_v35 }
  0x8e   :  { %v255_v36 = vpop.f32.mrf.mxu2 }
  0x96   :  { %v257_v44 = vpop.f32.mrf.mxu2 }
  0x9e   :  { %v217_v38 = vpop.f32.mrf.mxu0  ;;  %v260_v55 = vpop.f32.mrf.mxu2 }
  0x9f   :  { %v218_v39 = vadd.f32 %v412_v37, %v217_v38  ;;  %v236_v40 = vpop.f32.mrf.mxu1 }
  0xa1   :  { %v237_v41 = vadd.f32 %v236_v40, %v218_v39 }
  0xa3   :  { %v256_v42 = vadd.f32 %v255_v36, %v237_v41 }
  0xa4   :  { %v222_v49 = vpop.f32.mrf.mxu3 }
  0xa5   :  { %v265_v43 = vmax.f32 %v256_v42, 0.0  ;;  %v223_v52 = vadd.f32 %v412_v37, %v222_v49 }
  0xa6   :  { %v219_v45 = vpop.f32.mrf.mxu0  ;;  %v262_v1 = vpop.f32.mrf.mxu2 }
  0xa7   :  { %v269_v46 = vpack.c.bf16 %v265_v43, %v265_v43  ;;  %v220_v47 = vadd.f32 %v412_v37, %v219_v45  ;;  %v238_v48 = vpop.f32.mrf.mxu1 }
  0xa9   :  { %274 = vst.msk [vmem:[%s547_s3] sm:$0xf] %vm273_vm1, %v269_v46  ;;  %v239_v50 = vadd.f32 %v238_v48, %v220_v47 }
  0xab   :  { %v258_v51 = vadd.f32 %v257_v44, %v239_v50 }
  0xac   :  { %v224_v59 = vpop.f32.mrf.mxu3 }
  0xad   :  { %v266_v53 = vmax.f32 %v258_v51, 0.0  ;;  %v225_v61 = vadd.f32 %v412_v37, %v224_v59 }
  0xaf   :  { %v270_v54 = vpack.c.bf16 %v266_v53, %v266_v53  ;;  %v241_v56 = vpop.f32.mrf.mxu1 }
  0xb0   :  { %v242_v57 = vadd.f32 %v241_v56, %v223_v52 }
  0xb1   :  { %275 = vst.msk [vmem:[%s547_s3 + $0x4] sm:$0xf] %vm273_vm1, %v270_v54 }
  0xb2   :  { %v261_v58 = vadd.f32 %v260_v55, %v242_v57 }
  0xb4   :  { %v267_v60 = vmax.f32 %v261_v58, 0.0 }
  0xb6   :  { %v271_v62 = vpack.c.bf16 %v267_v60, %v267_v60 }
  0xb7   :  { %v243_v63 = vpop.f32.mrf.mxu1 }
  0xb8   :  { %276 = vst.msk [vmem:[%s547_s3 + $0x8] sm:$0xf] %vm273_vm1, %v271_v62  ;;  %v244_v0 = vadd.f32 %v243_v63, %v225_v61 }
  0xba   :  { %v263_v2 = vadd.f32 %v262_v1, %v244_v0 }
  0xbc   :  { %v268_v3 = vmax.f32 %v263_v2, 0.0 }
  0xbe   :  { %v272_v4 = vpack.c.bf16 %v268_v3, %v268_v3 }
  0xc0   :  { %277 = vst.msk [vmem:[%s547_s3 + $0xc] sm:$0xf] %vm273_vm1, %v272_v4 }

// kernel: hrnet_forward.65
= control target key start
LH: loop header
LB: loop body
LE: loop exit
PB: predicated region body
PF: predicated region fallthrough
CT: control target
= control target key end

     0   :  { %s330_s12 = smov 0   ;;  %s353_s0 = inlined_call_operand.vmem [shape: bf16[2,16,16], index: 0, kind: input, shape index: {}]   ;;  %s354_s1 = inlined_call_operand.vmem [shape: bf16[16,8], index: 1, kind: input, shape index: {}]   ;;  %s355_s2 = inlined_call_operand.vmem [shape: f32[1,8], index: 2, kind: input, shape index: {}]   ;;  %s356_s3 = inlined_call_operand.vmem [shape: bf16[2,16,8], index: 3, kind: output, shape index: {}]  }
   0x1 LB: > { %s269_s13 = sadd.s32 4294967295, %s308_s12   ;;  %p273_p0 = scmp.ge.s32.totalorder %s308_s12, 1  ;;  %s308_s12 = sphi %s330_s12, %s13_s12  }
   0x2   : > { %p137_p1 = scmp.lt.s32.totalorder %s308_s12, 3 }
   0x4   : > { %p138_p2 = pnand %p273_p0, %p137_p1 }
   0x5   : > { %p161_p3 = scmp.lt.s32.totalorder (!%p138_p2), %s269_s13, 1 }
   0x6   : > { %141 = sbr.rel (%p138_p2) target bundleno = 154 (0x9a), region = 32 }
   0xb   : > { %v292_v0 = vld [vmem:[%s354_s1] sm:$0xff]  ;;  %s358_s13 = smov (!%p161_p3, %s269_s13), 1  ;;  %vm191_vm0 = vcmask 130048   ;;  %vm211_vm1 = vcmask 60416  }
   0xc   : > { %202 = vmatpush.bf16.msra.mxu0 %v292_v0  ;;  %s289_s16 = sshll.u32 %s358_s13, 3  ;;  %v301_v2 = vld [vmem:[%s355_s2] ss:$0 sm:$0xff] }
   0xd   : > { %s165_s19 = scalar_lea.vmem %s353_s0, %s289_s16  ;;  %s170_s24 = scalar_lea.vmem %s356_s3, %s289_s16 }
   0xe   : > { %v291_v1 = vld [vmem:[%s165_s19] sm:$0xff] }
   0xf   : > { %286 = vmatmul.msk.bf16.vlgmr.msra.gmra.mxu0 %vm191_vm0, %v291_v1 }
  0x8c   : > { %v204_v3 = vpop.f32.mrf.mxu0 }
  0x8d   : > { %v205_v4 = vadd.f32 %v301_v2, %v204_v3 }
  0x8f   : > { %v209_v5 = vpack.c.bf16 %v205_v4, %v205_v4 }
  0x91   : > { %212 = vst.msk [vmem:[%s170_s24] sm:$0xf] %vm211_vm1, %v209_v5 }
  0x94   : > { %v206_v6 = vpop.f32.mrf.mxu0 }
  0x95   : > { %v207_v7 = vadd.f32 %v301_v2, %v206_v6 }
  0x97   : > { %v210_v8 = vpack.c.bf16 %v207_v7, %v207_v7 }
  0x99   : > { %213 = vst.msk [vmem:[%s170_s24 + $0x4] sm:$0xf] %vm211_vm1, %v210_v8 }
  0x9a PF: > { %s13_s12 = sadd.s32 1, %s308_s12  }
  0x9b   : > { %p10_p4 = scmp.ge.s32.totalorder %s13_s12, 4  }
  0x9d   :  { %12 = sbr.rel (!%p10_p4) target bundleno = 1 (0x1), region = 62 }

// kernel: hrnet_forward.63
= control target key start
LH: loop header
LB: loop body
LE: loop exit
PB: predicated region body
PF: predicated region fallthrough
CT: control target
= control target key end

     0   :  { %s658_s12 = smov 0   ;;  %s763_s0 = inlined_call_operand.vmem [shape: bf16[2,38,16], index: 0, kind: input, shape index: {}]   ;;  %s764_s1 = inlined_call_operand.vmem [shape: bf16[144,16], index: 1, kind: input, shape index: {}]   ;;  %s765_s2 = inlined_call_operand.vmem [shape: f32[1,16], index: 2, kind: input, shape index: {}]   ;;  %s766_s3 = inlined_call_operand.vmem [shape: bf16[2,24,16], index: 3, kind: output, shape index: {}]  }
   0x1 LB: > { %s537_s13 = sadd.s32 4294967295, %s629_s12   ;;  %p541_p0 = scmp.ge.s32.totalorder %s629_s12, 1  ;;  %s629_s12 = sphi %s658_s12, %s13_s12  }
   0x2   : > { %p137_p1 = scmp.lt.s32.totalorder %s629_s12, 3 }
   0x4   : > { %p138_p2 = pnand %p541_p0, %p137_p1 }
   0x5   : > { %p161_p3 = scmp.lt.s32.totalorder (!%p138_p2), %s537_s13, 1  ;;  %s631_s18 = smov (!%p138_p2), 32  }
   0x6   : > { %141 = sbr.rel (%p138_p2) target bundleno = 315 (0x13b), region = 32  ;;  %s632_s19 = smov (!%p138_p2), 48  }
   0x7   : > { %s633_s24 = smov (!%p138_p2), 64   ;;  %s634_s25 = smov (!%p138_p2), 80  }
   0x8   : > { %s635_s26 = smov (!%p138_p2), 16   ;;  %s636_s27 = smov (!%p138_p2), 112  }
   0x9   : > { %s637_s28 = smov (!%p138_p2), 96  }
   0xb   : > { %s768_s13 = smov (!%p161_p3, %s537_s13), 1  ;;  %vm232_vm0 = vcmask 1044480   ;;  %vm218_vm1 = vcmask 1046528   ;;  %v591_v27 = vld [vmem:[%s764_s1 + $0x38] sm:$0xff]  ;;  %v590_v34 = vld [vmem:[%s764_s1 + $0x30] sm:$0xff]  ;;  %vm277_vm5 = vcmask 1045504  }
   0xc   : > { %s605_s14 = smul.u32 20, %s768_s13  ;;  %436 = vmatpush.bf16.msra.mxu0 %v591_v27  ;;  %597 = vmatpush.bf16.msra.mxu2 %v591_v27  ;;  %vm243_vm2 = vsmask.f32 4352  ;;  %vm195_vm3 = vsmask.f32 7424  ;;  %vm316_vm6 = vcmask 130048  }
   0xd   : > { %vm288_vm4 = vsmask.f32 5376  ;;  %vm322_vm7 = vcmask 261120   ;;  %vm327_vm8 = vcmask 392192   ;;  %vm332_vm9 = vcmask 523264   ;;  %s606_s20 = smul.u32 12, %s768_s13 }
   0xe   : > { %s672_s17 = scalar_lea.vmem %s763_s0, %s605_s14  ;;  %vm337_vm10 = vcmask 654336   ;;  %vm342_vm11 = vcmask 785408   ;;  %vm347_vm12 = vcmask 916480   ;;  %vm478_vm13 = vcmask 125952  }
   0xf   : > { %v675_v0 = vld [vmem:[%s672_s17] sm:$0xff]   ;;  %v174_v1 = vld [vmem:[%s672_s17 + $0x8] sm:$0xff]   ;;  %v182_v25 = vld [vmem:[%s672_s17 + $0x10] sm:$0x7]  ;;  %s170_s23 = scalar_lea.vmem %s766_s3, %s606_s20 }
  0x10   : > { %v177_v2 = vld [vmem:[%s672_s17] sm:$0x8]  ;;  %v596_v3 = vunpack.c.h.b16 %v675_v0  ;;  %v178_v4 = vld [vmem:[%s672_s17 + $0xc] sm:$0x7]  ;;  %v681_v5 = vunpack.c.l.b16 %v174_v1  ;;  %v685_v13 = vunpack.c.h.b16 %v174_v1  ;;  %v180_v23 = vld [vmem:[%s672_s17 + $0x4] sm:$0xc]  ;;  %v286_v32 = vunpack.c.l.b16 %v182_v25  ;;  %437 = vmatpush.bf16.msra.mxu0 %v590_v34  ;;  %598 = vmatpush.bf16.msra.mxu2 %v590_v34 }
  0x11   : > { %v228_v6 = vunpack.c.l.b16 %v177_v2  ;;  %v175_v7 = vld [vmem:[%s672_s17 + $0xc] sm:$0x1]  ;;  %v176_v8 = vld [vmem:[%s672_s17] sm:$0xe]  ;;  %v229_v9 = vunpack.c.l.b16 %v178_v4  ;;  %v253_v24 = vshrl.u32 %v174_v1, 16  ;;  %v256_v26 = vshll.u32 %v174_v1, 16 }
  0x12   : > { %v193_v10 = vunpack.c.l.b16 %v175_v7  ;;  %v216_v11 = vunpack.c.l.b16 %v176_v8  ;;  %v199_v28 = vshll.u32 %v675_v0, 16  ;;  %v273_v30 = vunpack.c.l.b16 %v180_v23  ;;  %v181_v43 = vld [vmem:[%s672_s17 + $0x10] sm:$0x3]  ;;  %v589_v8 = vld [vmem:[%s764_s1 + $0x28] sm:$0xff] }
  0x13   : > { %v230_v12 = vpack.c.b16 %v596_v3, %v228_v6  ;;  %v231_v14 = vpack.c.b16 %v229_v9, %v681_v5  ;;  %v255_v29 = vrot.slane %v253_v24, 3  ;;  %v258_v31 = vrot.slane %v256_v26, 4  ;;  %v588_v9 = vld [vmem:[%s764_s1 + $0x20] sm:$0xff] }
  0x14   : > { %v194_v15 = vpack.c.b16 %v193_v10, %v681_v5  ;;  %v217_v16 = vpack.c.b16 %v596_v3, %v216_v11  ;;  %v265_v36 = vpack.c.b16 %v681_v5, %v596_v3  ;;  %v197_v40 = vshrl.u32 %v675_v0, 16  ;;  %438 = vmatpush.bf16.msra.mxu0 %v589_v8  ;;  %599 = vmatpush.bf16.msra.mxu2 %v589_v8  ;;  %v587_v10 = vld [vmem:[%s764_s1 + $0x18] sm:$0xff]  ;;  %v592_v11 = vld [vmem:[%s764_s1 + $0x40] sm:$0xff] }
  0x15   : > { %v233_v17 = vrot.slane %v230_v12, 3  ;;  %v234_v18 = vrot.slane %v231_v14, 3  ;;  %v245_v33 = vshrl.u32 %v230_v12, 16  ;;  %v248_v35 = vshll.u32 %v230_v12, 16  ;;  %461 = vmatpush.bf16.msra.mxu1 %v592_v11  ;;  %v586_v12 = vld [vmem:[%s764_s1 + $0x10] sm:$0xff] }
  0x16   : > { %v219_v19 = vrot.slane %v217_v16, 1  ;;  %v220_v20 = vrot.slane %v194_v15, 1  ;;  %v204_v37 = vshll.u32 %v194_v15, 16  ;;  %v259_v38 = vor.u32 %v258_v31, %v255_v29 }
  0x17   : > { %v235_v21 = vsel %vm232_vm0, %v233_v17, %v234_v18  ;;  %v247_v39 = vrot.slane %v245_v33, 3  ;;  %v201_v41 = vrot.slane %v199_v28, 1  ;;  %v250_v42 = vrot.slane %v248_v35, 4 }
  0x18   : > { %v221_v22 = vsel %vm218_vm1, %v219_v19, %v220_v20  ;;  %224 = vrot.lane.b32.xlu2 %v220_v20, %s631_s18  ;;  %236 = vrot.lane.b32.xlu1 %v235_v21, %s632_s19  ;;  %v275_v44 = vpack.c.b16 %v681_v5, %v273_v30  ;;  %v705_v45 = vpack.c.b16 %v286_v32, %v685_v13  ;;  %v208_v46 = vshrl.u32 %v194_v15, 16  ;;  %v585_v19 = vld [vmem:[%s764_s1 + $0x8] sm:$0xff]  ;;  %v584_v20 = vld [vmem:[%s764_s1] sm:$0xff] }
  0x19   : > { %222 = vrot.lane.b32.xlu0 %v221_v22, %s631_s18  ;;  %v206_v47 = vrot.slane %v204_v37, 1  ;;  %v251_v48 = vor.u32 %v250_v42, %v247_v39  ;;  %v202_v51 = vor.u32 %v201_v41, %v197_v40  ;;  %v274_v52 = vunpack.c.l.b16 %v181_v43  ;;  %439 = vmatpush.bf16.msra.mxu0 %v588_v9 }
  0x1a   : > { %v290_v49 = vshrl.u32 %v275_v44, 16  ;;  %v293_v50 = vshll.u32 %v275_v44, 16  ;;  %v298_v53 = vshrl.u32 %v705_v45, 16  ;;  %v301_v54 = vshll.u32 %v705_v45, 16  ;;  %600 = vmatpush.bf16.msra.mxu2 %v588_v9 }
  0x1b   : > { %v210_v55 = vor.u32 %v208_v46, %v206_v47  ;;  %v260_v56 = vsel %vm243_vm2, %v251_v48, %v259_v38  ;;  %v207_v59 = vsel %vm195_vm3, %v202_v51, %v206_v47  ;;  %v276_v60 = vpack.c.b16 %v274_v52, %v685_v13  ;;  %v622_v52 = vld [vmem:[%s765_s2] ss:$0 sm:$0xff] }
  0x1c   : > { %v292_v57 = vrot.slane %v290_v49, 2  ;;  %v295_v58 = vrot.slane %v293_v50, 3  ;;  %v300_v61 = vrot.slane %v298_v53, 2  ;;  %v303_v62 = vrot.slane %v301_v54, 3 }
  0x1d   : > { %v278_v1 = vrot.slane %v275_v44, 2  ;;  %v279_v2 = vrot.slane %v276_v60, 2  ;;  %v266_v4 = vpack.c.b16 %v685_v13, %v685_v13  ;;  %440 = vmatpush.bf16.msra.mxu0 %v587_v10  ;;  %v183_v13 = vld [vmem:[%s672_s17 + $0x4] sm:$0x8]  ;;  %v314_v17 = vrot.slane %v705_v45, 3 }
  0x1e   : > { %v296_v63 = vor.u32 %v295_v58, %v292_v57  ;;  %v304_v3 = vor.u32 %v303_v62, %v300_v61  ;;  %v311_v14 = vunpack.c.l.b16 %v183_v13  ;;  %601 = vmatpush.bf16.msra.mxu2 %v587_v10  ;;  %v191_v31 = vpack.c.b16 %v681_v5, %v681_v5 }
  0x1f   : > { %v280_v7 = vsel %vm277_vm5, %v278_v1, %v279_v2 }
  0x20   : > { %263 = vrot.lane.b32.xlu2 %v259_v38, %s633_s24  ;;  %267 = vrot.lane.b32.xlu1 %v265_v36, %s634_s25  ;;  %v305_v6 = vsel %vm288_vm4, %v296_v63, %v304_v3  ;;  %v312_v15 = vpack.c.b16 %v681_v5, %v311_v14 }
  0x21   : > { %238 = vrot.lane.b32.xlu0 %v234_v18, %s632_s19  ;;  %441 = vmatpush.bf16.msra.mxu0 %v586_v12 }
  0x22   : > { %v313_v16 = vrot.slane %v312_v15, 3  ;;  %602 = vmatpush.bf16.msra.mxu2 %v586_v12 }
  0x24   : > { %v315_v18 = vsel %vm232_vm0, %v313_v16, %v314_v17 }
  0x25   : > { %580 = vmatmul.msk.bf16.vlgmr.msra.gmra.mxu1 %vm316_vm6, %v315_v18  ;;  %442 = vmatpush.bf16.msra.mxu0 %v585_v19 }
  0x26   : > { %603 = vmatpush.bf16.msra.mxu2 %v585_v19 }
  0x28   : > { %261 = vrot.lane.b32.xlu2 %v260_v56, %s633_s24  ;;  %213 = vrot.lane.b32.xlu1 %v210_v55, %s635_s26 }
  0x29   : > { %211 = vrot.lane.b32.xlu0 %v207_v59, %s635_s26  ;;  %443 = vmatpush.bf16.msra.mxu0 %v584_v20 }
  0x2a   : > { %604 = vmatpush.bf16.msra.mxu2 %v584_v20 }
  0x30   : > { %306 = vrot.lane.b32.xlu2 %v305_v6, %s636_s27  ;;  %269 = vrot.lane.b32.xlu1 %v266_v4, %s634_s25 }
  0x31   : > { %281 = vrot.lane.b32.xlu0 %v280_v7, %s637_s28 }
  0x35   : > { %581 = vmatmul.msk.bf16.gmra.mxu1 %vm316_vm6, %v314_v17 }
  0x38   : > { %308 = vrot.lane.b32.xlu1 %v304_v3, %s636_s27 }
  0x39   : > { %283 = vrot.lane.b32.xlu0 %v279_v2, %s637_s28 }
  0x72   : > { %v225_v21 = vpop.permute.xlu2 %224 }
  0x7a   : > { %v264_v24 = vpop.permute.xlu2 %263 }
  0x82   : > { %v262_v27 = vpop.permute.xlu2 %261 }
  0x8a   : > { %v237_v22 = vpop.permute.xlu1 %236  ;;  %v307_v36 = vpop.permute.xlu2 %306 }
  0x8b   : > { %v223_v23 = vpop.permute.xlu0 %222 }
  0x92   : > { %v268_v25 = vpop.permute.xlu1 %267 }
  0x93   : > { %v239_v26 = vpop.permute.xlu0 %238 }
  0x9a   : > { %v214_v28 = vpop.permute.xlu1 %213 }
  0x9b   : > { %v212_v29 = vpop.permute.xlu0 %211  ;;  %v321_v35 = vsel %vm316_vm6, %v191_v31, %v214_v28 }
  0x9c   : > { %v318_v30 = vsel %vm316_vm6, %v675_v0, %v212_v29  ;;  %v326_v0 = vsel %vm322_vm7, %v321_v35, %v225_v21 }
  0x9d   : > { %v324_v32 = vsel %vm322_vm7, %v318_v30, %v223_v23  ;;  %v331_v41 = vsel %vm327_vm8, %v326_v0, %v239_v26 }
  0x9e   : > { %v329_v33 = vsel %vm327_vm8, %v324_v32, %v237_v22  ;;  %v336_v42 = vsel %vm332_vm9, %v331_v41, %v264_v24 }
  0x9f   : > { %v334_v34 = vsel %vm332_vm9, %v329_v33, %v262_v27 }
  0xa0   : > { %v339_v38 = vsel %vm337_vm10, %v334_v34, %v268_v25 }
  0xa2   : > { %v270_v37 = vpop.permute.xlu1 %269  ;;  %v463_v48 = vpop.f32.mrf.mxu1 }
  0xa3   : > { %v282_v39 = vpop.permute.xlu0 %281  ;;  %v341_v43 = vsel %vm337_vm10, %v336_v42, %v270_v37 }
  0xa4   : > { %v344_v40 = vsel %vm342_vm11, %v339_v38, %v282_v39 }
  0xa5   : > { %v349_v5 = vsel %vm347_vm12, %v344_v40, %v307_v36 }
  0xa6   : > { %444 = vmatmul.bf16.vlgmr.msra.gmra.mxu0 %v349_v5 }
  0xaa   : > { %v309_v45 = vpop.permute.xlu1 %308  ;;  %v465_v49 = vpop.f32.mrf.mxu1 }
  0xab   : > { %v284_v44 = vpop.permute.xlu0 %283 }
  0xac   : > { %v346_v46 = vsel %vm342_vm11, %v341_v43, %v284_v44 }
  0xad   : > { %v352_v47 = vsel %vm347_vm12, %v346_v46, %v309_v45 }
  0xae   : > { %449 = vmatmul.bf16.vlgmr.msra.gmra.mxu2 %v352_v47 }
  0xb2   : > { %v468_v50 = vpop.f32.mrf.mxu1 }
  0xba   : > { %v470_v51 = vpop.f32.mrf.mxu1 }
 0x123   : > { %v445_v53 = vpop.f32.mrf.mxu0 }
 0x124   : > { %v446_v54 = vadd.f32 %v622_v52, %v445_v53 }
 0x126   : > { %v464_v55 = vadd.f32 %v463_v48, %v446_v54 }
 0x128   : > { %v472_v56 = vmax.f32 %v464_v55, 0.0 }
 0x12a   : > { %v475_v57 = vpack.c.bf16 %v472_v56, %v472_v56 }
 0x12b   : > { %v447_v58 = vpop.f32.mrf.mxu0 }
 0x12c   : > { %479 = vst.msk [vmem:[%s170_s23] sm:$0xf] %vm478_vm13, %v475_v57  ;;  %v448_v59 = vadd.f32 %v622_v52, %v447_v58 }
 0x12e   : > { %v466_v60 = vadd.f32 %v465_v49, %v448_v59 }
 0x130   : > { %v473_v61 = vmax.f32 %v466_v60, 0.0 }
 0x131   : > { %v450_v62 = vpop.f32.mrf.mxu2 }
 0x132   : > { %v476_v63 = vpack.c.bf16 %v473_v61, %v473_v61  ;;  %v451_v1 = vadd.f32 %v622_v52, %v450_v62 }
 0x134   : > { %480 = vst.msk [vmem:[%s170_s23 + $0x4] sm:$0xf] %vm478_vm13, %v476_v63  ;;  %v469_v2 = vadd.f32 %v468_v50, %v451_v1 }
 0x136   : > { %v474_v3 = vmax.f32 %v469_v2, 0.0 }
 0x138   : > { %v477_v4 = vpack.c.bf16 %v474_v3, %v474_v3 }
 0x139   : > { %v452_v6 = vpop.f32.mrf.mxu2 }
 0x13a   : > { %481 = vst.msk [vmem:[%s170_s23 + $0x8] sm:$0xf] %vm478_vm13, %v477_v4 }
 0x13b PF: > { %s13_s12 = sadd.s32 1, %s629_s12  }
 0x13c   : > { %p10_p4 = scmp.ge.s32.totalorder %s13_s12, 4  }
 0x13e   :  { %12 = sbr.rel (!%p10_p4) target bundleno = 1 (0x1), region = 62 }

// kernel: hrnet_forward.64
= control target key start
LH: loop header
LB: loop body
LE: loop exit
PB: predicated region body
PF: predicated region fallthrough
CT: control target
= control target key end

     0   :  { %s736_s15 = smov 0   ;;  %s847_s0 = inlined_call_operand.vmem [shape: bf16[2,38,16], index: 0, kind: input, shape index: {}]   ;;  %s848_s1 = inlined_call_operand.vmem [shape: bf16[144,16], index: 1, kind: input, shape index: {}]   ;;  %s849_s2 = inlined_call_operand.vmem [shape: f32[1,16], index: 2, kind: input, shape index: {}]   ;;  %s850_s3 = inlined_call_operand.vmem [shape: bf16[2,24,16], index: 3, kind: input, shape index: {}]   ;;  %s851_s4 = inlined_call_operand.vmem [shape: bf16[2,24,16], index: 4, kind: output, shape index: {}]  }
   0x1 LB: > { %s605_s16 = sadd.s32 4294967295, %s702_s15   ;;  %p609_p0 = scmp.ge.s32.totalorder %s702_s15, 1  ;;  %s702_s15 = sphi %s736_s15, %s14_s15  }
   0x2   : > { %p172_p1 = scmp.lt.s32.totalorder %s702_s15, 3 }
   0x4   : > { %p173_p2 = pnand %p609_p0, %p172_p1 }
   0x5   : > { %p203_p3 = scmp.lt.s32.totalorder (!%p173_p2), %s605_s16, 1  ;;  %s704_s21 = smov (!%p173_p2), 32  }
   0x6   : > { %176 = sbr.rel (%p173_p2) target bundleno = 317 (0x13d), region = 36  ;;  %s705_s22 = smov (!%p173_p2), 48  }
   0x7   : > { %s706_s27 = smov (!%p173_p2), 64   ;;  %s707_s28 = smov (!%p173_p2), 80  }
   0x8   : > { %s708_s29 = smov (!%p173_p2), 16   ;;  %s709_s30 = smov (!%p173_p2), 112  }
   0x9   : > { %s710_s5 = smov (!%p173_p2), 96  }
   0xb   : > { %s853_s16 = smov (!%p203_p3, %s605_s16), 1  ;;  %vm279_vm0 = vcmask 1044480   ;;  %vm265_vm1 = vcmask 1046528   ;;  %v660_v27 = vld [vmem:[%s848_s1 + $0x38] sm:$0xff]  ;;  %v659_v34 = vld [vmem:[%s848_s1 + $0x30] sm:$0xff]  ;;  %vm324_vm5 = vcmask 1045504  }
   0xc   : > { %s678_s17 = smul.u32 20, %s853_s16  ;;  %483 = vmatpush.bf16.msra.mxu0 %v660_v27  ;;  %670 = vmatpush.bf16.msra.mxu2 %v660_v27  ;;  %vm290_vm2 = vsmask.f32 4352  ;;  %vm242_vm3 = vsmask.f32 7424  ;;  %vm363_vm6 = vcmask 130048  }
   0xd   : > { %vm335_vm4 = vsmask.f32 5376  ;;  %vm369_vm7 = vcmask 261120   ;;  %vm374_vm8 = vcmask 392192   ;;  %vm379_vm9 = vcmask 523264  }
   0xe   : > { %s750_s20 = scalar_lea.vmem %s847_s0, %s678_s17  ;;  %vm384_vm10 = vcmask 654336   ;;  %vm389_vm11 = vcmask 785408   ;;  %vm394_vm12 = vcmask 916480   ;;  %vm534_vm13 = vcmask 125952  }
   0xf   : > { %v753_v0 = vld [vmem:[%s750_s20] sm:$0xff]   ;;  %v221_v1 = vld [vmem:[%s750_s20 + $0x8] sm:$0xff]   ;;  %v229_v25 = vld [vmem:[%s750_s20 + $0x10] sm:$0x7] }
  0x10   : > { %v224_v2 = vld [vmem:[%s750_s20] sm:$0x8]  ;;  %v665_v3 = vunpack.c.h.b16 %v753_v0  ;;  %v225_v4 = vld [vmem:[%s750_s20 + $0xc] sm:$0x7]  ;;  %v759_v5 = vunpack.c.l.b16 %v221_v1  ;;  %v763_v13 = vunpack.c.h.b16 %v221_v1  ;;  %v227_v23 = vld [vmem:[%s750_s20 + $0x4] sm:$0xc]  ;;  %v333_v32 = vunpack.c.l.b16 %v229_v25  ;;  %484 = vmatpush.bf16.msra.mxu0 %v659_v34  ;;  %671 = vmatpush.bf16.msra.mxu2 %v659_v34 }
  0x11   : > { %v275_v6 = vunpack.c.l.b16 %v224_v2  ;;  %v222_v7 = vld [vmem:[%s750_s20 + $0xc] sm:$0x1]  ;;  %v223_v8 = vld [vmem:[%s750_s20] sm:$0xe]  ;;  %v276_v9 = vunpack.c.l.b16 %v225_v4  ;;  %v300_v24 = vshrl.u32 %v221_v1, 16  ;;  %v303_v26 = vshll.u32 %v221_v1, 16 }
  0x12   : > { %v240_v10 = vunpack.c.l.b16 %v222_v7  ;;  %v263_v11 = vunpack.c.l.b16 %v223_v8  ;;  %v246_v28 = vshll.u32 %v753_v0, 16  ;;  %v320_v30 = vunpack.c.l.b16 %v227_v23  ;;  %v228_v43 = vld [vmem:[%s750_s20 + $0x10] sm:$0x3]  ;;  %v658_v8 = vld [vmem:[%s848_s1 + $0x28] sm:$0xff] }
  0x13   : > { %v277_v12 = vpack.c.b16 %v665_v3, %v275_v6  ;;  %v278_v14 = vpack.c.b16 %v276_v9, %v759_v5  ;;  %v302_v29 = vrot.slane %v300_v24, 3  ;;  %v305_v31 = vrot.slane %v303_v26, 4  ;;  %v657_v9 = vld [vmem:[%s848_s1 + $0x20] sm:$0xff] }
  0x14   : > { %v241_v15 = vpack.c.b16 %v240_v10, %v759_v5  ;;  %v264_v16 = vpack.c.b16 %v665_v3, %v263_v11  ;;  %v312_v36 = vpack.c.b16 %v759_v5, %v665_v3  ;;  %v244_v40 = vshrl.u32 %v753_v0, 16  ;;  %485 = vmatpush.bf16.msra.mxu0 %v658_v8  ;;  %672 = vmatpush.bf16.msra.mxu2 %v658_v8  ;;  %v656_v10 = vld [vmem:[%s848_s1 + $0x18] sm:$0xff]  ;;  %v661_v11 = vld [vmem:[%s848_s1 + $0x40] sm:$0xff] }
  0x15   : > { %v280_v17 = vrot.slane %v277_v12, 3  ;;  %v281_v18 = vrot.slane %v278_v14, 3  ;;  %v292_v33 = vshrl.u32 %v277_v12, 16  ;;  %v295_v35 = vshll.u32 %v277_v12, 16  ;;  %v655_v12 = vld [vmem:[%s848_s1 + $0x10] sm:$0xff]  ;;  %508 = vmatpush.bf16.msra.mxu1 %v661_v11 }
  0x16   : > { %v266_v19 = vrot.slane %v264_v16, 1  ;;  %v267_v20 = vrot.slane %v241_v15, 1  ;;  %v251_v37 = vshll.u32 %v241_v15, 16  ;;  %v306_v38 = vor.u32 %v305_v31, %v302_v29 }
  0x17   : > { %v282_v21 = vsel %vm279_vm0, %v280_v17, %v281_v18  ;;  %v294_v39 = vrot.slane %v292_v33, 3  ;;  %v248_v41 = vrot.slane %v246_v28, 1  ;;  %v297_v42 = vrot.slane %v295_v35, 4 }
  0x18   : > { %v268_v22 = vsel %vm265_vm1, %v266_v19, %v267_v20  ;;  %271 = vrot.lane.b32.xlu2 %v267_v20, %s704_s21  ;;  %283 = vrot.lane.b32.xlu1 %v282_v21, %s705_s22  ;;  %v322_v44 = vpack.c.b16 %v759_v5, %v320_v30  ;;  %v783_v45 = vpack.c.b16 %v333_v32, %v763_v13  ;;  %v255_v46 = vshrl.u32 %v241_v15, 16  ;;  %v654_v19 = vld [vmem:[%s848_s1 + $0x8] sm:$0xff]  ;;  %v653_v20 = vld [vmem:[%s848_s1] sm:$0xff] }
  0x19   : > { %269 = vrot.lane.b32.xlu0 %v268_v22, %s704_s21  ;;  %v253_v47 = vrot.slane %v251_v37, 1  ;;  %v298_v48 = vor.u32 %v297_v42, %v294_v39  ;;  %v249_v51 = vor.u32 %v248_v41, %v244_v40  ;;  %v321_v52 = vunpack.c.l.b16 %v228_v43  ;;  %486 = vmatpush.bf16.msra.mxu0 %v657_v9 }
  0x1a   : > { %v337_v49 = vshrl.u32 %v322_v44, 16  ;;  %v340_v50 = vshll.u32 %v322_v44, 16  ;;  %v345_v53 = vshrl.u32 %v783_v45, 16  ;;  %v348_v54 = vshll.u32 %v783_v45, 16  ;;  %673 = vmatpush.bf16.msra.mxu2 %v657_v9 }
  0x1b   : > { %v257_v55 = vor.u32 %v255_v46, %v253_v47  ;;  %v307_v56 = vsel %vm290_vm2, %v298_v48, %v306_v38  ;;  %v254_v59 = vsel %vm242_vm3, %v249_v51, %v253_v47  ;;  %v323_v60 = vpack.c.b16 %v321_v52, %v763_v13  ;;  %v695_v52 = vld [vmem:[%s849_s2] ss:$0 sm:$0xff] }
  0x1c   : > { %v339_v57 = vrot.slane %v337_v49, 2  ;;  %v342_v58 = vrot.slane %v340_v50, 3  ;;  %v347_v61 = vrot.slane %v345_v53, 2  ;;  %v350_v62 = vrot.slane %v348_v54, 3 }
  0x1d   : > { %v325_v1 = vrot.slane %v322_v44, 2  ;;  %v326_v2 = vrot.slane %v323_v60, 2  ;;  %v313_v4 = vpack.c.b16 %v763_v13, %v763_v13  ;;  %487 = vmatpush.bf16.msra.mxu0 %v656_v10  ;;  %v230_v13 = vld [vmem:[%s750_s20 + $0x4] sm:$0x8]  ;;  %v361_v17 = vrot.slane %v783_v45, 3 }
  0x1e   : > { %v343_v63 = vor.u32 %v342_v58, %v339_v57  ;;  %v351_v3 = vor.u32 %v350_v62, %v347_v61  ;;  %674 = vmatpush.bf16.msra.mxu2 %v656_v10  ;;  %v358_v14 = vunpack.c.l.b16 %v230_v13  ;;  %v238_v31 = vpack.c.b16 %v759_v5, %v759_v5 }
  0x1f   : > { %v327_v7 = vsel %vm324_vm5, %v325_v1, %v326_v2 }
  0x20   : > { %310 = vrot.lane.b32.xlu2 %v306_v38, %s706_s27  ;;  %314 = vrot.lane.b32.xlu1 %v312_v36, %s707_s28  ;;  %v352_v6 = vsel %vm335_vm4, %v343_v63, %v351_v3  ;;  %v359_v15 = vpack.c.b16 %v759_v5, %v358_v14 }
  0x21   : > { %285 = vrot.lane.b32.xlu0 %v281_v18, %s705_s22  ;;  %488 = vmatpush.bf16.msra.mxu0 %v655_v12  ;;  %s679_s22 = smul.u32 12, %s853_s16 }
  0x22   : > { %675 = vmatpush.bf16.msra.mxu2 %v655_v12  ;;  %v360_v16 = vrot.slane %v359_v15, 3 }
  0x23   : > { %s212_s25 = scalar_lea.vmem %s850_s3, %s679_s22 }
  0x24   : > { %v362_v18 = vsel %vm279_vm0, %v360_v16, %v361_v17  ;;  %v667_v53 = vld [vmem:[%s212_s25] sm:$0xff]  }
  0x25   : > { %649 = vmatmul.msk.bf16.vlgmr.msra.gmra.mxu1 %vm363_vm6, %v362_v18  ;;  %489 = vmatpush.bf16.msra.mxu0 %v654_v19  ;;  %v669_v63 = vunpack.c.h.bf16 %v667_v53 }
  0x26   : > { %676 = vmatpush.bf16.msra.mxu2 %v654_v19 }
  0x28   : > { %308 = vrot.lane.b32.xlu2 %v307_v56, %s706_s27  ;;  %260 = vrot.lane.b32.xlu1 %v257_v55, %s708_s29  ;;  %v668_v56 = vunpack.c.l.bf16 %v667_v53 }
  0x29   : > { %258 = vrot.lane.b32.xlu0 %v254_v59, %s708_s29  ;;  %490 = vmatpush.bf16.msra.mxu0 %v653_v20 }
  0x2a   : > { %677 = vmatpush.bf16.msra.mxu2 %v653_v20 }
  0x30   : > { %353 = vrot.lane.b32.xlu2 %v352_v6, %s709_s30  ;;  %316 = vrot.lane.b32.xlu1 %v313_v4, %s707_s28 }
  0x31   : > { %328 = vrot.lane.b32.xlu0 %v327_v7, %s710_s5 }
  0x35   : > { %650 = vmatmul.msk.bf16.gmra.mxu1 %vm363_vm6, %v361_v17 }
  0x38   : > { %355 = vrot.lane.b32.xlu1 %v351_v3, %s709_s30  ;;  %s217_s30 = scalar_lea.vmem %s851_s4, %s679_s22 }
  0x39   : > { %330 = vrot.lane.b32.xlu0 %v326_v2, %s710_s5  ;;  %v521_v2 = vld [vmem:[%s212_s25 + $0x8] sm:$0xf] }
  0x3a   : > { %v524_v8 = vunpack.c.l.bf16 %v521_v2 }
  0x72   : > { %v272_v21 = vpop.permute.xlu2 %271 }
  0x7a   : > { %v311_v24 = vpop.permute.xlu2 %310 }
  0x82   : > { %v309_v27 = vpop.permute.xlu2 %308 }
  0x8a   : > { %v284_v22 = vpop.permute.xlu1 %283  ;;  %v354_v36 = vpop.permute.xlu2 %353 }
  0x8b   : > { %v270_v23 = vpop.permute.xlu0 %269 }
  0x92   : > { %v315_v25 = vpop.permute.xlu1 %314 }
  0x93   : > { %v286_v26 = vpop.permute.xlu0 %285 }
  0x9a   : > { %v261_v28 = vpop.permute.xlu1 %260 }
  0x9b   : > { %v259_v29 = vpop.permute.xlu0 %258  ;;  %v368_v35 = vsel %vm363_vm6, %v238_v31, %v261_v28 }
  0x9c   : > { %v365_v30 = vsel %vm363_vm6, %v753_v0, %v259_v29  ;;  %v373_v0 = vsel %vm369_vm7, %v368_v35, %v272_v21 }
  0x9d   : > { %v371_v32 = vsel %vm369_vm7, %v365_v30, %v270_v23  ;;  %v378_v41 = vsel %vm374_vm8, %v373_v0, %v286_v26 }
  0x9e   : > { %v376_v33 = vsel %vm374_vm8, %v371_v32, %v284_v22  ;;  %v383_v42 = vsel %vm379_vm9, %v378_v41, %v311_v24 }
  0x9f   : > { %v381_v34 = vsel %vm379_vm9, %v376_v33, %v309_v27 }
  0xa0   : > { %v386_v38 = vsel %vm384_vm10, %v381_v34, %v315_v25 }
  0xa2   : > { %v317_v37 = vpop.permute.xlu1 %316  ;;  %v510_v48 = vpop.f32.mrf.mxu1 }
  0xa3   : > { %v329_v39 = vpop.permute.xlu0 %328  ;;  %v388_v43 = vsel %vm384_vm10, %v383_v42, %v317_v37 }
  0xa4   : > { %v391_v5 = vsel %vm389_vm11, %v386_v38, %v329_v39 }
  0xa5   : > { %v396_v40 = vsel %vm394_vm12, %v391_v5, %v354_v36 }
  0xa6   : > { %491 = vmatmul.bf16.vlgmr.msra.gmra.mxu0 %v396_v40 }
  0xaa   : > { %v356_v45 = vpop.permute.xlu1 %355  ;;  %v512_v49 = vpop.f32.mrf.mxu1 }
  0xab   : > { %v331_v44 = vpop.permute.xlu0 %330 }
  0xac   : > { %v393_v46 = vsel %vm389_vm11, %v388_v43, %v331_v44 }
  0xad   : > { %v399_v47 = vsel %vm394_vm12, %v393_v46, %v356_v45 }
  0xae   : > { %496 = vmatmul.bf16.vlgmr.msra.gmra.mxu2 %v399_v47 }
  0xb2   : > { %v515_v50 = vpop.f32.mrf.mxu1 }
  0xba   : > { %v517_v51 = vpop.f32.mrf.mxu1 }
 0x123   : > { %v492_v54 = vpop.f32.mrf.mxu0 }
 0x124   : > { %v493_v55 = vadd.f32 %v695_v52, %v492_v54 }
 0x126   : > { %v511_v57 = vadd.f32 %v510_v48, %v493_v55 }
 0x128   : > { %v525_v58 = vadd.f32 %v668_v56, %v511_v57 }
 0x12a   : > { %v528_v59 = vmax.f32 %v525_v58, 0.0 }
 0x12b   : > { %v494_v60 = vpop.f32.mrf.mxu0 }
 0x12c   : > { %v531_v61 = vpack.c.bf16 %v528_v59, %v528_v59  ;;  %v495_v62 = vadd.f32 %v695_v52, %v494_v60 }
 0x12e   : > { %535 = vst.msk [vmem:[%s217_s30] sm:$0xf] %vm534_vm13, %v531_v61  ;;  %v513_v1 = vadd.f32 %v512_v49, %v495_v62 }
 0x130   : > { %v526_v3 = vadd.f32 %v669_v63, %v513_v1 }
 0x131   : > { %v497_v4 = vpop.f32.mrf.mxu2 }
 0x132   : > { %v529_v6 = vmax.f32 %v526_v3, 0.0  ;;  %v498_v7 = vadd.f32 %v695_v52, %v497_v4 }
 0x134   : > { %v532_v9 = vpack.c.bf16 %v529_v6, %v529_v6  ;;  %v516_v10 = vadd.f32 %v515_v50, %v498_v7 }
 0x136   : > { %536 = vst.msk [vmem:[%s217_s30 + $0x4] sm:$0xf] %vm534_vm13, %v532_v9  ;;  %v527_v11 = vadd.f32 %v524_v8, %v516_v10 }
 0x138   : > { %v530_v12 = vmax.f32 %v527_v11, 0.0 }
 0x139   : > { %v499_v13 = vpop.f32.mrf.mxu2 }
 0x13a   : > { %v533_v14 = vpack.c.bf16 %v530_v12, %v530_v12 }
 0x13c   : > { %537 = vst.msk [vmem:[%s217_s30 + $0x8] sm:$0xf] %vm534_vm13, %v533_v14 }
 0x13d PF: > { %s14_s15 = sadd.s32 1, %s702_s15  }
 0x13e   : > { %p11_p4 = scmp.ge.s32.totalorder %s14_s15, 4  }
 0x140   :  { %13 = sbr.rel (!%p11_p4) target bundleno = 1 (0x1), region = 69 }

// kernel: hrnet_forward.66
= control target key start
LH: loop header
LB: loop body
LE: loop exit
PB: predicated region body
PF: predicated region fallthrough
CT: control target
= control target key end

     0   :  { %vm79_vm0 = vcmask 1043456   ;;  %vm72_vm1 = vcmask 588800   ;;  %vm122_vm2 = vcmask 125952   ;;  %s249_s1 = inlined_call_operand.vmem [shape: bf16[72,16], index: 1, kind: input, shape index: {}]   ;;  %s250_s2 = inlined_call_operand.vmem [shape: f32[1,16], index: 2, kind: input, shape index: {}]   ;;  %s251_s0 = inlined_call_operand.vmem [shape: bf16[32,72], index: 0, kind: input, shape index: {}]   ;;  %s252_s3 = inlined_call_operand.vmem [shape: bf16[32,16], index: 3, kind: input, shape index: {}]   ;;  %s253_s4 = inlined_call_operand.vmem [shape: bf16[32,16], index: 4, kind: output, shape index: {}]  }
   0x1   :  { %v30_v0 = vld [vmem:[%s249_s1 + $0x20] sm:$0xf]  ;;  %v162_v4 = vld [vmem:[%s249_s1 + $0x18] sm:$0xff]  ;;  %v161_v5 = vld [vmem:[%s249_s1 + $0x10] sm:$0xff] }
   0x2   :  { %v62_v1 = vunpack.c.l.b16 %v30_v0  ;;  %v160_v6 = vld [vmem:[%s249_s1 + $0x8] sm:$0xff]  ;;  %v159_v7 = vld [vmem:[%s249_s1] sm:$0xff] }
   0x3   :  { %v157_v8 = vld [vmem:[%s251_s0] sm:$0xff]  ;;  %v158_v9 = vld [vmem:[%s251_s0 + $0x8] sm:$0xff] }
   0x4   :  { %v67_v2 = vpack.c.b16 %v62_v1, %v62_v1  ;;  %v164_v10 = vld [vmem:[%s252_s3] sm:$0xff]   ;;  %v171_v11 = vld [vmem:[%s252_s3 + $0x8] sm:$0xff]  }
   0x5   :  { %v177_v12 = vld [vmem:[%s250_s2] ss:$0 sm:$0xff]  ;;  %v165_v13 = vunpack.c.l.bf16 %v164_v10  ;;  %v169_v14 = vunpack.c.l.bf16 %v171_v11  ;;  %v166_v25 = vunpack.c.h.bf16 %v164_v10  ;;  %v170_v26 = vunpack.c.h.bf16 %v171_v11 }
   0x6   :  { %v81_v3 = vsel %vm79_vm0, %v67_v2, 0 }
   0x7   :  { %86 = vmatpush.bf16.msra.mxu0 %v81_v3  ;;  %172 = vmatpush.bf16.msra.mxu1 %v81_v3 }
   0xb   :  { %87 = vmatpush.bf16.msra.mxu0 %v162_v4  ;;  %173 = vmatpush.bf16.msra.mxu1 %v162_v4 }
   0xf   :  { %88 = vmatpush.bf16.msra.mxu0 %v161_v5  ;;  %174 = vmatpush.bf16.msra.mxu1 %v161_v5 }
  0x13   :  { %89 = vmatpush.bf16.msra.mxu0 %v160_v6  ;;  %175 = vmatpush.bf16.msra.mxu1 %v160_v6 }
  0x17   :  { %90 = vmatpush.bf16.msra.mxu0 %v159_v7  ;;  %176 = vmatpush.bf16.msra.mxu1 %v159_v7 }
  0x1a   :  { %155 = vmatmul.msk.bf16.vlgmr.msra.gmra.mxu0 %vm72_vm1, %v157_v8  ;;  %156 = vmatmul.msk.bf16.vlgmr.msra.gmra.mxu1 %vm72_vm1, %v158_v9 }
  0x97   :  { %v92_v15 = vpop.f32.mrf.mxu0  ;;  %v97_v16 = vpop.f32.mrf.mxu1 }
  0x98   :  { %v93_v17 = vadd.f32 %v177_v12, %v92_v15  ;;  %v98_v18 = vadd.f32 %v177_v12, %v97_v16 }
  0x9a   :  { %v110_v19 = vadd.f32 %v165_v13, %v93_v17  ;;  %v112_v20 = vadd.f32 %v169_v14, %v98_v18 }
  0x9c   :  { %v114_v21 = vmax.f32 %v110_v19, 0.0  ;;  %v116_v22 = vmax.f32 %v112_v20, 0.0 }
  0x9e   :  { %v118_v23 = vpack.c.bf16 %v114_v21, %v114_v21  ;;  %v120_v24 = vpack.c.bf16 %v116_v22, %v116_v22 }
  0x9f   :  { %v94_v27 = vpop.f32.mrf.mxu0  ;;  %v99_v28 = vpop.f32.mrf.mxu1 }
  0xa0   :  { %123 = vst.msk [vmem:[%s253_s4] sm:$0xf] %vm122_vm2, %v118_v23  ;;  %v95_v29 = vadd.f32 %v177_v12, %v94_v27  ;;  %v100_v30 = vadd.f32 %v177_v12, %v99_v28 }
  0xa1   :  { %125 = vst.msk [vmem:[%s253_s4 + $0x8] sm:$0xf] %vm122_vm2, %v120_v24 }
  0xa2   :  { %v111_v31 = vadd.f32 %v166_v25, %v95_v29  ;;  %v113_v32 = vadd.f32 %v170_v26, %v100_v30 }
  0xa4   :  { %v115_v33 = vmax.f32 %v111_v31, 0.0  ;;  %v117_v34 = vmax.f32 %v113_v32, 0.0 }
  0xa6   :  { %v119_v35 = vpack.c.bf16 %v115_v33, %v115_v33  ;;  %v121_v36 = vpack.c.bf16 %v117_v34, %v117_v34 }
  0xa8   :  { %124 = vst.msk [vmem:[%s253_s4 + $0x4] sm:$0xf] %vm122_vm2, %v119_v35 }
  0xa9   :  { %126 = vst.msk [vmem:[%s253_s4 + $0xc] sm:$0xf] %vm122_vm2, %v121_v36 }

// kernel: hrnet_forward.67
= control target key start
LH: loop header
LB: loop body
LE: loop exit
PB: predicated region body
PF: predicated region fallthrough
CT: control target
= control target key end

     0   :  { %vm98_vm0 = vcmask 130048   ;;  %vm130_vm1 = vcmask 257024   ;;  %s239_s1 = inlined_call_operand.vmem [shape: bf16[144,32], index: 1, kind: input, shape index: {}]   ;;  %s240_s0 = inlined_call_operand.vmem [shape: bf16[8,144], index: 0, kind: input, shape index: {}]   ;;  %s241_s2 = inlined_call_operand.vmem [shape: f32[1,32], index: 2, kind: input, shape index: {}]   ;;  %s242_s3 = inlined_call_operand.vmem [shape: bf16[8,32], index: 3, kind: output, shape index: {}]  }
   0x1   :  { %v180_v0 = vld [vmem:[%s239_s1 + $0x38] sm:$0xff]  ;;  %v179_v1 = vld [vmem:[%s239_s1 + $0x30] sm:$0xff]  ;;  %v181_v2 = vld [vmem:[%s239_s1 + $0x40] sm:$0xff] }
   0x2   :  { %102 = vmatpush.bf16.msra.mxu0 %v180_v0  ;;  %v15_v3 = vld [vmem:[%s240_s0] sm:$0xff]  ;;  %122 = vmatpush.bf16.msra.mxu1 %v181_v2  ;;  %v178_v6 = vld [vmem:[%s239_s1 + $0x28] sm:$0xff]  ;;  %v176_v8 = vld [vmem:[%s239_s1 + $0x18] sm:$0xff] }
   0x3   :  { %v40_v4 = vunpack.c.h.b16 %v15_v3  ;;  %v177_v7 = vld [vmem:[%s239_s1 + $0x20] sm:$0xff]  ;;  %v175_v9 = vld [vmem:[%s239_s1 + $0x10] sm:$0xff]  ;;  %v174_v10 = vld [vmem:[%s239_s1 + $0x8] sm:$0xff]  ;;  %v39_v11 = vunpack.c.l.b16 %v15_v3 }
   0x4   :  { %v173_v12 = vld [vmem:[%s239_s1] sm:$0xff] }
   0x5   :  { %v42_v5 = vpack.c.b16 %v40_v4, %v40_v4  ;;  %v41_v13 = vpack.c.b16 %v39_v11, %v39_v11  ;;  %v182_v16 = vld [vmem:[%s241_s2] ss:$0 sm:$0xff] }
   0x6   :  { %103 = vmatpush.bf16.msra.mxu0 %v179_v1 }
   0x7   :  { %172 = vmatmul.msk.bf16.vlgmr.msra.gmra.mxu1 %vm98_vm0, %v42_v5 }
   0xa   :  { %104 = vmatpush.bf16.msra.mxu0 %v178_v6 }
   0xe   :  { %105 = vmatpush.bf16.msra.mxu0 %v177_v7 }
  0x12   :  { %106 = vmatpush.bf16.msra.mxu0 %v176_v8 }
  0x16   :  { %107 = vmatpush.bf16.msra.mxu0 %v175_v9 }
  0x1a   :  { %108 = vmatpush.bf16.msra.mxu0 %v174_v10 }
  0x1e   :  { %109 = vmatpush.bf16.msra.mxu0 %v173_v12 }
  0x21   :  { %110 = vmatmul.bf16.vlgmr.msra.gmra.mxu0 %v41_v13 }
  0x84   :  { %v124_v14 = vpop.f32.mrf.mxu1 }
  0x8c   :  { %v126_v15 = vpop.f32.mrf.mxu1 }
  0x9e   :  { %v111_v17 = vpop.f32.mrf.mxu0 }
  0x9f   :  { %v112_v18 = vadd.f32 %v182_v16, %v111_v17 }
  0xa1   :  { %v125_v19 = vadd.f32 %v124_v14, %v112_v18 }
  0xa3   :  { %v128_v20 = vmax.f32 %v125_v19, 0.0 }
  0xa5   :  { %v129_v21 = vpack.c.bf16 %v128_v20, %v128_v20 }
  0xa6   :  { %v113_v22 = vpop.f32.mrf.mxu0 }
  0xa7   :  { %131 = vst.msk [vmem:[%s242_s3] sm:$0xf] %vm130_vm1, %v129_v21 }

// kernel: hrnet_forward.76
= control target key start
LH: loop header
LB: loop body
LE: loop exit
PB: predicated region body
PF: predicated region fallthrough
CT: control target
= control target key end

     0   :  { %s318_s12 = smov 0   ;;  %s338_s0 = inlined_call_operand.vmem [shape: bf16[2,4,32], index: 0, kind: input, shape index: {}]   ;;  %s339_s1 = inlined_call_operand.vmem [shape: bf16[32,16], index: 1, kind: input, shape index: {}]   ;;  %s340_s2 = inlined_call_operand.vmem [shape: f32[1,16], index: 2, kind: input, shape index: {}]   ;;  %s341_s3 = inlined_call_operand.vmem [shape: bf16[2,4,16], index: 3, kind: output, shape index: {}]  }
   0x1 LB: > { %s261_s13 = sadd.s32 4294967295, %s296_s12   ;;  %p265_p0 = scmp.ge.s32.totalorder %s296_s12, 1  ;;  %s296_s12 = sphi %s318_s12, %s13_s12  }
   0x2   : > { %p136_p1 = scmp.lt.s32.totalorder %s296_s12, 3 }
   0x4   : > { %p137_p2 = pnand %p265_p0, %p136_p1 }
   0x5   : > { %p158_p3 = scmp.lt.s32.totalorder (!%p137_p2), %s261_s13, 1 }
   0x6   : > { %140 = sbr.rel (%p137_p2) target bundleno = 153 (0x99), region = 32 }
   0xb   : > { %v280_v0 = vld [vmem:[%s339_s1 + $0x8] sm:$0xff]  ;;  %v279_v1 = vld [vmem:[%s339_s1] sm:$0xff]  ;;  %s343_s13 = smov (!%p158_p3, %s261_s13), 1  ;;  %vm188_vm0 = vcmask 261120   ;;  %vm206_vm1 = vcmask 123904  }
   0xc   : > { %198 = vmatpush.bf16.msra.mxu0 %v280_v0  ;;  %s266_s18 = sshll.u32 %s343_s13, 1  ;;  %v289_v3 = vld [vmem:[%s340_s2] ss:$0 sm:$0xff] }
   0xd   : > { %s161_s21 = scalar_lea.vmem %s338_s0, %s266_s18  ;;  %s165_s26 = scalar_lea.vmem %s341_s3, %s266_s18 }
   0xe   : > { %v167_v2 = vld [vmem:[%s161_s21] sm:$0x3] }
  0x10   : > { %199 = vmatpush.bf16.msra.mxu0 %v279_v1 }
  0x13   : > { %276 = vmatmul.msk.bf16.vlgmr.msra.gmra.mxu0 %vm188_vm0, %v167_v2 }
  0x90   : > { %v201_v4 = vpop.f32.mrf.mxu0 }
  0x91   : > { %v202_v5 = vadd.f32 %v289_v3, %v201_v4 }
  0x93   : > { %v205_v6 = vpack.c.bf16 %v202_v5, %v202_v5 }
  0x95   : > { %207 = vst.msk [vmem:[%s165_s26] sm:$0x3] %vm206_vm1, %v205_v6 }
  0x98   : > { %v203_v7 = vpop.f32.mrf.mxu0 }
  0x99 PF: > { %s13_s12 = sadd.s32 1, %s296_s12  }
  0x9a   : > { %p10_p4 = scmp.ge.s32.totalorder %s13_s12, 4  }
  0x9c   :  { %12 = sbr.rel (!%p10_p4) target bundleno = 1 (0x1), region = 62 }

// kernel: hrnet_forward.72
= control target key start
LH: loop header
LB: loop body
LE: loop exit
PB: predicated region body
PF: predicated region fallthrough
CT: control target
= control target key end

     0   :  { %s656_s12 = smov 0   ;;  %s757_s0 = inlined_call_operand.vmem [shape: bf16[2,18,32], index: 0, kind: input, shape index: {}]   ;;  %s758_s1 = inlined_call_operand.vmem [shape: bf16[288,32], index: 1, kind: input, shape index: {}]   ;;  %s759_s2 = inlined_call_operand.vmem [shape: f32[1,32], index: 2, kind: input, shape index: {}]   ;;  %s760_s3 = inlined_call_operand.vmem [shape: bf16[2,8,32], index: 3, kind: output, shape index: {}]  }
   0x1 LB: > { %s512_s13 = sadd.s32 4294967295, %s631_s12   ;;  %p516_p0 = scmp.ge.s32.totalorder %s631_s12, 1  ;;  %s631_s12 = sphi %s656_s12, %s13_s12  }
   0x2   : > { %p137_p1 = scmp.lt.s32.totalorder %s631_s12, 3 }
   0x4   : > { %p138_p2 = pnand %p516_p0, %p137_p1 }
   0x5   : > { %p160_p3 = scmp.lt.s32.totalorder (!%p138_p2), %s512_s13, 1  ;;  %s633_s9 = smov (!%p138_p2), 96  }
   0x6   : > { %141 = sbr.rel (%p138_p2) target bundleno = 290 (0x122), region = 32  ;;  %s634_s14 = smov (!%p138_p2), 64  }
   0x7   : > { %s635_s17 = smov (!%p138_p2), 32  }
   0xb   : > { %v609_v0 = vld [vmem:[%s758_s1 + $0x78] sm:$0xff]  ;;  %s762_s13 = smov (!%p160_p3, %s512_s13), 1  ;;  %v608_v2 = vld [vmem:[%s758_s1 + $0x70] sm:$0xff]  ;;  %v611_v4 = vld [vmem:[%s758_s1 + $0x88] sm:$0xff]  ;;  %vm246_vm0 = vcmask 261120   ;;  %vm250_vm1 = vcmask 523264  }
   0xc   : > { %v601_v1 = vld [vmem:[%s758_s1 + $0x38] sm:$0xff]  ;;  %429 = vmatpush.bf16.msra.mxu1 %v609_v0  ;;  %v600_v3 = vld [vmem:[%s758_s1 + $0x30] sm:$0xff]  ;;  %s612_s24 = smul.u32 12, %s762_s13  ;;  %448 = vmatpush.bf16.msra.mxu2 %v611_v4  ;;  %v607_v5 = vld [vmem:[%s758_s1 + $0x68] sm:$0xff]  ;;  %vm253_vm2 = vcmask 785408   ;;  %s518_s7 = sshll.u32 %s762_s13, 2 }
   0xd   : > { %416 = vmatpush.bf16.msra.mxu0 %v601_v1  ;;  %v599_v6 = vld [vmem:[%s758_s1 + $0x28] sm:$0xff]  ;;  %v606_v24 = vld [vmem:[%s758_s1 + $0x60] sm:$0xff]  ;;  %v605_v35 = vld [vmem:[%s758_s1 + $0x58] sm:$0xff]  ;;  %s168_s10 = scalar_lea.vmem %s760_s3, %s518_s7  ;;  %vm457_vm3 = vcmask 257024  }
   0xe   : > { %s685_s27 = scalar_lea.vmem %s757_s0, %s612_s24  ;;  %v598_v27 = vld [vmem:[%s758_s1 + $0x20] sm:$0xff]  ;;  %v597_v38 = vld [vmem:[%s758_s1 + $0x18] sm:$0xff]  ;;  %v604_v49 = vld [vmem:[%s758_s1 + $0x50] sm:$0xff] }
   0xf   : > { %v173_v7 = vld [vmem:[%s685_s27] sm:$0xc]  ;;  %v174_v8 = vld [vmem:[%s685_s27 + $0x4] sm:$0x3]  ;;  %v178_v19 = vld [vmem:[%s685_s27 + $0x8] sm:$0x1] }
  0x10   : > { %430 = vmatpush.bf16.msra.mxu1 %v608_v2  ;;  %v175_v9 = vld [vmem:[%s685_s27 + $0x4] sm:$0x7]  ;;  %v202_v10 = vunpack.c.l.b16 %v173_v7  ;;  %v203_v11 = vunpack.c.l.b16 %v174_v8  ;;  %v697_v13 = vld [vmem:[%s685_s27] sm:$0xf]  ;;  %v231_v26 = vunpack.c.l.b16 %v178_v19  ;;  %v596_v51 = vld [vmem:[%s758_s1 + $0x10] sm:$0xff] }
  0x11   : > { %417 = vmatpush.bf16.msra.mxu0 %v600_v3  ;;  %v209_v12 = vunpack.c.l.b16 %v175_v9  ;;  %v171_v14 = vld [vmem:[%s685_s27 + $0x4] sm:$0x1]  ;;  %v176_v15 = vld [vmem:[%s685_s27] sm:$0x8]  ;;  %v182_v16 = vunpack.c.l.b16 %v697_v13  ;;  %v179_v47 = vld [vmem:[%s685_s27 + $0x4] sm:$0xe] }
  0x12   : > { %v183_v17 = vunpack.c.l.b16 %v171_v14  ;;  %v177_v18 = vld [vmem:[%s685_s27 + $0x4] sm:$0xf]  ;;  %v204_v20 = vpack.c.b16 %v203_v11, %v202_v10  ;;  %v220_v22 = vunpack.c.l.b16 %v176_v15  ;;  %v172_v29 = vld [vmem:[%s685_s27] sm:$0xe]  ;;  %v243_v48 = vunpack.c.l.b16 %v179_v47  ;;  %v603_v54 = vld [vmem:[%s758_s1 + $0x48] sm:$0xff] }
  0x13   : > { %v704_v21 = vpack.c.b16 %v209_v12, %v202_v10  ;;  %v226_v23 = vunpack.c.l.b16 %v177_v18  ;;  %v195_v37 = vunpack.c.l.b16 %v172_v29  ;;  %v610_v50 = vld [vmem:[%s758_s1 + $0x80] sm:$0xff]  ;;  %v595_v55 = vld [vmem:[%s758_s1 + $0x8] sm:$0xff] }
  0x14   : > { %431 = vmatpush.bf16.msra.mxu1 %v607_v5  ;;  %v184_v25 = vpack.c.b16 %v183_v17, %v182_v16  ;;  %v205_v28 = vrot.slane %v204_v20, 2  ;;  %v221_v33 = vpack.c.b16 %v209_v12, %v220_v22  ;;  %v244_v52 = vpack.c.b16 %v231_v26, %v243_v48  ;;  %449 = vmatpush.bf16.msra.mxu2 %v610_v50  ;;  %v602_v56 = vld [vmem:[%s758_s1 + $0x40] sm:$0xff] }
  0x15   : > { %418 = vmatpush.bf16.msra.mxu0 %v599_v6  ;;  %v227_v32 = vpack.c.b16 %v226_v23, %v226_v23  ;;  %v232_v34 = vpack.c.b16 %v231_v26, %v226_v23  ;;  %v196_v44 = vpack.c.b16 %v183_v17, %v195_v37  ;;  %v594_v57 = vld [vmem:[%s758_s1] sm:$0xff]  ;;  %v212_v58 = vshrl.u32 %v704_v21, 16 }
  0x16   : > { %v186_v30 = vshrl.u32 %v184_v25, 16  ;;  %v188_v31 = vshll.u32 %v184_v25, 16  ;;  %206 = vrot.lane.b32.xlu1 %v205_v28, %s633_s9  ;;  %v222_v42 = vrot.slane %v221_v33, 3  ;;  %v245_v53 = vrot.slane %v244_v52, 1  ;;  %v624_v15 = vld [vmem:[%s759_s2] ss:$0 sm:$0xff] }
  0x17   : > { %228 = vrot.lane.b32.xlu2 %v227_v32, %s634_s14  ;;  %v234_v39 = vshrl.u32 %v232_v34, 16  ;;  %v236_v40 = vshll.u32 %v232_v34, 16  ;;  %v197_v46 = vrot.slane %v196_v44, 1  ;;  %v215_v59 = vshll.u32 %v704_v21, 16 }
  0x18   : > { %432 = vmatpush.bf16.msra.mxu1 %v606_v24  ;;  %v190_v36 = vrot.slane %v188_v31, 1  ;;  %591 = vmatmul.msk.bf16.vlgmr.msra.gmra.mxu2 %vm246_vm0, %v245_v53  ;;  %v214_v62 = vrot.slane %v212_v58, 2 }
  0x19   : > { %419 = vmatpush.bf16.msra.mxu0 %v598_v27  ;;  %v238_v43 = vrot.slane %v236_v40, 1  ;;  %v217_v63 = vrot.slane %v215_v59, 3 }
  0x1a   : > { %v191_v41 = vor.u32 %v190_v36, %v186_v30 }
  0x1b   : > { %v239_v45 = vor.u32 %v238_v43, %v234_v39  ;;  %v218_v1 = vor.u32 %v217_v63, %v214_v62 }
  0x1c   : > { %433 = vmatpush.bf16.msra.mxu1 %v605_v35  ;;  %192 = vrot.lane.b32.xlu0 %v191_v41, %s635_s17 }
  0x1d   : > { %420 = vmatpush.bf16.msra.mxu0 %v597_v38 }
  0x1e   : > { %223 = vrot.lane.b32.xlu1 %v222_v42, %s635_s17 }
  0x1f   : > { %240 = vrot.lane.b32.xlu2 %v239_v45, %s633_s9 }
  0x20   : > { %434 = vmatpush.bf16.msra.mxu1 %v604_v49 }
  0x21   : > { %421 = vmatpush.bf16.msra.mxu0 %v596_v51 }
  0x24   : > { %198 = vrot.lane.b32.xlu0 %v197_v46, %s634_s14  ;;  %435 = vmatpush.bf16.msra.mxu1 %v603_v54 }
  0x25   : > { %422 = vmatpush.bf16.msra.mxu0 %v595_v55 }
  0x28   : > { %436 = vmatpush.bf16.msra.mxu1 %v602_v56 }
  0x29   : > { %423 = vmatpush.bf16.msra.mxu0 %v594_v57 }
  0x71   : > { %v229_v60 = vpop.permute.xlu2 %228 }
  0x79   : > { %v241_v3 = vpop.permute.xlu2 %240 }
  0x88   : > { %v207_v61 = vpop.permute.xlu1 %206 }
  0x8e   : > { %v193_v0 = vpop.permute.xlu0 %192 }
  0x8f   : > { %v249_v7 = vsel %vm246_vm0, %v697_v13, %v193_v0 }
  0x90   : > { %v224_v2 = vpop.permute.xlu1 %223 }
  0x91   : > { %v259_v4 = vsel %vm246_vm0, %v218_v1, %v224_v2 }
  0x92   : > { %v261_v5 = vsel %vm250_vm1, %v259_v4, %v229_v60 }
  0x93   : > { %v263_v6 = vsel %vm253_vm2, %v261_v5, %v241_v3 }
  0x94   : > { %437 = vmatmul.bf16.vlgmr.msra.gmra.mxu1 %v263_v6 }
  0x96   : > { %v199_v8 = vpop.permute.xlu0 %198 }
  0x97   : > { %v252_v9 = vsel %vm250_vm1, %v249_v7, %v199_v8 }
  0x98   : > { %v255_v10 = vsel %vm253_vm2, %v252_v9, %v207_v61 }
  0x99   : > { %424 = vmatmul.bf16.vlgmr.msra.gmra.mxu0 %v255_v10 }
  0x9b   : > { %v451_v11 = vpop.f32.mrf.mxu2 }
  0xa3   : > { %v453_v12 = vpop.f32.mrf.mxu2 }
 0x111   : > { %v438_v14 = vpop.f32.mrf.mxu1 }
 0x116   : > { %v425_v16 = vpop.f32.mrf.mxu0 }
 0x117   : > { %v426_v17 = vadd.f32 %v624_v15, %v425_v16 }
 0x119   : > { %v439_v18 = vadd.f32 %v438_v14, %v426_v17  ;;  %v440_v19 = vpop.f32.mrf.mxu1 }
 0x11b   : > { %v452_v20 = vadd.f32 %v451_v11, %v439_v18 }
 0x11d   : > { %v455_v21 = vmax.f32 %v452_v20, 0.0 }
 0x11e   : > { %v427_v13 = vpop.f32.mrf.mxu0 }
 0x11f   : > { %v456_v22 = vpack.c.bf16 %v455_v21, %v455_v21 }
 0x121   : > { %458 = vst.msk [vmem:[%s168_s10] sm:$0xf] %vm457_vm3, %v456_v22 }
 0x122 PF: > { %s13_s12 = sadd.s32 1, %s631_s12  }
 0x123   : > { %p10_p4 = scmp.ge.s32.totalorder %s13_s12, 4  }
 0x125   :  { %12 = sbr.rel (!%p10_p4) target bundleno = 1 (0x1), region = 62 }

// kernel: hrnet_forward.73
= control target key start
LH: loop header
LB: loop body
LE: loop exit
PB: predicated region body
PF: predicated region fallthrough
CT: control target
= control target key end

     0   :  { %s721_s15 = smov 0   ;;  %s825_s0 = inlined_call_operand.vmem [shape: bf16[2,18,32], index: 0, kind: input, shape index: {}]   ;;  %s826_s1 = inlined_call_operand.vmem [shape: bf16[288,32], index: 1, kind: input, shape index: {}]   ;;  %s827_s2 = inlined_call_operand.vmem [shape: f32[1,32], index: 2, kind: input, shape index: {}]   ;;  %s828_s3 = inlined_call_operand.vmem [shape: bf16[2,8,32], index: 3, kind: input, shape index: {}]   ;;  %s829_s4 = inlined_call_operand.vmem [shape: bf16[2,8,32], index: 4, kind: output, shape index: {}]  }
   0x1 LB: > { %s571_s16 = sadd.s32 4294967295, %s691_s15   ;;  %p575_p0 = scmp.ge.s32.totalorder %s691_s15, 1  ;;  %s691_s15 = sphi %s721_s15, %s14_s15  }
   0x2   : > { %p171_p1 = scmp.lt.s32.totalorder %s691_s15, 3 }
   0x4   : > { %p172_p2 = pnand %p575_p0, %p171_p1 }
   0x5   : > { %p200_p3 = scmp.lt.s32.totalorder (!%p172_p2), %s571_s16, 1  ;;  %s693_s13 = smov (!%p172_p2), 96  }
   0x6   : > { %175 = sbr.rel (%p172_p2) target bundleno = 292 (0x124), region = 36  ;;  %s694_s18 = smov (!%p172_p2), 64  }
   0x7   : > { %s695_s21 = smov (!%p172_p2), 32  }
   0xb   : > { %v669_v0 = vld [vmem:[%s826_s1 + $0x78] sm:$0xff]  ;;  %s831_s16 = smov (!%p200_p3, %s571_s16), 1  ;;  %v668_v2 = vld [vmem:[%s826_s1 + $0x70] sm:$0xff]  ;;  %v671_v4 = vld [vmem:[%s826_s1 + $0x88] sm:$0xff]  ;;  %vm290_vm0 = vcmask 261120   ;;  %vm294_vm1 = vcmask 523264  }
   0xc   : > { %v661_v1 = vld [vmem:[%s826_s1 + $0x38] sm:$0xff]  ;;  %473 = vmatpush.bf16.msra.mxu1 %v669_v0  ;;  %v660_v3 = vld [vmem:[%s826_s1 + $0x30] sm:$0xff]  ;;  %s672_s27 = smul.u32 12, %s831_s16  ;;  %492 = vmatpush.bf16.msra.mxu2 %v671_v4  ;;  %v667_v5 = vld [vmem:[%s826_s1 + $0x68] sm:$0xff]  ;;  %vm297_vm2 = vcmask 785408   ;;  %s577_s10 = sshll.u32 %s831_s16, 2 }
   0xd   : > { %460 = vmatpush.bf16.msra.mxu0 %v661_v1  ;;  %v659_v6 = vld [vmem:[%s826_s1 + $0x28] sm:$0xff]  ;;  %v666_v24 = vld [vmem:[%s826_s1 + $0x60] sm:$0xff]  ;;  %v665_v35 = vld [vmem:[%s826_s1 + $0x58] sm:$0xff]  ;;  %s212_s19 = scalar_lea.vmem %s829_s4, %s577_s10  ;;  %vm504_vm3 = vcmask 257024  }
   0xe   : > { %s750_s30 = scalar_lea.vmem %s825_s0, %s672_s27  ;;  %v658_v27 = vld [vmem:[%s826_s1 + $0x20] sm:$0xff]  ;;  %v657_v38 = vld [vmem:[%s826_s1 + $0x18] sm:$0xff]  ;;  %v664_v48 = vld [vmem:[%s826_s1 + $0x50] sm:$0xff] }
   0xf   : > { %v217_v7 = vld [vmem:[%s750_s30] sm:$0xc]  ;;  %v218_v8 = vld [vmem:[%s750_s30 + $0x4] sm:$0x3]  ;;  %v222_v19 = vld [vmem:[%s750_s30 + $0x8] sm:$0x1] }
  0x10   : > { %474 = vmatpush.bf16.msra.mxu1 %v668_v2  ;;  %v219_v9 = vld [vmem:[%s750_s30 + $0x4] sm:$0x7]  ;;  %v246_v10 = vunpack.c.l.b16 %v217_v7  ;;  %v247_v11 = vunpack.c.l.b16 %v218_v8  ;;  %v762_v13 = vld [vmem:[%s750_s30] sm:$0xf]  ;;  %v275_v26 = vunpack.c.l.b16 %v222_v19  ;;  %v656_v50 = vld [vmem:[%s826_s1 + $0x10] sm:$0xff] }
  0x11   : > { %461 = vmatpush.bf16.msra.mxu0 %v660_v3  ;;  %v253_v12 = vunpack.c.l.b16 %v219_v9  ;;  %v215_v14 = vld [vmem:[%s750_s30 + $0x4] sm:$0x1]  ;;  %v220_v15 = vld [vmem:[%s750_s30] sm:$0x8]  ;;  %v226_v16 = vunpack.c.l.b16 %v762_v13  ;;  %v223_v47 = vld [vmem:[%s750_s30 + $0x4] sm:$0xe] }
  0x12   : > { %v227_v17 = vunpack.c.l.b16 %v215_v14  ;;  %v221_v18 = vld [vmem:[%s750_s30 + $0x4] sm:$0xf]  ;;  %v248_v20 = vpack.c.b16 %v247_v11, %v246_v10  ;;  %v264_v22 = vunpack.c.l.b16 %v220_v15  ;;  %v216_v29 = vld [vmem:[%s750_s30] sm:$0xe]  ;;  %v287_v51 = vunpack.c.l.b16 %v223_v47  ;;  %v663_v53 = vld [vmem:[%s826_s1 + $0x48] sm:$0xff] }
  0x13   : > { %v769_v21 = vpack.c.b16 %v253_v12, %v246_v10  ;;  %v270_v23 = vunpack.c.l.b16 %v221_v18  ;;  %v239_v37 = vunpack.c.l.b16 %v216_v29  ;;  %v670_v49 = vld [vmem:[%s826_s1 + $0x80] sm:$0xff]  ;;  %v655_v55 = vld [vmem:[%s826_s1 + $0x8] sm:$0xff] }
  0x14   : > { %475 = vmatpush.bf16.msra.mxu1 %v667_v5  ;;  %v228_v25 = vpack.c.b16 %v227_v17, %v226_v16  ;;  %v249_v28 = vrot.slane %v248_v20, 2  ;;  %v265_v33 = vpack.c.b16 %v253_v12, %v264_v22  ;;  %493 = vmatpush.bf16.msra.mxu2 %v670_v49  ;;  %v288_v52 = vpack.c.b16 %v275_v26, %v287_v51  ;;  %v662_v56 = vld [vmem:[%s826_s1 + $0x40] sm:$0xff] }
  0x15   : > { %462 = vmatpush.bf16.msra.mxu0 %v659_v6  ;;  %v271_v32 = vpack.c.b16 %v270_v23, %v270_v23  ;;  %v276_v34 = vpack.c.b16 %v275_v26, %v270_v23  ;;  %v240_v44 = vpack.c.b16 %v227_v17, %v239_v37  ;;  %v654_v57 = vld [vmem:[%s826_s1] sm:$0xff]  ;;  %v256_v58 = vshrl.u32 %v769_v21, 16 }
  0x16   : > { %v230_v30 = vshrl.u32 %v228_v25, 16  ;;  %v232_v31 = vshll.u32 %v228_v25, 16  ;;  %250 = vrot.lane.b32.xlu1 %v249_v28, %s693_s13  ;;  %v266_v42 = vrot.slane %v265_v33, 3  ;;  %v289_v54 = vrot.slane %v288_v52, 1  ;;  %v684_v15 = vld [vmem:[%s827_s2] ss:$0 sm:$0xff] }
  0x17   : > { %272 = vrot.lane.b32.xlu2 %v271_v32, %s694_s18  ;;  %v278_v39 = vshrl.u32 %v276_v34, 16  ;;  %v280_v40 = vshll.u32 %v276_v34, 16  ;;  %v241_v46 = vrot.slane %v240_v44, 1  ;;  %v259_v59 = vshll.u32 %v769_v21, 16 }
  0x18   : > { %476 = vmatpush.bf16.msra.mxu1 %v666_v24  ;;  %v234_v36 = vrot.slane %v232_v31, 1  ;;  %651 = vmatmul.msk.bf16.vlgmr.msra.gmra.mxu2 %vm290_vm0, %v289_v54  ;;  %v258_v62 = vrot.slane %v256_v58, 2 }
  0x19   : > { %463 = vmatpush.bf16.msra.mxu0 %v658_v27  ;;  %v282_v43 = vrot.slane %v280_v40, 1  ;;  %v261_v63 = vrot.slane %v259_v59, 3 }
  0x1a   : > { %v235_v41 = vor.u32 %v234_v36, %v230_v30 }
  0x1b   : > { %v283_v45 = vor.u32 %v282_v43, %v278_v39  ;;  %v262_v1 = vor.u32 %v261_v63, %v258_v62 }
  0x1c   : > { %477 = vmatpush.bf16.msra.mxu1 %v665_v35  ;;  %236 = vrot.lane.b32.xlu0 %v235_v41, %s695_s21 }
  0x1d   : > { %464 = vmatpush.bf16.msra.mxu0 %v657_v38 }
  0x1e   : > { %267 = vrot.lane.b32.xlu1 %v266_v42, %s695_s21 }
  0x1f   : > { %284 = vrot.lane.b32.xlu2 %v283_v45, %s693_s13  ;;  %s208_s13 = scalar_lea.vmem %s828_s3, %s577_s10 }
  0x20   : > { %478 = vmatpush.bf16.msra.mxu1 %v664_v48  ;;  %v499_v17 = vld [vmem:[%s208_s13] sm:$0xf] }
  0x21   : > { %465 = vmatpush.bf16.msra.mxu0 %v656_v50  ;;  %v500_v19 = vunpack.c.l.bf16 %v499_v17 }
  0x24   : > { %242 = vrot.lane.b32.xlu0 %v241_v46, %s694_s18  ;;  %479 = vmatpush.bf16.msra.mxu1 %v663_v53 }
  0x25   : > { %466 = vmatpush.bf16.msra.mxu0 %v655_v55 }
  0x28   : > { %480 = vmatpush.bf16.msra.mxu1 %v662_v56 }
  0x29   : > { %467 = vmatpush.bf16.msra.mxu0 %v654_v57 }
  0x71   : > { %v273_v60 = vpop.permute.xlu2 %272 }
  0x79   : > { %v285_v3 = vpop.permute.xlu2 %284 }
  0x88   : > { %v251_v61 = vpop.permute.xlu1 %250 }
  0x8e   : > { %v237_v0 = vpop.permute.xlu0 %236 }
  0x8f   : > { %v293_v7 = vsel %vm290_vm0, %v762_v13, %v237_v0 }
  0x90   : > { %v268_v2 = vpop.permute.xlu1 %267 }
  0x91   : > { %v303_v4 = vsel %vm290_vm0, %v262_v1, %v268_v2 }
  0x92   : > { %v305_v5 = vsel %vm294_vm1, %v303_v4, %v273_v60 }
  0x93   : > { %v307_v6 = vsel %vm297_vm2, %v305_v5, %v285_v3 }
  0x94   : > { %481 = vmatmul.bf16.vlgmr.msra.gmra.mxu1 %v307_v6 }
  0x96   : > { %v243_v8 = vpop.permute.xlu0 %242 }
  0x97   : > { %v296_v9 = vsel %vm294_vm1, %v293_v7, %v243_v8 }
  0x98   : > { %v299_v10 = vsel %vm297_vm2, %v296_v9, %v251_v61 }
  0x99   : > { %468 = vmatmul.bf16.vlgmr.msra.gmra.mxu0 %v299_v10 }
  0x9b   : > { %v495_v11 = vpop.f32.mrf.mxu2 }
  0xa3   : > { %v497_v12 = vpop.f32.mrf.mxu2 }
 0x111   : > { %v482_v14 = vpop.f32.mrf.mxu1 }
 0x116   : > { %v469_v16 = vpop.f32.mrf.mxu0 }
 0x117   : > { %v470_v18 = vadd.f32 %v684_v15, %v469_v16 }
 0x119   : > { %v483_v13 = vadd.f32 %v482_v14, %v470_v18  ;;  %v484_v20 = vpop.f32.mrf.mxu1 }
 0x11b   : > { %v496_v21 = vadd.f32 %v495_v11, %v483_v13 }
 0x11d   : > { %v501_v22 = vadd.f32 %v500_v19, %v496_v21 }
 0x11e   : > { %v471_v23 = vpop.f32.mrf.mxu0 }
 0x11f   : > { %v502_v24 = vmax.f32 %v501_v22, 0.0 }
 0x121   : > { %v503_v25 = vpack.c.bf16 %v502_v24, %v502_v24 }
 0x123   : > { %505 = vst.msk [vmem:[%s212_s19] sm:$0xf] %vm504_vm3, %v503_v25 }
 0x124 PF: > { %s14_s15 = sadd.s32 1, %s691_s15  }
 0x125   : > { %p11_p4 = scmp.ge.s32.totalorder %s14_s15, 4  }
 0x127   :  { %13 = sbr.rel (!%p11_p4) target bundleno = 1 (0x1), region = 69 }

// kernel: hrnet_forward.75
= control target key start
LH: loop header
LB: loop body
LE: loop exit
PB: predicated region body
PF: predicated region fallthrough
CT: control target
= control target key end

     0   :  { %s318_s12 = smov 0   ;;  %s338_s0 = inlined_call_operand.vmem [shape: bf16[2,4,32], index: 0, kind: input, shape index: {}]   ;;  %s339_s1 = inlined_call_operand.vmem [shape: bf16[32,8], index: 1, kind: input, shape index: {}]   ;;  %s340_s2 = inlined_call_operand.vmem [shape: f32[1,8], index: 2, kind: input, shape index: {}]   ;;  %s341_s3 = inlined_call_operand.vmem [shape: bf16[2,4,8], index: 3, kind: output, shape index: {}]  }
   0x1 LB: > { %s261_s13 = sadd.s32 4294967295, %s296_s12   ;;  %p265_p0 = scmp.ge.s32.totalorder %s296_s12, 1  ;;  %s296_s12 = sphi %s318_s12, %s13_s12  }
   0x2   : > { %p136_p1 = scmp.lt.s32.totalorder %s296_s12, 3 }
   0x4   : > { %p137_p2 = pnand %p265_p0, %p136_p1 }
   0x5   : > { %p158_p3 = scmp.lt.s32.totalorder (!%p137_p2), %s261_s13, 1 }
   0x6   : > { %140 = sbr.rel (%p137_p2) target bundleno = 153 (0x99), region = 32 }
   0xb   : > { %v280_v0 = vld [vmem:[%s339_s1 + $0x8] sm:$0xff]  ;;  %v279_v1 = vld [vmem:[%s339_s1] sm:$0xff]  ;;  %s343_s13 = smov (!%p158_p3, %s261_s13), 1  ;;  %vm188_vm0 = vcmask 261120   ;;  %vm206_vm1 = vcmask 58368  }
   0xc   : > { %198 = vmatpush.bf16.msra.mxu0 %v280_v0  ;;  %s266_s18 = sshll.u32 %s343_s13, 1  ;;  %v289_v3 = vld [vmem:[%s340_s2] ss:$0 sm:$0xff] }
   0xd   : > { %s161_s21 = scalar_lea.vmem %s338_s0, %s266_s18  ;;  %s165_s26 = scalar_lea.vmem %s341_s3, %s266_s18 }
   0xe   : > { %v167_v2 = vld [vmem:[%s161_s21] sm:$0x3] }
  0x10   : > { %199 = vmatpush.bf16.msra.mxu0 %v279_v1 }
  0x13   : > { %276 = vmatmul.msk.bf16.vlgmr.msra.gmra.mxu0 %vm188_vm0, %v167_v2 }
  0x90   : > { %v201_v4 = vpop.f32.mrf.mxu0 }
  0x91   : > { %v202_v5 = vadd.f32 %v289_v3, %v201_v4 }
  0x93   : > { %v205_v6 = vpack.c.bf16 %v202_v5, %v202_v5 }
  0x95   : > { %207 = vst.msk [vmem:[%s165_s26] sm:$0x3] %vm206_vm1, %v205_v6 }
  0x98   : > { %v203_v7 = vpop.f32.mrf.mxu0 }
  0x99 PF: > { %s13_s12 = sadd.s32 1, %s296_s12  }
  0x9a   : > { %p10_p4 = scmp.ge.s32.totalorder %s13_s12, 4  }
  0x9c   :  { %12 = sbr.rel (!%p10_p4) target bundleno = 1 (0x1), region = 62 }

// kernel: hrnet_forward.78
= control target key start
LH: loop header
LB: loop body
LE: loop exit
PB: predicated region body
PF: predicated region fallthrough
CT: control target
= control target key end

     0   :  { %vm76_vm0 = vcmask 1043456   ;;  %vm69_vm1 = vcmask 588800   ;;  %vm107_vm2 = vcmask 60416   ;;  %s210_s1 = inlined_call_operand.vmem [shape: bf16[72,8], index: 1, kind: input, shape index: {}]   ;;  %s211_s2 = inlined_call_operand.vmem [shape: f32[1,8], index: 2, kind: input, shape index: {}]   ;;  %s212_s0 = inlined_call_operand.vmem [shape: bf16[32,72], index: 0, kind: input, shape index: {}]   ;;  %s213_s3 = inlined_call_operand.vmem [shape: bf16[32,8], index: 3, kind: output, shape index: {}]  }
   0x1   :  { %v27_v0 = vld [vmem:[%s210_s1 + $0x20] sm:$0xf]  ;;  %v147_v4 = vld [vmem:[%s210_s1 + $0x18] sm:$0xff]  ;;  %v146_v5 = vld [vmem:[%s210_s1 + $0x10] sm:$0xff] }
   0x2   :  { %v59_v1 = vunpack.c.l.b16 %v27_v0  ;;  %v145_v6 = vld [vmem:[%s210_s1 + $0x8] sm:$0xff]  ;;  %v144_v7 = vld [vmem:[%s210_s1] sm:$0xff] }
   0x3   :  { %v142_v8 = vld [vmem:[%s212_s0] sm:$0xff]  ;;  %v143_v9 = vld [vmem:[%s212_s0 + $0x8] sm:$0xff] }
   0x4   :  { %v64_v2 = vpack.c.b16 %v59_v1, %v59_v1  ;;  %v153_v10 = vld [vmem:[%s211_s2] ss:$0 sm:$0xff] }
   0x6   :  { %v78_v3 = vsel %vm76_vm0, %v64_v2, 0 }
   0x7   :  { %83 = vmatpush.bf16.msra.mxu0 %v78_v3  ;;  %148 = vmatpush.bf16.msra.mxu1 %v78_v3 }
   0xb   :  { %84 = vmatpush.bf16.msra.mxu0 %v147_v4  ;;  %149 = vmatpush.bf16.msra.mxu1 %v147_v4 }
   0xf   :  { %85 = vmatpush.bf16.msra.mxu0 %v146_v5  ;;  %150 = vmatpush.bf16.msra.mxu1 %v146_v5 }
  0x13   :  { %86 = vmatpush.bf16.msra.mxu0 %v145_v6  ;;  %151 = vmatpush.bf16.msra.mxu1 %v145_v6 }
  0x17   :  { %87 = vmatpush.bf16.msra.mxu0 %v144_v7  ;;  %152 = vmatpush.bf16.msra.mxu1 %v144_v7 }
  0x1a   :  { %140 = vmatmul.msk.bf16.vlgmr.msra.gmra.mxu0 %vm69_vm1, %v142_v8  ;;  %141 = vmatmul.msk.bf16.vlgmr.msra.gmra.mxu1 %vm69_vm1, %v143_v9 }
  0x97   :  { %v89_v11 = vpop.f32.mrf.mxu0  ;;  %v94_v12 = vpop.f32.mrf.mxu1 }
  0x98   :  { %v90_v13 = vadd.f32 %v153_v10, %v89_v11  ;;  %v95_v14 = vadd.f32 %v153_v10, %v94_v12 }
  0x9a   :  { %v99_v15 = vmax.f32 %v90_v13, 0.0  ;;  %v101_v16 = vmax.f32 %v95_v14, 0.0 }
  0x9c   :  { %v103_v17 = vpack.c.bf16 %v99_v15, %v99_v15  ;;  %v105_v18 = vpack.c.bf16 %v101_v16, %v101_v16 }
  0x9e   :  { %108 = vst.msk [vmem:[%s213_s3] sm:$0xf] %vm107_vm2, %v103_v17 }
  0x9f   :  { %110 = vst.msk [vmem:[%s213_s3 + $0x8] sm:$0xf] %vm107_vm2, %v105_v18  ;;  %v91_v19 = vpop.f32.mrf.mxu0  ;;  %v96_v20 = vpop.f32.mrf.mxu1 }
  0xa0   :  { %v92_v21 = vadd.f32 %v153_v10, %v91_v19  ;;  %v97_v22 = vadd.f32 %v153_v10, %v96_v20 }
  0xa2   :  { %v100_v23 = vmax.f32 %v92_v21, 0.0  ;;  %v102_v24 = vmax.f32 %v97_v22, 0.0 }
  0xa4   :  { %v104_v25 = vpack.c.bf16 %v100_v23, %v100_v23  ;;  %v106_v26 = vpack.c.bf16 %v102_v24, %v102_v24 }
  0xa6   :  { %109 = vst.msk [vmem:[%s213_s3 + $0x4] sm:$0xf] %vm107_vm2, %v104_v25 }
  0xa7   :  { %111 = vst.msk [vmem:[%s213_s3 + $0xc] sm:$0xf] %vm107_vm2, %v106_v26 }

// kernel: hrnet_forward.79
= control target key start
LH: loop header
LB: loop body
LE: loop exit
PB: predicated region body
PF: predicated region fallthrough
CT: control target
= control target key end

     0   :  { %vm63_vm0 = vcmask 1043456   ;;  %vm59_vm1 = vcmask 588800   ;;  %vm84_vm2 = vcmask 257024   ;;  %s164_s1 = inlined_call_operand.vmem [shape: bf16[72,32], index: 1, kind: input, shape index: {}]   ;;  %s165_s2 = inlined_call_operand.vmem [shape: f32[1,32], index: 2, kind: input, shape index: {}]   ;;  %s166_s0 = inlined_call_operand.vmem [shape: bf16[8,72], index: 0, kind: input, shape index: {}]   ;;  %s167_s3 = inlined_call_operand.vmem [shape: bf16[8,32], index: 3, kind: input, shape index: {}]   ;;  %s168_s4 = inlined_call_operand.vmem [shape: bf16[8,32], index: 4, kind: output, shape index: {}]  }
   0x1   :  { %v27_v0 = vld [vmem:[%s164_s1 + $0x20] sm:$0xf]  ;;  %v110_v4 = vld [vmem:[%s164_s1 + $0x18] sm:$0xff]  ;;  %v109_v5 = vld [vmem:[%s164_s1 + $0x10] sm:$0xff] }
   0x2   :  { %v49_v1 = vunpack.c.l.b16 %v27_v0  ;;  %v108_v6 = vld [vmem:[%s164_s1 + $0x8] sm:$0xff]  ;;  %v107_v7 = vld [vmem:[%s164_s1] sm:$0xff] }
   0x3   :  { %v18_v8 = vld [vmem:[%s166_s0] sm:$0xf] }
   0x4   :  { %v54_v2 = vpack.c.b16 %v49_v1, %v49_v1  ;;  %v80_v9 = vld [vmem:[%s167_s3] sm:$0xf] }
   0x5   :  { %v111_v10 = vld [vmem:[%s165_s2] ss:$0 sm:$0xff]  ;;  %v81_v11 = vunpack.c.l.bf16 %v80_v9 }
   0x6   :  { %v65_v3 = vsel %vm63_vm0, %v54_v2, 0 }
   0x7   :  { %70 = vmatpush.bf16.msra.mxu0 %v65_v3 }
   0xb   :  { %71 = vmatpush.bf16.msra.mxu0 %v110_v4 }
   0xf   :  { %72 = vmatpush.bf16.msra.mxu0 %v109_v5 }
  0x13   :  { %73 = vmatpush.bf16.msra.mxu0 %v108_v6 }
  0x17   :  { %74 = vmatpush.bf16.msra.mxu0 %v107_v7 }
  0x1a   :  { %106 = vmatmul.msk.bf16.vlgmr.msra.gmra.mxu0 %vm59_vm1, %v18_v8 }
  0x97   :  { %v76_v12 = vpop.f32.mrf.mxu0 }
  0x98   :  { %v77_v13 = vadd.f32 %v111_v10, %v76_v12 }
  0x9a   :  { %v82_v14 = vadd.f32 %v81_v11, %v77_v13 }
  0x9c   :  { %v83_v15 = vpack.c.bf16 %v82_v14, %v82_v14 }
  0x9e   :  { %85 = vst.msk [vmem:[%s168_s4] sm:$0xf] %vm84_vm2, %v83_v15 }
  0x9f   :  { %v78_v16 = vpop.f32.mrf.mxu0 }

// kernel: hrnet_forward.80
= control target key start
LH: loop header
LB: loop body
LE: loop exit
PB: predicated region body
PF: predicated region fallthrough
CT: control target
= control target key end

     0   :  { %vm101_vm0 = vcmask 130048   ;;  %vm136_vm1 = vcmask 257024   ;;  %s253_s1 = inlined_call_operand.vmem [shape: bf16[144,32], index: 1, kind: input, shape index: {}]   ;;  %s254_s0 = inlined_call_operand.vmem [shape: bf16[8,144], index: 0, kind: input, shape index: {}]   ;;  %s255_s2 = inlined_call_operand.vmem [shape: f32[1,32], index: 2, kind: input, shape index: {}]   ;;  %s256_s3 = inlined_call_operand.vmem [shape: bf16[8,32], index: 3, kind: input, shape index: {}]   ;;  %s257_s4 = inlined_call_operand.vmem [shape: bf16[8,32], index: 4, kind: output, shape index: {}]  }
   0x1   :  { %v186_v0 = vld [vmem:[%s253_s1 + $0x38] sm:$0xff]  ;;  %v185_v1 = vld [vmem:[%s253_s1 + $0x30] sm:$0xff]  ;;  %v187_v2 = vld [vmem:[%s253_s1 + $0x40] sm:$0xff] }
   0x2   :  { %105 = vmatpush.bf16.msra.mxu0 %v186_v0  ;;  %v18_v3 = vld [vmem:[%s254_s0] sm:$0xff]  ;;  %125 = vmatpush.bf16.msra.mxu1 %v187_v2  ;;  %v184_v6 = vld [vmem:[%s253_s1 + $0x28] sm:$0xff]  ;;  %v182_v8 = vld [vmem:[%s253_s1 + $0x18] sm:$0xff] }
   0x3   :  { %v43_v4 = vunpack.c.h.b16 %v18_v3  ;;  %v183_v7 = vld [vmem:[%s253_s1 + $0x20] sm:$0xff]  ;;  %v181_v9 = vld [vmem:[%s253_s1 + $0x10] sm:$0xff]  ;;  %v180_v10 = vld [vmem:[%s253_s1 + $0x8] sm:$0xff]  ;;  %v42_v11 = vunpack.c.l.b16 %v18_v3 }
   0x4   :  { %v179_v12 = vld [vmem:[%s253_s1] sm:$0xff] }
   0x5   :  { %v45_v5 = vpack.c.b16 %v43_v4, %v43_v4  ;;  %v44_v13 = vpack.c.b16 %v42_v11, %v42_v11  ;;  %v188_v16 = vld [vmem:[%s255_s2] ss:$0 sm:$0xff] }
   0x6   :  { %106 = vmatpush.bf16.msra.mxu0 %v185_v1  ;;  %v131_v17 = vld [vmem:[%s256_s3] sm:$0xf] }
   0x7   :  { %178 = vmatmul.msk.bf16.vlgmr.msra.gmra.mxu1 %vm101_vm0, %v45_v5  ;;  %v132_v20 = vunpack.c.l.bf16 %v131_v17 }
   0xa   :  { %107 = vmatpush.bf16.msra.mxu0 %v184_v6 }
   0xe   :  { %108 = vmatpush.bf16.msra.mxu0 %v183_v7 }
  0x12   :  { %109 = vmatpush.bf16.msra.mxu0 %v182_v8 }
  0x16   :  { %110 = vmatpush.bf16.msra.mxu0 %v181_v9 }
  0x1a   :  { %111 = vmatpush.bf16.msra.mxu0 %v180_v10 }
  0x1e   :  { %112 = vmatpush.bf16.msra.mxu0 %v179_v12 }
  0x21   :  { %113 = vmatmul.bf16.vlgmr.msra.gmra.mxu0 %v44_v13 }
  0x84   :  { %v127_v14 = vpop.f32.mrf.mxu1 }
  0x8c   :  { %v129_v15 = vpop.f32.mrf.mxu1 }
  0x9e   :  { %v114_v18 = vpop.f32.mrf.mxu0 }
  0x9f   :  { %v115_v19 = vadd.f32 %v188_v16, %v114_v18 }
  0xa1   :  { %v128_v21 = vadd.f32 %v127_v14, %v115_v19 }
  0xa3   :  { %v133_v22 = vadd.f32 %v132_v20, %v128_v21 }
  0xa5   :  { %v134_v23 = vmax.f32 %v133_v22, 0.0 }
  0xa6   :  { %v116_v24 = vpop.f32.mrf.mxu0 }
  0xa7   :  { %v135_v25 = vpack.c.bf16 %v134_v23, %v134_v23 }
  0xa9   :  { %137 = vst.msk [vmem:[%s257_s4] sm:$0xf] %vm136_vm1, %v135_v25 }

// kernel: hrnet_forward.81
= control target key start
LH: loop header
LB: loop body
LE: loop exit
PB: predicated region body
PF: predicated region fallthrough
CT: control target
= control target key end

     0   :  { %vm175_vm0 = vcmask 261120   ;;  %vm220_vm1 = vcmask 519168   ;;  %s404_s1 = inlined_call_operand.vmem [shape: bf16[288,64], index: 1, kind: input, shape index: {}]   ;;  %s405_s0 = inlined_call_operand.vmem [shape: bf16[8,288], index: 0, kind: input, shape index: {}]   ;;  %s406_s2 = inlined_call_operand.vmem [shape: f32[1,64], index: 2, kind: input, shape index: {}]   ;;  %s407_s3 = inlined_call_operand.vmem [shape: bf16[8,64], index: 3, kind: output, shape index: {}]  }
   0x1   :  { %v306_v0 = vld [vmem:[%s404_s1 + $0x38] sm:$0xff]  ;;  %v305_v2 = vld [vmem:[%s404_s1 + $0x30] sm:$0xff]  ;;  %v316_v4 = vld [vmem:[%s404_s1 + $0x88] sm:$0xff] }
   0x2   :  { %v314_v1 = vld [vmem:[%s404_s1 + $0x78] sm:$0xff]  ;;  %179 = vmatpush.bf16.msra.mxu0 %v306_v0  ;;  %v313_v3 = vld [vmem:[%s404_s1 + $0x70] sm:$0xff]  ;;  %211 = vmatpush.bf16.msra.mxu2 %v316_v4  ;;  %v315_v5 = vld [vmem:[%s404_s1 + $0x80] sm:$0xff] }
   0x3   :  { %192 = vmatpush.bf16.msra.mxu1 %v314_v1  ;;  %v16_v6 = vld [vmem:[%s405_s0 + $0x8] sm:$0xf]  ;;  %v303_v11 = vld [vmem:[%s404_s1 + $0x20] sm:$0xff]  ;;  %v302_v13 = vld [vmem:[%s404_s1 + $0x18] sm:$0xff] }
   0x4   :  { %v61_v7 = vunpack.c.l.b16 %v16_v6  ;;  %v304_v8 = vld [vmem:[%s404_s1 + $0x28] sm:$0xff]  ;;  %v311_v12 = vld [vmem:[%s404_s1 + $0x60] sm:$0xff]  ;;  %v310_v14 = vld [vmem:[%s404_s1 + $0x58] sm:$0xff] }
   0x5   :  { %v312_v9 = vld [vmem:[%s404_s1 + $0x68] sm:$0xff]  ;;  %v301_v15 = vld [vmem:[%s404_s1 + $0x10] sm:$0xff]  ;;  %v15_v19 = vld [vmem:[%s405_s0] sm:$0xff] }
   0x6   :  { %180 = vmatpush.bf16.msra.mxu0 %v305_v2  ;;  %v64_v10 = vpack.c.b16 %v61_v7, %v61_v7  ;;  %212 = vmatpush.bf16.msra.mxu2 %v315_v5  ;;  %v309_v16 = vld [vmem:[%s404_s1 + $0x50] sm:$0xff]  ;;  %v300_v17 = vld [vmem:[%s404_s1 + $0x8] sm:$0xff]  ;;  %v59_v20 = vunpack.c.l.b16 %v15_v19  ;;  %v60_v21 = vunpack.c.h.b16 %v15_v19  ;;  %v299_v22 = vld [vmem:[%s404_s1] sm:$0xff] }
   0x7   :  { %193 = vmatpush.bf16.msra.mxu1 %v313_v3  ;;  %v308_v18 = vld [vmem:[%s404_s1 + $0x48] sm:$0xff]  ;;  %v307_v23 = vld [vmem:[%s404_s1 + $0x40] sm:$0xff] }
   0x8   :  { %v62_v24 = vpack.c.b16 %v59_v20, %v59_v20  ;;  %v63_v25 = vpack.c.b16 %v60_v21, %v60_v21  ;;  %v317_v28 = vld [vmem:[%s406_s2] ss:$0 sm:$0xff] }
   0x9   :  { %298 = vmatmul.msk.bf16.vlgmr.msra.gmra.mxu2 %vm175_vm0, %v64_v10 }
   0xa   :  { %181 = vmatpush.bf16.msra.mxu0 %v304_v8 }
   0xb   :  { %194 = vmatpush.bf16.msra.mxu1 %v312_v9 }
   0xe   :  { %182 = vmatpush.bf16.msra.mxu0 %v303_v11 }
   0xf   :  { %195 = vmatpush.bf16.msra.mxu1 %v311_v12 }
  0x12   :  { %183 = vmatpush.bf16.msra.mxu0 %v302_v13 }
  0x13   :  { %196 = vmatpush.bf16.msra.mxu1 %v310_v14 }
  0x16   :  { %184 = vmatpush.bf16.msra.mxu0 %v301_v15 }
  0x17   :  { %197 = vmatpush.bf16.msra.mxu1 %v309_v16 }
  0x1a   :  { %185 = vmatpush.bf16.msra.mxu0 %v300_v17 }
  0x1b   :  { %198 = vmatpush.bf16.msra.mxu1 %v308_v18 }
  0x1e   :  { %186 = vmatpush.bf16.msra.mxu0 %v299_v22 }
  0x1f   :  { %199 = vmatpush.bf16.msra.mxu1 %v307_v23 }
  0x21   :  { %187 = vmatmul.bf16.vlgmr.msra.gmra.mxu0 %v62_v24 }
  0x22   :  { %200 = vmatmul.bf16.vlgmr.msra.gmra.mxu1 %v63_v25 }
  0x8c   :  { %v214_v26 = vpop.f32.mrf.mxu2 }
  0x94   :  { %v216_v27 = vpop.f32.mrf.mxu2 }
  0x9e   :  { %v188_v29 = vpop.f32.mrf.mxu0 }
  0x9f   :  { %v201_v30 = vpop.f32.mrf.mxu1  ;;  %v189_v31 = vadd.f32 %v317_v28, %v188_v29 }
  0xa1   :  { %v202_v32 = vadd.f32 %v201_v30, %v189_v31 }
  0xa3   :  { %v215_v33 = vadd.f32 %v214_v26, %v202_v32 }
  0xa5   :  { %v218_v34 = vmax.f32 %v215_v33, 0.0 }
  0xa6   :  { %v190_v35 = vpop.f32.mrf.mxu0 }
  0xa7   :  { %v203_v36 = vpop.f32.mrf.mxu1  ;;  %v219_v37 = vpack.c.bf16 %v218_v34, %v218_v34 }
  0xa9   :  { %221 = vst.msk [vmem:[%s407_s3] sm:$0xf] %vm220_vm1, %v219_v37 }

// kernel: hrnet_forward.92
= control target key start
LH: loop header
LB: loop body
LE: loop exit
PB: predicated region body
PF: predicated region fallthrough
CT: control target
= control target key end

     0   :  { %s328_s12 = smov 0   ;;  %s360_s0 = inlined_call_operand.vmem [shape: bf16[2,1,64], index: 0, kind: input, shape index: {}]   ;;  %s361_s1 = inlined_call_operand.vmem [shape: bf16[64,8], index: 1, kind: input, shape index: {}]   ;;  %s362_s2 = inlined_call_operand.vmem [shape: f32[1,8], index: 2, kind: input, shape index: {}]   ;;  %s363_s3 = inlined_call_operand.vmem [shape: bf16[2,1,8], index: 3, kind: output, shape index: {}]  }
   0x1 LB: > { %s264_s13 = sadd.s32 4294967295, %s306_s12   ;;  %p268_p0 = scmp.ge.s32.totalorder %s306_s12, 1  ;;  %s306_s12 = sphi %s328_s12, %s13_s12  }
   0x2   : > { %p135_p1 = scmp.lt.s32.totalorder %s306_s12, 3 }
   0x4   : > { %p136_p2 = pnand %p268_p0, %p135_p1 }
   0x5   : > { %p155_p3 = scmp.lt.s32.totalorder (!%p136_p2), %s264_s13, 1 }
   0x6   : > { %139 = sbr.rel (%p136_p2) target bundleno = 161 (0xa1), region = 32 }
   0xb   : > { %v291_v0 = vld [vmem:[%s361_s1 + $0x18] sm:$0xff]  ;;  %v290_v1 = vld [vmem:[%s361_s1 + $0x10] sm:$0xff]  ;;  %v289_v2 = vld [vmem:[%s361_s1 + $0x8] sm:$0xff]  ;;  %s365_s13 = smov (!%p155_p3, %s264_s13), 1  ;;  %vm196_vm0 = vcmask 523264   ;;  %vm214_vm1 = vcmask 57344  }
   0xc   : > { %204 = vmatpush.bf16.msra.mxu0 %v291_v0  ;;  %v288_v3 = vld [vmem:[%s361_s1] sm:$0xff]  ;;  %s157_s24 = scalar_lea.vmem %s360_s0, %s365_s13  ;;  %s160_s29 = scalar_lea.vmem %s363_s3, %s365_s13  ;;  %vm215_vm2 = vsmask.f32 256 }
   0xd   : > { %v162_v4 = vld [vmem:[%s157_s24] sm:$0x1]  ;;  %vm216_vm3 = vmand %vm214_vm1, %vm215_vm2 }
   0xe   : > { %v171_v5 = vld [vmem:[%s362_s2] sm:$0x1] }
   0xf   : > { %v217_v8 = vld [vmem:[%s160_s29] sm:$0x1] }
  0x10   : > { %205 = vmatpush.bf16.msra.mxu0 %v290_v1 }
  0x14   : > { %206 = vmatpush.bf16.msra.mxu0 %v289_v2 }
  0x18   : > { %207 = vmatpush.bf16.msra.mxu0 %v288_v3 }
  0x1b   : > { %285 = vmatmul.msk.bf16.vlgmr.msra.gmra.mxu0 %vm196_vm0, %v162_v4 }
  0x98   : > { %v209_v6 = vpop.f32.mrf.mxu0 }
  0x99   : > { %v210_v7 = vadd.f32 %v209_v6, %v171_v5 }
  0x9b   : > { %v213_v9 = vpack.c.bf16 %v210_v7, %v210_v7 }
  0x9d   : > { %v218_v10 = vsel %vm216_vm3, %v213_v9, %v217_v8 }
  0x9e   : > { %219 = vst [vmem:[%s160_s29] sm:$0x1] %v218_v10 }
  0xa0   : > { %v211_v11 = vpop.f32.mrf.mxu0 }
  0xa1 PF: > { %s13_s12 = sadd.s32 1, %s306_s12  }
  0xa2   : > { %p10_p4 = scmp.ge.s32.totalorder %s13_s12, 4  }
  0xa4   :  { %12 = sbr.rel (!%p10_p4) target bundleno = 1 (0x1), region = 62 }

// kernel: hrnet_forward.88
= control target key start
LH: loop header
LB: loop body
LE: loop exit
PB: predicated region body
PF: predicated region fallthrough
CT: control target
= control target key end

     0   :  { %s906_s12 = smov 0   ;;  %s1070_s0 = inlined_call_operand.vmem [shape: bf16[2,11,64], index: 0, kind: input, shape index: {}]   ;;  %s1071_s1 = inlined_call_operand.vmem [shape: bf16[576,64], index: 1, kind: input, shape index: {}]   ;;  %s1072_s2 = inlined_call_operand.vmem [shape: f32[1,64], index: 2, kind: input, shape index: {}]   ;;  %s1073_s3 = inlined_call_operand.vmem [shape: bf16[2,3,64], index: 3, kind: output, shape index: {}]  }
   0x1 LB: > { %s670_s13 = sadd.s32 4294967295, %s883_s12   ;;  %p674_p0 = scmp.ge.s32.totalorder %s883_s12, 1  ;;  %s883_s12 = sphi %s906_s12, %s13_s12  }
   0x2   : > { %p137_p1 = scmp.lt.s32.totalorder %s883_s12, 3 }
   0x4   : > { %p138_p2 = pnand %p674_p0, %p137_p1 }
   0x5   : > { %p160_p3 = scmp.lt.s32.totalorder (!%p138_p2), %s670_s13, 1  ;;  %s885_s29 = smov (!%p138_p2), 64  }
   0x6   : > { %141 = sbr.rel (%p138_p2) target bundleno = 294 (0x126), region = 32 }
   0xb   : > { %v862_v0 = vld [vmem:[%s1071_s1 + $0xf8] sm:$0xff]  ;;  %s1075_s13 = smov (!%p160_p3, %s670_s13), 1  ;;  %v861_v3 = vld [vmem:[%s1071_s1 + $0xf0] sm:$0xff]  ;;  %v860_v8 = vld [vmem:[%s1071_s1 + $0xe8] sm:$0xff]  ;;  %vm232_vm0 = vcmask 523264   ;;  %vm611_vm1 = vcmask 517120  }
   0xc   : > { %v838_v1 = vld [vmem:[%s1071_s1 + $0x38] sm:$0xff]  ;;  %583 = vmatpush.bf16.msra.mxu3 %v862_v0  ;;  %v837_v4 = vld [vmem:[%s1071_s1 + $0x30] sm:$0xff]  ;;  %s829_s28 = sshll.u32 %s1075_s13, 3  ;;  %v836_v9 = vld [vmem:[%s1071_s1 + $0x28] sm:$0xff]  ;;  %s677_s20 = sshll.u32 %s1075_s13, 1 }
   0xd   : > { %v846_v2 = vld [vmem:[%s1071_s1 + $0x78] sm:$0xff]  ;;  %544 = vmatpush.bf16.msra.mxu0 %v838_v1  ;;  %v845_v6 = vld [vmem:[%s1071_s1 + $0x70] sm:$0xff]  ;;  %s944_s6 = scalar_lea.vmem %s1070_s0, %s829_s28  ;;  %v844_v17 = vld [vmem:[%s1071_s1 + $0x68] sm:$0xff]  ;;  %s168_s22 = scalar_lea.vmem %s1073_s3, %s677_s20  ;;  %vm612_vm2 = vsmask.f32 1280 }
   0xe   : > { %v854_v5 = vld [vmem:[%s1071_s1 + $0xb8] sm:$0xff]  ;;  %557 = vmatpush.bf16.msra.mxu1 %v846_v2  ;;  %v853_v7 = vld [vmem:[%s1071_s1 + $0xb0] sm:$0xff]  ;;  %v680_v10 = vld [vmem:[%s944_s6] sm:$0x8] }
   0xf   : > { %570 = vmatpush.bf16.msra.mxu2 %v854_v5  ;;  %v830_v11 = vld [vmem:[%s944_s6] sm:$0x10]  ;;  %v955_v12 = vld [vmem:[%s944_s6] sm:$0x3]  ;;  %v172_v16 = vld [vmem:[%s944_s6] sm:$0xc] }
  0x10   : > { %584 = vmatpush.bf16.msra.mxu3 %v861_v3  ;;  %v957_v13 = vor.u32 %v830_v11, %v680_v10  ;;  %v177_v14 = vunpack.c.l.b16 %v955_v12  ;;  %v171_v15 = vld [vmem:[%s944_s6] sm:$0x6]  ;;  %v203_v19 = vunpack.c.l.b16 %v172_v16  ;;  %v852_v20 = vld [vmem:[%s1071_s1 + $0xa8] sm:$0xff]  ;;  %v858_v40 = vld [vmem:[%s1071_s1 + $0xd8] sm:$0xff] }
  0x11   : > { %545 = vmatpush.bf16.msra.mxu0 %v837_v4  ;;  %v189_v18 = vunpack.c.l.b16 %v171_v15  ;;  %v859_v26 = vld [vmem:[%s1071_s1 + $0xe0] sm:$0xff]  ;;  %v834_v41 = vld [vmem:[%s1071_s1 + $0x18] sm:$0xff]  ;;  %v857_v49 = vld [vmem:[%s1071_s1 + $0xd0] sm:$0xff] }
  0x12   : > { %558 = vmatpush.bf16.msra.mxu1 %v845_v6  ;;  %v223_v21 = vshrl.u32 %v957_v13, 16  ;;  %v226_v22 = vshll.u32 %v957_v13, 16  ;;  %v178_v23 = vpack.c.b16 %v177_v14, %v177_v14  ;;  %v972_v25 = vpack.c.b16 %v203_v19, %v203_v19  ;;  %v835_v27 = vld [vmem:[%s1071_s1 + $0x20] sm:$0xff]  ;;  %v842_v45 = vld [vmem:[%s1071_s1 + $0x58] sm:$0xff]  ;;  %v833_v50 = vld [vmem:[%s1071_s1 + $0x10] sm:$0xff] }
  0x13   : > { %571 = vmatpush.bf16.msra.mxu2 %v853_v7  ;;  %v970_v24 = vpack.c.b16 %v189_v18, %v189_v18  ;;  %v843_v32 = vld [vmem:[%s1071_s1 + $0x60] sm:$0xff]  ;;  %v850_v46 = vld [vmem:[%s1071_s1 + $0x98] sm:$0xff]  ;;  %v841_v52 = vld [vmem:[%s1071_s1 + $0x50] sm:$0xff]  ;;  %v221_v3 = vrot.slane %v957_v13, 3 }
  0x14   : > { %585 = vmatpush.bf16.msra.mxu3 %v860_v8  ;;  %v225_v28 = vrot.slane %v223_v21, 3  ;;  %v228_v29 = vrot.slane %v226_v22, 4  ;;  %v180_v30 = vshrl.u32 %v178_v23, 16  ;;  %v182_v31 = vshll.u32 %v178_v23, 16  ;;  %v851_v35 = vld [vmem:[%s1071_s1 + $0xa0] sm:$0xff]  ;;  %v856_v54 = vld [vmem:[%s1071_s1 + $0xc8] sm:$0xff]  ;;  %vm613_vm3 = vmand %vm611_vm1, %vm612_vm2 }
  0x15   : > { %546 = vmatpush.bf16.msra.mxu0 %v836_v9  ;;  %v193_v33 = vshrl.u32 %v970_v24, 16  ;;  %v196_v34 = vshll.u32 %v970_v24, 16  ;;  %v207_v38 = vshrl.u32 %v972_v25, 16  ;;  %v210_v39 = vshll.u32 %v972_v25, 16  ;;  %v832_v55 = vld [vmem:[%s1071_s1 + $0x8] sm:$0xff]  ;;  %v855_v56 = vld [vmem:[%s1071_s1 + $0xc0] sm:$0xff] }
  0x16   : > { %559 = vmatpush.bf16.msra.mxu1 %v844_v17  ;;  %v229_v36 = vor.u32 %v228_v29, %v225_v28  ;;  %v184_v37 = vrot.slane %v182_v31, 1  ;;  %v831_v57 = vld [vmem:[%s1071_s1] sm:$0xff]  ;;  %v849_v58 = vld [vmem:[%s1071_s1 + $0x90] sm:$0xff]  ;;  %v840_v59 = vld [vmem:[%s1071_s1 + $0x48] sm:$0xff]  ;;  %v191_v8 = vrot.slane %v970_v24, 1  ;;  %v205_v9 = vrot.slane %v972_v25, 2 }
  0x17   : > { %572 = vmatpush.bf16.msra.mxu2 %v852_v20  ;;  %v195_v43 = vrot.slane %v193_v33, 1  ;;  %v198_v44 = vrot.slane %v196_v34, 2  ;;  %v209_v47 = vrot.slane %v207_v38, 2  ;;  %v212_v48 = vrot.slane %v210_v39, 3  ;;  %v848_v60 = vld [vmem:[%s1071_s1 + $0x88] sm:$0xff]  ;;  %v866_v61 = vld [vmem:[%s1071_s1 + $0x118] sm:$0xff] }
  0x18   : > { %586 = vmatpush.bf16.msra.mxu3 %v859_v26  ;;  %230 = vrot.lane.b32.xlu1 %v229_v36, %s885_s29  ;;  %v185_v42 = vor.u32 %v184_v37, %v180_v30  ;;  %v839_v62 = vld [vmem:[%s1071_s1 + $0x40] sm:$0xff]  ;;  %v865_v0 = vld [vmem:[%s1071_s1 + $0x110] sm:$0xff]  ;;  %v864_v1 = vld [vmem:[%s1071_s1 + $0x108] sm:$0xff] }
  0x19   : > { %547 = vmatpush.bf16.msra.mxu0 %v835_v27  ;;  %v199_v51 = vor.u32 %v198_v44, %v195_v43  ;;  %v213_v53 = vor.u32 %v212_v48, %v209_v47  ;;  %v847_v63 = vld [vmem:[%s1071_s1 + $0x80] sm:$0xff] }
  0x1a   : > { %560 = vmatpush.bf16.msra.mxu1 %v843_v32  ;;  %186 = vrot.lane.b32.xlu0 %v185_v42, %s885_s29  ;;  %v863_v2 = vld [vmem:[%s1071_s1 + $0x100] sm:$0xff] }
  0x1b   : > { %573 = vmatpush.bf16.msra.mxu2 %v851_v35  ;;  %v175_v15 = vld [vmem:[%s944_s6 + $0x4] sm:$0x3]  ;;  %v876_v18 = vld [vmem:[%s1072_s2] ss:$0 sm:$0xff] }
  0x1c   : > { %587 = vmatpush.bf16.msra.mxu3 %v858_v40  ;;  %v614_v30 = vld [vmem:[%s168_s22] sm:$0x3] }
  0x1d   : > { %548 = vmatpush.bf16.msra.mxu0 %v834_v41 }
  0x1e   : > { %561 = vmatpush.bf16.msra.mxu1 %v842_v45 }
  0x1f   : > { %574 = vmatpush.bf16.msra.mxu2 %v850_v46 }
  0x20   : > { %588 = vmatpush.bf16.msra.mxu3 %v857_v49  ;;  %200 = vrot.lane.b32.xlu1 %v199_v51, %s885_s29 }
  0x21   : > { %549 = vmatpush.bf16.msra.mxu0 %v833_v50 }
  0x22   : > { %562 = vmatpush.bf16.msra.mxu1 %v841_v52  ;;  %214 = vrot.lane.b32.xlu0 %v213_v53, %s885_s29 }
  0x23   : > { %575 = vmatpush.bf16.msra.mxu2 %v849_v58 }
  0x24   : > { %589 = vmatpush.bf16.msra.mxu3 %v856_v54 }
  0x25   : > { %550 = vmatpush.bf16.msra.mxu0 %v832_v55 }
  0x26   : > { %563 = vmatpush.bf16.msra.mxu1 %v840_v59 }
  0x27   : > { %576 = vmatpush.bf16.msra.mxu2 %v848_v60 }
  0x28   : > { %590 = vmatpush.bf16.msra.mxu3 %v855_v56 }
  0x29   : > { %551 = vmatpush.bf16.msra.mxu0 %v831_v57 }
  0x2a   : > { %564 = vmatpush.bf16.msra.mxu1 %v839_v62 }
  0x2b   : > { %577 = vmatpush.bf16.msra.mxu2 %v847_v63 }
  0x2d   : > { %600 = vmatpush.bf16.msrb.mxu0 %v866_v61 }
  0x31   : > { %601 = vmatpush.bf16.msrb.mxu0 %v865_v0 }
  0x35   : > { %602 = vmatpush.bf16.msrb.mxu0 %v864_v1 }
  0x39   : > { %603 = vmatpush.bf16.msrb.mxu0 %v863_v2 }
  0x8a   : > { %v231_v4 = vpop.permute.xlu1 %230 }
  0x8b   : > { %v247_v5 = vsel %vm232_vm0, %v221_v3, %v231_v4 }
  0x8c   : > { %591 = vmatmul.bf16.vlgmr.msra.gmra.mxu3 %v247_v5  ;;  %v187_v6 = vpop.permute.xlu0 %186 }
  0x8d   : > { %v235_v7 = vsel %vm232_vm0, %v955_v12, %v187_v6 }
  0x8e   : > { %552 = vmatmul.bf16.vlgmr.msra.gmra.mxu0 %v235_v7 }
  0x92   : > { %v201_v10 = vpop.permute.xlu1 %200 }
  0x93   : > { %v239_v11 = vsel %vm232_vm0, %v191_v8, %v201_v10 }
  0x94   : > { %565 = vmatmul.bf16.vlgmr.msra.gmra.mxu1 %v239_v11  ;;  %v215_v13 = vpop.permute.xlu0 %214 }
  0x95   : > { %v243_v14 = vsel %vm232_vm0, %v205_v9, %v215_v13 }
  0x96   : > { %578 = vmatmul.bf16.vlgmr.msra.gmra.mxu2 %v243_v14 }
  0x9e   : > { %826 = vmatmul.msk.bf16.vlgmr.msrb.gmra.mxu0 %vm232_vm0, %v175_v15 }
 0x10b   : > { %v553_v16 = vpop.f32.mrf.mxu0 }
 0x10c   : > { %v554_v20 = vadd.f32 %v876_v18, %v553_v16 }
 0x10f   : > { %v592_v17 = vpop.f32.mrf.mxu3 }
 0x111   : > { %v566_v12 = vpop.f32.mrf.mxu1 }
 0x112   : > { %v567_v22 = vadd.f32 %v566_v12, %v554_v20 }
 0x113   : > { %v555_v19 = vpop.f32.mrf.mxu0 }
 0x117   : > { %v594_v21 = vpop.f32.mrf.mxu3 }
 0x119   : > { %v568_v23 = vpop.f32.mrf.mxu1  ;;  %v579_v24 = vpop.f32.mrf.mxu2 }
 0x11a   : > { %v580_v25 = vadd.f32 %v579_v24, %v567_v22 }
 0x11b   : > { %v605_v26 = vpop.f32.mrf.mxu0 }
 0x11c   : > { %v593_v27 = vadd.f32 %v592_v17, %v580_v25 }
 0x11e   : > { %v606_v28 = vadd.f32 %v605_v26, %v593_v27 }
 0x120   : > { %v609_v29 = vmax.f32 %v606_v28, 0.0 }
 0x121   : > { %v581_v31 = vpop.f32.mrf.mxu2 }
 0x122   : > { %v610_v32 = vpack.c.bf16 %v609_v29, %v609_v29 }
 0x123   : > { %v607_v33 = vpop.f32.mrf.mxu0 }
 0x124   : > { %v615_v34 = vsel %vm613_vm3, %v610_v32, %v614_v30 }
 0x125   : > { %616 = vst [vmem:[%s168_s22] sm:$0x3] %v615_v34 }
 0x126 PF: > { %s13_s12 = sadd.s32 1, %s883_s12  }
 0x127   : > { %p10_p4 = scmp.ge.s32.totalorder %s13_s12, 4  }
 0x129   :  { %12 = sbr.rel (!%p10_p4) target bundleno = 1 (0x1), region = 62 }

// kernel: hrnet_forward.89
= control target key start
LH: loop header
LB: loop body
LE: loop exit
PB: predicated region body
PF: predicated region fallthrough
CT: control target
= control target key end

     0   :  { %s971_s15 = smov 0   ;;  %s1138_s0 = inlined_call_operand.vmem [shape: bf16[2,11,64], index: 0, kind: input, shape index: {}]   ;;  %s1139_s1 = inlined_call_operand.vmem [shape: bf16[576,64], index: 1, kind: input, shape index: {}]   ;;  %s1140_s2 = inlined_call_operand.vmem [shape: f32[1,64], index: 2, kind: input, shape index: {}]   ;;  %s1141_s3 = inlined_call_operand.vmem [shape: bf16[2,3,64], index: 3, kind: input, shape index: {}]   ;;  %s1142_s4 = inlined_call_operand.vmem [shape: bf16[2,3,64], index: 4, kind: output, shape index: {}]  }
   0x1 LB: > { %s729_s16 = sadd.s32 4294967295, %s943_s15   ;;  %p733_p0 = scmp.ge.s32.totalorder %s943_s15, 1  ;;  %s943_s15 = sphi %s971_s15, %s14_s15  }
   0x2   : > { %p171_p1 = scmp.lt.s32.totalorder %s943_s15, 3 }
   0x4   : > { %p172_p2 = pnand %p733_p0, %p171_p1 }
   0x5   : > { %p200_p3 = scmp.lt.s32.totalorder (!%p172_p2), %s729_s16, 1  ;;  %s945_s7 = smov (!%p172_p2), 64  }
   0x6   : > { %175 = sbr.rel (%p172_p2) target bundleno = 296 (0x128), region = 36 }
   0xb   : > { %v922_v0 = vld [vmem:[%s1139_s1 + $0xf8] sm:$0xff]  ;;  %s1144_s16 = smov (!%p200_p3, %s729_s16), 1  ;;  %v921_v3 = vld [vmem:[%s1139_s1 + $0xf0] sm:$0xff]  ;;  %v920_v8 = vld [vmem:[%s1139_s1 + $0xe8] sm:$0xff]  ;;  %vm276_vm0 = vcmask 523264   ;;  %vm658_vm1 = vcmask 517120  }
   0xc   : > { %v898_v1 = vld [vmem:[%s1139_s1 + $0x38] sm:$0xff]  ;;  %627 = vmatpush.bf16.msra.mxu3 %v922_v0  ;;  %v897_v4 = vld [vmem:[%s1139_s1 + $0x30] sm:$0xff]  ;;  %s889_s5 = sshll.u32 %s1144_s16, 3  ;;  %v896_v9 = vld [vmem:[%s1139_s1 + $0x28] sm:$0xff]  ;;  %s736_s26 = sshll.u32 %s1144_s16, 1 }
   0xd   : > { %v906_v2 = vld [vmem:[%s1139_s1 + $0x78] sm:$0xff]  ;;  %588 = vmatpush.bf16.msra.mxu0 %v898_v1  ;;  %v905_v6 = vld [vmem:[%s1139_s1 + $0x70] sm:$0xff]  ;;  %s1009_s10 = scalar_lea.vmem %s1138_s0, %s889_s5  ;;  %v904_v17 = vld [vmem:[%s1139_s1 + $0x68] sm:$0xff]  ;;  %s208_s29 = scalar_lea.vmem %s1141_s3, %s736_s26  ;;  %vm659_vm2 = vsmask.f32 1280 }
   0xe   : > { %v914_v5 = vld [vmem:[%s1139_s1 + $0xb8] sm:$0xff]  ;;  %601 = vmatpush.bf16.msra.mxu1 %v906_v2  ;;  %v913_v7 = vld [vmem:[%s1139_s1 + $0xb0] sm:$0xff]  ;;  %v740_v10 = vld [vmem:[%s1009_s10] sm:$0x8]  ;;  %s212_s5 = scalar_lea.vmem %s1142_s4, %s736_s26 }
   0xf   : > { %614 = vmatpush.bf16.msra.mxu2 %v914_v5  ;;  %v890_v11 = vld [vmem:[%s1009_s10] sm:$0x10]  ;;  %v1020_v12 = vld [vmem:[%s1009_s10] sm:$0x3]  ;;  %v216_v16 = vld [vmem:[%s1009_s10] sm:$0xc] }
  0x10   : > { %628 = vmatpush.bf16.msra.mxu3 %v921_v3  ;;  %v1022_v13 = vor.u32 %v890_v11, %v740_v10  ;;  %v221_v14 = vunpack.c.l.b16 %v1020_v12  ;;  %v215_v15 = vld [vmem:[%s1009_s10] sm:$0x6]  ;;  %v247_v19 = vunpack.c.l.b16 %v216_v16  ;;  %v912_v20 = vld [vmem:[%s1139_s1 + $0xa8] sm:$0xff]  ;;  %v918_v40 = vld [vmem:[%s1139_s1 + $0xd8] sm:$0xff] }
  0x11   : > { %589 = vmatpush.bf16.msra.mxu0 %v897_v4  ;;  %v233_v18 = vunpack.c.l.b16 %v215_v15  ;;  %v919_v26 = vld [vmem:[%s1139_s1 + $0xe0] sm:$0xff]  ;;  %v894_v41 = vld [vmem:[%s1139_s1 + $0x18] sm:$0xff]  ;;  %v917_v49 = vld [vmem:[%s1139_s1 + $0xd0] sm:$0xff] }
  0x12   : > { %602 = vmatpush.bf16.msra.mxu1 %v905_v6  ;;  %v267_v21 = vshrl.u32 %v1022_v13, 16  ;;  %v270_v22 = vshll.u32 %v1022_v13, 16  ;;  %v222_v23 = vpack.c.b16 %v221_v14, %v221_v14  ;;  %v1037_v25 = vpack.c.b16 %v247_v19, %v247_v19  ;;  %v895_v27 = vld [vmem:[%s1139_s1 + $0x20] sm:$0xff]  ;;  %v902_v45 = vld [vmem:[%s1139_s1 + $0x58] sm:$0xff]  ;;  %v893_v50 = vld [vmem:[%s1139_s1 + $0x10] sm:$0xff] }
  0x13   : > { %615 = vmatpush.bf16.msra.mxu2 %v913_v7  ;;  %v1035_v24 = vpack.c.b16 %v233_v18, %v233_v18  ;;  %v903_v32 = vld [vmem:[%s1139_s1 + $0x60] sm:$0xff]  ;;  %v910_v46 = vld [vmem:[%s1139_s1 + $0x98] sm:$0xff]  ;;  %v901_v52 = vld [vmem:[%s1139_s1 + $0x50] sm:$0xff]  ;;  %v265_v3 = vrot.slane %v1022_v13, 3 }
  0x14   : > { %629 = vmatpush.bf16.msra.mxu3 %v920_v8  ;;  %v269_v28 = vrot.slane %v267_v21, 3  ;;  %v272_v29 = vrot.slane %v270_v22, 4  ;;  %v224_v30 = vshrl.u32 %v222_v23, 16  ;;  %v226_v31 = vshll.u32 %v222_v23, 16  ;;  %v911_v35 = vld [vmem:[%s1139_s1 + $0xa0] sm:$0xff]  ;;  %v916_v54 = vld [vmem:[%s1139_s1 + $0xc8] sm:$0xff]  ;;  %vm660_vm3 = vmand %vm658_vm1, %vm659_vm2 }
  0x15   : > { %590 = vmatpush.bf16.msra.mxu0 %v896_v9  ;;  %v237_v33 = vshrl.u32 %v1035_v24, 16  ;;  %v240_v34 = vshll.u32 %v1035_v24, 16  ;;  %v251_v38 = vshrl.u32 %v1037_v25, 16  ;;  %v254_v39 = vshll.u32 %v1037_v25, 16  ;;  %v892_v55 = vld [vmem:[%s1139_s1 + $0x8] sm:$0xff]  ;;  %v915_v56 = vld [vmem:[%s1139_s1 + $0xc0] sm:$0xff] }
  0x16   : > { %603 = vmatpush.bf16.msra.mxu1 %v904_v17  ;;  %v273_v36 = vor.u32 %v272_v29, %v269_v28  ;;  %v228_v37 = vrot.slane %v226_v31, 1  ;;  %v891_v57 = vld [vmem:[%s1139_s1] sm:$0xff]  ;;  %v909_v58 = vld [vmem:[%s1139_s1 + $0x90] sm:$0xff]  ;;  %v900_v59 = vld [vmem:[%s1139_s1 + $0x48] sm:$0xff]  ;;  %v235_v8 = vrot.slane %v1035_v24, 1  ;;  %v249_v9 = vrot.slane %v1037_v25, 2 }
  0x17   : > { %616 = vmatpush.bf16.msra.mxu2 %v912_v20  ;;  %v239_v43 = vrot.slane %v237_v33, 1  ;;  %v242_v44 = vrot.slane %v240_v34, 2  ;;  %v253_v47 = vrot.slane %v251_v38, 2  ;;  %v256_v48 = vrot.slane %v254_v39, 3  ;;  %v908_v60 = vld [vmem:[%s1139_s1 + $0x88] sm:$0xff]  ;;  %v926_v61 = vld [vmem:[%s1139_s1 + $0x118] sm:$0xff] }
  0x18   : > { %630 = vmatpush.bf16.msra.mxu3 %v919_v26  ;;  %274 = vrot.lane.b32.xlu1 %v273_v36, %s945_s7  ;;  %v229_v42 = vor.u32 %v228_v37, %v224_v30  ;;  %v899_v62 = vld [vmem:[%s1139_s1 + $0x40] sm:$0xff]  ;;  %v925_v0 = vld [vmem:[%s1139_s1 + $0x110] sm:$0xff]  ;;  %v924_v1 = vld [vmem:[%s1139_s1 + $0x108] sm:$0xff] }
  0x19   : > { %591 = vmatpush.bf16.msra.mxu0 %v895_v27  ;;  %v243_v51 = vor.u32 %v242_v44, %v239_v43  ;;  %v257_v53 = vor.u32 %v256_v48, %v253_v47  ;;  %v907_v63 = vld [vmem:[%s1139_s1 + $0x80] sm:$0xff] }
  0x1a   : > { %604 = vmatpush.bf16.msra.mxu1 %v903_v32  ;;  %230 = vrot.lane.b32.xlu0 %v229_v42, %s945_s7  ;;  %v923_v2 = vld [vmem:[%s1139_s1 + $0x100] sm:$0xff] }
  0x1b   : > { %617 = vmatpush.bf16.msra.mxu2 %v911_v35  ;;  %v219_v15 = vld [vmem:[%s1009_s10 + $0x4] sm:$0x3]  ;;  %v936_v18 = vld [vmem:[%s1140_s2] ss:$0 sm:$0xff] }
  0x1c   : > { %631 = vmatpush.bf16.msra.mxu3 %v918_v40  ;;  %v653_v25 = vld [vmem:[%s208_s29] sm:$0x3] }
  0x1d   : > { %592 = vmatpush.bf16.msra.mxu0 %v894_v41  ;;  %v654_v29 = vunpack.c.l.bf16 %v653_v25  ;;  %v661_v34 = vld [vmem:[%s212_s5] sm:$0x3] }
  0x1e   : > { %605 = vmatpush.bf16.msra.mxu1 %v902_v45 }
  0x1f   : > { %618 = vmatpush.bf16.msra.mxu2 %v910_v46 }
  0x20   : > { %632 = vmatpush.bf16.msra.mxu3 %v917_v49  ;;  %244 = vrot.lane.b32.xlu1 %v243_v51, %s945_s7 }
  0x21   : > { %593 = vmatpush.bf16.msra.mxu0 %v893_v50 }
  0x22   : > { %606 = vmatpush.bf16.msra.mxu1 %v901_v52  ;;  %258 = vrot.lane.b32.xlu0 %v257_v53, %s945_s7 }
  0x23   : > { %619 = vmatpush.bf16.msra.mxu2 %v909_v58 }
  0x24   : > { %633 = vmatpush.bf16.msra.mxu3 %v916_v54 }
  0x25   : > { %594 = vmatpush.bf16.msra.mxu0 %v892_v55 }
  0x26   : > { %607 = vmatpush.bf16.msra.mxu1 %v900_v59 }
  0x27   : > { %620 = vmatpush.bf16.msra.mxu2 %v908_v60 }
  0x28   : > { %634 = vmatpush.bf16.msra.mxu3 %v915_v56 }
  0x29   : > { %595 = vmatpush.bf16.msra.mxu0 %v891_v57 }
  0x2a   : > { %608 = vmatpush.bf16.msra.mxu1 %v899_v62 }
  0x2b   : > { %621 = vmatpush.bf16.msra.mxu2 %v907_v63 }
  0x2d   : > { %644 = vmatpush.bf16.msrb.mxu0 %v926_v61 }
  0x31   : > { %645 = vmatpush.bf16.msrb.mxu0 %v925_v0 }
  0x35   : > { %646 = vmatpush.bf16.msrb.mxu0 %v924_v1 }
  0x39   : > { %647 = vmatpush.bf16.msrb.mxu0 %v923_v2 }
  0x8a   : > { %v275_v4 = vpop.permute.xlu1 %274 }
  0x8b   : > { %v291_v5 = vsel %vm276_vm0, %v265_v3, %v275_v4 }
  0x8c   : > { %635 = vmatmul.bf16.vlgmr.msra.gmra.mxu3 %v291_v5  ;;  %v231_v6 = vpop.permute.xlu0 %230 }
  0x8d   : > { %v279_v7 = vsel %vm276_vm0, %v1020_v12, %v231_v6 }
  0x8e   : > { %596 = vmatmul.bf16.vlgmr.msra.gmra.mxu0 %v279_v7 }
  0x92   : > { %v245_v10 = vpop.permute.xlu1 %244 }
  0x93   : > { %v283_v11 = vsel %vm276_vm0, %v235_v8, %v245_v10 }
  0x94   : > { %609 = vmatmul.bf16.vlgmr.msra.gmra.mxu1 %v283_v11  ;;  %v259_v13 = vpop.permute.xlu0 %258 }
  0x95   : > { %v287_v14 = vsel %vm276_vm0, %v249_v9, %v259_v13 }
  0x96   : > { %622 = vmatmul.bf16.vlgmr.msra.gmra.mxu2 %v287_v14 }
  0x9e   : > { %886 = vmatmul.msk.bf16.vlgmr.msrb.gmra.mxu0 %vm276_vm0, %v219_v15 }
 0x10b   : > { %v597_v16 = vpop.f32.mrf.mxu0 }
 0x10c   : > { %v598_v20 = vadd.f32 %v936_v18, %v597_v16 }
 0x10f   : > { %v636_v17 = vpop.f32.mrf.mxu3 }
 0x111   : > { %v610_v12 = vpop.f32.mrf.mxu1 }
 0x112   : > { %v611_v22 = vadd.f32 %v610_v12, %v598_v20 }
 0x113   : > { %v599_v19 = vpop.f32.mrf.mxu0 }
 0x117   : > { %v638_v21 = vpop.f32.mrf.mxu3 }
 0x119   : > { %v612_v23 = vpop.f32.mrf.mxu1  ;;  %v623_v24 = vpop.f32.mrf.mxu2 }
 0x11a   : > { %v624_v26 = vadd.f32 %v623_v24, %v611_v22 }
 0x11b   : > { %v649_v27 = vpop.f32.mrf.mxu0 }
 0x11c   : > { %v637_v28 = vadd.f32 %v636_v17, %v624_v26 }
 0x11e   : > { %v650_v30 = vadd.f32 %v649_v27, %v637_v28 }
 0x120   : > { %v655_v31 = vadd.f32 %v654_v29, %v650_v30 }
 0x121   : > { %v625_v32 = vpop.f32.mrf.mxu2 }
 0x122   : > { %v656_v33 = vmax.f32 %v655_v31, 0.0 }
 0x123   : > { %v651_v35 = vpop.f32.mrf.mxu0 }
 0x124   : > { %v657_v36 = vpack.c.bf16 %v656_v33, %v656_v33 }
 0x126   : > { %v662_v37 = vsel %vm660_vm3, %v657_v36, %v661_v34 }
 0x127   : > { %663 = vst [vmem:[%s212_s5] sm:$0x3] %v662_v37 }
 0x128 PF: > { %s14_s15 = sadd.s32 1, %s943_s15  }
 0x129   : > { %p11_p4 = scmp.ge.s32.totalorder %s14_s15, 4  }
 0x12b   :  { %13 = sbr.rel (!%p11_p4) target bundleno = 1 (0x1), region = 69 }

// kernel: hrnet_forward.101
= control target key start
LH: loop header
LB: loop body
LE: loop exit
PB: predicated region body
PF: predicated region fallthrough
CT: control target
= control target key end

     0   :  { %vm60_vm0 = vcmask 1043456   ;;  %vm56_vm1 = vcmask 588800   ;;  %vm79_vm2 = vcmask 60416   ;;  %s151_s1 = inlined_call_operand.vmem [shape: bf16[72,8], index: 1, kind: input, shape index: {}]   ;;  %s152_s2 = inlined_call_operand.vmem [shape: f32[1,8], index: 2, kind: input, shape index: {}]   ;;  %s153_s0 = inlined_call_operand.vmem [shape: bf16[8,72], index: 0, kind: input, shape index: {}]   ;;  %s154_s3 = inlined_call_operand.vmem [shape: bf16[8,8], index: 3, kind: output, shape index: {}]  }
   0x1   :  { %v24_v0 = vld [vmem:[%s151_s1 + $0x20] sm:$0xf]  ;;  %v105_v4 = vld [vmem:[%s151_s1 + $0x18] sm:$0xff]  ;;  %v104_v5 = vld [vmem:[%s151_s1 + $0x10] sm:$0xff] }
   0x2   :  { %v46_v1 = vunpack.c.l.b16 %v24_v0  ;;  %v103_v6 = vld [vmem:[%s151_s1 + $0x8] sm:$0xff]  ;;  %v102_v7 = vld [vmem:[%s151_s1] sm:$0xff] }
   0x3   :  { %v15_v8 = vld [vmem:[%s153_s0] sm:$0xf] }
   0x4   :  { %v51_v2 = vpack.c.b16 %v46_v1, %v46_v1  ;;  %v106_v9 = vld [vmem:[%s152_s2] ss:$0 sm:$0xff] }
   0x6   :  { %v62_v3 = vsel %vm60_vm0, %v51_v2, 0 }
   0x7   :  { %67 = vmatpush.bf16.msra.mxu0 %v62_v3 }
   0xb   :  { %68 = vmatpush.bf16.msra.mxu0 %v105_v4 }
   0xf   :  { %69 = vmatpush.bf16.msra.mxu0 %v104_v5 }
  0x13   :  { %70 = vmatpush.bf16.msra.mxu0 %v103_v6 }
  0x17   :  { %71 = vmatpush.bf16.msra.mxu0 %v102_v7 }
  0x1a   :  { %101 = vmatmul.msk.bf16.vlgmr.msra.gmra.mxu0 %vm56_vm1, %v15_v8 }
  0x97   :  { %v73_v10 = vpop.f32.mrf.mxu0 }
  0x98   :  { %v74_v11 = vadd.f32 %v106_v9, %v73_v10 }
  0x9a   :  { %v77_v12 = vmax.f32 %v74_v11, 0.0 }
  0x9c   :  { %v78_v13 = vpack.c.bf16 %v77_v12, %v77_v12 }
  0x9e   :  { %80 = vst.msk [vmem:[%s154_s3] sm:$0xf] %vm79_vm2, %v78_v13 }
  0x9f   :  { %v75_v14 = vpop.f32.mrf.mxu0 }

// kernel: hrnet_forward.102
= control target key start
LH: loop header
LB: loop body
LE: loop exit
PB: predicated region body
PF: predicated region fallthrough
CT: control target
= control target key end

     0   :  { %vm63_vm0 = vcmask 1043456   ;;  %vm59_vm1 = vcmask 588800   ;;  %vm84_vm2 = vcmask 519168   ;;  %s164_s1 = inlined_call_operand.vmem [shape: bf16[72,64], index: 1, kind: input, shape index: {}]   ;;  %s165_s2 = inlined_call_operand.vmem [shape: f32[1,64], index: 2, kind: input, shape index: {}]   ;;  %s166_s0 = inlined_call_operand.vmem [shape: bf16[8,72], index: 0, kind: input, shape index: {}]   ;;  %s167_s3 = inlined_call_operand.vmem [shape: bf16[8,64], index: 3, kind: input, shape index: {}]   ;;  %s168_s4 = inlined_call_operand.vmem [shape: bf16[8,64], index: 4, kind: output, shape index: {}]  }
   0x1   :  { %v27_v0 = vld [vmem:[%s164_s1 + $0x20] sm:$0xf]  ;;  %v110_v4 = vld [vmem:[%s164_s1 + $0x18] sm:$0xff]  ;;  %v109_v5 = vld [vmem:[%s164_s1 + $0x10] sm:$0xff] }
   0x2   :  { %v49_v1 = vunpack.c.l.b16 %v27_v0  ;;  %v108_v6 = vld [vmem:[%s164_s1 + $0x8] sm:$0xff]  ;;  %v107_v7 = vld [vmem:[%s164_s1] sm:$0xff] }
   0x3   :  { %v18_v8 = vld [vmem:[%s166_s0] sm:$0xf] }
   0x4   :  { %v54_v2 = vpack.c.b16 %v49_v1, %v49_v1  ;;  %v80_v9 = vld [vmem:[%s167_s3] sm:$0xf] }
   0x5   :  { %v111_v10 = vld [vmem:[%s165_s2] ss:$0 sm:$0xff]  ;;  %v81_v11 = vunpack.c.l.bf16 %v80_v9 }
   0x6   :  { %v65_v3 = vsel %vm63_vm0, %v54_v2, 0 }
   0x7   :  { %70 = vmatpush.bf16.msra.mxu0 %v65_v3 }
   0xb   :  { %71 = vmatpush.bf16.msra.mxu0 %v110_v4 }
   0xf   :  { %72 = vmatpush.bf16.msra.mxu0 %v109_v5 }
  0x13   :  { %73 = vmatpush.bf16.msra.mxu0 %v108_v6 }
  0x17   :  { %74 = vmatpush.bf16.msra.mxu0 %v107_v7 }
  0x1a   :  { %106 = vmatmul.msk.bf16.vlgmr.msra.gmra.mxu0 %vm59_vm1, %v18_v8 }
  0x97   :  { %v76_v12 = vpop.f32.mrf.mxu0 }
  0x98   :  { %v77_v13 = vadd.f32 %v111_v10, %v76_v12 }
  0x9a   :  { %v82_v14 = vadd.f32 %v81_v11, %v77_v13 }
  0x9c   :  { %v83_v15 = vpack.c.bf16 %v82_v14, %v82_v14 }
  0x9e   :  { %85 = vst.msk [vmem:[%s168_s4] sm:$0xf] %vm84_vm2, %v83_v15 }
  0x9f   :  { %v78_v16 = vpop.f32.mrf.mxu0 }

// kernel: hrnet_forward.103
= control target key start
LH: loop header
LB: loop body
LE: loop exit
PB: predicated region body
PF: predicated region fallthrough
CT: control target
= control target key end

     0   :  { %vm98_vm0 = vcmask 130048   ;;  %vm130_vm1 = vcmask 125952   ;;  %s239_s1 = inlined_call_operand.vmem [shape: bf16[144,16], index: 1, kind: input, shape index: {}]   ;;  %s240_s0 = inlined_call_operand.vmem [shape: bf16[8,144], index: 0, kind: input, shape index: {}]   ;;  %s241_s2 = inlined_call_operand.vmem [shape: f32[1,16], index: 2, kind: input, shape index: {}]   ;;  %s242_s3 = inlined_call_operand.vmem [shape: bf16[8,16], index: 3, kind: output, shape index: {}]  }
   0x1   :  { %v180_v0 = vld [vmem:[%s239_s1 + $0x38] sm:$0xff]  ;;  %v179_v1 = vld [vmem:[%s239_s1 + $0x30] sm:$0xff]  ;;  %v181_v2 = vld [vmem:[%s239_s1 + $0x40] sm:$0xff] }
   0x2   :  { %102 = vmatpush.bf16.msra.mxu0 %v180_v0  ;;  %v15_v3 = vld [vmem:[%s240_s0] sm:$0xff]  ;;  %122 = vmatpush.bf16.msra.mxu1 %v181_v2  ;;  %v178_v6 = vld [vmem:[%s239_s1 + $0x28] sm:$0xff]  ;;  %v176_v8 = vld [vmem:[%s239_s1 + $0x18] sm:$0xff] }
   0x3   :  { %v40_v4 = vunpack.c.h.b16 %v15_v3  ;;  %v177_v7 = vld [vmem:[%s239_s1 + $0x20] sm:$0xff]  ;;  %v175_v9 = vld [vmem:[%s239_s1 + $0x10] sm:$0xff]  ;;  %v174_v10 = vld [vmem:[%s239_s1 + $0x8] sm:$0xff]  ;;  %v39_v11 = vunpack.c.l.b16 %v15_v3 }
   0x4   :  { %v173_v12 = vld [vmem:[%s239_s1] sm:$0xff] }
   0x5   :  { %v42_v5 = vpack.c.b16 %v40_v4, %v40_v4  ;;  %v41_v13 = vpack.c.b16 %v39_v11, %v39_v11  ;;  %v182_v16 = vld [vmem:[%s241_s2] ss:$0 sm:$0xff] }
   0x6   :  { %103 = vmatpush.bf16.msra.mxu0 %v179_v1 }
   0x7   :  { %172 = vmatmul.msk.bf16.vlgmr.msra.gmra.mxu1 %vm98_vm0, %v42_v5 }
   0xa   :  { %104 = vmatpush.bf16.msra.mxu0 %v178_v6 }
   0xe   :  { %105 = vmatpush.bf16.msra.mxu0 %v177_v7 }
  0x12   :  { %106 = vmatpush.bf16.msra.mxu0 %v176_v8 }
  0x16   :  { %107 = vmatpush.bf16.msra.mxu0 %v175_v9 }
  0x1a   :  { %108 = vmatpush.bf16.msra.mxu0 %v174_v10 }
  0x1e   :  { %109 = vmatpush.bf16.msra.mxu0 %v173_v12 }
  0x21   :  { %110 = vmatmul.bf16.vlgmr.msra.gmra.mxu0 %v41_v13 }
  0x84   :  { %v124_v14 = vpop.f32.mrf.mxu1 }
  0x8c   :  { %v126_v15 = vpop.f32.mrf.mxu1 }
  0x9e   :  { %v111_v17 = vpop.f32.mrf.mxu0 }
  0x9f   :  { %v112_v18 = vadd.f32 %v182_v16, %v111_v17 }
  0xa1   :  { %v125_v19 = vadd.f32 %v124_v14, %v112_v18 }
  0xa3   :  { %v128_v20 = vmax.f32 %v125_v19, 0.0 }
  0xa5   :  { %v129_v21 = vpack.c.bf16 %v128_v20, %v128_v20 }
  0xa6   :  { %v113_v22 = vpop.f32.mrf.mxu0 }
  0xa7   :  { %131 = vst.msk [vmem:[%s242_s3] sm:$0xf] %vm130_vm1, %v129_v21 }

// kernel: hrnet_forward.104
= control target key start
LH: loop header
LB: loop body
LE: loop exit
PB: predicated region body
PF: predicated region fallthrough
CT: control target
= control target key end

     0   :  { %vm101_vm0 = vcmask 130048   ;;  %vm135_vm1 = vcmask 519168   ;;  %s252_s1 = inlined_call_operand.vmem [shape: bf16[144,64], index: 1, kind: input, shape index: {}]   ;;  %s253_s0 = inlined_call_operand.vmem [shape: bf16[8,144], index: 0, kind: input, shape index: {}]   ;;  %s254_s2 = inlined_call_operand.vmem [shape: f32[1,64], index: 2, kind: input, shape index: {}]   ;;  %s255_s3 = inlined_call_operand.vmem [shape: bf16[8,64], index: 3, kind: input, shape index: {}]   ;;  %s256_s4 = inlined_call_operand.vmem [shape: bf16[8,64], index: 4, kind: output, shape index: {}]  }
   0x1   :  { %v185_v0 = vld [vmem:[%s252_s1 + $0x38] sm:$0xff]  ;;  %v184_v1 = vld [vmem:[%s252_s1 + $0x30] sm:$0xff]  ;;  %v186_v2 = vld [vmem:[%s252_s1 + $0x40] sm:$0xff] }
   0x2   :  { %105 = vmatpush.bf16.msra.mxu0 %v185_v0  ;;  %v18_v3 = vld [vmem:[%s253_s0] sm:$0xff]  ;;  %125 = vmatpush.bf16.msra.mxu1 %v186_v2  ;;  %v183_v6 = vld [vmem:[%s252_s1 + $0x28] sm:$0xff]  ;;  %v181_v8 = vld [vmem:[%s252_s1 + $0x18] sm:$0xff] }
   0x3   :  { %v43_v4 = vunpack.c.h.b16 %v18_v3  ;;  %v182_v7 = vld [vmem:[%s252_s1 + $0x20] sm:$0xff]  ;;  %v180_v9 = vld [vmem:[%s252_s1 + $0x10] sm:$0xff]  ;;  %v179_v10 = vld [vmem:[%s252_s1 + $0x8] sm:$0xff]  ;;  %v42_v11 = vunpack.c.l.b16 %v18_v3 }
   0x4   :  { %v178_v12 = vld [vmem:[%s252_s1] sm:$0xff] }
   0x5   :  { %v45_v5 = vpack.c.b16 %v43_v4, %v43_v4  ;;  %v44_v13 = vpack.c.b16 %v42_v11, %v42_v11  ;;  %v187_v16 = vld [vmem:[%s254_s2] ss:$0 sm:$0xff] }
   0x6   :  { %106 = vmatpush.bf16.msra.mxu0 %v184_v1  ;;  %v131_v17 = vld [vmem:[%s255_s3] sm:$0xf] }
   0x7   :  { %177 = vmatmul.msk.bf16.vlgmr.msra.gmra.mxu1 %vm101_vm0, %v45_v5  ;;  %v132_v20 = vunpack.c.l.bf16 %v131_v17 }
   0xa   :  { %107 = vmatpush.bf16.msra.mxu0 %v183_v6 }
   0xe   :  { %108 = vmatpush.bf16.msra.mxu0 %v182_v7 }
  0x12   :  { %109 = vmatpush.bf16.msra.mxu0 %v181_v8 }
  0x16   :  { %110 = vmatpush.bf16.msra.mxu0 %v180_v9 }
  0x1a   :  { %111 = vmatpush.bf16.msra.mxu0 %v179_v10 }
  0x1e   :  { %112 = vmatpush.bf16.msra.mxu0 %v178_v12 }
  0x21   :  { %113 = vmatmul.bf16.vlgmr.msra.gmra.mxu0 %v44_v13 }
  0x84   :  { %v127_v14 = vpop.f32.mrf.mxu1 }
  0x8c   :  { %v129_v15 = vpop.f32.mrf.mxu1 }
  0x9e   :  { %v114_v18 = vpop.f32.mrf.mxu0 }
  0x9f   :  { %v115_v19 = vadd.f32 %v187_v16, %v114_v18 }
  0xa1   :  { %v128_v21 = vadd.f32 %v127_v14, %v115_v19 }
  0xa3   :  { %v133_v22 = vadd.f32 %v132_v20, %v128_v21 }
  0xa5   :  { %v134_v23 = vpack.c.bf16 %v133_v22, %v133_v22 }
  0xa6   :  { %v116_v24 = vpop.f32.mrf.mxu0 }
  0xa7   :  { %136 = vst.msk [vmem:[%s256_s4] sm:$0xf] %vm135_vm1, %v134_v23 }

// kernel: hrnet_forward.96
= control target key start
LH: loop header
LB: loop body
LE: loop exit
PB: predicated region body
PF: predicated region fallthrough
CT: control target
= control target key end

     0   :  { %s328_s12 = smov 0   ;;  %s360_s0 = inlined_call_operand.vmem [shape: bf16[2,1,64], index: 0, kind: input, shape index: {}]   ;;  %s361_s1 = inlined_call_operand.vmem [shape: bf16[64,32], index: 1, kind: input, shape index: {}]   ;;  %s362_s2 = inlined_call_operand.vmem [shape: f32[1,32], index: 2, kind: input, shape index: {}]   ;;  %s363_s3 = inlined_call_operand.vmem [shape: bf16[2,1,32], index: 3, kind: output, shape index: {}]  }
   0x1 LB: > { %s264_s13 = sadd.s32 4294967295, %s306_s12   ;;  %p268_p0 = scmp.ge.s32.totalorder %s306_s12, 1  ;;  %s306_s12 = sphi %s328_s12, %s13_s12  }
   0x2   : > { %p135_p1 = scmp.lt.s32.totalorder %s306_s12, 3 }
   0x4   : > { %p136_p2 = pnand %p268_p0, %p135_p1 }
   0x5   : > { %p155_p3 = scmp.lt.s32.totalorder (!%p136_p2), %s264_s13, 1 }
   0x6   : > { %139 = sbr.rel (%p136_p2) target bundleno = 161 (0xa1), region = 32 }
   0xb   : > { %v291_v0 = vld [vmem:[%s361_s1 + $0x18] sm:$0xff]  ;;  %v290_v1 = vld [vmem:[%s361_s1 + $0x10] sm:$0xff]  ;;  %v289_v2 = vld [vmem:[%s361_s1 + $0x8] sm:$0xff]  ;;  %s365_s13 = smov (!%p155_p3, %s264_s13), 1  ;;  %vm196_vm0 = vcmask 523264   ;;  %vm214_vm1 = vcmask 253952  }
   0xc   : > { %204 = vmatpush.bf16.msra.mxu0 %v291_v0  ;;  %v288_v3 = vld [vmem:[%s361_s1] sm:$0xff]  ;;  %s157_s24 = scalar_lea.vmem %s360_s0, %s365_s13  ;;  %s160_s29 = scalar_lea.vmem %s363_s3, %s365_s13  ;;  %vm215_vm2 = vsmask.f32 256 }
   0xd   : > { %v162_v4 = vld [vmem:[%s157_s24] sm:$0x1]  ;;  %vm216_vm3 = vmand %vm214_vm1, %vm215_vm2 }
   0xe   : > { %v171_v5 = vld [vmem:[%s362_s2] sm:$0x1] }
   0xf   : > { %v217_v8 = vld [vmem:[%s160_s29] sm:$0x1] }
  0x10   : > { %205 = vmatpush.bf16.msra.mxu0 %v290_v1 }
  0x14   : > { %206 = vmatpush.bf16.msra.mxu0 %v289_v2 }
  0x18   : > { %207 = vmatpush.bf16.msra.mxu0 %v288_v3 }
  0x1b   : > { %285 = vmatmul.msk.bf16.vlgmr.msra.gmra.mxu0 %vm196_vm0, %v162_v4 }
  0x98   : > { %v209_v6 = vpop.f32.mrf.mxu0 }
  0x99   : > { %v210_v7 = vadd.f32 %v209_v6, %v171_v5 }
  0x9b   : > { %v213_v9 = vpack.c.bf16 %v210_v7, %v210_v7 }
  0x9d   : > { %v218_v10 = vsel %vm216_vm3, %v213_v9, %v217_v8 }
  0x9e   : > { %219 = vst [vmem:[%s160_s29] sm:$0x1] %v218_v10 }
  0xa0   : > { %v211_v11 = vpop.f32.mrf.mxu0 }
  0xa1 PF: > { %s13_s12 = sadd.s32 1, %s306_s12  }
  0xa2   : > { %p10_p4 = scmp.ge.s32.totalorder %s13_s12, 4  }
  0xa4   :  { %12 = sbr.rel (!%p10_p4) target bundleno = 1 (0x1), region = 62 }

// kernel: hrnet_forward.105
= control target key start
LH: loop header
LB: loop body
LE: loop exit
PB: predicated region body
PF: predicated region fallthrough
CT: control target
= control target key end

     0   :  { %vm178_vm0 = vcmask 261120   ;;  %vm226_vm1 = vcmask 519168   ;;  %s418_s1 = inlined_call_operand.vmem [shape: bf16[288,64], index: 1, kind: input, shape index: {}]   ;;  %s419_s0 = inlined_call_operand.vmem [shape: bf16[8,288], index: 0, kind: input, shape index: {}]   ;;  %s420_s2 = inlined_call_operand.vmem [shape: f32[1,64], index: 2, kind: input, shape index: {}]   ;;  %s421_s3 = inlined_call_operand.vmem [shape: bf16[8,64], index: 3, kind: input, shape index: {}]   ;;  %s422_s4 = inlined_call_operand.vmem [shape: bf16[8,64], index: 4, kind: output, shape index: {}]  }
   0x1   :  { %v312_v0 = vld [vmem:[%s418_s1 + $0x38] sm:$0xff]  ;;  %v311_v2 = vld [vmem:[%s418_s1 + $0x30] sm:$0xff]  ;;  %v322_v4 = vld [vmem:[%s418_s1 + $0x88] sm:$0xff] }
   0x2   :  { %v320_v1 = vld [vmem:[%s418_s1 + $0x78] sm:$0xff]  ;;  %182 = vmatpush.bf16.msra.mxu0 %v312_v0  ;;  %v319_v3 = vld [vmem:[%s418_s1 + $0x70] sm:$0xff]  ;;  %214 = vmatpush.bf16.msra.mxu2 %v322_v4  ;;  %v321_v5 = vld [vmem:[%s418_s1 + $0x80] sm:$0xff] }
   0x3   :  { %195 = vmatpush.bf16.msra.mxu1 %v320_v1  ;;  %v19_v6 = vld [vmem:[%s419_s0 + $0x8] sm:$0xf]  ;;  %v309_v11 = vld [vmem:[%s418_s1 + $0x20] sm:$0xff]  ;;  %v308_v13 = vld [vmem:[%s418_s1 + $0x18] sm:$0xff] }
   0x4   :  { %v64_v7 = vunpack.c.l.b16 %v19_v6  ;;  %v310_v8 = vld [vmem:[%s418_s1 + $0x28] sm:$0xff]  ;;  %v317_v12 = vld [vmem:[%s418_s1 + $0x60] sm:$0xff]  ;;  %v316_v14 = vld [vmem:[%s418_s1 + $0x58] sm:$0xff] }
   0x5   :  { %v318_v9 = vld [vmem:[%s418_s1 + $0x68] sm:$0xff]  ;;  %v307_v15 = vld [vmem:[%s418_s1 + $0x10] sm:$0xff]  ;;  %v18_v19 = vld [vmem:[%s419_s0] sm:$0xff] }
   0x6   :  { %183 = vmatpush.bf16.msra.mxu0 %v311_v2  ;;  %v67_v10 = vpack.c.b16 %v64_v7, %v64_v7  ;;  %215 = vmatpush.bf16.msra.mxu2 %v321_v5  ;;  %v315_v16 = vld [vmem:[%s418_s1 + $0x50] sm:$0xff]  ;;  %v306_v17 = vld [vmem:[%s418_s1 + $0x8] sm:$0xff]  ;;  %v62_v20 = vunpack.c.l.b16 %v18_v19  ;;  %v63_v21 = vunpack.c.h.b16 %v18_v19  ;;  %v305_v22 = vld [vmem:[%s418_s1] sm:$0xff] }
   0x7   :  { %196 = vmatpush.bf16.msra.mxu1 %v319_v3  ;;  %v314_v18 = vld [vmem:[%s418_s1 + $0x48] sm:$0xff]  ;;  %v313_v23 = vld [vmem:[%s418_s1 + $0x40] sm:$0xff] }
   0x8   :  { %v65_v24 = vpack.c.b16 %v62_v20, %v62_v20  ;;  %v66_v25 = vpack.c.b16 %v63_v21, %v63_v21  ;;  %v323_v28 = vld [vmem:[%s420_s2] ss:$0 sm:$0xff] }
   0x9   :  { %304 = vmatmul.msk.bf16.vlgmr.msra.gmra.mxu2 %vm178_vm0, %v67_v10  ;;  %v221_v31 = vld [vmem:[%s421_s3] sm:$0xf] }
   0xa   :  { %184 = vmatpush.bf16.msra.mxu0 %v310_v8  ;;  %v222_v34 = vunpack.c.l.bf16 %v221_v31 }
   0xb   :  { %197 = vmatpush.bf16.msra.mxu1 %v318_v9 }
   0xe   :  { %185 = vmatpush.bf16.msra.mxu0 %v309_v11 }
   0xf   :  { %198 = vmatpush.bf16.msra.mxu1 %v317_v12 }
  0x12   :  { %186 = vmatpush.bf16.msra.mxu0 %v308_v13 }
  0x13   :  { %199 = vmatpush.bf16.msra.mxu1 %v316_v14 }
  0x16   :  { %187 = vmatpush.bf16.msra.mxu0 %v307_v15 }
  0x17   :  { %200 = vmatpush.bf16.msra.mxu1 %v315_v16 }
  0x1a   :  { %188 = vmatpush.bf16.msra.mxu0 %v306_v17 }
  0x1b   :  { %201 = vmatpush.bf16.msra.mxu1 %v314_v18 }
  0x1e   :  { %189 = vmatpush.bf16.msra.mxu0 %v305_v22 }
  0x1f   :  { %202 = vmatpush.bf16.msra.mxu1 %v313_v23 }
  0x21   :  { %190 = vmatmul.bf16.vlgmr.msra.gmra.mxu0 %v65_v24 }
  0x22   :  { %203 = vmatmul.bf16.vlgmr.msra.gmra.mxu1 %v66_v25 }
  0x8c   :  { %v217_v26 = vpop.f32.mrf.mxu2 }
  0x94   :  { %v219_v27 = vpop.f32.mrf.mxu2 }
  0x9e   :  { %v191_v29 = vpop.f32.mrf.mxu0 }
  0x9f   :  { %v204_v30 = vpop.f32.mrf.mxu1  ;;  %v192_v32 = vadd.f32 %v323_v28, %v191_v29 }
  0xa1   :  { %v205_v33 = vadd.f32 %v204_v30, %v192_v32 }
  0xa3   :  { %v218_v35 = vadd.f32 %v217_v26, %v205_v33 }
  0xa5   :  { %v223_v36 = vadd.f32 %v222_v34, %v218_v35 }
  0xa6   :  { %v193_v37 = vpop.f32.mrf.mxu0 }
  0xa7   :  { %v206_v38 = vpop.f32.mrf.mxu1  ;;  %v224_v39 = vmax.f32 %v223_v36, 0.0 }
  0xa9   :  { %v225_v40 = vpack.c.bf16 %v224_v39, %v224_v39 }
  0xab   :  { %227 = vst.msk [vmem:[%s422_s4] sm:$0xf] %vm226_vm1, %v225_v40 }

// kernel: hrnet_forward.94
= control target key start
LH: loop header
LB: loop body
LE: loop exit
PB: predicated region body
PF: predicated region fallthrough
CT: control target
= control target key end

     0   :  { %s328_s12 = smov 0   ;;  %s360_s0 = inlined_call_operand.vmem [shape: bf16[2,1,64], index: 0, kind: input, shape index: {}]   ;;  %s361_s1 = inlined_call_operand.vmem [shape: bf16[64,16], index: 1, kind: input, shape index: {}]   ;;  %s362_s2 = inlined_call_operand.vmem [shape: f32[1,16], index: 2, kind: input, shape index: {}]   ;;  %s363_s3 = inlined_call_operand.vmem [shape: bf16[2,1,16], index: 3, kind: output, shape index: {}]  }
   0x1 LB: > { %s264_s13 = sadd.s32 4294967295, %s306_s12   ;;  %p268_p0 = scmp.ge.s32.totalorder %s306_s12, 1  ;;  %s306_s12 = sphi %s328_s12, %s13_s12  }
   0x2   : > { %p135_p1 = scmp.lt.s32.totalorder %s306_s12, 3 }
   0x4   : > { %p136_p2 = pnand %p268_p0, %p135_p1 }
   0x5   : > { %p155_p3 = scmp.lt.s32.totalorder (!%p136_p2), %s264_s13, 1 }
   0x6   : > { %139 = sbr.rel (%p136_p2) target bundleno = 161 (0xa1), region = 32 }
   0xb   : > { %v291_v0 = vld [vmem:[%s361_s1 + $0x18] sm:$0xff]  ;;  %v290_v1 = vld [vmem:[%s361_s1 + $0x10] sm:$0xff]  ;;  %v289_v2 = vld [vmem:[%s361_s1 + $0x8] sm:$0xff]  ;;  %s365_s13 = smov (!%p155_p3, %s264_s13), 1  ;;  %vm196_vm0 = vcmask 523264   ;;  %vm214_vm1 = vcmask 122880  }
   0xc   : > { %204 = vmatpush.bf16.msra.mxu0 %v291_v0  ;;  %v288_v3 = vld [vmem:[%s361_s1] sm:$0xff]  ;;  %s157_s24 = scalar_lea.vmem %s360_s0, %s365_s13  ;;  %s160_s29 = scalar_lea.vmem %s363_s3, %s365_s13  ;;  %vm215_vm2 = vsmask.f32 256 }
   0xd   : > { %v162_v4 = vld [vmem:[%s157_s24] sm:$0x1]  ;;  %vm216_vm3 = vmand %vm214_vm1, %vm215_vm2 }
   0xe   : > { %v171_v5 = vld [vmem:[%s362_s2] sm:$0x1] }
   0xf   : > { %v217_v8 = vld [vmem:[%s160_s29] sm:$0x1] }
  0x10   : > { %205 = vmatpush.bf16.msra.mxu0 %v290_v1 }
  0x14   : > { %206 = vmatpush.bf16.msra.mxu0 %v289_v2 }
  0x18   : > { %207 = vmatpush.bf16.msra.mxu0 %v288_v3 }
  0x1b   : > { %285 = vmatmul.msk.bf16.vlgmr.msra.gmra.mxu0 %vm196_vm0, %v162_v4 }
  0x98   : > { %v209_v6 = vpop.f32.mrf.mxu0 }
  0x99   : > { %v210_v7 = vadd.f32 %v209_v6, %v171_v5 }
  0x9b   : > { %v213_v9 = vpack.c.bf16 %v210_v7, %v210_v7 }
  0x9d   : > { %v218_v10 = vsel %vm216_vm3, %v213_v9, %v217_v8 }
  0x9e   : > { %219 = vst [vmem:[%s160_s29] sm:$0x1] %v218_v10 }
  0xa0   : > { %v211_v11 = vpop.f32.mrf.mxu0 }
  0xa1 PF: > { %s13_s12 = sadd.s32 1, %s306_s12  }
  0xa2   : > { %p10_p4 = scmp.ge.s32.totalorder %s13_s12, 4  }
  0xa4   :  { %12 = sbr.rel (!%p10_p4) target bundleno = 1 (0x1), region = 62 }

</bundles_post_ra>
